<compile_context>
chip_gen: v7x
topology: tpu7x:2x2x1
jax: 0.10.0
libtpu: 0.0.40
codegen_flags: <defaults>
</compile_context>

<pallas_src>
import jax
import jax.numpy as jnp
from jax.experimental import pallas as pl
from jax.experimental.pallas import tpu as pltpu

THRESHOLD = 1.25
CURRENT_DECAY = 0.25
VOLTAGE_DECAY = 0.03


def _cuba_step(z, cur, vol):
    cur = (1.0 - CURRENT_DECAY) * cur + z
    vol = (1.0 - VOLTAGE_DECAY) * vol + cur
    spiked = vol >= THRESHOLD
    s = spiked.astype(jnp.float32)
    vol = jnp.where(spiked, 0.0, vol)
    return s, cur, vol


# ----------------------------------------------------------------------------
# Fused kernel: conv+CUBA -> pool+CUBA -> flatten -> dense+CUBA, per batch elem
# ----------------------------------------------------------------------------
def fused_net_kernel(wpool_ref, patch_ref, wconv_ref, wdense_ref,
                     spike_ref, csum_ref, psum_ref, dsum_ref,
                     z_ref, lhs_ref):
    # wpool_ref : SMEM (4,)                patch_ref : (18, T*4*PPAD)
    # wconv_ref : (8, 18)                  wdense_ref: (8*PPAD, 128)
    # spike_ref : (T, 128)                 *sum_ref  : (1, 1) per-batch totals
    # z_ref     : scratch (8, T*4*PPAD)    lhs_ref   : scratch (T, 8*PPAD)
    T = spike_ref.shape[0]
    OC = wconv_ref.shape[0]
    KP = wpool_ref.shape[0]                      # 4 pooling taps
    PPAD = lhs_ref.shape[1] // OC                # padded pool positions (640)
    CHUNK = z_ref.shape[1] // T                  # columns per timestep = KP*PPAD

    # Pool weights: read the 4 SMEM scalars once (hoisted out of the time loop).
    wp = [wpool_ref[k] for k in range(KP)]

    # Conv synapse for ALL timesteps in a single MXU matmul.
    z_ref[...] = jnp.dot(wconv_ref[...], patch_ref[...],
                         preferred_element_type=jnp.float32)

    conv_cur = jnp.zeros((OC, CHUNK), jnp.float32)
    conv_vol = jnp.zeros((OC, CHUNK), jnp.float32)
    conv_acc = jnp.zeros((OC, CHUNK), jnp.float32)
    pool_cur = jnp.zeros((OC, PPAD), jnp.float32)
    pool_vol = jnp.zeros((OC, PPAD), jnp.float32)
    pool_acc = jnp.zeros((OC, PPAD), jnp.float32)

    for t in range(T):                           # small static T -> unrolled
        z_c = z_ref[:, t * CHUNK:(t + 1) * CHUNK]            # aligned lane slice
        s_c, conv_cur, conv_vol = _cuba_step(z_c, conv_cur, conv_vol)
        conv_acc = conv_acc + s_c

        # Pool synapse: weighted sum over the 4 pooling taps (aligned slices).
        z_p = wp[0] * s_c[:, 0:PPAD]
        for k in range(1, KP):
            z_p = z_p + wp[k] * s_c[:, k * PPAD:(k + 1) * PPAD]
        s_p, pool_cur, pool_vol = _cuba_step(z_p, pool_cur, pool_vol)
        pool_acc = pool_acc + s_p

        # Flatten (feature index = c*PPAD + p) into this timestep's dense LHS row.
        for c in range(OC):
            lhs_ref[t:t + 1, c * PPAD:(c + 1) * PPAD] = s_p[c:c + 1, :]

    # Dense synapse: one matmul over all timesteps.
    z_d = jnp.dot(lhs_ref[...], wdense_ref[...],
                  preferred_element_type=jnp.float32)         # (T, 128)

    N = spike_ref.shape[1]
    d_cur = jnp.zeros((1, N), jnp.float32)
    d_vol = jnp.zeros((1, N), jnp.float32)
    d_acc = jnp.zeros((1, N), jnp.float32)
    for t in range(T):
        s_d, d_cur, d_vol = _cuba_step(z_d[t:t + 1, :], d_cur, d_vol)
        spike_ref[t:t + 1, :] = s_d
        d_acc = d_acc + s_d

    # Per-batch spike totals (zero-padded columns never spike, so sums are exact).
    csum_ref[...] = jnp.zeros_like(csum_ref) + jnp.sum(conv_acc)
    psum_ref[...] = jnp.zeros_like(psum_ref) + jnp.sum(pool_acc)
    dsum_ref[...] = jnp.zeros_like(dsum_ref) + jnp.sum(d_acc)


def fused_net(w_pool, patches, w_conv, w_dense_r, T, n_out):
    B, CK, TK = patches.shape
    OC = w_conv.shape[0]
    F = w_dense_r.shape[0]
    return pl.pallas_call(
        fused_net_kernel,
        out_shape=(
            jax.ShapeDtypeStruct((B, T, n_out), jnp.float32),   # dense spikes
            jax.ShapeDtypeStruct((B, 1, 1), jnp.float32),       # conv spike sum
            jax.ShapeDtypeStruct((B, 1, 1), jnp.float32),       # pool spike sum
            jax.ShapeDtypeStruct((B, 1, 1), jnp.float32),       # dense spike sum
        ),
        grid=(B,),
        in_specs=[
            pl.BlockSpec(memory_space=pltpu.MemorySpace.SMEM),          # w_pool (4,)
            pl.BlockSpec((None, CK, TK), lambda b: (b, 0, 0)),          # patches
            pl.BlockSpec((OC, CK), lambda b: (0, 0)),                   # w_conv (resident)
            pl.BlockSpec((F, n_out), lambda b: (0, 0)),                 # w_dense (resident)
        ],
        out_specs=(
            pl.BlockSpec((None, T, n_out), lambda b: (b, 0, 0)),
            pl.BlockSpec((None, 1, 1), lambda b: (b, 0, 0)),
            pl.BlockSpec((None, 1, 1), lambda b: (b, 0, 0)),
            pl.BlockSpec((None, 1, 1), lambda b: (b, 0, 0)),
        ),
        scratch_shapes=[
            pltpu.VMEM((OC, TK), jnp.float32),   # conv currents for all timesteps
            pltpu.VMEM((T, F), jnp.float32),     # flattened pool spikes (dense LHS)
        ],
        compiler_params=pltpu.CompilerParams(
            dimension_semantics=("parallel",),   # per-batch outputs -> safe to shard TCs
            vmem_limit_bytes=32 * 1024 * 1024,
        ),
    )(w_pool, patches, w_conv, w_dense_r)


# ----------------------------------------------------------------------------
# Glue: im2col (column order = t, pool-tap, pool-pos), dense-weight re-layout
# ----------------------------------------------------------------------------
def build_patches(x_nchwt, ppad):
    # x: (B, C, H, W, T) spikes; conv is 3x3, stride 2, pad 1 -> OHxOW = H/2 x W/2.
    B, C, H, W, T = x_nchwt.shape
    OH, OW = H // 2, W // 2
    PH, PW = OH // 2, OW // 2
    x = jnp.transpose(x_nchwt, (0, 4, 1, 2, 3))                      # B,T,C,H,W
    xp = jnp.pad(x, ((0, 0), (0, 0), (0, 0), (1, 1), (1, 1)))
    taps = []
    for kh in range(3):
        for kw in range(3):
            taps.append(xp[:, :, :, kh:kh + 2 * OH:2, kw:kw + 2 * OW:2])
    g = jnp.stack(taps, axis=3)                                      # B,T,C,9,OH,OW
    g = g.reshape(B, T, C, 9, PH, 2, PW, 2)                          # oh=2ph+a, ow=2pw+b
    g = jnp.transpose(g, (0, 2, 3, 1, 5, 7, 4, 6))                   # B,C,9,T,a,b,PH,PW
    g = g.reshape(B, C * 9, T, 4, PH * PW)
    g = jnp.pad(g, ((0, 0), (0, 0), (0, 0), (0, 0), (0, ppad - PH * PW)))
    return g.reshape(B, C * 9, T * 4 * ppad)


def build_dense_weight(w_dense, oc, ph, pw, ppad):
    # w_dense: (N, oc*ph*pw) with torch-flatten feature index c*(ph*pw) + y*pw + x.
    n_out = w_dense.shape[0]
    wd = jnp.transpose(w_dense).reshape(oc, ph * pw, n_out)
    wd = jnp.pad(wd, ((0, 0), (0, ppad - ph * pw), (0, 0)))          # zero-pad features
    return wd.reshape(oc * ppad, n_out)


def apply_weight_norm(v):
    # torch.nn.utils.weight_norm(dim=0) with g initialized to ||v|| -> w == v
    flat = v.reshape(v.shape[0], -1)
    norm = jnp.sqrt(jnp.sum(flat * flat, axis=1, keepdims=True))
    w = (norm / (norm + 1e-12)) * flat
    return w.reshape(v.shape)


def network_forward(x, params):
    B, C, H, W, T = x.shape
    w_conv = params["w_conv"].reshape(params["w_conv"].shape[0], -1)   # (8, 18)
    w_pool = params["w_pool"].reshape(-1)                              # (4,)
    w_dense = params["w_dense"]                                        # (128, 4608)
    OC = w_conv.shape[0]
    N = w_dense.shape[0]

    OH, OW = H // 2, W // 2            # 48 x 48 conv output
    PH, PW = OH // 2, OW // 2          # 24 x 24 pool output
    ppad = ((PH * PW + 127) // 128) * 128          # 576 -> 640 (lane aligned)

    patches = build_patches(x, ppad)                       # (B, 18, T*4*ppad)
    wd_r = build_dense_weight(w_dense, OC, PH, PW, ppad)   # (OC*ppad, 128)

    spike, csum, psum, dsum = fused_net(w_pool, patches, w_conv, wd_r, T, N)

    conv_mean = jnp.sum(csum) / (B * T * OC * OH * OW)
    pool_mean = jnp.sum(psum) / (B * T * OC * PH * PW)
    dense_mean = jnp.sum(dsum) / (B * T * N)
    # Flatten block leaves the mean unchanged -> repeat the pool mean.
    counts = jnp.stack([conv_mean, pool_mean, pool_mean, dense_mean]).reshape(1, 4)

    spike_out = jnp.transpose(spike, (0, 2, 1))            # (B, 128, T) = N, C, T
    return spike_out, counts


if __name__ == "__main__":
    key = jax.random.PRNGKey(0)
    k_in, k_conv, k_dense = jax.random.split(key, 3)

    # Input spatial size is pinned by Dense(in_neurons=8*24*24): 96x96 input.
    B, C, H, W, T = 2, 2, 96, 96, 4
    x = (jax.random.uniform(k_in, (B, C, H, W, T)) < 0.3).astype(jnp.float32)

    v_conv = jax.random.normal(k_conv, (8, 2, 3, 3), jnp.float32) * 0.8
    v_dense = jax.random.normal(k_dense, (128, 8 * 24 * 24), jnp.float32) * 0.05
    params = {
        "w_conv": apply_weight_norm(v_conv),
        "w_pool": apply_weight_norm(jnp.ones((1, 1, 2, 2), jnp.float32)),
        "w_dense": apply_weight_norm(v_dense),
    }

    fwd = jax.jit(network_forward)
    spike, count = fwd(x, params)
    jax.block_until_ready((spike, count))
    assert spike.shape == (B, 128, T) and count.shape == (1, 4)
    assert bool(jnp.all(jnp.isfinite(count)))
    print("KERNEL_OK")
</pallas_src>

<mosaic_0001>
module attributes {stable_mosaic.version = 11 : i64} {
  func.func @fused_net_kernel(%arg0: i32, %arg1: memref<4xf32, #tpu.memory_space<smem>>, %arg2: memref<1x18x10240xf32, #tpu.memory_space<vmem>>, %arg3: memref<8x18xf32, #tpu.memory_space<vmem>>, %arg4: memref<5120x128xf32, #tpu.memory_space<vmem>>, %arg5: memref<1x4x128xf32, #tpu.memory_space<vmem>>, %arg6: memref<1x1x1xf32, #tpu.memory_space<vmem>>, %arg7: memref<1x1x1xf32, #tpu.memory_space<vmem>>, %arg8: memref<1x1x1xf32, #tpu.memory_space<vmem>>, %arg9: memref<8x10240xf32, #tpu.memory_space<vmem>>, %arg10: memref<4x5120xf32, #tpu.memory_space<vmem>>) attributes {dimension_semantics = [#tpu.dimension_semantics<parallel>], iteration_bounds = array<i64: 2>, scalar_prefetch = 0 : i64, scratch_operands = 2 : i64, tpu.core_type = #tpu.core_type<tc>, window_params = [{transform_indices = @transform_0, window_bounds = array<i64: 4>}, {transform_indices = @transform_1, window_bounds = array<i64: 1, 18, 10240>}, {pipeline_mode = #tpu.pipeline_mode<synchronous>, transform_indices = @transform_2, window_bounds = array<i64: 8, 18>}, {pipeline_mode = #tpu.pipeline_mode<synchronous>, transform_indices = @transform_3, window_bounds = array<i64: 5120, 128>}, {transform_indices = @transform_4, window_bounds = array<i64: 1, 4, 128>}, {transform_indices = @transform_5, window_bounds = array<i64: 1, 1, 1>}, {transform_indices = @transform_6, window_bounds = array<i64: 1, 1, 1>}, {transform_indices = @transform_7, window_bounds = array<i64: 1, 1, 1>}]} {
    %c0 = arith.constant 0 : index
    %0 = memref.load %arg1[%c0] : memref<4xf32, #tpu.memory_space<smem>>
    %c1 = arith.constant 1 : index
    %1 = memref.load %arg1[%c1] : memref<4xf32, #tpu.memory_space<smem>>
    %c2 = arith.constant 2 : index
    %2 = memref.load %arg1[%c2] : memref<4xf32, #tpu.memory_space<smem>>
    %c3 = arith.constant 3 : index
    %3 = memref.load %arg1[%c3] : memref<4xf32, #tpu.memory_space<smem>>
    %c0_0 = arith.constant 0 : index
    %c0_1 = arith.constant 0 : index
    %4 = vector.load %arg3[%c0_0, %c0_1] : memref<8x18xf32, #tpu.memory_space<vmem>>, vector<8x18xf32>
    %c0_2 = arith.constant 0 : index
    %c0_3 = arith.constant 0 : index
    %c0_4 = arith.constant 0 : index
    %5 = vector.load %arg2[%c0_2, %c0_3, %c0_4] : memref<1x18x10240xf32, #tpu.memory_space<vmem>>, vector<1x18x10240xf32>
    %6 = vector.shape_cast %5 : vector<1x18x10240xf32> to vector<18x10240xf32>
    %cst = arith.constant dense<0.000000e+00> : vector<8x10240xf32>
    %7 = tpu.matmul %4, %6, %cst {dimension_numbers = #tpu.dot_dimension_numbers<[1], [0], [0], [1], [0, 0, 1, 1], [], []>} : vector<8x18xf32>, vector<18x10240xf32>, vector<8x10240xf32> -> vector<8x10240xf32>
    %c0_5 = arith.constant 0 : index
    %c0_6 = arith.constant 0 : index
    %8 = vector.load %arg9[%c0_5, %c0_6] : memref<8x10240xf32, #tpu.memory_space<vmem>>, vector<8x10240xf32>
    tpu.vector_store %arg9[%c0_5, %c0_6], %7 {strides = array<i32>} : memref<8x10240xf32, #tpu.memory_space<vmem>>, vector<8x10240xf32>,
    %cst_7 = arith.constant 0.000000e+00 : f32
    %9 = vector.broadcast %cst_7 : f32 to vector<8x2560xf32>
    %cst_8 = arith.constant 0.000000e+00 : f32
    %10 = vector.broadcast %cst_8 : f32 to vector<8x2560xf32>
    %cst_9 = arith.constant 0.000000e+00 : f32
    %11 = vector.broadcast %cst_9 : f32 to vector<8x2560xf32>
    %cst_10 = arith.constant 0.000000e+00 : f32
    %12 = vector.broadcast %cst_10 : f32 to vector<8x640xf32>
    %cst_11 = arith.constant 0.000000e+00 : f32
    %13 = vector.broadcast %cst_11 : f32 to vector<8x640xf32>
    %cst_12 = arith.constant 0.000000e+00 : f32
    %14 = vector.broadcast %cst_12 : f32 to vector<8x640xf32>
    %c0_13 = arith.constant 0 : index
    %c0_14 = arith.constant 0 : index
    %15 = vector.load %arg9[%c0_13, %c0_14] : memref<8x10240xf32, #tpu.memory_space<vmem>>, vector<8x2560xf32>
    %cst_15 = arith.constant 7.500000e-01 : f32
    %16 = vector.broadcast %cst_15 : f32 to vector<8x2560xf32>
    %17 = arith.mulf %16, %9 : vector<8x2560xf32>
    %18 = arith.addf %17, %15 : vector<8x2560xf32>
    %cst_16 = arith.constant 9.700000e-01 : f32
    %19 = vector.broadcast %cst_16 : f32 to vector<8x2560xf32>
    %20 = arith.mulf %19, %10 : vector<8x2560xf32>
    %21 = arith.addf %20, %18 : vector<8x2560xf32>
    %cst_17 = arith.constant 1.250000e+00 : f32
    %22 = vector.broadcast %cst_17 : f32 to vector<8x2560xf32>
    %23 = arith.cmpf oge, %21, %22 : vector<8x2560xf32>
    %24 = arith.extui %23 : vector<8x2560xi1> to vector<8x2560xi32>
    %25 = arith.sitofp %24 : vector<8x2560xi32> to vector<8x2560xf32>
    %cst_18 = arith.constant 0.000000e+00 : f32
    %26 = vector.broadcast %cst_18 : f32 to vector<8x2560xf32>
    %27 = arith.select %23, %26, %21 : vector<8x2560xi1>, vector<8x2560xf32>
    %28 = arith.addf %11, %25 : vector<8x2560xf32>
    %29 = vector.extract_strided_slice %25 {offsets = [0, 0], sizes = [8, 640], strides = [1, 1]} : vector<8x2560xf32> to vector<8x640xf32>
    %30 = vector.broadcast %0 : f32 to vector<8x640xf32>
    %31 = arith.mulf %30, %29 : vector<8x640xf32>
    %32 = vector.extract_strided_slice %25 {offsets = [0, 640], sizes = [8, 640], strides = [1, 1]} : vector<8x2560xf32> to vector<8x640xf32>
    %33 = vector.broadcast %1 : f32 to vector<8x640xf32>
    %34 = arith.mulf %33, %32 : vector<8x640xf32>
    %35 = arith.addf %31, %34 : vector<8x640xf32>
    %36 = vector.extract_strided_slice %25 {offsets = [0, 1280], sizes = [8, 640], strides = [1, 1]} : vector<8x2560xf32> to vector<8x640xf32>
    %37 = vector.broadcast %2 : f32 to vector<8x640xf32>
    %38 = arith.mulf %37, %36 : vector<8x640xf32>
    %39 = arith.addf %35, %38 : vector<8x640xf32>
    %40 = vector.extract_strided_slice %25 {offsets = [0, 1920], sizes = [8, 640], strides = [1, 1]} : vector<8x2560xf32> to vector<8x640xf32>
    %41 = vector.broadcast %3 : f32 to vector<8x640xf32>
    %42 = arith.mulf %41, %40 : vector<8x640xf32>
    %43 = arith.addf %39, %42 : vector<8x640xf32>
    %cst_19 = arith.constant 7.500000e-01 : f32
    %44 = vector.broadcast %cst_19 : f32 to vector<8x640xf32>
    %45 = arith.mulf %44, %12 : vector<8x640xf32>
    %46 = arith.addf %45, %43 : vector<8x640xf32>
    %cst_20 = arith.constant 9.700000e-01 : f32
    %47 = vector.broadcast %cst_20 : f32 to vector<8x640xf32>
    %48 = arith.mulf %47, %13 : vector<8x640xf32>
    %49 = arith.addf %48, %46 : vector<8x640xf32>
    %cst_21 = arith.constant 1.250000e+00 : f32
    %50 = vector.broadcast %cst_21 : f32 to vector<8x640xf32>
    %51 = arith.cmpf oge, %49, %50 : vector<8x640xf32>
    %52 = arith.extui %51 : vector<8x640xi1> to vector<8x640xi32>
    %53 = arith.sitofp %52 : vector<8x640xi32> to vector<8x640xf32>
    %cst_22 = arith.constant 0.000000e+00 : f32
    %54 = vector.broadcast %cst_22 : f32 to vector<8x640xf32>
    %55 = arith.select %51, %54, %49 : vector<8x640xi1>, vector<8x640xf32>
    %56 = arith.addf %14, %53 : vector<8x640xf32>
    %57 = vector.extract_strided_slice %53 {offsets = [0, 0], sizes = [1, 640], strides = [1, 1]} : vector<8x640xf32> to vector<1x640xf32>
    %c0_23 = arith.constant 0 : index
    %c0_24 = arith.constant 0 : index
    %58 = vector.load %arg10[%c0_23, %c0_24] : memref<4x5120xf32, #tpu.memory_space<vmem>>, vector<1x640xf32>
    tpu.vector_store %arg10[%c0_23, %c0_24], %57 {strides = array<i32>} : memref<4x5120xf32, #tpu.memory_space<vmem>>, vector<1x640xf32>,
    %59 = vector.extract_strided_slice %53 {offsets = [1, 0], sizes = [1, 640], strides = [1, 1]} : vector<8x640xf32> to vector<1x640xf32>
    %c0_25 = arith.constant 0 : index
    %c640 = arith.constant 640 : index
    %60 = vector.load %arg10[%c0_25, %c640] : memref<4x5120xf32, #tpu.memory_space<vmem>>, vector<1x640xf32>
    tpu.vector_store %arg10[%c0_25, %c640], %59 {strides = array<i32>} : memref<4x5120xf32, #tpu.memory_space<vmem>>, vector<1x640xf32>,
    %61 = vector.extract_strided_slice %53 {offsets = [2, 0], sizes = [1, 640], strides = [1, 1]} : vector<8x640xf32> to vector<1x640xf32>
    %c0_26 = arith.constant 0 : index
    %c1280 = arith.constant 1280 : index
    %62 = vector.load %arg10[%c0_26, %c1280] : memref<4x5120xf32, #tpu.memory_space<vmem>>, vector<1x640xf32>
    tpu.vector_store %arg10[%c0_26, %c1280], %61 {strides = array<i32>} : memref<4x5120xf32, #tpu.memory_space<vmem>>, vector<1x640xf32>,
    %63 = vector.extract_strided_slice %53 {offsets = [3, 0], sizes = [1, 640], strides = [1, 1]} : vector<8x640xf32> to vector<1x640xf32>
    %c0_27 = arith.constant 0 : index
    %c1920 = arith.constant 1920 : index
    %64 = vector.load %arg10[%c0_27, %c1920] : memref<4x5120xf32, #tpu.memory_space<vmem>>, vector<1x640xf32>
    tpu.vector_store %arg10[%c0_27, %c1920], %63 {strides = array<i32>} : memref<4x5120xf32, #tpu.memory_space<vmem>>, vector<1x640xf32>,
    %65 = vector.extract_strided_slice %53 {offsets = [4, 0], sizes = [1, 640], strides = [1, 1]} : vector<8x640xf32> to vector<1x640xf32>
    %c0_28 = arith.constant 0 : index
    %c2560 = arith.constant 2560 : index
    %66 = vector.load %arg10[%c0_28, %c2560] : memref<4x5120xf32, #tpu.memory_space<vmem>>, vector<1x640xf32>
    tpu.vector_store %arg10[%c0_28, %c2560], %65 {strides = array<i32>} : memref<4x5120xf32, #tpu.memory_space<vmem>>, vector<1x640xf32>,
    %67 = vector.extract_strided_slice %53 {offsets = [5, 0], sizes = [1, 640], strides = [1, 1]} : vector<8x640xf32> to vector<1x640xf32>
    %c0_29 = arith.constant 0 : index
    %c3200 = arith.constant 3200 : index
    %68 = vector.load %arg10[%c0_29, %c3200] : memref<4x5120xf32, #tpu.memory_space<vmem>>, vector<1x640xf32>
    tpu.vector_store %arg10[%c0_29, %c3200], %67 {strides = array<i32>} : memref<4x5120xf32, #tpu.memory_space<vmem>>, vector<1x640xf32>,
    %69 = vector.extract_strided_slice %53 {offsets = [6, 0], sizes = [1, 640], strides = [1, 1]} : vector<8x640xf32> to vector<1x640xf32>
    %c0_30 = arith.constant 0 : index
    %c3840 = arith.constant 3840 : index
    %70 = vector.load %arg10[%c0_30, %c3840] : memref<4x5120xf32, #tpu.memory_space<vmem>>, vector<1x640xf32>
    tpu.vector_store %arg10[%c0_30, %c3840], %69 {strides = array<i32>} : memref<4x5120xf32, #tpu.memory_space<vmem>>, vector<1x640xf32>,
    %71 = vector.extract_strided_slice %53 {offsets = [7, 0], sizes = [1, 640], strides = [1, 1]} : vector<8x640xf32> to vector<1x640xf32>
    %c0_31 = arith.constant 0 : index
    %c4480 = arith.constant 4480 : index
    %72 = vector.load %arg10[%c0_31, %c4480] : memref<4x5120xf32, #tpu.memory_space<vmem>>, vector<1x640xf32>
    tpu.vector_store %arg10[%c0_31, %c4480], %71 {strides = array<i32>} : memref<4x5120xf32, #tpu.memory_space<vmem>>, vector<1x640xf32>,
    %c0_32 = arith.constant 0 : index
    %c2560_33 = arith.constant 2560 : index
    %73 = vector.load %arg9[%c0_32, %c2560_33] : memref<8x10240xf32, #tpu.memory_space<vmem>>, vector<8x2560xf32>
    %cst_34 = arith.constant 7.500000e-01 : f32
    %74 = vector.broadcast %cst_34 : f32 to vector<8x2560xf32>
    %75 = arith.mulf %74, %18 : vector<8x2560xf32>
    %76 = arith.addf %75, %73 : vector<8x2560xf32>
    %cst_35 = arith.constant 9.700000e-01 : f32
    %77 = vector.broadcast %cst_35 : f32 to vector<8x2560xf32>
    %78 = arith.mulf %77, %27 : vector<8x2560xf32>
    %79 = arith.addf %78, %76 : vector<8x2560xf32>
    %cst_36 = arith.constant 1.250000e+00 : f32
    %80 = vector.broadcast %cst_36 : f32 to vector<8x2560xf32>
    %81 = arith.cmpf oge, %79, %80 : vector<8x2560xf32>
    %82 = arith.extui %81 : vector<8x2560xi1> to vector<8x2560xi32>
    %83 = arith.sitofp %82 : vector<8x2560xi32> to vector<8x2560xf32>
    %cst_37 = arith.constant 0.000000e+00 : f32
    %84 = vector.broadcast %cst_37 : f32 to vector<8x2560xf32>
    %85 = arith.select %81, %84, %79 : vector<8x2560xi1>, vector<8x2560xf32>
    %86 = arith.addf %28, %83 : vector<8x2560xf32>
    %87 = vector.extract_strided_slice %83 {offsets = [0, 0], sizes = [8, 640], strides = [1, 1]} : vector<8x2560xf32> to vector<8x640xf32>
    %88 = vector.broadcast %0 : f32 to vector<8x640xf32>
    %89 = arith.mulf %88, %87 : vector<8x640xf32>
    %90 = vector.extract_strided_slice %83 {offsets = [0, 640], sizes = [8, 640], strides = [1, 1]} : vector<8x2560xf32> to vector<8x640xf32>
    %91 = vector.broadcast %1 : f32 to vector<8x640xf32>
    %92 = arith.mulf %91, %90 : vector<8x640xf32>
    %93 = arith.addf %89, %92 : vector<8x640xf32>
    %94 = vector.extract_strided_slice %83 {offsets = [0, 1280], sizes = [8, 640], strides = [1, 1]} : vector<8x2560xf32> to vector<8x640xf32>
    %95 = vector.broadcast %2 : f32 to vector<8x640xf32>
    %96 = arith.mulf %95, %94 : vector<8x640xf32>
    %97 = arith.addf %93, %96 : vector<8x640xf32>
    %98 = vector.extract_strided_slice %83 {offsets = [0, 1920], sizes = [8, 640], strides = [1, 1]} : vector<8x2560xf32> to vector<8x640xf32>
    %99 = vector.broadcast %3 : f32 to vector<8x640xf32>
    %100 = arith.mulf %99, %98 : vector<8x640xf32>
    %101 = arith.addf %97, %100 : vector<8x640xf32>
    %cst_38 = arith.constant 7.500000e-01 : f32
    %102 = vector.broadcast %cst_38 : f32 to vector<8x640xf32>
    %103 = arith.mulf %102, %46 : vector<8x640xf32>
    %104 = arith.addf %103, %101 : vector<8x640xf32>
    %cst_39 = arith.constant 9.700000e-01 : f32
    %105 = vector.broadcast %cst_39 : f32 to vector<8x640xf32>
    %106 = arith.mulf %105, %55 : vector<8x640xf32>
    %107 = arith.addf %106, %104 : vector<8x640xf32>
    %cst_40 = arith.constant 1.250000e+00 : f32
    %108 = vector.broadcast %cst_40 : f32 to vector<8x640xf32>
    %109 = arith.cmpf oge, %107, %108 : vector<8x640xf32>
    %110 = arith.extui %109 : vector<8x640xi1> to vector<8x640xi32>
    %111 = arith.sitofp %110 : vector<8x640xi32> to vector<8x640xf32>
    %cst_41 = arith.constant 0.000000e+00 : f32
    %112 = vector.broadcast %cst_41 : f32 to vector<8x640xf32>
    %113 = arith.select %109, %112, %107 : vector<8x640xi1>, vector<8x640xf32>
    %114 = arith.addf %56, %111 : vector<8x640xf32>
    %115 = vector.extract_strided_slice %111 {offsets = [0, 0], sizes = [1, 640], strides = [1, 1]} : vector<8x640xf32> to vector<1x640xf32>
    %c1_42 = arith.constant 1 : index
    %c0_43 = arith.constant 0 : index
    %116 = vector.load %arg10[%c1_42, %c0_43] : memref<4x5120xf32, #tpu.memory_space<vmem>>, vector<1x640xf32>
    tpu.vector_store %arg10[%c1_42, %c0_43], %115 {strides = array<i32>} : memref<4x5120xf32, #tpu.memory_space<vmem>>, vector<1x640xf32>,
    %117 = vector.extract_strided_slice %111 {offsets = [1, 0], sizes = [1, 640], strides = [1, 1]} : vector<8x640xf32> to vector<1x640xf32>
    %c1_44 = arith.constant 1 : index
    %c640_45 = arith.constant 640 : index
    %118 = vector.load %arg10[%c1_44, %c640_45] : memref<4x5120xf32, #tpu.memory_space<vmem>>, vector<1x640xf32>
    tpu.vector_store %arg10[%c1_44, %c640_45], %117 {strides = array<i32>} : memref<4x5120xf32, #tpu.memory_space<vmem>>, vector<1x640xf32>,
    %119 = vector.extract_strided_slice %111 {offsets = [2, 0], sizes = [1, 640], strides = [1, 1]} : vector<8x640xf32> to vector<1x640xf32>
    %c1_46 = arith.constant 1 : index
    %c1280_47 = arith.constant 1280 : index
    %120 = vector.load %arg10[%c1_46, %c1280_47] : memref<4x5120xf32, #tpu.memory_space<vmem>>, vector<1x640xf32>
    tpu.vector_store %arg10[%c1_46, %c1280_47], %119 {strides = array<i32>} : memref<4x5120xf32, #tpu.memory_space<vmem>>, vector<1x640xf32>,
    %121 = vector.extract_strided_slice %111 {offsets = [3, 0], sizes = [1, 640], strides = [1, 1]} : vector<8x640xf32> to vector<1x640xf32>
    %c1_48 = arith.constant 1 : index
    %c1920_49 = arith.constant 1920 : index
    %122 = vector.load %arg10[%c1_48, %c1920_49] : memref<4x5120xf32, #tpu.memory_space<vmem>>, vector<1x640xf32>
    tpu.vector_store %arg10[%c1_48, %c1920_49], %121 {strides = array<i32>} : memref<4x5120xf32, #tpu.memory_space<vmem>>, vector<1x640xf32>,
    %123 = vector.extract_strided_slice %111 {offsets = [4, 0], sizes = [1, 640], strides = [1, 1]} : vector<8x640xf32> to vector<1x640xf32>
    %c1_50 = arith.constant 1 : index
    %c2560_51 = arith.constant 2560 : index
    %124 = vector.load %arg10[%c1_50, %c2560_51] : memref<4x5120xf32, #tpu.memory_space<vmem>>, vector<1x640xf32>
    tpu.vector_store %arg10[%c1_50, %c2560_51], %123 {strides = array<i32>} : memref<4x5120xf32, #tpu.memory_space<vmem>>, vector<1x640xf32>,
    %125 = vector.extract_strided_slice %111 {offsets = [5, 0], sizes = [1, 640], strides = [1, 1]} : vector<8x640xf32> to vector<1x640xf32>
    %c1_52 = arith.constant 1 : index
    %c3200_53 = arith.constant 3200 : index
    %126 = vector.load %arg10[%c1_52, %c3200_53] : memref<4x5120xf32, #tpu.memory_space<vmem>>, vector<1x640xf32>
    tpu.vector_store %arg10[%c1_52, %c3200_53], %125 {strides = array<i32>} : memref<4x5120xf32, #tpu.memory_space<vmem>>, vector<1x640xf32>,
    %127 = vector.extract_strided_slice %111 {offsets = [6, 0], sizes = [1, 640], strides = [1, 1]} : vector<8x640xf32> to vector<1x640xf32>
    %c1_54 = arith.constant 1 : index
    %c3840_55 = arith.constant 3840 : index
    %128 = vector.load %arg10[%c1_54, %c3840_55] : memref<4x5120xf32, #tpu.memory_space<vmem>>, vector<1x640xf32>
    tpu.vector_store %arg10[%c1_54, %c3840_55], %127 {strides = array<i32>} : memref<4x5120xf32, #tpu.memory_space<vmem>>, vector<1x640xf32>,
    %129 = vector.extract_strided_slice %111 {offsets = [7, 0], sizes = [1, 640], strides = [1, 1]} : vector<8x640xf32> to vector<1x640xf32>
    %c1_56 = arith.constant 1 : index
    %c4480_57 = arith.constant 4480 : index
    %130 = vector.load %arg10[%c1_56, %c4480_57] : memref<4x5120xf32, #tpu.memory_space<vmem>>, vector<1x640xf32>
    tpu.vector_store %arg10[%c1_56, %c4480_57], %129 {strides = array<i32>} : memref<4x5120xf32, #tpu.memory_space<vmem>>, vector<1x640xf32>,
    %c0_58 = arith.constant 0 : index
    %c5120 = arith.constant 5120 : index
    %131 = vector.load %arg9[%c0_58, %c5120] : memref<8x10240xf32, #tpu.memory_space<vmem>>, vector<8x2560xf32>
    %cst_59 = arith.constant 7.500000e-01 : f32
    %132 = vector.broadcast %cst_59 : f32 to vector<8x2560xf32>
    %133 = arith.mulf %132, %76 : vector<8x2560xf32>
    %134 = arith.addf %133, %131 : vector<8x2560xf32>
    %cst_60 = arith.constant 9.700000e-01 : f32
    %135 = vector.broadcast %cst_60 : f32 to vector<8x2560xf32>
    %136 = arith.mulf %135, %85 : vector<8x2560xf32>
    %137 = arith.addf %136, %134 : vector<8x2560xf32>
    %cst_61 = arith.constant 1.250000e+00 : f32
    %138 = vector.broadcast %cst_61 : f32 to vector<8x2560xf32>
    %139 = arith.cmpf oge, %137, %138 : vector<8x2560xf32>
    %140 = arith.extui %139 : vector<8x2560xi1> to vector<8x2560xi32>
    %141 = arith.sitofp %140 : vector<8x2560xi32> to vector<8x2560xf32>
    %cst_62 = arith.constant 0.000000e+00 : f32
    %142 = vector.broadcast %cst_62 : f32 to vector<8x2560xf32>
    %143 = arith.select %139, %142, %137 : vector<8x2560xi1>, vector<8x2560xf32>
    %144 = arith.addf %86, %141 : vector<8x2560xf32>
    %145 = vector.extract_strided_slice %141 {offsets = [0, 0], sizes = [8, 640], strides = [1, 1]} : vector<8x2560xf32> to vector<8x640xf32>
    %146 = vector.broadcast %0 : f32 to vector<8x640xf32>
    %147 = arith.mulf %146, %145 : vector<8x640xf32>
    %148 = vector.extract_strided_slice %141 {offsets = [0, 640], sizes = [8, 640], strides = [1, 1]} : vector<8x2560xf32> to vector<8x640xf32>
    %149 = vector.broadcast %1 : f32 to vector<8x640xf32>
    %150 = arith.mulf %149, %148 : vector<8x640xf32>
    %151 = arith.addf %147, %150 : vector<8x640xf32>
    %152 = vector.extract_strided_slice %141 {offsets = [0, 1280], sizes = [8, 640], strides = [1, 1]} : vector<8x2560xf32> to vector<8x640xf32>
    %153 = vector.broadcast %2 : f32 to vector<8x640xf32>
    %154 = arith.mulf %153, %152 : vector<8x640xf32>
    %155 = arith.addf %151, %154 : vector<8x640xf32>
    %156 = vector.extract_strided_slice %141 {offsets = [0, 1920], sizes = [8, 640], strides = [1, 1]} : vector<8x2560xf32> to vector<8x640xf32>
    %157 = vector.broadcast %3 : f32 to vector<8x640xf32>
    %158 = arith.mulf %157, %156 : vector<8x640xf32>
    %159 = arith.addf %155, %158 : vector<8x640xf32>
    %cst_63 = arith.constant 7.500000e-01 : f32
    %160 = vector.broadcast %cst_63 : f32 to vector<8x640xf32>
    %161 = arith.mulf %160, %104 : vector<8x640xf32>
    %162 = arith.addf %161, %159 : vector<8x640xf32>
    %cst_64 = arith.constant 9.700000e-01 : f32
    %163 = vector.broadcast %cst_64 : f32 to vector<8x640xf32>
    %164 = arith.mulf %163, %113 : vector<8x640xf32>
    %165 = arith.addf %164, %162 : vector<8x640xf32>
    %cst_65 = arith.constant 1.250000e+00 : f32
    %166 = vector.broadcast %cst_65 : f32 to vector<8x640xf32>
    %167 = arith.cmpf oge, %165, %166 : vector<8x640xf32>
    %168 = arith.extui %167 : vector<8x640xi1> to vector<8x640xi32>
    %169 = arith.sitofp %168 : vector<8x640xi32> to vector<8x640xf32>
    %cst_66 = arith.constant 0.000000e+00 : f32
    %170 = vector.broadcast %cst_66 : f32 to vector<8x640xf32>
    %171 = arith.select %167, %170, %165 : vector<8x640xi1>, vector<8x640xf32>
    %172 = arith.addf %114, %169 : vector<8x640xf32>
    %173 = vector.extract_strided_slice %169 {offsets = [0, 0], sizes = [1, 640], strides = [1, 1]} : vector<8x640xf32> to vector<1x640xf32>
    %c2_67 = arith.constant 2 : index
    %c0_68 = arith.constant 0 : index
    %174 = vector.load %arg10[%c2_67, %c0_68] : memref<4x5120xf32, #tpu.memory_space<vmem>>, vector<1x640xf32>
    tpu.vector_store %arg10[%c2_67, %c0_68], %173 {strides = array<i32>} : memref<4x5120xf32, #tpu.memory_space<vmem>>, vector<1x640xf32>,
    %175 = vector.extract_strided_slice %169 {offsets = [1, 0], sizes = [1, 640], strides = [1, 1]} : vector<8x640xf32> to vector<1x640xf32>
    %c2_69 = arith.constant 2 : index
    %c640_70 = arith.constant 640 : index
    %176 = vector.load %arg10[%c2_69, %c640_70] : memref<4x5120xf32, #tpu.memory_space<vmem>>, vector<1x640xf32>
    tpu.vector_store %arg10[%c2_69, %c640_70], %175 {strides = array<i32>} : memref<4x5120xf32, #tpu.memory_space<vmem>>, vector<1x640xf32>,
    %177 = vector.extract_strided_slice %169 {offsets = [2, 0], sizes = [1, 640], strides = [1, 1]} : vector<8x640xf32> to vector<1x640xf32>
    %c2_71 = arith.constant 2 : index
    %c1280_72 = arith.constant 1280 : index
    %178 = vector.load %arg10[%c2_71, %c1280_72] : memref<4x5120xf32, #tpu.memory_space<vmem>>, vector<1x640xf32>
    tpu.vector_store %arg10[%c2_71, %c1280_72], %177 {strides = array<i32>} : memref<4x5120xf32, #tpu.memory_space<vmem>>, vector<1x640xf32>,
    %179 = vector.extract_strided_slice %169 {offsets = [3, 0], sizes = [1, 640], strides = [1, 1]} : vector<8x640xf32> to vector<1x640xf32>
    %c2_73 = arith.constant 2 : index
    %c1920_74 = arith.constant 1920 : index
    %180 = vector.load %arg10[%c2_73, %c1920_74] : memref<4x5120xf32, #tpu.memory_space<vmem>>, vector<1x640xf32>
    tpu.vector_store %arg10[%c2_73, %c1920_74], %179 {strides = array<i32>} : memref<4x5120xf32, #tpu.memory_space<vmem>>, vector<1x640xf32>,
    %181 = vector.extract_strided_slice %169 {offsets = [4, 0], sizes = [1, 640], strides = [1, 1]} : vector<8x640xf32> to vector<1x640xf32>
    %c2_75 = arith.constant 2 : index
    %c2560_76 = arith.constant 2560 : index
    %182 = vector.load %arg10[%c2_75, %c2560_76] : memref<4x5120xf32, #tpu.memory_space<vmem>>, vector<1x640xf32>
    tpu.vector_store %arg10[%c2_75, %c2560_76], %181 {strides = array<i32>} : memref<4x5120xf32, #tpu.memory_space<vmem>>, vector<1x640xf32>,
    %183 = vector.extract_strided_slice %169 {offsets = [5, 0], sizes = [1, 640], strides = [1, 1]} : vector<8x640xf32> to vector<1x640xf32>
    %c2_77 = arith.constant 2 : index
    %c3200_78 = arith.constant 3200 : index
    %184 = vector.load %arg10[%c2_77, %c3200_78] : memref<4x5120xf32, #tpu.memory_space<vmem>>, vector<1x640xf32>
    tpu.vector_store %arg10[%c2_77, %c3200_78], %183 {strides = array<i32>} : memref<4x5120xf32, #tpu.memory_space<vmem>>, vector<1x640xf32>,
    %185 = vector.extract_strided_slice %169 {offsets = [6, 0], sizes = [1, 640], strides = [1, 1]} : vector<8x640xf32> to vector<1x640xf32>
    %c2_79 = arith.constant 2 : index
    %c3840_80 = arith.constant 3840 : index
    %186 = vector.load %arg10[%c2_79, %c3840_80] : memref<4x5120xf32, #tpu.memory_space<vmem>>, vector<1x640xf32>
    tpu.vector_store %arg10[%c2_79, %c3840_80], %185 {strides = array<i32>} : memref<4x5120xf32, #tpu.memory_space<vmem>>, vector<1x640xf32>,
    %187 = vector.extract_strided_slice %169 {offsets = [7, 0], sizes = [1, 640], strides = [1, 1]} : vector<8x640xf32> to vector<1x640xf32>
    %c2_81 = arith.constant 2 : index
    %c4480_82 = arith.constant 4480 : index
    %188 = vector.load %arg10[%c2_81, %c4480_82] : memref<4x5120xf32, #tpu.memory_space<vmem>>, vector<1x640xf32>
    tpu.vector_store %arg10[%c2_81, %c4480_82], %187 {strides = array<i32>} : memref<4x5120xf32, #tpu.memory_space<vmem>>, vector<1x640xf32>,
    %c0_83 = arith.constant 0 : index
    %c7680 = arith.constant 7680 : index
    %189 = vector.load %arg9[%c0_83, %c7680] : memref<8x10240xf32, #tpu.memory_space<vmem>>, vector<8x2560xf32>
    %cst_84 = arith.constant 7.500000e-01 : f32
    %190 = vector.broadcast %cst_84 : f32 to vector<8x2560xf32>
    %191 = arith.mulf %190, %134 : vector<8x2560xf32>
    %192 = arith.addf %191, %189 : vector<8x2560xf32>
    %cst_85 = arith.constant 9.700000e-01 : f32
    %193 = vector.broadcast %cst_85 : f32 to vector<8x2560xf32>
    %194 = arith.mulf %193, %143 : vector<8x2560xf32>
    %195 = arith.addf %194, %192 : vector<8x2560xf32>
    %cst_86 = arith.constant 1.250000e+00 : f32
    %196 = vector.broadcast %cst_86 : f32 to vector<8x2560xf32>
    %197 = arith.cmpf oge, %195, %196 : vector<8x2560xf32>
    %198 = arith.extui %197 : vector<8x2560xi1> to vector<8x2560xi32>
    %199 = arith.sitofp %198 : vector<8x2560xi32> to vector<8x2560xf32>
    %200 = arith.addf %144, %199 : vector<8x2560xf32>
    %201 = vector.extract_strided_slice %199 {offsets = [0, 0], sizes = [8, 640], strides = [1, 1]} : vector<8x2560xf32> to vector<8x640xf32>
    %202 = vector.broadcast %0 : f32 to vector<8x640xf32>
    %203 = arith.mulf %202, %201 : vector<8x640xf32>
    %204 = vector.extract_strided_slice %199 {offsets = [0, 640], sizes = [8, 640], strides = [1, 1]} : vector<8x2560xf32> to vector<8x640xf32>
    %205 = vector.broadcast %1 : f32 to vector<8x640xf32>
    %206 = arith.mulf %205, %204 : vector<8x640xf32>
    %207 = arith.addf %203, %206 : vector<8x640xf32>
    %208 = vector.extract_strided_slice %199 {offsets = [0, 1280], sizes = [8, 640], strides = [1, 1]} : vector<8x2560xf32> to vector<8x640xf32>
    %209 = vector.broadcast %2 : f32 to vector<8x640xf32>
    %210 = arith.mulf %209, %208 : vector<8x640xf32>
    %211 = arith.addf %207, %210 : vector<8x640xf32>
    %212 = vector.extract_strided_slice %199 {offsets = [0, 1920], sizes = [8, 640], strides = [1, 1]} : vector<8x2560xf32> to vector<8x640xf32>
    %213 = vector.broadcast %3 : f32 to vector<8x640xf32>
    %214 = arith.mulf %213, %212 : vector<8x640xf32>
    %215 = arith.addf %211, %214 : vector<8x640xf32>
    %cst_87 = arith.constant 7.500000e-01 : f32
    %216 = vector.broadcast %cst_87 : f32 to vector<8x640xf32>
    %217 = arith.mulf %216, %162 : vector<8x640xf32>
    %218 = arith.addf %217, %215 : vector<8x640xf32>
    %cst_88 = arith.constant 9.700000e-01 : f32
    %219 = vector.broadcast %cst_88 : f32 to vector<8x640xf32>
    %220 = arith.mulf %219, %171 : vector<8x640xf32>
    %221 = arith.addf %220, %218 : vector<8x640xf32>
    %cst_89 = arith.constant 1.250000e+00 : f32
    %222 = vector.broadcast %cst_89 : f32 to vector<8x640xf32>
    %223 = arith.cmpf oge, %221, %222 : vector<8x640xf32>
    %224 = arith.extui %223 : vector<8x640xi1> to vector<8x640xi32>
    %225 = arith.sitofp %224 : vector<8x640xi32> to vector<8x640xf32>
    %226 = arith.addf %172, %225 : vector<8x640xf32>
    %227 = vector.extract_strided_slice %225 {offsets = [0, 0], sizes = [1, 640], strides = [1, 1]} : vector<8x640xf32> to vector<1x640xf32>
    %c3_90 = arith.constant 3 : index
    %c0_91 = arith.constant 0 : index
    %228 = vector.load %arg10[%c3_90, %c0_91] : memref<4x5120xf32, #tpu.memory_space<vmem>>, vector<1x640xf32>
    tpu.vector_store %arg10[%c3_90, %c0_91], %227 {strides = array<i32>} : memref<4x5120xf32, #tpu.memory_space<vmem>>, vector<1x640xf32>,
    %229 = vector.extract_strided_slice %225 {offsets = [1, 0], sizes = [1, 640], strides = [1, 1]} : vector<8x640xf32> to vector<1x640xf32>
    %c3_92 = arith.constant 3 : index
    %c640_93 = arith.constant 640 : index
    %230 = vector.load %arg10[%c3_92, %c640_93] : memref<4x5120xf32, #tpu.memory_space<vmem>>, vector<1x640xf32>
    tpu.vector_store %arg10[%c3_92, %c640_93], %229 {strides = array<i32>} : memref<4x5120xf32, #tpu.memory_space<vmem>>, vector<1x640xf32>,
    %231 = vector.extract_strided_slice %225 {offsets = [2, 0], sizes = [1, 640], strides = [1, 1]} : vector<8x640xf32> to vector<1x640xf32>
    %c3_94 = arith.constant 3 : index
    %c1280_95 = arith.constant 1280 : index
    %232 = vector.load %arg10[%c3_94, %c1280_95] : memref<4x5120xf32, #tpu.memory_space<vmem>>, vector<1x640xf32>
    tpu.vector_store %arg10[%c3_94, %c1280_95], %231 {strides = array<i32>} : memref<4x5120xf32, #tpu.memory_space<vmem>>, vector<1x640xf32>,
    %233 = vector.extract_strided_slice %225 {offsets = [3, 0], sizes = [1, 640], strides = [1, 1]} : vector<8x640xf32> to vector<1x640xf32>
    %c3_96 = arith.constant 3 : index
    %c1920_97 = arith.constant 1920 : index
    %234 = vector.load %arg10[%c3_96, %c1920_97] : memref<4x5120xf32, #tpu.memory_space<vmem>>, vector<1x640xf32>
    tpu.vector_store %arg10[%c3_96, %c1920_97], %233 {strides = array<i32>} : memref<4x5120xf32, #tpu.memory_space<vmem>>, vector<1x640xf32>,
    %235 = vector.extract_strided_slice %225 {offsets = [4, 0], sizes = [1, 640], strides = [1, 1]} : vector<8x640xf32> to vector<1x640xf32>
    %c3_98 = arith.constant 3 : index
    %c2560_99 = arith.constant 2560 : index
    %236 = vector.load %arg10[%c3_98, %c2560_99] : memref<4x5120xf32, #tpu.memory_space<vmem>>, vector<1x640xf32>
    tpu.vector_store %arg10[%c3_98, %c2560_99], %235 {strides = array<i32>} : memref<4x5120xf32, #tpu.memory_space<vmem>>, vector<1x640xf32>,
    %237 = vector.extract_strided_slice %225 {offsets = [5, 0], sizes = [1, 640], strides = [1, 1]} : vector<8x640xf32> to vector<1x640xf32>
    %c3_100 = arith.constant 3 : index
    %c3200_101 = arith.constant 3200 : index
    %238 = vector.load %arg10[%c3_100, %c3200_101] : memref<4x5120xf32, #tpu.memory_space<vmem>>, vector<1x640xf32>
    tpu.vector_store %arg10[%c3_100, %c3200_101], %237 {strides = array<i32>} : memref<4x5120xf32, #tpu.memory_space<vmem>>, vector<1x640xf32>,
    %239 = vector.extract_strided_slice %225 {offsets = [6, 0], sizes = [1, 640], strides = [1, 1]} : vector<8x640xf32> to vector<1x640xf32>
    %c3_102 = arith.constant 3 : index
    %c3840_103 = arith.constant 3840 : index
    %240 = vector.load %arg10[%c3_102, %c3840_103] : memref<4x5120xf32, #tpu.memory_space<vmem>>, vector<1x640xf32>
    tpu.vector_store %arg10[%c3_102, %c3840_103], %239 {strides = array<i32>} : memref<4x5120xf32, #tpu.memory_space<vmem>>, vector<1x640xf32>,
    %241 = vector.extract_strided_slice %225 {offsets = [7, 0], sizes = [1, 640], strides = [1, 1]} : vector<8x640xf32> to vector<1x640xf32>
    %c3_104 = arith.constant 3 : index
    %c4480_105 = arith.constant 4480 : index
    %242 = vector.load %arg10[%c3_104, %c4480_105] : memref<4x5120xf32, #tpu.memory_space<vmem>>, vector<1x640xf32>
    tpu.vector_store %arg10[%c3_104, %c4480_105], %241 {strides = array<i32>} : memref<4x5120xf32, #tpu.memory_space<vmem>>, vector<1x640xf32>,
    %c0_106 = arith.constant 0 : index
    %c0_107 = arith.constant 0 : index
    %243 = vector.load %arg10[%c0_106, %c0_107] : memref<4x5120xf32, #tpu.memory_space<vmem>>, vector<4x5120xf32>
    %c0_108 = arith.constant 0 : index
    %c0_109 = arith.constant 0 : index
    %244 = vector.load %arg4[%c0_108, %c0_109] : memref<5120x128xf32, #tpu.memory_space<vmem>>, vector<5120x128xf32>
    %cst_110 = arith.constant dense<0.000000e+00> : vector<4x128xf32>
    %245 = tpu.matmul %243, %244, %cst_110 {dimension_numbers = #tpu.dot_dimension_numbers<[1], [0], [0], [1], [0, 0, 1, 1], [], []>} : vector<4x5120xf32>, vector<5120x128xf32>, vector<4x128xf32> -> vector<4x128xf32>
    %cst_111 = arith.constant 0.000000e+00 : f32
    %246 = vector.broadcast %cst_111 : f32 to vector<1x128xf32>
    %cst_112 = arith.constant 0.000000e+00 : f32
    %247 = vector.broadcast %cst_112 : f32 to vector<1x128xf32>
    %cst_113 = arith.constant 0.000000e+00 : f32
    %248 = vector.broadcast %cst_113 : f32 to vector<1x128xf32>
    %249 = vector.extract_strided_slice %245 {offsets = [0, 0], sizes = [1, 128], strides = [1, 1]} : vector<4x128xf32> to vector<1x128xf32>
    %cst_114 = arith.constant 7.500000e-01 : f32
    %250 = vector.broadcast %cst_114 : f32 to vector<1x128xf32>
    %251 = arith.mulf %250, %246 : vector<1x128xf32>
    %252 = arith.addf %251, %249 : vector<1x128xf32>
    %cst_115 = arith.constant 9.700000e-01 : f32
    %253 = vector.broadcast %cst_115 : f32 to vector<1x128xf32>
    %254 = arith.mulf %253, %247 : vector<1x128xf32>
    %255 = arith.addf %254, %252 : vector<1x128xf32>
    %cst_116 = arith.constant 1.250000e+00 : f32
    %256 = vector.broadcast %cst_116 : f32 to vector<1x128xf32>
    %257 = arith.cmpf oge, %255, %256 : vector<1x128xf32>
    %258 = arith.extui %257 : vector<1x128xi1> to vector<1x128xi32>
    %259 = arith.sitofp %258 : vector<1x128xi32> to vector<1x128xf32>
    %cst_117 = arith.constant 0.000000e+00 : f32
    %260 = vector.broadcast %cst_117 : f32 to vector<1x128xf32>
    %261 = arith.select %257, %260, %255 : vector<1x128xi1>, vector<1x128xf32>
    %c0_118 = arith.constant 0 : index
    %c0_119 = arith.constant 0 : index
    %c0_120 = arith.constant 0 : index
    %262 = vector.load %arg5[%c0_118, %c0_119, %c0_120] : memref<1x4x128xf32, #tpu.memory_space<vmem>>, vector<1x1x128xf32>
    %263 = vector.shape_cast %262 : vector<1x1x128xf32> to vector<1x128xf32>
    %264 = vector.shape_cast %259 : vector<1x128xf32> to vector<1x1x128xf32>
    tpu.vector_store %arg5[%c0_118, %c0_119, %c0_120], %264 {strides = array<i32>} : memref<1x4x128xf32, #tpu.memory_space<vmem>>, vector<1x1x128xf32>,
    %265 = arith.addf %248, %259 : vector<1x128xf32>
    %266 = vector.extract_strided_slice %245 {offsets = [1, 0], sizes = [1, 128], strides = [1, 1]} : vector<4x128xf32> to vector<1x128xf32>
    %cst_121 = arith.constant 7.500000e-01 : f32
    %267 = vector.broadcast %cst_121 : f32 to vector<1x128xf32>
    %268 = arith.mulf %267, %252 : vector<1x128xf32>
    %269 = arith.addf %268, %266 : vector<1x128xf32>
    %cst_122 = arith.constant 9.700000e-01 : f32
    %270 = vector.broadcast %cst_122 : f32 to vector<1x128xf32>
    %271 = arith.mulf %270, %261 : vector<1x128xf32>
    %272 = arith.addf %271, %269 : vector<1x128xf32>
    %cst_123 = arith.constant 1.250000e+00 : f32
    %273 = vector.broadcast %cst_123 : f32 to vector<1x128xf32>
    %274 = arith.cmpf oge, %272, %273 : vector<1x128xf32>
    %275 = arith.extui %274 : vector<1x128xi1> to vector<1x128xi32>
    %276 = arith.sitofp %275 : vector<1x128xi32> to vector<1x128xf32>
    %cst_124 = arith.constant 0.000000e+00 : f32
    %277 = vector.broadcast %cst_124 : f32 to vector<1x128xf32>
    %278 = arith.select %274, %277, %272 : vector<1x128xi1>, vector<1x128xf32>
    %c0_125 = arith.constant 0 : index
    %c1_126 = arith.constant 1 : index
    %c0_127 = arith.constant 0 : index
    %279 = vector.load %arg5[%c0_125, %c1_126, %c0_127] : memref<1x4x128xf32, #tpu.memory_space<vmem>>, vector<1x1x128xf32>
    %280 = vector.shape_cast %279 : vector<1x1x128xf32> to vector<1x128xf32>
    %281 = vector.shape_cast %276 : vector<1x128xf32> to vector<1x1x128xf32>
    tpu.vector_store %arg5[%c0_125, %c1_126, %c0_127], %281 {strides = array<i32>} : memref<1x4x128xf32, #tpu.memory_space<vmem>>, vector<1x1x128xf32>,
    %282 = arith.addf %265, %276 : vector<1x128xf32>
    %283 = vector.extract_strided_slice %245 {offsets = [2, 0], sizes = [1, 128], strides = [1, 1]} : vector<4x128xf32> to vector<1x128xf32>
    %cst_128 = arith.constant 7.500000e-01 : f32
    %284 = vector.broadcast %cst_128 : f32 to vector<1x128xf32>
    %285 = arith.mulf %284, %269 : vector<1x128xf32>
    %286 = arith.addf %285, %283 : vector<1x128xf32>
    %cst_129 = arith.constant 9.700000e-01 : f32
    %287 = vector.broadcast %cst_129 : f32 to vector<1x128xf32>
    %288 = arith.mulf %287, %278 : vector<1x128xf32>
    %289 = arith.addf %288, %286 : vector<1x128xf32>
    %cst_130 = arith.constant 1.250000e+00 : f32
    %290 = vector.broadcast %cst_130 : f32 to vector<1x128xf32>
    %291 = arith.cmpf oge, %289, %290 : vector<1x128xf32>
    %292 = arith.extui %291 : vector<1x128xi1> to vector<1x128xi32>
    %293 = arith.sitofp %292 : vector<1x128xi32> to vector<1x128xf32>
    %cst_131 = arith.constant 0.000000e+00 : f32
    %294 = vector.broadcast %cst_131 : f32 to vector<1x128xf32>
    %295 = arith.select %291, %294, %289 : vector<1x128xi1>, vector<1x128xf32>
    %c0_132 = arith.constant 0 : index
    %c2_133 = arith.constant 2 : index
    %c0_134 = arith.constant 0 : index
    %296 = vector.load %arg5[%c0_132, %c2_133, %c0_134] : memref<1x4x128xf32, #tpu.memory_space<vmem>>, vector<1x1x128xf32>
    %297 = vector.shape_cast %296 : vector<1x1x128xf32> to vector<1x128xf32>
    %298 = vector.shape_cast %293 : vector<1x128xf32> to vector<1x1x128xf32>
    tpu.vector_store %arg5[%c0_132, %c2_133, %c0_134], %298 {strides = array<i32>} : memref<1x4x128xf32, #tpu.memory_space<vmem>>, vector<1x1x128xf32>,
    %299 = arith.addf %282, %293 : vector<1x128xf32>
    %300 = vector.extract_strided_slice %245 {offsets = [3, 0], sizes = [1, 128], strides = [1, 1]} : vector<4x128xf32> to vector<1x128xf32>
    %cst_135 = arith.constant 7.500000e-01 : f32
    %301 = vector.broadcast %cst_135 : f32 to vector<1x128xf32>
    %302 = arith.mulf %301, %286 : vector<1x128xf32>
    %303 = arith.addf %302, %300 : vector<1x128xf32>
    %cst_136 = arith.constant 9.700000e-01 : f32
    %304 = vector.broadcast %cst_136 : f32 to vector<1x128xf32>
    %305 = arith.mulf %304, %295 : vector<1x128xf32>
    %306 = arith.addf %305, %303 : vector<1x128xf32>
    %cst_137 = arith.constant 1.250000e+00 : f32
    %307 = vector.broadcast %cst_137 : f32 to vector<1x128xf32>
    %308 = arith.cmpf oge, %306, %307 : vector<1x128xf32>
    %309 = arith.extui %308 : vector<1x128xi1> to vector<1x128xi32>
    %310 = arith.sitofp %309 : vector<1x128xi32> to vector<1x128xf32>
    %c0_138 = arith.constant 0 : index
    %c3_139 = arith.constant 3 : index
    %c0_140 = arith.constant 0 : index
    %311 = vector.load %arg5[%c0_138, %c3_139, %c0_140] : memref<1x4x128xf32, #tpu.memory_space<vmem>>, vector<1x1x128xf32>
    %312 = vector.shape_cast %311 : vector<1x1x128xf32> to vector<1x128xf32>
    %313 = vector.shape_cast %310 : vector<1x128xf32> to vector<1x1x128xf32>
    tpu.vector_store %arg5[%c0_138, %c3_139, %c0_140], %313 {strides = array<i32>} : memref<1x4x128xf32, #tpu.memory_space<vmem>>, vector<1x1x128xf32>,
    %314 = arith.addf %299, %310 : vector<1x128xf32>
    %cst_141 = arith.constant 0.000000e+00 : f32
    %315 = vector.broadcast %cst_141 : f32 to vector<1x1xf32>
    %316 = vector.shape_cast %200 : vector<8x2560xf32> to vector<1x8x2560xf32>
    %cst_142 = arith.constant dense<0.000000e+00> : vector<1xf32>
    %317 = vector.multi_reduction <add>, %316, %cst_142 [1, 2] : vector<1x8x2560xf32> to vector<1xf32>
    %318 = vector.shape_cast %317 : vector<1xf32> to vector<1x1x1xf32>
    %319 = vector.extract %318[0, 0, 0] : f32 from vector<1x1x1xf32>
    %320 = vector.broadcast %319 : f32 to vector<1x1xf32>
    %321 = arith.addf %315, %320 : vector<1x1xf32>
    %c0_143 = arith.constant 0 : index
    %c0_144 = arith.constant 0 : index
    %c0_145 = arith.constant 0 : index
    %322 = vector.load %arg6[%c0_143, %c0_144, %c0_145] : memref<1x1x1xf32, #tpu.memory_space<vmem>>, vector<1x1x1xf32>
    %323 = vector.shape_cast %322 : vector<1x1x1xf32> to vector<1x1xf32>
    %324 = vector.shape_cast %321 : vector<1x1xf32> to vector<1x1x1xf32>
    tpu.vector_store %arg6[%c0_143, %c0_144, %c0_145], %324 {strides = array<i32>} : memref<1x1x1xf32, #tpu.memory_space<vmem>>, vector<1x1x1xf32>,
    %cst_146 = arith.constant 0.000000e+00 : f32
    %325 = vector.broadcast %cst_146 : f32 to vector<1x1xf32>
    %326 = vector.shape_cast %226 : vector<8x640xf32> to vector<1x8x640xf32>
    %cst_147 = arith.constant dense<0.000000e+00> : vector<1xf32>
    %327 = vector.multi_reduction <add>, %326, %cst_147 [1, 2] : vector<1x8x640xf32> to vector<1xf32>
    %328 = vector.shape_cast %327 : vector<1xf32> to vector<1x1x1xf32>
    %329 = vector.extract %328[0, 0, 0] : f32 from vector<1x1x1xf32>
    %330 = vector.broadcast %329 : f32 to vector<1x1xf32>
    %331 = arith.addf %325, %330 : vector<1x1xf32>
    %c0_148 = arith.constant 0 : index
    %c0_149 = arith.constant 0 : index
    %c0_150 = arith.constant 0 : index
    %332 = vector.load %arg7[%c0_148, %c0_149, %c0_150] : memref<1x1x1xf32, #tpu.memory_space<vmem>>, vector<1x1x1xf32>
    %333 = vector.shape_cast %332 : vector<1x1x1xf32> to vector<1x1xf32>
    %334 = vector.shape_cast %331 : vector<1x1xf32> to vector<1x1x1xf32>
    tpu.vector_store %arg7[%c0_148, %c0_149, %c0_150], %334 {strides = array<i32>} : memref<1x1x1xf32, #tpu.memory_space<vmem>>, vector<1x1x1xf32>,
    %cst_151 = arith.constant 0.000000e+00 : f32
    %335 = vector.broadcast %cst_151 : f32 to vector<1x1xf32>
    %336 = vector.shape_cast %314 : vector<1x128xf32> to vector<1x1x128xf32>
    %cst_152 = arith.constant dense<0.000000e+00> : vector<1xf32>
    %337 = vector.multi_reduction <add>, %336, %cst_152 [1, 2] : vector<1x1x128xf32> to vector<1xf32>
    %338 = vector.shape_cast %337 : vector<1xf32> to vector<1x1x1xf32>
    %339 = vector.extract %338[0, 0, 0] : f32 from vector<1x1x1xf32>
    %340 = vector.broadcast %339 : f32 to vector<1x1xf32>
    %341 = arith.addf %335, %340 : vector<1x1xf32>
    %c0_153 = arith.constant 0 : index
    %c0_154 = arith.constant 0 : index
    %c0_155 = arith.constant 0 : index
    %342 = vector.load %arg8[%c0_153, %c0_154, %c0_155] : memref<1x1x1xf32, #tpu.memory_space<vmem>>, vector<1x1x1xf32>
    %343 = vector.shape_cast %342 : vector<1x1x1xf32> to vector<1x1xf32>
    %344 = vector.shape_cast %341 : vector<1x1xf32> to vector<1x1x1xf32>
    tpu.vector_store %arg8[%c0_153, %c0_154, %c0_155], %344 {strides = array<i32>} : memref<1x1x1xf32, #tpu.memory_space<vmem>>, vector<1x1x1xf32>,
    return
  }
  func.func @transform_0(%arg0: i32) -> i32 {
    %c0_i32 = arith.constant 0 : i32
    %c0_i32_0 = arith.constant 0 : i32
    return %c0_i32 : i32
  }
  func.func @transform_1(%arg0: i32) -> (i32, i32, i32) {
    %c0_i32 = arith.constant 0 : i32
    %c0_i32_0 = arith.constant 0 : i32
    %c0_i32_1 = arith.constant 0 : i32
    return %arg0, %c0_i32, %c0_i32_0 : i32, i32, i32
  }
  func.func @transform_2(%arg0: i32) -> (i32, i32) {
    %c0_i32 = arith.constant 0 : i32
    %c0_i32_0 = arith.constant 0 : i32
    %c0_i32_1 = arith.constant 0 : i32
    return %c0_i32, %c0_i32_0 : i32, i32
  }
  func.func @transform_3(%arg0: i32) -> (i32, i32) {
    %c0_i32 = arith.constant 0 : i32
    %c0_i32_0 = arith.constant 0 : i32
    %c0_i32_1 = arith.constant 0 : i32
    return %c0_i32, %c0_i32_0 : i32, i32
  }
  func.func @transform_4(%arg0: i32) -> (i32, i32, i32) {
    %c0_i32 = arith.constant 0 : i32
    %c0_i32_0 = arith.constant 0 : i32
    %c0_i32_1 = arith.constant 0 : i32
    return %arg0, %c0_i32, %c0_i32_0 : i32, i32, i32
  }
  func.func @transform_5(%arg0: i32) -> (i32, i32, i32) {
    %c0_i32 = arith.constant 0 : i32
    %c0_i32_0 = arith.constant 0 : i32
    %c0_i32_1 = arith.constant 0 : i32
    return %arg0, %c0_i32, %c0_i32_0 : i32, i32, i32
  }
  func.func @transform_6(%arg0: i32) -> (i32, i32, i32) {
    %c0_i32 = arith.constant 0 : i32
    %c0_i32_0 = arith.constant 0 : i32
    %c0_i32_1 = arith.constant 0 : i32
    return %arg0, %c0_i32, %c0_i32_0 : i32, i32, i32
  }
  func.func @transform_7(%arg0: i32) -> (i32, i32, i32) {
    %c0_i32 = arith.constant 0 : i32
    %c0_i32_0 = arith.constant 0 : i32
    %c0_i32_1 = arith.constant 0 : i32
    return %arg0, %c0_i32, %c0_i32_0 : i32, i32, i32
  }
}

</mosaic_0001>

<bundles_post_ra>
// kernel: network_forward.1
= control target key start
LH: loop header
LB: loop body
LE: loop exit
PB: predicated region body
PF: predicated region fallthrough
CT: control target
= control target key end

     0   :  { %13 = vsyncpa [#allocation6], 0  ;;  %s13808_s0 = inlined_call_operand.vmem [shape: f32[4], index: 0, kind: input, shape index: {}]   ;;  %s13809_s1 = inlined_call_operand.vmem [shape: f32[2,18,10240], index: 1, kind: input, shape index: {}]   ;;  %s13810_s2 = inlined_call_operand.vmem [shape: f32[8,18], index: 2, kind: input, shape index: {}]   ;;  %s13811_s3 = inlined_call_operand.vmem [shape: f32[5120,128], index: 3, kind: input, shape index: {}]   ;;  %s13812_s4 = inlined_call_operand.hbm [shape: f32[2,4,128], index: 4, kind: output, shape index: {0}]   ;;  %s13813_s5 = inlined_call_operand.vmem [shape: f32[2,1,1], index: 5, kind: output, shape index: {1}]   ;;  %s13814_s6 = inlined_call_operand.vmem [shape: f32[2,1,1], index: 6, kind: output, shape index: {2}]   ;;  %s13815_s7 = inlined_call_operand.vmem [shape: f32[2,1,1], index: 7, kind: output, shape index: {3}]  }
   0x1   :  { %14 = vsyncpa [#allocation5], 0 }
   0x2   :  { %16 = vsyncpa [#allocation5 + $0x1], 0  ;;  %s9694_s24 = smov 0   ;;  %s9696_s25 = smov 0  }
   0x3   :  { %s9698_s26 = smov 0   ;;  %s9700_s27 = smov 0  }
   0x4 LB: > { %s9715_s28 = sadd.s32 4294967295, %s9648_s27   ;;  %s7748_s29 = sadd.s32 4294967294, %s9648_s27   ;;  %s9648_s27 = sphi %s9700_s27, %s14126_s27   ;;  %s9644_s26 = sphi %s9698_s26, %s14125_s26   ;;  %s9640_s25 = sphi %s9696_s25, %s14124_s25   ;;  %s9636_s24 = sphi %s9694_s24, %s14123_s24  }
   0x5   : > { %s9719_s30 = sadd.s32 1, %s9648_s27   ;;  %s118_s8 = sadd.s32 1, %s9644_s26 }
   0x6   : > { %s115_s9 = ssub.s32 %s9648_s27, %s9719_s30  ;;  %p128_p0 = scmp.ne.s32.totalorder %s9644_s26, %s9640_s25 }
   0x7   : > { %p116_p1 = scmp.eq.s32.totalorder %s115_s9, 0  ;;  %p129_p2 = scmp.eq.s32.totalorder %s9715_s28, 1 }
   0x8   : > { %p134_p3 = scmp.ne.s32.totalorder %s9640_s25, %s9636_s24  ;;  %p135_p4 = scmp.eq.s32.totalorder %s7748_s29, 1 }
   0x9   : > { %s9730_s10 = scalar_select %p116_p1, %s9644_s26, %s118_s8  }
   0xa   : > { %p9732_p5 = por %p129_p2, %p128_p0  ;;  %p9736_p6 = por %p135_p4, %p134_p3 }
   0xb   : > { %p7749_p7 = scmp.ge.s32.totalorder %s9648_s27, 1  ;;  %p220_p8 = scmp.lt.s32.totalorder %s9648_s27, 3 }
   0xc   : > { %p9508_p9 = scmp.eq.s32.totalorder %s9715_s28, 0  ;;  %s233_s16 = sshll.u32 %s13808_s0, 4  ;;  %s234_s16 = int_to_ptr.vmem [resolvable:$true] %s233_s16 }
   0xd   : > { %p9743_p10 = pnand %p7749_p7, %p220_p8  ;;  %s9567_s17 = scalar_lea.vmem %s234_s16, 16 }
   0xe   : > { %p9568_p13 = scmp.ne.s32.totalorder %s234_s16, %s9567_s17  ;;  %p9575_p3 = scmp.lt.s32.totalorder %s234_s16, %s234_s16 }
   0xf   : > { %p9500_p11 = pneg %p9743_p10  ;;  %p9576_p4 = scmp.lt.s32.totalorder %s9567_s17, %s9567_s17 }
  0x11   : > { %p9501_p12 = pnand %p9508_p9, %p9500_p11  ;;  %p9577_p7 = por %p9576_p4, %p9575_p3 }
  0x13   : > { %p9569_p0 = pneg %p9501_p12 }
  0x15   : > { %p9570_p1 = pnand %p9569_p0, %p9568_p13 }
  0x17   : > { %p9571_p2 = pneg %p9570_p1 }
  0x19   : > { %p9578_p8 = pnand %p9577_p7, %p9571_p2 }
  0x1b   : > { %9581 = shalt.err (!%p9578_p8)
}
  0x1c   : > { %s9650_s18 = smov [#allocation4]   ;;  %260 = sbr.rel (%p9743_p10) target bundleno = 1265 (0x4f1), region = 36 }
  0x1d   : > { %9503 = dma.vmem_to_smem (!%p9501_p12), %s234_s16, 16, %s9650_s18, [#allocation6]  }
  0x23   : > { %9627 = dma.done.wait (%p9508_p9), [#allocation6], 16  }
  0x24   : > { %9629 = vsyncadd (%p9508_p9), [#allocation6], 4294967280 }
  0x25   : > { %266 = sfence }
  0x26   : > { %p302_p11 = scmp.lt.s32.totalorder %s9715_s28, 1  ;;  %v13821_v0 = vmov 0.0   ;;  %vm565_vm0 = vcmask 1041408   ;;  %v9786_v16 = vld [vmem:[%s13810_s2] sm:$0xff]  ;;  %vm561_vm1 = vcmask 146432   ;;  %s316_s14 = sld [smem:[#allocation4]] }
  0x27   : > { %870 = vmatprep.mubr.f32.mxu0 %v13821_v0  ;;  %941 = vmatprep.mubr.f32.mxu1 %v13821_v0  ;;  %s7756_s15 = sld [smem:[#allocation4 + $0x1]]  ;;  %s7757_s16 = sld [smem:[#allocation4 + $0x2]] }
  0x28   : > { %s9764_s19 = scalar_select %p302_p11, %s9715_s28, 1 }
  0x29   : > { %s7758_s17 = sld [smem:[#allocation4 + $0x3]] }
  0x2a   : > { %s9487_s20 = smul.u32 1920, %s9764_s19  ;;  %s309_s9 = scalar_lea.vmem %s13813_s5, %s9764_s19 }
  0x2b   : > { %s312_s8 = scalar_lea.vmem %s13814_s6, %s9764_s19 }
  0x2c   : > { %s9770_s23 = scalar_lea.vmem %s13809_s1, %s9487_s20  ;;  %s284_s20 = sand.u32 1, %s9640_s25  }
  0x2d   : > { %v322_v1 = vld [vmem:[%s9770_s23 + $0x8] sm:$0xff]  ;;  %v324_v3 = vld [vmem:[%s9770_s23 + $0x18] sm:$0xff]  ;;  %v321_v6 = vld [vmem:[%s9770_s23] sm:$0xff]  ;;  %s7754_s21 = sshll.u32 %s284_s20, 2 }
  0x2e   : > { %v402_v2 = vld [vmem:[%s9770_s23 + $0x288] sm:$0xff]  ;;  %v404_v5 = vld [vmem:[%s9770_s23 + $0x298] sm:$0xff]  ;;  %v401_v7 = vld [vmem:[%s9770_s23 + $0x280] sm:$0xff]  ;;  %s13751_s22 = scalar_lea.vmem [#allocation7], %s7754_s21 }
  0x2f   : > { %v8687_v4 = vpack.c.bf16 %v402_v2, %v322_v1  ;;  %v8691_v8 = vpack.c.bf16 %v404_v5, %v324_v3  ;;  %v8689_v9 = vpack.c.bf16 %v401_v7, %v321_v6  ;;  %v323_v10 = vld [vmem:[%s9770_s23 + $0x10] sm:$0xff]  ;;  %v482_v12 = vld [vmem:[%s9770_s23 + $0x508] sm:$0x3]  ;;  %v484_v14 = vld [vmem:[%s9770_s23 + $0x518] sm:$0x3] }
  0x30   : > { %v403_v11 = vld [vmem:[%s9770_s23 + $0x290] sm:$0xff]  ;;  %v481_v15 = vld [vmem:[%s9770_s23 + $0x500] sm:$0x3]  ;;  %v326_v17 = vld [vmem:[%s9770_s23 + $0x28] sm:$0xff] }
  0x31   : > { %8688 = vmatprep.subr.bf16.mxu0 %v8687_v4  ;;  %v8693_v13 = vpack.c.bf16 %v403_v11, %v323_v10  ;;  %8692 = vmatprep.subr.bf16.mxu1 %v8691_v8  ;;  %v406_v18 = vld [vmem:[%s9770_s23 + $0x2a8] sm:$0xff]  ;;  %v328_v19 = vld [vmem:[%s9770_s23 + $0x38] sm:$0xff]  ;;  %v325_v21 = vld [vmem:[%s9770_s23 + $0x20] sm:$0xff] }
  0x32   : > { %8690 = vmatpush1.bf16.msra.mxu0 %v8689_v9  ;;  %v408_v20 = vld [vmem:[%s9770_s23 + $0x2b8] sm:$0xff]  ;;  %v405_v22 = vld [vmem:[%s9770_s23 + $0x2a0] sm:$0xff]  ;;  %v483_v23 = vld [vmem:[%s9770_s23 + $0x510] sm:$0x3]  ;;  %v8695_v24 = vpack.c.bf16 %v406_v18, %v326_v17 }
  0x33   : > { %8694 = vmatpush1.bf16.msra.mxu1 %v8693_v13  ;;  %7759 = vmatprep.subr.msk.mxu0 %vm565_vm0, %v482_v12  ;;  %v327_v25 = vld [vmem:[%s9770_s23 + $0x30] sm:$0xff]  ;;  %v8699_v27 = vpack.c.bf16 %v408_v20, %v328_v19  ;;  %v8697_v28 = vpack.c.bf16 %v405_v22, %v325_v21  ;;  %v486_v30 = vld [vmem:[%s9770_s23 + $0x528] sm:$0x3]  ;;  %v488_v31 = vld [vmem:[%s9770_s23 + $0x538] sm:$0x3] }
  0x34   : > { %7762 = vmatprep.subr.msk.mxu1 %vm565_vm0, %v484_v14  ;;  %v407_v26 = vld [vmem:[%s9770_s23 + $0x2b0] sm:$0xff]  ;;  %v330_v32 = vld [vmem:[%s9770_s23 + $0x48] sm:$0xff]  ;;  %v332_v34 = vld [vmem:[%s9770_s23 + $0x58] sm:$0xff] }
  0x35   : > { %v8701_v29 = vpack.c.bf16 %v407_v26, %v327_v25  ;;  %v410_v33 = vld [vmem:[%s9770_s23 + $0x2c8] sm:$0xff]  ;;  %v412_v35 = vld [vmem:[%s9770_s23 + $0x2d8] sm:$0xff]  ;;  %v329_v36 = vld [vmem:[%s9770_s23 + $0x40] sm:$0xff] }
  0x36   : > { %7760 = vmatpush1.msk.msra.mxu0 %vm565_vm0, %v481_v15  ;;  %v409_v37 = vld [vmem:[%s9770_s23 + $0x2c0] sm:$0xff]  ;;  %v331_v39 = vld [vmem:[%s9770_s23 + $0x50] sm:$0xff]  ;;  %v8703_v42 = vpack.c.bf16 %v410_v33, %v330_v32  ;;  %v8707_v43 = vpack.c.bf16 %v412_v35, %v332_v34  ;;  %v490_v46 = vld [vmem:[%s9770_s23 + $0x548] sm:$0x3] }
  0x37   : > { %7763 = vmatpush1.msk.msra.mxu1 %vm565_vm0, %v483_v23  ;;  %7761 = vmatmul.mubr.msk.f32.vlgmr.msra.gmra.mrb[0].mxu0 %vm561_vm1, %v9786_v16  ;;  %v485_v38 = vld [vmem:[%s9770_s23 + $0x520] sm:$0x3]  ;;  %v411_v40 = vld [vmem:[%s9770_s23 + $0x2d0] sm:$0xff]  ;;  %v8705_v44 = vpack.c.bf16 %v409_v37, %v329_v36  ;;  %v492_v47 = vld [vmem:[%s9770_s23 + $0x558] sm:$0x3] }
  0x38   : > { %7764 = vmatmul.mubr.msk.f32.vlgmr.msra.gmra.mrb[0].mxu1 %vm561_vm1, %v9786_v16  ;;  %8696 = vmatprep.subr.bf16.mxu0 %v8695_v24  ;;  %v487_v41 = vld [vmem:[%s9770_s23 + $0x530] sm:$0x3]  ;;  %v8709_v45 = vpack.c.bf16 %v411_v40, %v331_v39  ;;  %v334_v48 = vld [vmem:[%s9770_s23 + $0x68] sm:$0xff]  ;;  %v336_v50 = vld [vmem:[%s9770_s23 + $0x78] sm:$0xff] }
  0x39   : > { %8700 = vmatprep.subr.bf16.mxu1 %v8699_v27  ;;  %8698 = vmatpush1.bf16.msra.mxu0 %v8697_v28  ;;  %v414_v49 = vld [vmem:[%s9770_s23 + $0x2e8] sm:$0xff]  ;;  %v416_v51 = vld [vmem:[%s9770_s23 + $0x2f8] sm:$0xff]  ;;  %v333_v52 = vld [vmem:[%s9770_s23 + $0x60] sm:$0xff] }
  0x3a   : > { %8702 = vmatpush1.bf16.msra.mxu1 %v8701_v29  ;;  %7765 = vmatprep.subr.msk.mxu0 %vm565_vm0, %v486_v30  ;;  %v413_v53 = vld [vmem:[%s9770_s23 + $0x2e0] sm:$0xff]  ;;  %v335_v55 = vld [vmem:[%s9770_s23 + $0x70] sm:$0xff]  ;;  %v8711_v58 = vpack.c.bf16 %v414_v49, %v334_v48  ;;  %v8715_v59 = vpack.c.bf16 %v416_v51, %v336_v50  ;;  %v494_v62 = vld [vmem:[%s9770_s23 + $0x568] sm:$0x3] }
  0x3b   : > { %7768 = vmatprep.subr.msk.mxu1 %vm565_vm0, %v488_v31  ;;  %1012 = vmatprep.mubr.f32.mxu0 %v13821_v0  ;;  %v489_v54 = vld [vmem:[%s9770_s23 + $0x540] sm:$0x3]  ;;  %v415_v56 = vld [vmem:[%s9770_s23 + $0x2f0] sm:$0xff]  ;;  %v8713_v60 = vpack.c.bf16 %v413_v53, %v333_v52  ;;  %v496_v63 = vld [vmem:[%s9770_s23 + $0x578] sm:$0x3] }
  0x3c   : > { %1083 = vmatprep.mubr.f32.mxu1 %v13821_v0  ;;  %v491_v57 = vld [vmem:[%s9770_s23 + $0x550] sm:$0x3]  ;;  %v8717_v61 = vpack.c.bf16 %v415_v56, %v335_v55  ;;  %v338_v1 = vld [vmem:[%s9770_s23 + $0x88] sm:$0xff]  ;;  %v340_v3 = vld [vmem:[%s9770_s23 + $0x98] sm:$0xff] }
  0x3d   : > { %7766 = vmatpush1.msk.msra.mxu0 %vm565_vm0, %v485_v38  ;;  %v418_v2 = vld [vmem:[%s9770_s23 + $0x308] sm:$0xff]  ;;  %v420_v4 = vld [vmem:[%s9770_s23 + $0x318] sm:$0xff]  ;;  %v337_v5 = vld [vmem:[%s9770_s23 + $0x80] sm:$0xff] }
  0x3e   : > { %7769 = vmatpush1.msk.msra.mxu1 %vm565_vm0, %v487_v41  ;;  %7767 = vmatmul.mubr.msk.f32.vlgmr.msra.gmra.mrb[2].mxu0 %vm561_vm1, %v9786_v16  ;;  %v417_v6 = vld [vmem:[%s9770_s23 + $0x300] sm:$0xff]  ;;  %v339_v8 = vld [vmem:[%s9770_s23 + $0x90] sm:$0xff]  ;;  %v8719_v11 = vpack.c.bf16 %v418_v2, %v338_v1  ;;  %v8723_v12 = vpack.c.bf16 %v420_v4, %v340_v3  ;;  %v498_v15 = vld [vmem:[%s9770_s23 + $0x588] sm:$0x3] }
  0x3f   : > { %7770 = vmatmul.mubr.msk.f32.vlgmr.msra.gmra.mrb[2].mxu1 %vm561_vm1, %v9786_v16  ;;  %8704 = vmatprep.subr.bf16.mxu0 %v8703_v42  ;;  %v493_v7 = vld [vmem:[%s9770_s23 + $0x560] sm:$0x3]  ;;  %v419_v9 = vld [vmem:[%s9770_s23 + $0x310] sm:$0xff]  ;;  %v8721_v13 = vpack.c.bf16 %v417_v6, %v337_v5  ;;  %v500_v17 = vld [vmem:[%s9770_s23 + $0x598] sm:$0x3] }
  0x40   : > { %8708 = vmatprep.subr.bf16.mxu1 %v8707_v43  ;;  %8706 = vmatpush1.bf16.msra.mxu0 %v8705_v44  ;;  %v495_v10 = vld [vmem:[%s9770_s23 + $0x570] sm:$0x3]  ;;  %v8725_v14 = vpack.c.bf16 %v419_v9, %v339_v8  ;;  %v342_v18 = vld [vmem:[%s9770_s23 + $0xa8] sm:$0xff]  ;;  %v344_v20 = vld [vmem:[%s9770_s23 + $0xb8] sm:$0xff] }
  0x41   : > { %8710 = vmatpush1.bf16.msra.mxu1 %v8709_v45  ;;  %7771 = vmatprep.subr.msk.mxu0 %vm565_vm0, %v490_v46  ;;  %v422_v19 = vld [vmem:[%s9770_s23 + $0x328] sm:$0xff]  ;;  %v424_v21 = vld [vmem:[%s9770_s23 + $0x338] sm:$0xff]  ;;  %v341_v22 = vld [vmem:[%s9770_s23 + $0xa0] sm:$0xff] }
  0x42   : > { %7774 = vmatprep.subr.msk.mxu1 %vm565_vm0, %v492_v47  ;;  %1154 = vmatprep.mubr.f32.mxu0 %v13821_v0  ;;  %v421_v23 = vld [vmem:[%s9770_s23 + $0x320] sm:$0xff]  ;;  %v343_v25 = vld [vmem:[%s9770_s23 + $0xb0] sm:$0xff]  ;;  %v8727_v28 = vpack.c.bf16 %v422_v19, %v342_v18  ;;  %v8731_v29 = vpack.c.bf16 %v424_v21, %v344_v20  ;;  %v502_v32 = vld [vmem:[%s9770_s23 + $0x5a8] sm:$0x3] }
  0x43   : > { %1225 = vmatprep.mubr.f32.mxu1 %v13821_v0  ;;  %v497_v24 = vld [vmem:[%s9770_s23 + $0x580] sm:$0x3]  ;;  %v423_v26 = vld [vmem:[%s9770_s23 + $0x330] sm:$0xff]  ;;  %v8729_v30 = vpack.c.bf16 %v421_v23, %v341_v22  ;;  %v504_v33 = vld [vmem:[%s9770_s23 + $0x5b8] sm:$0x3] }
  0x44   : > { %7772 = vmatpush1.msk.msra.mxu0 %vm565_vm0, %v489_v54  ;;  %v499_v27 = vld [vmem:[%s9770_s23 + $0x590] sm:$0x3]  ;;  %v8733_v31 = vpack.c.bf16 %v423_v26, %v343_v25  ;;  %v346_v34 = vld [vmem:[%s9770_s23 + $0xc8] sm:$0xff]  ;;  %v348_v36 = vld [vmem:[%s9770_s23 + $0xd8] sm:$0xff] }
  0x45   : > { %7775 = vmatpush1.msk.msra.mxu1 %vm565_vm0, %v491_v57  ;;  %7773 = vmatmul.mubr.msk.f32.vlgmr.msra.gmra.mrb[4].mxu0 %vm561_vm1, %v9786_v16  ;;  %v426_v35 = vld [vmem:[%s9770_s23 + $0x348] sm:$0xff]  ;;  %v428_v37 = vld [vmem:[%s9770_s23 + $0x358] sm:$0xff]  ;;  %v345_v38 = vld [vmem:[%s9770_s23 + $0xc0] sm:$0xff] }
  0x46   : > { %7776 = vmatmul.mubr.msk.f32.vlgmr.msra.gmra.mrb[4].mxu1 %vm561_vm1, %v9786_v16  ;;  %8712 = vmatprep.subr.bf16.mxu0 %v8711_v58  ;;  %v425_v39 = vld [vmem:[%s9770_s23 + $0x340] sm:$0xff]  ;;  %v347_v41 = vld [vmem:[%s9770_s23 + $0xd0] sm:$0xff]  ;;  %v8735_v44 = vpack.c.bf16 %v426_v35, %v346_v34  ;;  %v8739_v45 = vpack.c.bf16 %v428_v37, %v348_v36  ;;  %v506_v48 = vld [vmem:[%s9770_s23 + $0x5c8] sm:$0x3] }
  0x47   : > { %8716 = vmatprep.subr.bf16.mxu1 %v8715_v59  ;;  %8714 = vmatpush1.bf16.msra.mxu0 %v8713_v60  ;;  %v501_v40 = vld [vmem:[%s9770_s23 + $0x5a0] sm:$0x3]  ;;  %v427_v42 = vld [vmem:[%s9770_s23 + $0x350] sm:$0xff]  ;;  %v8737_v46 = vpack.c.bf16 %v425_v39, %v345_v38  ;;  %v508_v49 = vld [vmem:[%s9770_s23 + $0x5d8] sm:$0x3] }
  0x48   : > { %8718 = vmatpush1.bf16.msra.mxu1 %v8717_v61  ;;  %7777 = vmatprep.subr.msk.mxu0 %vm565_vm0, %v494_v62  ;;  %v503_v43 = vld [vmem:[%s9770_s23 + $0x5b0] sm:$0x3]  ;;  %v8741_v47 = vpack.c.bf16 %v427_v42, %v347_v41  ;;  %v350_v50 = vld [vmem:[%s9770_s23 + $0xe8] sm:$0xff]  ;;  %v352_v52 = vld [vmem:[%s9770_s23 + $0xf8] sm:$0xff] }
  0x49   : > { %7780 = vmatprep.subr.msk.mxu1 %vm565_vm0, %v496_v63  ;;  %1296 = vmatprep.mubr.f32.mxu0 %v13821_v0  ;;  %v430_v51 = vld [vmem:[%s9770_s23 + $0x368] sm:$0xff]  ;;  %v432_v53 = vld [vmem:[%s9770_s23 + $0x378] sm:$0xff]  ;;  %v349_v54 = vld [vmem:[%s9770_s23 + $0xe0] sm:$0xff] }
  0x4a   : > { %1367 = vmatprep.mubr.f32.mxu1 %v13821_v0  ;;  %v429_v55 = vld [vmem:[%s9770_s23 + $0x360] sm:$0xff]  ;;  %v351_v57 = vld [vmem:[%s9770_s23 + $0xf0] sm:$0xff]  ;;  %v8743_v60 = vpack.c.bf16 %v430_v51, %v350_v50  ;;  %v8747_v61 = vpack.c.bf16 %v432_v53, %v352_v52  ;;  %v510_v1 = vld [vmem:[%s9770_s23 + $0x5e8] sm:$0x3] }
  0x4b   : > { %7778 = vmatpush1.msk.msra.mxu0 %vm565_vm0, %v493_v7  ;;  %v505_v56 = vld [vmem:[%s9770_s23 + $0x5c0] sm:$0x3]  ;;  %v431_v58 = vld [vmem:[%s9770_s23 + $0x370] sm:$0xff]  ;;  %v8745_v62 = vpack.c.bf16 %v429_v55, %v349_v54  ;;  %v512_v2 = vld [vmem:[%s9770_s23 + $0x5f8] sm:$0x3] }
  0x4c   : > { %7781 = vmatpush1.msk.msra.mxu1 %vm565_vm0, %v495_v10  ;;  %7779 = vmatmul.mubr.msk.f32.vlgmr.msra.gmra.mrb[6].mxu0 %vm561_vm1, %v9786_v16  ;;  %v507_v59 = vld [vmem:[%s9770_s23 + $0x5d0] sm:$0x3]  ;;  %v8749_v63 = vpack.c.bf16 %v431_v58, %v351_v57  ;;  %v354_v3 = vld [vmem:[%s9770_s23 + $0x108] sm:$0xff]  ;;  %v356_v5 = vld [vmem:[%s9770_s23 + $0x118] sm:$0xff] }
  0x4d   : > { %7782 = vmatmul.mubr.msk.f32.vlgmr.msra.gmra.mrb[6].mxu1 %vm561_vm1, %v9786_v16  ;;  %8720 = vmatprep.subr.bf16.mxu0 %v8719_v11  ;;  %v434_v4 = vld [vmem:[%s9770_s23 + $0x388] sm:$0xff]  ;;  %v436_v6 = vld [vmem:[%s9770_s23 + $0x398] sm:$0xff]  ;;  %v353_v7 = vld [vmem:[%s9770_s23 + $0x100] sm:$0xff] }
  0x4e   : > { %8724 = vmatprep.subr.bf16.mxu1 %v8723_v12  ;;  %8722 = vmatpush1.bf16.msra.mxu0 %v8721_v13  ;;  %v433_v8 = vld [vmem:[%s9770_s23 + $0x380] sm:$0xff]  ;;  %v355_v10 = vld [vmem:[%s9770_s23 + $0x110] sm:$0xff]  ;;  %v8751_v13 = vpack.c.bf16 %v434_v4, %v354_v3  ;;  %v514_v18 = vld [vmem:[%s9770_s23 + $0x608] sm:$0x3] }
  0x4f   : > { %8726 = vmatpush1.bf16.msra.mxu1 %v8725_v14  ;;  %7783 = vmatprep.subr.msk.mxu0 %vm565_vm0, %v498_v15  ;;  %v509_v9 = vld [vmem:[%s9770_s23 + $0x5e0] sm:$0x3]  ;;  %v435_v11 = vld [vmem:[%s9770_s23 + $0x390] sm:$0xff]  ;;  %v8755_v14 = vpack.c.bf16 %v436_v6, %v356_v5  ;;  %v8753_v15 = vpack.c.bf16 %v433_v8, %v353_v7  ;;  %v516_v19 = vld [vmem:[%s9770_s23 + $0x618] sm:$0x3] }
  0x50   : > { %7786 = vmatprep.subr.msk.mxu1 %vm565_vm0, %v500_v17  ;;  %1438 = vmatprep.mubr.f32.mxu0 %v13821_v0  ;;  %v511_v12 = vld [vmem:[%s9770_s23 + $0x5f0] sm:$0x3]  ;;  %v8757_v17 = vpack.c.bf16 %v435_v11, %v355_v10  ;;  %v358_v20 = vld [vmem:[%s9770_s23 + $0x128] sm:$0xff]  ;;  %v360_v22 = vld [vmem:[%s9770_s23 + $0x138] sm:$0xff] }
  0x51   : > { %1509 = vmatprep.mubr.f32.mxu1 %v13821_v0  ;;  %v438_v21 = vld [vmem:[%s9770_s23 + $0x3a8] sm:$0xff]  ;;  %v440_v23 = vld [vmem:[%s9770_s23 + $0x3b8] sm:$0xff]  ;;  %v437_v25 = vld [vmem:[%s9770_s23 + $0x3a0] sm:$0xff] }
  0x52   : > { %7784 = vmatpush1.msk.msra.mxu0 %vm565_vm0, %v497_v24  ;;  %v357_v24 = vld [vmem:[%s9770_s23 + $0x120] sm:$0xff]  ;;  %v518_v34 = vld [vmem:[%s9770_s23 + $0x628] sm:$0x3]  ;;  %v520_v35 = vld [vmem:[%s9770_s23 + $0x638] sm:$0x3] }
  0x53   : > { %7787 = vmatpush1.msk.msra.mxu1 %vm565_vm0, %v499_v27  ;;  %7785 = vmatmul.mubr.msk.f32.vlgmr.msra.gmra.mrb[8].mxu0 %vm561_vm1, %v9786_v16  ;;  %v513_v26 = vld [vmem:[%s9770_s23 + $0x600] sm:$0x3]  ;;  %v359_v27 = vld [vmem:[%s9770_s23 + $0x130] sm:$0xff]  ;;  %v362_v36 = vld [vmem:[%s9770_s23 + $0x148] sm:$0xff] }
  0x54   : > { %7788 = vmatmul.mubr.msk.f32.vlgmr.msra.gmra.mrb[8].mxu1 %vm561_vm1, %v9786_v16  ;;  %8728 = vmatprep.subr.bf16.mxu0 %v8727_v28  ;;  %v439_v28 = vld [vmem:[%s9770_s23 + $0x3b0] sm:$0xff]  ;;  %v442_v37 = vld [vmem:[%s9770_s23 + $0x3c8] sm:$0xff]  ;;  %v364_v38 = vld [vmem:[%s9770_s23 + $0x158] sm:$0xff] }
  0x55   : > { %8732 = vmatprep.subr.bf16.mxu1 %v8731_v29  ;;  %8730 = vmatpush1.bf16.msra.mxu0 %v8729_v30  ;;  %v515_v29 = vld [vmem:[%s9770_s23 + $0x610] sm:$0x3]  ;;  %v8759_v30 = vpack.c.bf16 %v438_v21, %v358_v20  ;;  %v444_v39 = vld [vmem:[%s9770_s23 + $0x3d8] sm:$0xff]  ;;  %v441_v41 = vld [vmem:[%s9770_s23 + $0x3c0] sm:$0xff] }
  0x56   : > { %8734 = vmatpush1.bf16.msra.mxu1 %v8733_v31  ;;  %7789 = vmatprep.subr.msk.mxu0 %vm565_vm0, %v502_v32  ;;  %v8763_v31 = vpack.c.bf16 %v440_v23, %v360_v22  ;;  %v8761_v32 = vpack.c.bf16 %v437_v25, %v357_v24  ;;  %v517_v42 = vld [vmem:[%s9770_s23 + $0x620] sm:$0x3]  ;;  %v522_v50 = vld [vmem:[%s9770_s23 + $0x648] sm:$0x3]  ;;  %v524_v51 = vld [vmem:[%s9770_s23 + $0x658] sm:$0x3] }
  0x57   : > { %7792 = vmatprep.subr.msk.mxu1 %vm565_vm0, %v504_v33  ;;  %1580 = vmatprep.mubr.f32.mxu0 %v13821_v0  ;;  %v8765_v33 = vpack.c.bf16 %v439_v28, %v359_v27  ;;  %v366_v52 = vld [vmem:[%s9770_s23 + $0x168] sm:$0xff]  ;;  %v368_v54 = vld [vmem:[%s9770_s23 + $0x178] sm:$0xff]  ;;  %v445_v57 = vld [vmem:[%s9770_s23 + $0x3e0] sm:$0xff] }
  0x58   : > { %1651 = vmatprep.mubr.f32.mxu1 %v13821_v0  ;;  %v446_v53 = vld [vmem:[%s9770_s23 + $0x3e8] sm:$0xff]  ;;  %v448_v55 = vld [vmem:[%s9770_s23 + $0x3f8] sm:$0xff]  ;;  %v521_v58 = vld [vmem:[%s9770_s23 + $0x640] sm:$0x3] }
  0x59   : > { %7790 = vmatpush1.msk.msra.mxu0 %vm565_vm0, %v501_v40  ;;  %v361_v40 = vld [vmem:[%s9770_s23 + $0x140] sm:$0xff]  ;;  %v526_v3 = vld [vmem:[%s9770_s23 + $0x668] sm:$0x3]  ;;  %v528_v4 = vld [vmem:[%s9770_s23 + $0x678] sm:$0x3] }
  0x5a   : > { %7793 = vmatpush1.msk.msra.mxu1 %vm565_vm0, %v503_v43  ;;  %7791 = vmatmul.mubr.msk.f32.vlgmr.msra.gmra.mrb[10].mxu0 %vm561_vm1, %v9786_v16  ;;  %v363_v43 = vld [vmem:[%s9770_s23 + $0x150] sm:$0xff]  ;;  %v370_v5 = vld [vmem:[%s9770_s23 + $0x188] sm:$0xff]  ;;  %v372_v7 = vld [vmem:[%s9770_s23 + $0x198] sm:$0xff] }
  0x5b   : > { %7794 = vmatmul.mubr.msk.f32.vlgmr.msra.gmra.mrb[10].mxu1 %vm561_vm1, %v9786_v16  ;;  %8736 = vmatprep.subr.bf16.mxu0 %v8735_v44  ;;  %v443_v44 = vld [vmem:[%s9770_s23 + $0x3d0] sm:$0xff]  ;;  %v450_v6 = vld [vmem:[%s9770_s23 + $0x408] sm:$0xff]  ;;  %v452_v8 = vld [vmem:[%s9770_s23 + $0x418] sm:$0xff] }
  0x5c   : > { %8740 = vmatprep.subr.bf16.mxu1 %v8739_v45  ;;  %8738 = vmatpush1.bf16.msra.mxu0 %v8737_v46  ;;  %v519_v45 = vld [vmem:[%s9770_s23 + $0x630] sm:$0x3]  ;;  %v8767_v46 = vpack.c.bf16 %v442_v37, %v362_v36  ;;  %v449_v10 = vld [vmem:[%s9770_s23 + $0x400] sm:$0xff]  ;;  %v530_v20 = vld [vmem:[%s9770_s23 + $0x688] sm:$0x3] }
  0x5d   : > { %8742 = vmatpush1.bf16.msra.mxu1 %v8741_v47  ;;  %7795 = vmatprep.subr.msk.mxu0 %vm565_vm0, %v506_v48  ;;  %v8771_v47 = vpack.c.bf16 %v444_v39, %v364_v38  ;;  %v8769_v48 = vpack.c.bf16 %v441_v41, %v361_v40  ;;  %v525_v11 = vld [vmem:[%s9770_s23 + $0x660] sm:$0x3]  ;;  %v532_v21 = vld [vmem:[%s9770_s23 + $0x698] sm:$0x3]  ;;  %v374_v22 = vld [vmem:[%s9770_s23 + $0x1a8] sm:$0xff] }
  0x5e   : > { %7798 = vmatprep.subr.msk.mxu1 %vm565_vm0, %v508_v49  ;;  %1722 = vmatprep.mubr.f32.mxu0 %v13821_v0  ;;  %v8773_v49 = vpack.c.bf16 %v443_v44, %v363_v43  ;;  %v454_v23 = vld [vmem:[%s9770_s23 + $0x428] sm:$0xff]  ;;  %v376_v24 = vld [vmem:[%s9770_s23 + $0x1b8] sm:$0xff]  ;;  %v453_v27 = vld [vmem:[%s9770_s23 + $0x420] sm:$0xff] }
  0x5f   : > { %1793 = vmatprep.mubr.f32.mxu1 %v13821_v0  ;;  %v456_v25 = vld [vmem:[%s9770_s23 + $0x438] sm:$0xff]  ;;  %v529_v28 = vld [vmem:[%s9770_s23 + $0x680] sm:$0x3]  ;;  %v534_v36 = vld [vmem:[%s9770_s23 + $0x6a8] sm:$0x3] }
  0x60   : > { %7796 = vmatpush1.msk.msra.mxu0 %vm565_vm0, %v505_v56  ;;  %v365_v56 = vld [vmem:[%s9770_s23 + $0x160] sm:$0xff]  ;;  %v536_v37 = vld [vmem:[%s9770_s23 + $0x6b8] sm:$0x3]  ;;  %v378_v38 = vld [vmem:[%s9770_s23 + $0x1c8] sm:$0xff] }
  0x61   : > { %7799 = vmatpush1.msk.msra.mxu1 %vm565_vm0, %v507_v59  ;;  %7797 = vmatmul.mubr.msk.f32.vlgmr.msra.gmra.mrb[12].mxu0 %vm561_vm1, %v9786_v16  ;;  %v367_v59 = vld [vmem:[%s9770_s23 + $0x170] sm:$0xff]  ;;  %v458_v39 = vld [vmem:[%s9770_s23 + $0x448] sm:$0xff]  ;;  %v380_v40 = vld [vmem:[%s9770_s23 + $0x1d8] sm:$0xff] }
  0x62   : > { %7800 = vmatmul.mubr.msk.f32.vlgmr.msra.gmra.mrb[12].mxu1 %vm561_vm1, %v9786_v16  ;;  %8744 = vmatprep.subr.bf16.mxu0 %v8743_v60  ;;  %v447_v60 = vld [vmem:[%s9770_s23 + $0x3f0] sm:$0xff]  ;;  %v460_v41 = vld [vmem:[%s9770_s23 + $0x458] sm:$0xff]  ;;  %v457_v43 = vld [vmem:[%s9770_s23 + $0x440] sm:$0xff] }
  0x63   : > { %8748 = vmatprep.subr.bf16.mxu1 %v8747_v61  ;;  %8746 = vmatpush1.bf16.msra.mxu0 %v8745_v62  ;;  %v523_v61 = vld [vmem:[%s9770_s23 + $0x650] sm:$0x3]  ;;  %v8775_v62 = vpack.c.bf16 %v446_v53, %v366_v52  ;;  %v533_v44 = vld [vmem:[%s9770_s23 + $0x6a0] sm:$0x3]  ;;  %v538_v52 = vld [vmem:[%s9770_s23 + $0x6c8] sm:$0x3] }
  0x64   : > { %8750 = vmatpush1.bf16.msra.mxu1 %v8749_v63  ;;  %7801 = vmatprep.subr.msk.mxu0 %vm565_vm0, %v510_v1  ;;  %v8779_v63 = vpack.c.bf16 %v448_v55, %v368_v54  ;;  %v8777_v1 = vpack.c.bf16 %v445_v57, %v365_v56  ;;  %v540_v53 = vld [vmem:[%s9770_s23 + $0x6d8] sm:$0x3]  ;;  %v382_v54 = vld [vmem:[%s9770_s23 + $0x1e8] sm:$0xff] }
  0x65   : > { %7804 = vmatprep.subr.msk.mxu1 %vm565_vm0, %v512_v2  ;;  %1864 = vmatprep.mubr.f32.mxu0 %v13821_v0  ;;  %v8781_v2 = vpack.c.bf16 %v447_v60, %v367_v59  ;;  %v462_v55 = vld [vmem:[%s9770_s23 + $0x468] sm:$0xff]  ;;  %v384_v56 = vld [vmem:[%s9770_s23 + $0x1f8] sm:$0xff]  ;;  %v461_v59 = vld [vmem:[%s9770_s23 + $0x460] sm:$0xff] }
  0x66   : > { %1935 = vmatprep.mubr.f32.mxu1 %v13821_v0  ;;  %v464_v57 = vld [vmem:[%s9770_s23 + $0x478] sm:$0xff]  ;;  %v537_v60 = vld [vmem:[%s9770_s23 + $0x6c0] sm:$0x3] }
  0x67   : > { %7802 = vmatpush1.msk.msra.mxu0 %vm565_vm0, %v509_v9  ;;  %v369_v9 = vld [vmem:[%s9770_s23 + $0x180] sm:$0xff] }
  0x68   : > { %7805 = vmatpush1.msk.msra.mxu1 %vm565_vm0, %v511_v12  ;;  %7803 = vmatmul.mubr.msk.f32.vlgmr.msra.gmra.mrb[14].mxu0 %vm561_vm1, %v9786_v16  ;;  %v371_v12 = vld [vmem:[%s9770_s23 + $0x190] sm:$0xff] }
  0x69   : > { %7806 = vmatmul.mubr.msk.f32.vlgmr.msra.gmra.mrb[14].mxu1 %vm561_vm1, %v9786_v16  ;;  %8752 = vmatprep.subr.bf16.mxu0 %v8751_v13  ;;  %v451_v13 = vld [vmem:[%s9770_s23 + $0x410] sm:$0xff] }
  0x6a   : > { %8756 = vmatprep.subr.bf16.mxu1 %v8755_v14  ;;  %8754 = vmatpush1.bf16.msra.mxu0 %v8753_v15  ;;  %v527_v14 = vld [vmem:[%s9770_s23 + $0x670] sm:$0x3]  ;;  %v8783_v15 = vpack.c.bf16 %v450_v6, %v370_v5  ;;  %v542_v5 = vld [vmem:[%s9770_s23 + $0x6e8] sm:$0x3]  ;;  %v544_v6 = vld [vmem:[%s9770_s23 + $0x6f8] sm:$0x3] }
  0x6b   : > { %8758 = vmatpush1.bf16.msra.mxu1 %v8757_v17  ;;  %7807 = vmatprep.subr.msk.mxu0 %vm565_vm0, %v514_v18  ;;  %v8787_v17 = vpack.c.bf16 %v452_v8, %v372_v7  ;;  %v8785_v18 = vpack.c.bf16 %v449_v10, %v369_v9  ;;  %v386_v7 = vld [vmem:[%s9770_s23 + $0x208] sm:$0xff]  ;;  %v388_v9 = vld [vmem:[%s9770_s23 + $0x218] sm:$0xff] }
  0x6c   : > { %7810 = vmatprep.subr.msk.mxu1 %vm565_vm0, %v516_v19  ;;  %2006 = vmatprep.mubr.f32.mxu0 %v13821_v0  ;;  %v8789_v19 = vpack.c.bf16 %v451_v13, %v371_v12  ;;  %v466_v8 = vld [vmem:[%s9770_s23 + $0x488] sm:$0xff]  ;;  %v468_v10 = vld [vmem:[%s9770_s23 + $0x498] sm:$0xff]  ;;  %v465_v12 = vld [vmem:[%s9770_s23 + $0x480] sm:$0xff] }
  0x6d   : > { %2077 = vmatprep.mubr.f32.mxu1 %v13821_v0  ;;  %v541_v13 = vld [vmem:[%s9770_s23 + $0x6e0] sm:$0x3] }
  0x6e   : > { %7808 = vmatpush1.msk.msra.mxu0 %vm565_vm0, %v513_v26  ;;  %v373_v26 = vld [vmem:[%s9770_s23 + $0x1a0] sm:$0xff] }
  0x6f   : > { %7811 = vmatpush1.msk.msra.mxu1 %vm565_vm0, %v515_v29  ;;  %7809 = vmatmul.mubr.msk.f32.vlgmr.msra.gmra.mrb[16].mxu0 %vm561_vm1, %v9786_v16  ;;  %v375_v29 = vld [vmem:[%s9770_s23 + $0x1b0] sm:$0xff] }
  0x70   : > { %7812 = vmatmul.mubr.msk.f32.vlgmr.msra.gmra.mrb[16].mxu1 %vm561_vm1, %v9786_v16  ;;  %8760 = vmatprep.subr.bf16.mxu0 %v8759_v30  ;;  %v455_v30 = vld [vmem:[%s9770_s23 + $0x430] sm:$0xff] }
  0x71   : > { %8764 = vmatprep.subr.bf16.mxu1 %v8763_v31  ;;  %8762 = vmatpush1.bf16.msra.mxu0 %v8761_v32  ;;  %v531_v31 = vld [vmem:[%s9770_s23 + $0x690] sm:$0x3]  ;;  %v8791_v32 = vpack.c.bf16 %v454_v23, %v374_v22  ;;  %v546_v22 = vld [vmem:[%s9770_s23 + $0x708] sm:$0x3]  ;;  %v548_v23 = vld [vmem:[%s9770_s23 + $0x718] sm:$0x3] }
  0x72   : > { %8766 = vmatpush1.bf16.msra.mxu1 %v8765_v33  ;;  %7813 = vmatprep.subr.msk.mxu0 %vm565_vm0, %v518_v34  ;;  %v8795_v33 = vpack.c.bf16 %v456_v25, %v376_v24  ;;  %v8793_v34 = vpack.c.bf16 %v453_v27, %v373_v26  ;;  %v390_v24 = vld [vmem:[%s9770_s23 + $0x228] sm:$0xff]  ;;  %v392_v26 = vld [vmem:[%s9770_s23 + $0x238] sm:$0xff] }
  0x73   : > { %7816 = vmatprep.subr.msk.mxu1 %vm565_vm0, %v520_v35  ;;  %2148 = vmatprep.mubr.f32.mxu0 %v13821_v0  ;;  %v8797_v35 = vpack.c.bf16 %v455_v30, %v375_v29  ;;  %v470_v25 = vld [vmem:[%s9770_s23 + $0x4a8] sm:$0xff]  ;;  %v472_v27 = vld [vmem:[%s9770_s23 + $0x4b8] sm:$0xff]  ;;  %v469_v29 = vld [vmem:[%s9770_s23 + $0x4a0] sm:$0xff] }
  0x74   : > { %2219 = vmatprep.mubr.f32.mxu1 %v13821_v0  ;;  %v545_v30 = vld [vmem:[%s9770_s23 + $0x700] sm:$0x3] }
  0x75   : > { %7814 = vmatpush1.msk.msra.mxu0 %vm565_vm0, %v517_v42  ;;  %v377_v42 = vld [vmem:[%s9770_s23 + $0x1c0] sm:$0xff] }
  0x76   : > { %7817 = vmatpush1.msk.msra.mxu1 %vm565_vm0, %v519_v45  ;;  %7815 = vmatmul.mubr.msk.f32.vlgmr.msra.gmra.mrb[18].mxu0 %vm561_vm1, %v9786_v16  ;;  %v379_v45 = vld [vmem:[%s9770_s23 + $0x1d0] sm:$0xff] }
  0x77   : > { %7818 = vmatmul.mubr.msk.f32.vlgmr.msra.gmra.mrb[18].mxu1 %vm561_vm1, %v9786_v16  ;;  %8768 = vmatprep.subr.bf16.mxu0 %v8767_v46  ;;  %v459_v46 = vld [vmem:[%s9770_s23 + $0x450] sm:$0xff] }
  0x78   : > { %8772 = vmatprep.subr.bf16.mxu1 %v8771_v47  ;;  %8770 = vmatpush1.bf16.msra.mxu0 %v8769_v48  ;;  %v535_v47 = vld [vmem:[%s9770_s23 + $0x6b0] sm:$0x3]  ;;  %v8799_v48 = vpack.c.bf16 %v458_v39, %v378_v38  ;;  %v550_v38 = vld [vmem:[%s9770_s23 + $0x728] sm:$0x3]  ;;  %v552_v39 = vld [vmem:[%s9770_s23 + $0x738] sm:$0x3] }
  0x79   : > { %8774 = vmatpush1.bf16.msra.mxu1 %v8773_v49  ;;  %7819 = vmatprep.subr.msk.mxu0 %vm565_vm0, %v522_v50  ;;  %v8803_v49 = vpack.c.bf16 %v460_v41, %v380_v40  ;;  %v8801_v50 = vpack.c.bf16 %v457_v43, %v377_v42  ;;  %v394_v40 = vld [vmem:[%s9770_s23 + $0x248] sm:$0xff]  ;;  %v396_v42 = vld [vmem:[%s9770_s23 + $0x258] sm:$0xff] }
  0x7a   : > { %7822 = vmatprep.subr.msk.mxu1 %vm565_vm0, %v524_v51  ;;  %2290 = vmatprep.mubr.f32.mxu0 %v13821_v0  ;;  %v8805_v51 = vpack.c.bf16 %v459_v46, %v379_v45  ;;  %v474_v41 = vld [vmem:[%s9770_s23 + $0x4c8] sm:$0xff]  ;;  %v476_v43 = vld [vmem:[%s9770_s23 + $0x4d8] sm:$0xff]  ;;  %v473_v45 = vld [vmem:[%s9770_s23 + $0x4c0] sm:$0xff] }
  0x7b   : > { %2361 = vmatprep.mubr.f32.mxu1 %v13821_v0  ;;  %v549_v46 = vld [vmem:[%s9770_s23 + $0x720] sm:$0x3] }
  0x7c   : > { %7820 = vmatpush1.msk.msra.mxu0 %vm565_vm0, %v521_v58  ;;  %v381_v58 = vld [vmem:[%s9770_s23 + $0x1e0] sm:$0xff] }
  0x7d   : > { %7823 = vmatpush1.msk.msra.mxu1 %vm565_vm0, %v523_v61  ;;  %7821 = vmatmul.mubr.msk.f32.vlgmr.msra.gmra.mrb[20].mxu0 %vm561_vm1, %v9786_v16  ;;  %v383_v61 = vld [vmem:[%s9770_s23 + $0x1f0] sm:$0xff] }
  0x7e   : > { %7824 = vmatmul.mubr.msk.f32.vlgmr.msra.gmra.mrb[20].mxu1 %vm561_vm1, %v9786_v16  ;;  %8776 = vmatprep.subr.bf16.mxu0 %v8775_v62  ;;  %v463_v62 = vld [vmem:[%s9770_s23 + $0x470] sm:$0xff] }
  0x7f   : > { %8780 = vmatprep.subr.bf16.mxu1 %v8779_v63  ;;  %8778 = vmatpush1.bf16.msra.mxu0 %v8777_v1  ;;  %v539_v63 = vld [vmem:[%s9770_s23 + $0x6d0] sm:$0x3]  ;;  %v8807_v1 = vpack.c.bf16 %v462_v55, %v382_v54  ;;  %v554_v54 = vld [vmem:[%s9770_s23 + $0x748] sm:$0x3]  ;;  %v556_v55 = vld [vmem:[%s9770_s23 + $0x758] sm:$0x3] }
  0x80   : > { %8782 = vmatpush1.bf16.msra.mxu1 %v8781_v2  ;;  %7825 = vmatprep.subr.msk.mxu0 %vm565_vm0, %v526_v3  ;;  %v8811_v2 = vpack.c.bf16 %v464_v57, %v384_v56  ;;  %v8809_v3 = vpack.c.bf16 %v461_v59, %v381_v58  ;;  %v398_v56 = vld [vmem:[%s9770_s23 + $0x268] sm:$0xff]  ;;  %v400_v58 = vld [vmem:[%s9770_s23 + $0x278] sm:$0xff] }
  0x81   : > { %7828 = vmatprep.subr.msk.mxu1 %vm565_vm0, %v528_v4  ;;  %2432 = vmatprep.mubr.f32.mxu0 %v13821_v0  ;;  %v8813_v4 = vpack.c.bf16 %v463_v62, %v383_v61  ;;  %v478_v57 = vld [vmem:[%s9770_s23 + $0x4e8] sm:$0xff]  ;;  %v480_v59 = vld [vmem:[%s9770_s23 + $0x4f8] sm:$0xff]  ;;  %v477_v61 = vld [vmem:[%s9770_s23 + $0x4e0] sm:$0xff] }
  0x82   : > { %2503 = vmatprep.mubr.f32.mxu1 %v13821_v0  ;;  %v553_v62 = vld [vmem:[%s9770_s23 + $0x740] sm:$0x3] }
  0x83   : > { %7826 = vmatpush1.msk.msra.mxu0 %vm565_vm0, %v525_v11  ;;  %v385_v11 = vld [vmem:[%s9770_s23 + $0x200] sm:$0xff] }
  0x84   : > { %7829 = vmatpush1.msk.msra.mxu1 %vm565_vm0, %v527_v14  ;;  %7827 = vmatmul.mubr.msk.f32.vlgmr.msra.gmra.mrb[22].mxu0 %vm561_vm1, %v9786_v16  ;;  %v387_v14 = vld [vmem:[%s9770_s23 + $0x210] sm:$0xff] }
  0x85   : > { %7830 = vmatmul.mubr.msk.f32.vlgmr.msra.gmra.mrb[22].mxu1 %vm561_vm1, %v9786_v16  ;;  %8784 = vmatprep.subr.bf16.mxu0 %v8783_v15  ;;  %v467_v15 = vld [vmem:[%s9770_s23 + $0x490] sm:$0xff] }
  0x86   : > { %8788 = vmatprep.subr.bf16.mxu1 %v8787_v17  ;;  %8786 = vmatpush1.bf16.msra.mxu0 %v8785_v18  ;;  %v543_v17 = vld [vmem:[%s9770_s23 + $0x6f0] sm:$0x3]  ;;  %v8815_v18 = vpack.c.bf16 %v466_v8, %v386_v7  ;;  %v558_v7 = vld [vmem:[%s9770_s23 + $0x768] sm:$0x3]  ;;  %v560_v8 = vld [vmem:[%s9770_s23 + $0x778] sm:$0x3] }
  0x87   : > { %8790 = vmatpush1.bf16.msra.mxu1 %v8789_v19  ;;  %7831 = vmatprep.subr.msk.mxu0 %vm565_vm0, %v530_v20  ;;  %v8819_v19 = vpack.c.bf16 %v468_v10, %v388_v9  ;;  %v8817_v20 = vpack.c.bf16 %v465_v12, %v385_v11  ;;  %v557_v9 = vld [vmem:[%s9770_s23 + $0x760] sm:$0x3]  ;;  %v559_v10 = vld [vmem:[%s9770_s23 + $0x770] sm:$0x3]  ;;  %v9652_v11 = vmov 1966171168  }
  0x88   : > { %7834 = vmatprep.subr.msk.mxu1 %vm565_vm0, %v532_v21  ;;  %2574 = vmatprep.mubr.f32.mxu0 %v13821_v0  ;;  %v8821_v21 = vpack.c.bf16 %v467_v15, %v387_v14  ;;  %v3968_v12 = vunpack.c.l.s4 %v9652_v11 }
  0x89   : > { %2645 = vmatprep.mubr.f32.mxu1 %v13821_v0 }
  0x8a   : > { %7832 = vmatpush1.msk.msra.mxu0 %vm565_vm0, %v529_v28  ;;  %v389_v28 = vld [vmem:[%s9770_s23 + $0x220] sm:$0xff] }
  0x8b   : > { %7835 = vmatpush1.msk.msra.mxu1 %vm565_vm0, %v531_v31  ;;  %7833 = vmatmul.mubr.msk.f32.vlgmr.msra.gmra.mrb[24].mxu0 %vm561_vm1, %v9786_v16  ;;  %v391_v31 = vld [vmem:[%s9770_s23 + $0x230] sm:$0xff] }
  0x8c   : > { %7836 = vmatmul.mubr.msk.f32.vlgmr.msra.gmra.mrb[24].mxu1 %vm561_vm1, %v9786_v16  ;;  %8792 = vmatprep.subr.bf16.mxu0 %v8791_v32  ;;  %v471_v32 = vld [vmem:[%s9770_s23 + $0x4b0] sm:$0xff] }
  0x8d   : > { %8796 = vmatprep.subr.bf16.mxu1 %v8795_v33  ;;  %8794 = vmatpush1.bf16.msra.mxu0 %v8793_v34  ;;  %v547_v33 = vld [vmem:[%s9770_s23 + $0x710] sm:$0x3]  ;;  %v8823_v34 = vpack.c.bf16 %v470_v25, %v390_v24 }
  0x8e   : > { %8798 = vmatpush1.bf16.msra.mxu1 %v8797_v35  ;;  %7837 = vmatprep.subr.msk.mxu0 %vm565_vm0, %v534_v36  ;;  %v8827_v35 = vpack.c.bf16 %v472_v27, %v392_v26  ;;  %v8825_v36 = vpack.c.bf16 %v469_v29, %v389_v28  ;;  %v10223_v26 = vstv %s7756_s15  ;;  %v10225_v27 = vstv %s7757_s16  ;;  %s7611_s16 = sshll.u32 %s13751_s22, 4  ;;  %s7612_s16 = int_to_ptr.vmem [resolvable:$true] %s7611_s16 }
  0x8f   : > { %7840 = vmatprep.subr.msk.mxu1 %vm565_vm0, %v536_v37  ;;  %2716 = vmatprep.mubr.f32.mxu0 %v13821_v0  ;;  %v8829_v37 = vpack.c.bf16 %v471_v32, %v391_v31  ;;  %13883 = vst [vmem:[#allocation10_spill] sm:$0xff] %v10223_v26  ;;  %13884 = vst [vmem:[#allocation11_spill] sm:$0xff] %v10225_v27 }
  0x90   : > { %2787 = vmatprep.mubr.f32.mxu1 %v13821_v0 }
  0x91   : > { %7838 = vmatpush1.msk.msra.mxu0 %vm565_vm0, %v533_v44  ;;  %v393_v44 = vld [vmem:[%s9770_s23 + $0x240] sm:$0xff] }
  0x92   : > { %7841 = vmatpush1.msk.msra.mxu1 %vm565_vm0, %v535_v47  ;;  %7839 = vmatmul.mubr.msk.f32.vlgmr.msra.gmra.mrb[26].mxu0 %vm561_vm1, %v9786_v16  ;;  %v395_v47 = vld [vmem:[%s9770_s23 + $0x250] sm:$0xff] }
  0x93   : > { %7842 = vmatmul.mubr.msk.f32.vlgmr.msra.gmra.mrb[26].mxu1 %vm561_vm1, %v9786_v16  ;;  %8800 = vmatprep.subr.bf16.mxu0 %v8799_v48  ;;  %v475_v48 = vld [vmem:[%s9770_s23 + $0x4d0] sm:$0xff] }
  0x94   : > { %8804 = vmatprep.subr.bf16.mxu1 %v8803_v49  ;;  %8802 = vmatpush1.bf16.msra.mxu0 %v8801_v50  ;;  %v551_v49 = vld [vmem:[%s9770_s23 + $0x730] sm:$0x3]  ;;  %v8831_v50 = vpack.c.bf16 %v474_v41, %v394_v40 }
  0x95   : > { %8806 = vmatpush1.bf16.msra.mxu1 %v8805_v51  ;;  %7843 = vmatprep.subr.msk.mxu0 %vm565_vm0, %v538_v52  ;;  %v8835_v51 = vpack.c.bf16 %v476_v43, %v396_v42  ;;  %v8833_v52 = vpack.c.bf16 %v473_v45, %v393_v44 }
  0x96   : > { %7846 = vmatprep.subr.msk.mxu1 %vm565_vm0, %v540_v53  ;;  %2858 = vmatprep.mubr.f32.mxu0 %v13821_v0  ;;  %v8837_v53 = vpack.c.bf16 %v475_v48, %v395_v47 }
  0x97   : > { %2929 = vmatprep.mubr.f32.mxu1 %v13821_v0 }
  0x98   : > { %7844 = vmatpush1.msk.msra.mxu0 %vm565_vm0, %v537_v60  ;;  %v397_v60 = vld [vmem:[%s9770_s23 + $0x260] sm:$0xff] }
  0x99   : > { %7847 = vmatpush1.msk.msra.mxu1 %vm565_vm0, %v539_v63  ;;  %7845 = vmatmul.mubr.msk.f32.vlgmr.msra.gmra.mrb[28].mxu0 %vm561_vm1, %v9786_v16  ;;  %v399_v63 = vld [vmem:[%s9770_s23 + $0x270] sm:$0xff] }
  0x9a   : > { %7848 = vmatmul.mubr.msk.f32.vlgmr.msra.gmra.mrb[28].mxu1 %vm561_vm1, %v9786_v16  ;;  %8808 = vmatprep.subr.bf16.mxu0 %v8807_v1  ;;  %v479_v1 = vld [vmem:[%s9770_s23 + $0x4f0] sm:$0xff] }
  0x9b   : > { %8812 = vmatprep.subr.bf16.mxu1 %v8811_v2  ;;  %8810 = vmatpush1.bf16.msra.mxu0 %v8809_v3  ;;  %v8839_v2 = vpack.c.bf16 %v478_v57, %v398_v56  ;;  %v8843_v3 = vpack.c.bf16 %v480_v59, %v400_v58 }
  0x9c   : > { %8814 = vmatpush1.bf16.msra.mxu1 %v8813_v4  ;;  %7849 = vmatprep.subr.msk.mxu0 %vm565_vm0, %v542_v5  ;;  %v8841_v4 = vpack.c.bf16 %v477_v61, %v397_v60  ;;  %v8845_v5 = vpack.c.bf16 %v479_v1, %v399_v63 }
  0x9d   : > { %7852 = vmatprep.subr.msk.mxu1 %vm565_vm0, %v544_v6  ;;  %3000 = vmatprep.mubr.f32.mxu0 %v13821_v0  ;;  %v9566_v6 = vld [vmem:[%s13810_s2] sm:$0xff] }
  0x9e   : > { %3071 = vmatprep.mubr.f32.mxu1 %v13821_v0 }
  0x9f   : > { %7850 = vmatpush1.msk.msra.mxu0 %vm565_vm0, %v541_v13  ;;  %v13816_v13 = vlaneseq }
  0xa0   : > { %7853 = vmatpush1.msk.msra.mxu1 %vm565_vm0, %v543_v17  ;;  %7851 = vmatmul.mubr.msk.f32.vlgmr.msra.gmra.mrb[30].mxu0 %vm561_vm1, %v9786_v16 }
  0xa1   : > { %7854 = vmatmul.mubr.msk.f32.vlgmr.msra.gmra.mrb[30].mxu1 %vm561_vm1, %v9786_v16  ;;  %8816 = vmatprep.subr.bf16.mxu0 %v8815_v18 }
  0xa2   : > { %8820 = vmatprep.subr.bf16.mxu1 %v8819_v19  ;;  %8818 = vmatpush1.bf16.msra.mxu0 %v8817_v20  ;;  %v3969_v19 = vunpack.c.0.s8 %v3968_v12  ;;  %v3971_v20 = vshrl.u32 %v13816_v13, 7 }
  0xa3   : > { %8822 = vmatpush1.bf16.msra.mxu1 %v8821_v21  ;;  %7855 = vmatprep.subr.msk.mxu0 %vm565_vm0, %v546_v22 }
  0xa4   : > { %7858 = vmatprep.subr.msk.mxu1 %vm565_vm0, %v548_v23  ;;  %3142 = vmatprep.mubr.f32.mxu0 %v13821_v0  ;;  %v10218_v23 = vstv %s316_s14 }
  0xa5   : > { %3213 = vmatprep.mubr.f32.mxu1 %v13821_v0 }
  0xa6   : > { %7856 = vmatpush1.msk.msra.mxu0 %vm565_vm0, %v545_v30  ;;  %v10230_v30 = vstv %s7758_s17 }
  0xa7   : > { %7859 = vmatpush1.msk.msra.mxu1 %vm565_vm0, %v547_v33  ;;  %7857 = vmatmul.mubr.msk.f32.vlgmr.msra.gmra.mrb[32].mxu0 %vm561_vm1, %v9786_v16  ;;  %v10236_v33 = vsub.s32 %v3969_v19, %v3971_v20 }
  0xa8   : > { %7860 = vmatmul.mubr.msk.f32.vlgmr.msra.gmra.mrb[32].mxu1 %vm561_vm1, %v9786_v16  ;;  %8824 = vmatprep.subr.bf16.mxu0 %v8823_v34 }
  0xa9   : > { %8828 = vmatprep.subr.bf16.mxu1 %v8827_v35  ;;  %8826 = vmatpush1.bf16.msra.mxu0 %v8825_v36  ;;  %13885 = vst [vmem:[#allocation12_spill] sm:$0xff] %v10236_v33 }
  0xaa   : > { %8830 = vmatpush1.bf16.msra.mxu1 %v8829_v37  ;;  %7861 = vmatprep.subr.msk.mxu0 %vm565_vm0, %v550_v38 }
  0xab   : > { %7864 = vmatprep.subr.msk.mxu1 %vm565_vm0, %v552_v39  ;;  %3284 = vmatprep.mubr.f32.mxu0 %v13821_v0 }
  0xac   : > { %3355 = vmatprep.mubr.f32.mxu1 %v13821_v0 }
  0xad   : > { %7862 = vmatpush1.msk.msra.mxu0 %vm565_vm0, %v549_v46 }
  0xae   : > { %7865 = vmatpush1.msk.msra.mxu1 %vm565_vm0, %v551_v49  ;;  %7863 = vmatmul.mubr.msk.f32.vlgmr.msra.gmra.mrb[34].mxu0 %vm561_vm1, %v9786_v16 }
  0xaf   : > { %7866 = vmatmul.mubr.msk.f32.vlgmr.msra.gmra.mrb[34].mxu1 %vm561_vm1, %v9786_v16  ;;  %8832 = vmatprep.subr.bf16.mxu0 %v8831_v50  ;;  %v555_v16 = vld [vmem:[%s9770_s23 + $0x750] sm:$0x3]  ;;  %s7984_s23 = sshll.u32 %s9715_s28, 6 }
  0xb0   : > { %8836 = vmatprep.subr.bf16.mxu1 %v8835_v51  ;;  %8834 = vmatpush1.bf16.msra.mxu0 %v8833_v52  ;;  %s13764_s15 = scalar_lea.hbm %s13812_s4, %s7984_s23 }
  0xb1   : > { %8838 = vmatpush1.bf16.msra.mxu1 %v8837_v53  ;;  %7867 = vmatprep.subr.msk.mxu0 %vm565_vm0, %v554_v54 }
  0xb2   : > { %7870 = vmatprep.subr.msk.mxu1 %vm565_vm0, %v556_v55  ;;  %3426 = vmatprep.mubr.f32.mxu0 %v13821_v0 }
  0xb3   : > { %3497 = vmatprep.mubr.f32.mxu1 %v13821_v0 }
  0xb4   : > { %7868 = vmatpush1.msk.msra.mxu0 %vm565_vm0, %v553_v62 }
  0xb5   : > { %7871 = vmatpush1.msk.msra.mxu1 %vm565_vm0, %v555_v16  ;;  %7869 = vmatmul.mubr.msk.f32.vlgmr.msra.gmra.mrb[36].mxu0 %vm561_vm1, %v9566_v6 }
  0xb6   : > { %7872 = vmatmul.mubr.msk.f32.vlgmr.msra.gmra.mrb[36].mxu1 %vm561_vm1, %v9566_v6  ;;  %8840 = vmatprep.subr.bf16.mxu0 %v8839_v2 }
  0xb7   : > { %8844 = vmatprep.subr.bf16.mxu1 %v8843_v3  ;;  %8842 = vmatpush1.bf16.msra.mxu0 %v8841_v4 }
  0xb8   : > { %8846 = vmatpush1.bf16.msra.mxu1 %v8845_v5  ;;  %7873 = vmatprep.subr.msk.mxu0 %vm565_vm0, %v558_v7 }
  0xb9   : > { %7876 = vmatprep.subr.msk.mxu1 %vm565_vm0, %v560_v8  ;;  %3568 = vmatprep.mubr.f32.mxu0 %v13821_v0 }
  0xba   : > { %3639 = vmatprep.mubr.f32.mxu1 %v13821_v0 }
  0xbb   : > { %7874 = vmatpush1.msk.msra.mxu0 %vm565_vm0, %v557_v9 }
  0xbc   : > { %7877 = vmatpush1.msk.msra.mxu1 %vm565_vm0, %v559_v10  ;;  %7875 = vmatmul.mubr.msk.f32.vlgmr.msra.gmra.mrb[38].mxu0 %vm561_vm1, %v9566_v6 }
  0xbd   : > { %7878 = vmatmul.mubr.msk.f32.vlgmr.msra.gmra.mrb[38].mxu1 %vm561_vm1, %v9566_v6 }
 0x10a   : > { %v872_v14 = vpop.f32.mrb[0].mxu0 }
 0x10b   : > { %vm3786_vm2 = vcmp.ge.f32.partialorder %v872_v14, 1.25  ;;  %v943_v15 = vpop.f32.mrb[0].mxu1  ;;  %v874_v17 = vpop.f32.mrb[1].mxu0  ;;  %v10238_v34 = vmul.f32 0.75, %v872_v14 }
 0x10c   : > { %vm3788_vm3 = vcmp.ge.f32.partialorder %v943_v15, 1.25  ;;  %vm3787_vm4 = vcmp.ge.f32.partialorder %v874_v17, 1.25  ;;  %v945_v18 = vpop.f32.mrb[1].mxu1  ;;  %v10216_v21 = vsel %vm3786_vm2, 1.0, %v13821_v0  ;;  %v3846_v22 = vsel %vm3786_vm2, 0.0, %v872_v14 }
 0x10d   : > { %v10221_v24 = vsel %vm3788_vm3, 1.0, %v13821_v0  ;;  %v3848_v25 = vsel %vm3788_vm3, 0.0, %v943_v15  ;;  %v10228_v28 = vsel %vm3787_vm4, 1.0, %v13821_v0  ;;  %v3847_v29 = vsel %vm3787_vm4, 0.0, %v874_v17 }
 0x10e   : > { %vm3789_vm5 = vcmp.ge.f32.partialorder %v945_v18, 1.25  ;;  %v3887_v31 = vmul.f32 %v10216_v21, %v10218_v23  ;;  %v10234_v32 = vmul.f32 0.97, %v3846_v22  ;;  %v3889_v35 = vmul.f32 %v10221_v24, %v10218_v23 }
 0x10f   : > { %v10242_v36 = vmul.f32 0.97, %v3848_v25  ;;  %v10245_v37 = vsel %vm3789_vm5, 1.0, %v13821_v0  ;;  %v3849_v38 = vsel %vm3789_vm5, 0.0, %v945_v18  ;;  %v3888_v40 = vmul.f32 %v10228_v28, %v10218_v23 }
 0x110   : > { %v10249_v41 = vmul.f32 0.97, %v3847_v29  ;;  %v10251_v44 = vmul.f32 0.75, %v943_v15  ;;  %v10253_v46 = vmul.f32 0.75, %v874_v17  ;;  %v10255_v47 = vmul.f32 0.75, %v945_v18 }
 0x111   : > { %v1014_v39 = vpop.f32.mrb[2].mxu0  ;;  %v3890_v48 = vmul.f32 %v10245_v37, %v10218_v23  ;;  %v10259_v49 = vmul.f32 0.97, %v3849_v38 }
 0x112   : > { %vm3790_vm6 = vcmp.ge.f32.partialorder %v1014_v39, 1.25  ;;  %v1085_v42 = vpop.f32.mrb[2].mxu1  ;;  %v1016_v43 = vpop.f32.mrb[3].mxu0  ;;  %v10276_v58 = vmul.f32 0.75, %v1014_v39 }
 0x113   : > { %vm3792_vm7 = vcmp.ge.f32.partialorder %v1085_v42, 1.25  ;;  %vm3791_vm8 = vcmp.ge.f32.partialorder %v1016_v43, 1.25  ;;  %v1087_v45 = vpop.f32.mrb[3].mxu1  ;;  %v3850_v50 = vsel %vm3790_vm6, 0.0, %v1014_v39  ;;  %v10272_v56 = vsel %vm3790_vm6, 1.0, %v13821_v0 }
 0x114   : > { %v10263_v51 = vsel %vm3792_vm7, 1.0, %v13821_v0  ;;  %v3852_v52 = vsel %vm3792_vm7, 0.0, %v1085_v42  ;;  %v10268_v54 = vsel %vm3791_vm8, 1.0, %v13821_v0  ;;  %v3851_v55 = vsel %vm3791_vm8, 0.0, %v1016_v43 }
 0x115   : > { %v3894_v53 = vmul.f32 %v10263_v51, %v10223_v26  ;;  %v3893_v57 = vmul.f32 %v10268_v54, %v10223_v26  ;;  %vm3793_vm9 = vcmp.ge.f32.partialorder %v1087_v45, 1.25  ;;  %v10278_v59 = vmul.f32 0.97, %v3850_v50 }
 0x116   : > { %v10281_v61 = vsel %vm3793_vm9, 1.0, %v13821_v0  ;;  %v3853_v62 = vsel %vm3793_vm9, 0.0, %v1087_v45  ;;  %v10283_v63 = vmul.f32 0.97, %v3852_v52  ;;  %v10285_v16 = vmul.f32 0.97, %v3851_v55 }
 0x117   : > { %v3899_v60 = vadd.f32 %v3894_v53, %v3888_v40  ;;  %v3898_v1 = vadd.f32 %v3893_v57, %v3887_v31  ;;  %v3895_v2 = vmul.f32 %v10281_v61, %v10223_v26  ;;  %v3891_v4 = vmul.f32 %v10272_v56, %v10218_v23 }
 0x118   : > { %v1156_v3 = vpop.f32.mrb[4].mxu0  ;;  %v10291_v7 = vmul.f32 0.75, %v1085_v42  ;;  %v10293_v8 = vmul.f32 0.75, %v1016_v43  ;;  %v10295_v10 = vmul.f32 0.97, %v3853_v62  ;;  %v10305_v18 = vmul.f32 0.75, %v1087_v45 }
 0x119   : > { %vm3794_vm10 = vcmp.ge.f32.partialorder %v1156_v3, 1.25  ;;  %v1227_v5 = vpop.f32.mrb[4].mxu1  ;;  %v1158_v6 = vpop.f32.mrb[5].mxu0  ;;  %v3900_v9 = vadd.f32 %v3895_v2, %v3889_v35  ;;  %v10325_v50 = vmul.f32 0.75, %v1156_v3 }
 0x11a   : > { %v10298_v11 = vsel %vm3794_vm10, 1.0, %v13821_v0  ;;  %vm3796_vm11 = vcmp.ge.f32.partialorder %v1227_v5, 1.25  ;;  %v1229_v12 = vpop.f32.mrb[5].mxu1  ;;  %v3854_v14 = vsel %vm3794_vm10, 0.0, %v1156_v3  ;;  %vm3795_vm12 = vcmp.ge.f32.partialorder %v1158_v6, 1.25 }
 0x11b   : > { %v3896_v15 = vmul.f32 %v10298_v11, %v10223_v26  ;;  %v10303_v17 = vsel %vm3796_vm11, 1.0, %v13821_v0  ;;  %v3856_v19 = vsel %vm3796_vm11, 0.0, %v1227_v5  ;;  %vm3797_vm13 = vcmp.ge.f32.partialorder %v1229_v12, 1.25 }
 0x11c   : > { %13886 = vst [vmem:[#allocation13_spill] sm:$0xff] %v10303_v17  ;;  %v3904_v20 = vmul.f32 %v10303_v17, %v10225_v27  ;;  %v10310_v25 = vsel %vm3795_vm12, 1.0, %v13821_v0  ;;  %v3855_v29 = vsel %vm3795_vm12, 0.0, %v1158_v6  ;;  %v10313_v31 = vsel %vm3797_vm13, 1.0, %v13821_v0 }
 0x11d   : > { %v3901_v22 = vadd.f32 %v3896_v15, %v3890_v48  ;;  %13887 = vst [vmem:[#allocation14_spill] sm:$0xff] %v10310_v25  ;;  %13888 = vst [vmem:[#allocation15_spill] sm:$0xff] %v10313_v31  ;;  %v10315_v35 = vmul.f32 0.97, %v3854_v14  ;;  %v3897_v39 = vmul.f32 %v10310_v25, %v10223_v26  ;;  %v3857_v40 = vsel %vm3797_vm13, 0.0, %v1229_v12 }
 0x11e   : > { %v3909_v38 = vadd.f32 %v3904_v20, %v3898_v1  ;;  %v10319_v42 = vmul.f32 0.97, %v3856_v19  ;;  %v10321_v43 = vmul.f32 0.97, %v3855_v29  ;;  %v3905_v45 = vmul.f32 %v10313_v31, %v10225_v27 }
 0x11f   : > { %v1298_v48 = vpop.f32.mrb[6].mxu0  ;;  %v3902_v52 = vadd.f32 %v3897_v39, %v3891_v4  ;;  %v10327_v53 = vmul.f32 0.97, %v3857_v40  ;;  %v10329_v62 = vmul.f32 0.75, %v1227_v5  ;;  %v10334_v15 = vmul.f32 0.75, %v1158_v6 }
 0x120   : > { %vm3798_vm14 = vcmp.ge.f32.partialorder %v1298_v48, 1.25  ;;  %v1369_v55 = vpop.f32.mrb[6].mxu1  ;;  %v1300_v57 = vpop.f32.mrb[7].mxu0  ;;  %v3910_v1 = vadd.f32 %v3905_v45, %v3899_v60  ;;  %v10341_v20 = vmul.f32 0.75, %v1229_v12  ;;  %v10363_v25 = vmul.f32 0.75, %v1298_v48 }
 0x121   : > { %v10332_v2 = vsel %vm3798_vm14, 1.0, %v13821_v0  ;;  %vm3800_vm15 = vcmp.ge.f32.partialorder %v1369_v55, 1.25  ;;  %v1371_v14 = vpop.f32.mrb[7].mxu1  ;;  %v3858_v19 = vsel %vm3798_vm14, 0.0, %v1298_v48  ;;  %vm3799_vm0 = vcmp.ge.f32.partialorder %v1300_v57, 1.25 }
 0x122   : > { %13889 = vst [vmem:[#allocation16_spill] sm:$0xff] %v10332_v2  ;;  %v3906_v3 = vmul.f32 %v10332_v2, %v10225_v27  ;;  %v10339_v4 = vsel %vm3800_vm15, 1.0, %v13821_v0  ;;  %v3860_v29 = vsel %vm3800_vm15, 0.0, %v1369_v55  ;;  %vm3801_vm1 = vcmp.ge.f32.partialorder %v1371_v14, 1.25  ;;  %13896 = vst [vmem:[#allocation23_spill] sm:$0xff] %v10363_v25 }
 0x123   : > { %13890 = vst [vmem:[#allocation17_spill] sm:$0xff] %v10339_v4  ;;  %v3908_v60 = vmul.f32 %v10339_v4, %v10225_v27  ;;  %v10346_v39 = vsel %vm3799_vm0, 1.0, %v13821_v0  ;;  %v3859_v6 = vsel %vm3799_vm0, 0.0, %v1300_v57  ;;  %v10349_v40 = vsel %vm3801_vm1, 1.0, %v13821_v0 }
 0x124   : > { %v3911_v5 = vadd.f32 %v3906_v3, %v3900_v9  ;;  %13891 = vst [vmem:[#allocation18_spill] sm:$0xff] %v10346_v39  ;;  %13892 = vst [vmem:[#allocation19_spill] sm:$0xff] %v10349_v40  ;;  %v10351_v45 = vmul.f32 0.97, %v3858_v19  ;;  %v3907_v12 = vmul.f32 %v10346_v39, %v10225_v27  ;;  %v3861_v2 = vsel %vm3801_vm1, 0.0, %v1371_v14 }
 0x125   : > { %v10353_v13 = vadd.f32 %v3908_v60, %v3902_v52  ;;  %v10357_v31 = vmul.f32 0.97, %v3860_v29  ;;  %v10359_v4 = vmul.f32 0.97, %v3859_v6  ;;  %v3915_v9 = vmul.f32 %v10349_v40, %v10230_v30 }
 0x126   : > { %13893 = vst [vmem:[#allocation20_spill] sm:$0xff] %v10351_v45  ;;  %v1440_v3 = vpop.f32.mrb[8].mxu0  ;;  %v3912_v0 = vadd.f32 %v3907_v12, %v3901_v22  ;;  %v10365_v17 = vmul.f32 0.97, %v3861_v2  ;;  %v10371_v60 = vmul.f32 0.75, %v1369_v55  ;;  %v13899_v39 = vmov 0.0  }
 0x127   : > { %13894 = vst [vmem:[#allocation21_spill] sm:$0xff] %v10357_v31  ;;  %13895 = vst [vmem:[#allocation22_spill] sm:$0xff] %v10359_v4  ;;  %vm3802_vm2 = vcmp.ge.f32.partialorder %v1440_v3, 1.25  ;;  %v10367_v52 = vpop.f32.mrb[8].mxu1  ;;  %v10369_v19 = vpop.f32.mrb[9].mxu0  ;;  %v3920_v29 = vadd.f32 %v3915_v9, %v3909_v38  ;;  %v10385_v12 = vmul.f32 0.75, %v1300_v57 }
 0x128   : > { %13897 = vst [vmem:[#allocation24_spill] sm:$0xff] %v10365_v17  ;;  %13898 = vst [vmem:[#allocation25_spill] sm:$0xff] %v10371_v60  ;;  %v10374_v6 = vsel %vm3802_vm2, 1.0, %v13899_v39  ;;  %v3862_v4 = vsel %vm3802_vm2, 0.0, %v1440_v3  ;;  %vm3804_vm3 = vcmp.ge.f32.partialorder %v10367_v52, 1.25  ;;  %v10377_v40 = vpop.f32.mrb[9].mxu1 }
 0x129   : > { %13900 = vst [vmem:[#allocation26_spill] sm:$0xff] %v10374_v6  ;;  %v3916_v22 = vmul.f32 %v10374_v6, %v10230_v30  ;;  %v10382_v48 = vsel %vm3804_vm3, 1.0, %v13899_v39  ;;  %v3864_v2 = vsel %vm3804_vm3, 0.0, %v10367_v52  ;;  %13902 = vst [vmem:[#allocation28_spill] sm:$0xff] %v10385_v12  ;;  %vm3935_vm4 = vcmp.ge.f32.partialorder %v3920_v29, 1.25 }
 0x12a   : > { %13901 = vst [vmem:[#allocation27_spill] sm:$0xff] %v10382_v48  ;;  %v3918_v38 = vmul.f32 %v10382_v48, %v10230_v30  ;;  %v10389_v55 = vmul.f32 0.75, %v1371_v14  ;;  %v10391_v9 = vmul.f32 0.75, %v1440_v3  ;;  %v3950_v17 = vsel %vm3935_vm4, 0.0, %v3920_v29 }
 0x12b   : > { %v3921_v31 = vadd.f32 %v3916_v22, %v3910_v1  ;;  %v10394_v45 = vmul.f32 0.97, %v3862_v4  ;;  %vm3803_vm5 = vcmp.ge.f32.partialorder %v10369_v19, 1.25  ;;  %v10397_v6 = vmul.f32 0.75, %v3920_v29 }
 0x12c   : > { %13903 = vst [vmem:[#allocation29_spill] sm:$0xff] %v10389_v55  ;;  %13904 = vst [vmem:[#allocation30_spill] sm:$0xff] %v10391_v9  ;;  %v10399_v60 = vadd.f32 %v3918_v38, %v3912_v0  ;;  %v10401_v57 = vmul.f32 0.97, %v3864_v2  ;;  %v10404_v12 = vsel %vm3803_vm5, 1.0, %v13899_v39  ;;  %v3863_v3 = vsel %vm3803_vm5, 0.0, %v10369_v19 }
 0x12d   : > { %13905 = vst [vmem:[#allocation31_spill] sm:$0xff] %v10394_v45  ;;  %13906 = vst [vmem:[#allocation32_spill] sm:$0xff] %v10397_v6  ;;  %v10406_v14 = vmul.f32 0.97, %v3950_v17  ;;  %vm3936_vm6 = vcmp.ge.f32.partialorder %v3921_v31, 1.25  ;;  %v3917_v1 = vmul.f32 %v10404_v12, %v10230_v30  ;;  %v1582_v4 = vpop.f32.mrb[10].mxu0 }
 0x12e   : > { %13907 = vst [vmem:[#allocation33_spill] sm:$0xff] %v10399_v60  ;;  %13908 = vst [vmem:[#allocation34_spill] sm:$0xff] %v10401_v57  ;;  %v10413_v22 = vsel %vm3935_vm4, 1.0, %v13899_v39  ;;  %v10416_v0 = vsel %vm3936_vm6, 1.0, %v13899_v39  ;;  %v3951_v2 = vsel %vm3936_vm6, 0.0, %v3921_v31  ;;  %vm3938_vm7 = vcmp.ge.f32.partialorder %v10399_v60, 1.25 }
 0x12f   : > { %13909 = vst [vmem:[#allocation35_spill] sm:$0xff] %v10404_v12  ;;  %13910 = vst [vmem:[#allocation36_spill] sm:$0xff] %v10406_v14  ;;  %v1653_v38 = vpop.f32.mrb[10].mxu1  ;;  %v1584_v17 = vpop.f32.mrb[11].mxu0  ;;  %v3965_v14 = vcombine.low %v10413_v22, %v10416_v0  ;;  %v4038_v6 = vcombine.high %v10413_v22, %v10416_v0  ;;  %v10423_v12 = vmul.f32 0.75, %v3921_v31  ;;  %v3953_v29 = vsel %vm3938_vm7, 0.0, %v10399_v60 }
 0x130   : > { %13911 = vst [vmem:[#allocation37_spill] sm:$0xff] %v10413_v22  ;;  %13912 = vst [vmem:[#allocation38_spill] sm:$0xff] %v10416_v0  ;;  %v1655_v48 = vpop.f32.mrb[11].mxu1  ;;  %v3922_v57 = vadd.f32 %v3917_v1, %v3911_v5  ;;  %v10428_v45 = vmul.f32 0.97, %v3863_v3  ;;  %vm3805_vm8 = vcmp.ge.f32.partialorder %v10377_v40, 1.25  ;;  %v10432_v9 = vadd.f32 %v10238_v34, %v1582_v4 }
 0x131   : > { %v10434_v55 = vmul.f32 0.97, %v3951_v2  ;;  %v10437_v25 = vmul.f32 0.75, %v10399_v60  ;;  %v10439_v31 = vmul.f32 0.97, %v3953_v29  ;;  %v10442_v0 = vsel %vm3805_vm8, 1.0, %v13899_v39 }
 0x132   : > { %13913 = vst [vmem:[#allocation39_spill] sm:$0xff] %v10442_v0  ;;  %v10445_v22 = vrot.slane %v3965_v14, %v10236_v33  ;;  %vm3937_vm9 = vcmp.ge.f32.partialorder %v3922_v57, 1.25  ;;  %v3865_v5 = vsel %vm3805_vm8, 0.0, %v10377_v40  ;;  %v3919_v34 = vmul.f32 %v10442_v0, %v10230_v30 }
 0x133   : > { %v10451_v3 = vrot.slane %v4038_v6, %v10236_v33  ;;  %v3952_v1 = vsel %vm3937_vm9, 0.0, %v3922_v57  ;;  %v4189_v4 = vadd.f32 %v10234_v32, %v10432_v9  ;;  %v10457_v2 = vadd.f32 %v10251_v44, %v1653_v38 }
 0x134   : > { %13914 = vst [vmem:[#allocation40_spill] sm:$0xff] %v10445_v22  ;;  %v10459_v29 = vmul.f32 0.75, %v3922_v57  ;;  %v10462_v14 = vadd.f32 %v3919_v34, %v10353_v13  ;;  %v10465_v22 = vadd.f32 %v10253_v46, %v1584_v17  ;;  %v10468_v60 = vadd.f32 %v10255_v47, %v1655_v48  ;;  %v1724_v6 = vpop.f32.mrb[12].mxu0 }
 0x135   : > { %13915 = vst [vmem:[#allocation41_spill] sm:$0xff] %v10451_v3  ;;  %v10470_v3 = vmul.f32 0.97, %v3865_v5  ;;  %vm4209_vm10 = vcmp.ge.f32.partialorder %v4189_v4, 1.25  ;;  %v4191_v32 = vadd.f32 %v10242_v36, %v10457_v2  ;;  %v10475_v44 = vadd.f32 %v10276_v58, %v1724_v6  ;;  %v1795_v38 = vpop.f32.mrb[12].mxu1  ;;  %v1726_v0 = vpop.f32.mrb[13].mxu0 }
 0x136   : > { %13916 = vst [vmem:[#allocation42_spill] sm:$0xff] %v10462_v14  ;;  %13917 = vst [vmem:[#allocation43_spill] sm:$0xff] %v10468_v60  ;;  %v10479_v13 = vsel %vm3937_vm9, 1.0, %v13899_v39  ;;  %v10481_v46 = vmul.f32 0.97, %v3952_v1  ;;  %v7904_v47 = vsel %vm4209_vm10, 1.0, %v13899_v39  ;;  %v4190_v48 = vadd.f32 %v10249_v41, %v10465_v22 }
 0x137   : > { %13918 = vst [vmem:[#allocation44_spill] sm:$0xff] %v10475_v44  ;;  %13919 = vst [vmem:[#allocation45_spill] sm:$0xff] %v10479_v13  ;;  %v1797_v17 = vpop.f32.mrb[13].mxu1  ;;  %v10488_v36 = vadd.f32 %v7904_v47, %v10216_v21  ;;  %vm4211_vm11 = vcmp.ge.f32.partialorder %v4191_v32, 1.25  ;;  %v4192_v58 = vadd.f32 %v10259_v49, %v10468_v60  ;;  %v10493_v57 = vmul.f32 0.75, %v10367_v52 }
 0x138   : > { %v10496_v5 = vmul.f32 0.75, %v10462_v14  ;;  %v7906_v34 = vsel %vm4211_vm11, 1.0, %v13899_v39  ;;  %vm4210_vm12 = vcmp.ge.f32.partialorder %v4190_v48, 1.25  ;;  %v4193_v41 = vadd.f32 %v10278_v59, %v10475_v44 }
 0x139   : > { %v10502_v1 = vsel %vm4209_vm10, 0.0, %v4189_v4  ;;  %v4309_v21 = vmul.f32 %v7904_v47, %v10218_v23  ;;  %v10506_v6 = vadd.f32 %v7906_v34, %v10221_v24  ;;  %v7905_v49 = vsel %vm4210_vm12, 1.0, %v13899_v39 }
 0x13a   : > { %v10509_v52 = vsel %vm4211_vm11, 0.0, %v4191_v32  ;;  %v10512_v13 = vadd.f32 %v7905_v49, %v10228_v28  ;;  %vm4212_vm13 = vcmp.ge.f32.partialorder %v4192_v58, 1.25  ;;  %vm4213_vm14 = vcmp.ge.f32.partialorder %v4193_v41, 1.25 }
 0x13b   : > { %13920 = vst [vmem:[#allocation46_spill] sm:$0xff] %v10506_v6  ;;  %v4311_v14 = vmul.f32 %v7906_v34, %v10218_v23  ;;  %v10515_v59 = vsel %vm4210_vm12, 0.0, %v4190_v48  ;;  %v7907_v4 = vsel %vm4212_vm13, 1.0, %v13899_v39  ;;  %v7908_v47 = vsel %vm4213_vm14, 1.0, %v13899_v39  ;;  %v1866_v24 = vpop.f32.mrb[14].mxu0 }
 0x13c   : > { %13921 = vst [vmem:[#allocation47_spill] sm:$0xff] %v10512_v13  ;;  %13922 = vst [vmem:[#allocation48_spill] sm:$0xff] %v10515_v59  ;;  %v4310_v6 = vmul.f32 %v7905_v49, %v10218_v23  ;;  %v10521_v44 = vsel %vm4212_vm13, 0.0, %v4192_v58  ;;  %v10524_v32 = vadd.f32 %v7907_v4, %v10245_v37  ;;  %v10527_v28 = vadd.f32 %v7908_v47, %v10272_v56  ;;  %v1937_v13 = vpop.f32.mrb[14].mxu1  ;;  %v1868_v34 = vpop.f32.mrb[15].mxu0 }
 0x13d   : > { %v10530_v48 = vadd.f32 %v10291_v7, %v1795_v38  ;;  %v10533_v60 = vadd.f32 %v10293_v8, %v1726_v0  ;;  %v10536_v59 = vadd.f32 %v10305_v18, %v1797_v17  ;;  %v10539_v58 = vadd.f32 %v10325_v50, %v1866_v24  ;;  %v1939_v49 = vpop.f32.mrb[15].mxu1 }
 0x13e   : > { %13923 = vst [vmem:[#allocation49_spill] sm:$0xff] %v10527_v28  ;;  %v10542_v37 = vsel %vm4213_vm14, 0.0, %v4193_v41  ;;  %v10545_v56 = vadd.f32 %v10329_v62, %v1937_v13  ;;  %v10548_v28 = vadd.f32 %v10334_v15, %v1868_v34  ;;  %v10551_v7 = vadd.f32 %v10341_v20, %v1939_v49 }
 0x13f   : > { %v4195_v8 = vadd.f32 %v10283_v63, %v10530_v48  ;;  %v4194_v18 = vadd.f32 %v10285_v16, %v10533_v60  ;;  %v4196_v50 = vadd.f32 %v10295_v10, %v10536_v59  ;;  %v4197_v0 = vadd.f32 %v10315_v35, %v10539_v58 }
 0x140   : > { %13924 = vst [vmem:[#allocation50_spill] sm:$0xff] %v10545_v56  ;;  %13925 = vst [vmem:[#allocation51_spill] sm:$0xff] %v10548_v28  ;;  %v4312_v62 = vmul.f32 %v7907_v4, %v10218_v23  ;;  %v10564_v15 = vadd.f32 %v10319_v42, %v10545_v56  ;;  %v10568_v20 = vadd.f32 %v10321_v43, %v10548_v28  ;;  %v4146_v38 = vmul.f32 0.75, %v10369_v19  ;;  %v13943_v28 = vld [vmem:[#allocation28_spill] sm:$0xff] }
 0x141   : > { %13926 = vst [vmem:[#allocation52_spill] sm:$0xff] %v10551_v7  ;;  %v10572_v63 = vadd.f32 %v10327_v53, %v10551_v7  ;;  %vm4215_vm15 = vcmp.ge.f32.partialorder %v4195_v8, 1.25  ;;  %vm4214_vm0 = vcmp.ge.f32.partialorder %v4194_v18, 1.25  ;;  %vm4216_vm1 = vcmp.ge.f32.partialorder %v4196_v50, 1.25 }
 0x142   : > { %vm4217_vm2 = vcmp.ge.f32.partialorder %v4197_v0, 1.25  ;;  %v4313_v16 = vmul.f32 %v7908_v47, %v10218_v23  ;;  %v7910_v10 = vsel %vm4215_vm15, 1.0, %v13899_v39  ;;  %v7909_v35 = vsel %vm4214_vm0, 1.0, %v13899_v39  ;;  %v2008_v42 = vpop.f32.mrb[16].mxu0 }
 0x143   : > { %v10580_v43 = vadd.f32 %v7910_v10, %v10263_v51  ;;  %v4315_v53 = vmul.f32 %v7910_v10, %v10223_v26  ;;  %v10584_v13 = vadd.f32 %v7909_v35, %v10268_v54  ;;  %v4314_v17 = vmul.f32 %v7909_v35, %v10223_v26  ;;  %v2079_v41 = vpop.f32.mrb[16].mxu1  ;;  %v2010_v4 = vpop.f32.mrb[17].mxu0 }
 0x144   : > { %v10587_v47 = vsel %vm4215_vm15, 0.0, %v4195_v8  ;;  %v7911_v24 = vsel %vm4216_vm1, 1.0, %v13899_v39  ;;  %v7912_v19 = vsel %vm4217_vm2, 1.0, %v13899_v39  ;;  %v2081_v34 = vpop.f32.mrb[17].mxu1  ;;  %v10594_v51 = vmul.f32 0.75, %v10377_v40 }
 0x145   : > { %13927 = vst [vmem:[#allocation53_spill] sm:$0xff] %v10580_v43  ;;  %13928 = vst [vmem:[#allocation54_spill] sm:$0xff] %v10584_v13  ;;  %v4320_v49 = vadd.f32 %v4315_v53, %v4310_v6  ;;  %v4319_v10 = vadd.f32 %v4314_v17, %v4309_v21  ;;  %v10597_v54 = vadd.f32 %v7911_v24, %v10281_v61  ;;  %vm4219_vm3 = vcmp.ge.f32.partialorder %v10564_v15, 1.25  ;;  %v13931_v53 = vld [vmem:[#allocation13_spill] sm:$0xff] }
 0x146   : > { %v4316_v35 = vmul.f32 %v7911_v24, %v10223_v26  ;;  %v10601_v8 = vadd.f32 %v7912_v19, %v10298_v11  ;;  %v4317_v7 = vmul.f32 %v7912_v19, %v10223_v26  ;;  %vm4218_vm4 = vcmp.ge.f32.partialorder %v10568_v20, 1.25 }
 0x147   : > { %13929 = vst [vmem:[#allocation55_spill] sm:$0xff] %v10597_v54  ;;  %v10607_v13 = vsel %vm4214_vm0, 0.0, %v4194_v18  ;;  %v7914_v61 = vsel %vm4219_vm3, 1.0, %v13899_v39  ;;  %v7913_v21 = vsel %vm4218_vm4, 1.0, %v13899_v39  ;;  %v10616_v11 = vsel %vm4216_vm1, 0.0, %v4196_v50  ;;  %v13933_v18 = vld [vmem:[#allocation14_spill] sm:$0xff] }
 0x148   : > { %13930 = vst [vmem:[#allocation56_spill] sm:$0xff] %v10601_v8  ;;  %v4321_v40 = vadd.f32 %v4316_v35, %v4311_v14  ;;  %v4322_v6 = vadd.f32 %v4317_v7, %v4312_v62  ;;  %v10619_v17 = vadd.f32 %v7914_v61, %v13931_v53  ;;  %v4324_v24 = vmul.f32 %v7914_v61, %v10225_v27  ;;  %v13935_v35 = vld [vmem:[#allocation23_spill] sm:$0xff]  ;;  %v13937_v61 = vld [vmem:[#allocation25_spill] sm:$0xff] }
 0x149   : > { %v10623_v19 = vadd.f32 %v7913_v21, %v13933_v18  ;;  %v4318_v14 = vmul.f32 %v7913_v21, %v10223_v26  ;;  %vm4220_vm5 = vcmp.ge.f32.partialorder %v10572_v63, 1.25  ;;  %v10628_v8 = vadd.f32 %v13935_v35, %v2008_v42  ;;  %v2150_v54 = vpop.f32.mrb[18].mxu0  ;;  %v13941_v35 = vld [vmem:[#allocation20_spill] sm:$0xff] }
 0x14a   : > { %13932 = vst [vmem:[#allocation13_spill] sm:$0xff] %v10619_v17  ;;  %v10631_v50 = vsel %vm4217_vm2, 0.0, %v4197_v0  ;;  %v4329_v7 = vadd.f32 %v4324_v24, %v4319_v10  ;;  %v7915_v62 = vsel %vm4220_vm5, 1.0, %v13899_v39  ;;  %v10637_v53 = vadd.f32 %v13937_v61, %v2079_v41  ;;  %v2221_v18 = vpop.f32.mrb[18].mxu1  ;;  %v13939_v17 = vld [vmem:[#allocation15_spill] sm:$0xff]  ;;  %v13942_v10 = vld [vmem:[#allocation21_spill] sm:$0xff] }
 0x14b   : > { %13934 = vst [vmem:[#allocation14_spill] sm:$0xff] %v10623_v19  ;;  %13936 = vst [vmem:[#allocation23_spill] sm:$0xff] %v10631_v50  ;;  %v2152_v19 = vpop.f32.mrb[19].mxu0  ;;  %v4323_v21 = vadd.f32 %v4318_v14, %v4313_v16  ;;  %v10640_v26 = vadd.f32 %v7915_v62, %v13939_v17  ;;  %v4325_v42 = vmul.f32 %v7915_v62, %v10225_v27  ;;  %v2223_v43 = vpop.f32.mrb[19].mxu1  ;;  %v13945_v41 = vld [vmem:[#allocation29_spill] sm:$0xff]  ;;  %v13947_v50 = vld [vmem:[#allocation30_spill] sm:$0xff] }
 0x14c   : > { %13938 = vst [vmem:[#allocation25_spill] sm:$0xff] %v10637_v53  ;;  %v4201_v0 = vadd.f32 %v13941_v35, %v10628_v8  ;;  %v4203_v24 = vadd.f32 %v13942_v10, %v10637_v53  ;;  %v10648_v56 = vadd.f32 %v13943_v28, %v2010_v4  ;;  %v10651_v61 = vadd.f32 %v13945_v41, %v2081_v34  ;;  %v13950_v4 = vld [vmem:[#allocation22_spill] sm:$0xff] }
 0x14d   : > { %13940 = vst [vmem:[#allocation15_spill] sm:$0xff] %v10640_v26  ;;  %v10654_v16 = vadd.f32 %v13947_v50, %v2150_v54  ;;  %v4330_v17 = vadd.f32 %v4325_v42, %v4320_v49  ;;  %v10657_v14 = vadd.f32 %v10493_v57, %v2221_v18  ;;  %v10659_v62 = vadd.f32 %v4146_v38, %v2152_v19  ;;  %v13951_v57 = vld [vmem:[#allocation16_spill] sm:$0xff]  ;;  %v13953_v19 = vld [vmem:[#allocation17_spill] sm:$0xff] }
 0x14e   : > { %13944 = vst [vmem:[#allocation20_spill] sm:$0xff] %v10648_v56  ;;  %13946 = vst [vmem:[#allocation21_spill] sm:$0xff] %v10651_v61  ;;  %vm4221_vm6 = vcmp.ge.f32.partialorder %v4201_v0, 1.25  ;;  %v10664_v35 = vsel %vm4219_vm3, 0.0, %v10564_v15  ;;  %vm4223_vm8 = vcmp.ge.f32.partialorder %v4203_v24, 1.25  ;;  %v4202_v34 = vadd.f32 %v13950_v4, %v10648_v56  ;;  %v13955_v42 = vld [vmem:[#allocation24_spill] sm:$0xff] }
 0x14f   : > { %13948 = vst [vmem:[#allocation28_spill] sm:$0xff] %v10654_v16  ;;  %13949 = vst [vmem:[#allocation29_spill] sm:$0xff] %v10657_v14  ;;  %v7916_v28 = vsel %vm4221_vm6, 1.0, %v13899_v39  ;;  %v10673_v49 = vsel %vm4218_vm4, 0.0, %v10568_v20  ;;  %v7918_v15 = vsel %vm4223_vm8, 1.0, %v13899_v39  ;;  %v4204_v10 = vadd.f32 %v13955_v42, %v10651_v61  ;;  %v13957_v42 = vld [vmem:[#allocation18_spill] sm:$0xff] }
 0x150   : > { %v10676_v38 = vadd.f32 %v7916_v28, %v13951_v57  ;;  %v4326_v54 = vmul.f32 %v7916_v28, %v10225_v27  ;;  %v10682_v50 = vadd.f32 %v7918_v15, %v13953_v19  ;;  %v4328_v18 = vmul.f32 %v7918_v15, %v10225_v27  ;;  %v2292_v41 = vpop.f32.mrb[20].mxu0  ;;  %v13956_v57 = vld [vmem:[#allocation31_spill] sm:$0xff] }
 0x151   : > { %vm4222_vm9 = vcmp.ge.f32.partialorder %v4202_v34, 1.25  ;;  %v10690_v20 = vsel %vm4220_vm5, 0.0, %v10572_v63  ;;  %v4205_v19 = vadd.f32 %v13956_v57, %v10654_v16  ;;  %v10698_v15 = vpop.f32.mrb[21].mxu0  ;;  %vm4224_vm10 = vcmp.ge.f32.partialorder %v4204_v10, 1.25  ;;  %v13959_v57 = vld [vmem:[#allocation34_spill] sm:$0xff] }
 0x152   : > { %13952 = vst [vmem:[#allocation30_spill] sm:$0xff] %v10676_v38  ;;  %13954 = vst [vmem:[#allocation22_spill] sm:$0xff] %v10682_v50  ;;  %v4331_v4 = vadd.f32 %v4326_v54, %v4321_v40  ;;  %v7917_v28 = vsel %vm4222_vm9, 1.0, %v13899_v39  ;;  %v10696_v50 = vpop.f32.mrb[20].mxu1  ;;  %v10700_v38 = vadd.f32 %v4328_v18, %v4323_v21  ;;  %v10709_v40 = vsel %vm4221_vm6, 0.0, %v4201_v0  ;;  %v13960_v18 = vld [vmem:[#allocation19_spill] sm:$0xff] }
 0x153   : > { %v10703_v61 = vadd.f32 %v7917_v28, %v13957_v42  ;;  %v4327_v26 = vmul.f32 %v7917_v28, %v10225_v27  ;;  %v10706_v63 = vpop.f32.mrb[21].mxu1  ;;  %v7919_v54 = vsel %vm4224_vm10, 1.0, %v13899_v39  ;;  %vm4225_vm11 = vcmp.ge.f32.partialorder %v4205_v19, 1.25  ;;  %v13962_v0 = vld [vmem:[#allocation26_spill] sm:$0xff] }
 0x154   : > { %v4207_v16 = vadd.f32 %v13959_v57, %v10657_v14  ;;  %v10716_v56 = vadd.f32 %v7919_v54, %v13960_v18  ;;  %v4334_v42 = vmul.f32 %v7919_v54, %v10230_v30  ;;  %v7920_v28 = vsel %vm4225_vm11, 1.0, %v13899_v39 }
 0x155   : > { %13958 = vst [vmem:[#allocation16_spill] sm:$0xff] %v10703_v61  ;;  %v4332_v21 = vadd.f32 %v4327_v26, %v4322_v6  ;;  %v10722_v61 = vsel %vm4223_vm8, 0.0, %v4203_v24  ;;  %v10725_v53 = vadd.f32 %v7920_v28, %v13962_v0  ;;  %v4335_v27 = vmul.f32 %v7920_v28, %v10230_v30 }
 0x156   : > { %13961 = vst [vmem:[#allocation17_spill] sm:$0xff] %v10716_v56  ;;  %vm4227_vm12 = vcmp.ge.f32.partialorder %v4207_v16, 1.25  ;;  %v10729_v57 = vsel %vm4222_vm9, 0.0, %v4202_v34  ;;  %v4339_v26 = vadd.f32 %v4334_v42, %v4329_v7  ;;  %v4206_v54 = vadd.f32 %v10428_v45, %v10659_v62  ;;  %v13964_v56 = vld [vmem:[#allocation27_spill] sm:$0xff]  ;;  %v13966_v7 = vld [vmem:[#allocation32_spill] sm:$0xff] }
 0x157   : > { %13963 = vst [vmem:[#allocation24_spill] sm:$0xff] %v10725_v53  ;;  %v7922_v6 = vsel %vm4227_vm12, 1.0, %v13899_v39  ;;  %v4340_v18 = vadd.f32 %v4335_v27, %v4330_v17  ;;  %v10740_v53 = vadd.f32 %v10594_v51, %v2223_v43  ;;  %v10742_v28 = vpop.f32.mrb[22].mxu0  ;;  %v10745_v34 = vsel %vm4224_vm10, 0.0, %v4204_v10 }
 0x158   : > { %v10736_v24 = vadd.f32 %v7922_v6, %v13964_v56  ;;  %v4337_v0 = vmul.f32 %v7922_v6, %v10230_v30  ;;  %v10748_v42 = vadd.f32 %v13966_v7, %v4339_v26  ;;  %v10751_v14 = vsel %vm4225_vm11, 0.0, %v4205_v19  ;;  %v10753_v27 = vpop.f32.mrb[22].mxu1  ;;  %v10755_v45 = vpop.f32.mrb[23].mxu0  ;;  %v13967_v26 = vld [vmem:[#allocation36_spill] sm:$0xff]  ;;  %v13968_v6 = vld [vmem:[#allocation35_spill] sm:$0xff] }
 0x159   : > { %vm4226_vm13 = vcmp.ge.f32.partialorder %v4206_v54, 1.25  ;;  %v10758_v56 = vadd.f32 %v10423_v12, %v4340_v18  ;;  %v4555_v17 = vmul.f32 0.75, %v10432_v9  ;;  %v10763_v10 = vpop.f32.mrb[23].mxu1  ;;  %v4208_v12 = vadd.f32 %v10470_v3, %v10740_v53 }
 0x15a   : > { %13965 = vst [vmem:[#allocation31_spill] sm:$0xff] %v10736_v24  ;;  %v4342_v43 = vadd.f32 %v4337_v0, %v4332_v21  ;;  %v7921_v51 = vsel %vm4226_vm13, 1.0, %v13899_v39  ;;  %v4359_v19 = vadd.f32 %v13967_v26, %v10748_v42  ;;  %v10776_v18 = vsel %vm4227_vm12, 0.0, %v4207_v16 }
 0x15b   : > { %v10768_v7 = vadd.f32 %v7921_v51, %v13968_v6  ;;  %v4336_v24 = vmul.f32 %v7921_v51, %v10230_v30  ;;  %v4360_v21 = vadd.f32 %v10434_v55, %v10758_v56  ;;  %v10781_v0 = vadd.f32 %v4555_v17, %v2292_v41 }
 0x15c   : > { %v10779_v9 = vadd.f32 %v10437_v25, %v4342_v43  ;;  %vm4364_vm14 = vcmp.ge.f32.partialorder %v4359_v19, 1.25  ;;  %vm4228_vm15 = vcmp.ge.f32.partialorder %v4208_v12, 1.25  ;;  %v4595_v6 = vmul.f32 0.97, %v10502_v1 }
 0x15d   : > { %13969 = vst [vmem:[#allocation18_spill] sm:$0xff] %v10768_v7  ;;  %13970 = vst [vmem:[#allocation34_spill] sm:$0xff] %v10781_v0  ;;  %v4341_v26 = vadd.f32 %v4336_v24, %v4331_v4  ;;  %vm4365_vm0 = vcmp.ge.f32.partialorder %v4360_v21, 1.25  ;;  %v10789_v55 = vsel %vm4226_vm13, 0.0, %v4206_v54  ;;  %v4557_v16 = vmul.f32 0.75, %v10457_v2 }
 0x15e   : > { %v10786_v3 = vadd.f32 %v10439_v31, %v10779_v9  ;;  %v10794_v25 = vsel %vm4364_vm14, 1.0, %v13899_v39  ;;  %v10798_v41 = vsel %vm4365_vm0, 1.0, %v13899_v39  ;;  %v10805_v31 = vsel %vm4228_vm15, 1.0, %v13899_v39  ;;  %v10807_v4 = vpop.f32.mrb[24].mxu0 }
 0x15f   : > { %13972 = vst [vmem:[#allocation26_spill] sm:$0xff] %v10794_v25  ;;  %13973 = vst [vmem:[#allocation27_spill] sm:$0xff] %v10798_v41  ;;  %v10801_v1 = vadd.f32 %v10459_v29, %v4341_v26  ;;  %v4394_v2 = vcombine.low %v10794_v25, %v10798_v41  ;;  %v4464_v54 = vcombine.high %v10794_v25, %v10798_v41  ;;  %v4597_v24 = vmul.f32 0.97, %v10509_v52  ;;  %v10815_v43 = vpop.f32.mrb[24].mxu1  ;;  %v10817_v29 = vpop.f32.mrb[25].mxu0 }
 0x160   : > { %13971 = vst [vmem:[#allocation19_spill] sm:$0xff] %v10786_v3  ;;  %13974 = vst [vmem:[#allocation32_spill] sm:$0xff] %v10805_v31  ;;  %vm4367_vm1 = vcmp.ge.f32.partialorder %v10786_v3, 1.25  ;;  %v10820_v51 = vsel %vm4364_vm14, 0.0, %v4359_v19  ;;  %v4338_v26 = vmul.f32 %v10805_v31, %v10230_v30  ;;  %v4615_v41 = vadd.f32 %v4595_v6, %v10781_v0  ;;  %v10829_v25 = vpop.f32.mrb[25].mxu1 }
 0x161   : > { %v10824_v17 = vadd.f32 %v10481_v46, %v10801_v1  ;;  %v10832_v52 = vsel %vm4365_vm0, 0.0, %v4360_v21  ;;  %v10837_v7 = vsel %vm4367_vm1, 0.0, %v10786_v3  ;;  %v10840_v19 = vsel %vm4228_vm15, 0.0, %v4208_v12 }
 0x162   : > { %v10843_v46 = vadd.f32 %v4557_v16, %v10696_v50  ;;  %v4343_v6 = vadd.f32 %v4338_v26, %v10700_v38  ;;  %vm4635_vm3 = vcmp.ge.f32.partialorder %v4615_v41, 1.25  ;;  %v4556_v31 = vmul.f32 0.75, %v10465_v22  ;;  %v13981_v22 = vld [vmem:[#allocation48_spill] sm:$0xff] }
 0x163   : > { %13975 = vst [vmem:[#allocation36_spill] sm:$0xff] %v10824_v17  ;;  %vm4366_vm2 = vcmp.ge.f32.partialorder %v10824_v17, 1.25  ;;  %v10849_v21 = vrot.slane %v4394_v2, %v10236_v33  ;;  %v10852_v0 = vrot.slane %v4464_v54, %v10236_v33  ;;  %v7929_v3 = vsel %vm4635_vm3, 1.0, %v13899_v39  ;;  %v13982_v54 = vld [vmem:[#allocation43_spill] sm:$0xff]  ;;  %v13984_v33 = vld [vmem:[#allocation46_spill] sm:$0xff] }
 0x164   : > { %v4617_v12 = vadd.f32 %v4597_v24, %v10843_v46  ;;  %v10857_v50 = vadd.f32 %v10496_v5, %v4343_v6  ;;  %v10860_v16 = vadd.f32 %v7929_v3, %v10488_v36  ;;  %v10863_v38 = vadd.f32 %v4556_v31, %v10698_v15  ;;  %v13983_v24 = vld [vmem:[#allocation44_spill] sm:$0xff] }
 0x165   : > { %13976 = vst [vmem:[#allocation35_spill] sm:$0xff] %v10849_v21  ;;  %13977 = vst [vmem:[#allocation57_spill] sm:$0xff] %v10852_v0  ;;  %v4596_v26 = vmul.f32 0.97, %v13981_v22  ;;  %v10869_v2 = vsel %vm4366_vm2, 0.0, %v10824_v17  ;;  %v4558_v0 = vmul.f32 0.75, %v13982_v54 }
 0x166   : > { %13978 = vst [vmem:[#allocation58_spill] sm:$0xff] %v10857_v50  ;;  %13979 = vst [vmem:[#allocation59_spill] sm:$0xff] %v10860_v16  ;;  %vm4637_vm4 = vcmp.ge.f32.partialorder %v4617_v12, 1.25  ;;  %v4559_v21 = vmul.f32 0.75, %v13983_v24  ;;  %v10873_v5 = vpop.f32.mrb[26].mxu0  ;;  %v10875_v6 = vsel %vm4635_vm3, 0.0, %v4615_v41 }
 0x167   : > { %13980 = vst [vmem:[#allocation60_spill] sm:$0xff] %v10863_v38  ;;  %v7931_v36 = vsel %vm4637_vm4, 1.0, %v13899_v39  ;;  %v4616_v15 = vadd.f32 %v4596_v26, %v10863_v38  ;;  %v4598_v31 = vmul.f32 0.97, %v10521_v44  ;;  %v10881_v22 = vpop.f32.mrb[26].mxu1  ;;  %v10883_v17 = vpop.f32.mrb[27].mxu0  ;;  %v10889_v54 = vadd.f32 %v4558_v0, %v10706_v63 }
 0x168   : > { %v10886_v50 = vadd.f32 %v7931_v36, %v13984_v33  ;;  %v10892_v41 = vadd.f32 %v4559_v21, %v10742_v28  ;;  %v4599_v24 = vmul.f32 0.97, %v10542_v37  ;;  %v10895_v16 = vpop.f32.mrb[27].mxu1  ;;  %v4735_v26 = vmul.f32 %v7929_v3, %v10218_v23  ;;  %v13989_v21 = vld [vmem:[#allocation47_spill] sm:$0xff] }
 0x169   : > { %13986 = vst [vmem:[#allocation43_spill] sm:$0xff] %v10889_v54  ;;  %vm4636_vm5 = vcmp.ge.f32.partialorder %v4616_v15, 1.25  ;;  %v4561_v44 = vmul.f32 0.75, %v10530_v48  ;;  %v4560_v38 = vmul.f32 0.75, %v10533_v60  ;;  %v10901_v33 = vsel %vm4637_vm4, 0.0, %v4617_v12 }
 0x16a   : > { %13985 = vst [vmem:[#allocation48_spill] sm:$0xff] %v10886_v50  ;;  %13987 = vst [vmem:[#allocation44_spill] sm:$0xff] %v10892_v41  ;;  %v7930_v63 = vsel %vm4636_vm5, 1.0, %v13899_v39  ;;  %v4618_v0 = vadd.f32 %v4598_v31, %v10889_v54  ;;  %v4619_v28 = vadd.f32 %v4599_v24, %v10892_v41  ;;  %v4737_v37 = vmul.f32 %v7931_v36, %v10218_v23 }
 0x16b   : > { %13988 = vst [vmem:[#allocation46_spill] sm:$0xff] %v10901_v33  ;;  %v10908_v50 = vadd.f32 %v7930_v63, %v13989_v21  ;;  %v10911_v3 = vadd.f32 %v4561_v44, %v10753_v27  ;;  %v10914_v48 = vadd.f32 %v4560_v38, %v10755_v45  ;;  %v10916_v60 = vsel %vm4636_vm5, 0.0, %v4616_v15  ;;  %v13996_v44 = vld [vmem:[#allocation49_spill] sm:$0xff] }
 0x16c   : > { %13993 = vst [vmem:[#allocation63_spill] sm:$0xff] %v10916_v60  ;;  %vm4638_vm6 = vcmp.ge.f32.partialorder %v4618_v0, 1.25  ;;  %vm4639_vm8 = vcmp.ge.f32.partialorder %v4619_v28, 1.25  ;;  %v4601_v12 = vmul.f32 0.97, %v10587_v47  ;;  %v4562_v21 = vmul.f32 0.75, %v10536_v59 }
 0x16d   : > { %13990 = vst [vmem:[#allocation47_spill] sm:$0xff] %v10908_v50  ;;  %13991 = vst [vmem:[#allocation61_spill] sm:$0xff] %v10911_v3  ;;  %v7932_v31 = vsel %vm4638_vm6, 1.0, %v13899_v39  ;;  %v7933_v36 = vsel %vm4639_vm8, 1.0, %v13899_v39  ;;  %v4600_v24 = vmul.f32 0.97, %v10607_v13  ;;  %v4736_v45 = vmul.f32 %v7930_v63, %v10218_v23 }
 0x16e   : > { %13992 = vst [vmem:[#allocation62_spill] sm:$0xff] %v10914_v48  ;;  %v10924_v27 = vpop.f32.mrb[28].mxu0  ;;  %v10927_v38 = vsel %vm4638_vm6, 0.0, %v4618_v0  ;;  %v10930_v15 = vadd.f32 %v7932_v31, %v10524_v32  ;;  %v10933_v47 = vadd.f32 %v7933_v36, %v13996_v44  ;;  %v10935_v50 = vpop.f32.mrb[28].mxu1  ;;  %v4621_v13 = vadd.f32 %v4601_v12, %v10911_v3  ;;  %v14003_v3 = vld [vmem:[#allocation53_spill] sm:$0xff]  ;;  %v14006_v60 = vld [vmem:[#allocation54_spill] sm:$0xff] }
 0x16f   : > { %13994 = vst [vmem:[#allocation64_spill] sm:$0xff] %v10927_v38  ;;  %v10937_v41 = vpop.f32.mrb[29].mxu0  ;;  %v4620_v59 = vadd.f32 %v4600_v24, %v10914_v48  ;;  %v10942_v54 = vadd.f32 %v4562_v21, %v10763_v10  ;;  %v4602_v63 = vmul.f32 0.97, %v10616_v11  ;;  %v10945_v0 = vpop.f32.mrb[29].mxu1  ;;  %v4738_v32 = vmul.f32 %v7932_v31, %v10218_v23  ;;  %v14001_v24 = vld [vmem:[#allocation50_spill] sm:$0xff] }
 0x170   : > { %13995 = vst [vmem:[#allocation65_spill] sm:$0xff] %v10930_v15  ;;  %13997 = vst [vmem:[#allocation49_spill] sm:$0xff] %v10933_v47  ;;  %v10949_v44 = vsel %vm4639_vm8, 0.0, %v4619_v28  ;;  %v4563_v47 = vmul.f32 0.75, %v10539_v58  ;;  %v14000_v15 = vld [vmem:[#allocation23_spill] sm:$0xff]  ;;  %vm4641_vm9 = vcmp.ge.f32.partialorder %v4621_v13, 1.25 }
 0x171   : > { %13998 = vst [vmem:[#allocation66_spill] sm:$0xff] %v10942_v54  ;;  %13999 = vst [vmem:[#allocation67_spill] sm:$0xff] %v10949_v44  ;;  %v4603_v38 = vmul.f32 0.97, %v14000_v15  ;;  %vm4640_vm10 = vcmp.ge.f32.partialorder %v4620_v59, 1.25  ;;  %v4622_v12 = vadd.f32 %v4602_v63, %v10942_v54  ;;  %v4565_v10 = vmul.f32 0.75, %v14001_v24 }
 0x172   : > { %v7935_v11 = vsel %vm4641_vm9, 1.0, %v13899_v39  ;;  %v7934_v21 = vsel %vm4640_vm10, 1.0, %v13899_v39  ;;  %v4605_v31 = vmul.f32 0.97, %v10664_v35  ;;  %v14002_v28 = vld [vmem:[#allocation51_spill] sm:$0xff]  ;;  %v14005_v15 = vld [vmem:[#allocation10_spill] sm:$0xff]  ;;  %v10970_v24 = vadd.f32 %v4563_v47, %v10807_v4 }
 0x173   : > { %v4564_v48 = vmul.f32 0.75, %v14002_v28  ;;  %v10962_v58 = vadd.f32 %v7935_v11, %v14003_v3  ;;  %v4741_v44 = vmul.f32 %v7935_v11, %v14005_v15  ;;  %v10966_v33 = vadd.f32 %v7934_v21, %v14006_v60  ;;  %v10978_v28 = vpop.f32.mrb[30].mxu0  ;;  %v14011_v47 = vld [vmem:[#allocation55_spill] sm:$0xff] }
 0x174   : > { %v4740_v63 = vmul.f32 %v7934_v21, %v14005_v15  ;;  %vm4642_vm11 = vcmp.ge.f32.partialorder %v4622_v12, 1.25  ;;  %14008 = vst [vmem:[#allocation51_spill] sm:$0xff] %v10970_v24  ;;  %v10973_v54 = vadd.f32 %v4565_v10, %v10815_v43  ;;  %v4739_v3 = vmul.f32 %v7933_v36, %v10218_v23  ;;  %v10987_v4 = vpop.f32.mrb[31].mxu0 }
 0x175   : > { %14004 = vst [vmem:[#allocation23_spill] sm:$0xff] %v10962_v58  ;;  %14007 = vst [vmem:[#allocation50_spill] sm:$0xff] %v10966_v33  ;;  %v10976_v35 = vadd.f32 %v4564_v48, %v10817_v29  ;;  %v10981_v11 = vadd.f32 %v4741_v44, %v4736_v45  ;;  %v7936_v21 = vsel %vm4642_vm11, 1.0, %v13899_v39  ;;  %v10985_v33 = vpop.f32.mrb[30].mxu1  ;;  %v4623_v48 = vadd.f32 %v4603_v38, %v10970_v24 }
 0x176   : > { %14009 = vst [vmem:[#allocation53_spill] sm:$0xff] %v10973_v54  ;;  %v4745_v60 = vadd.f32 %v4740_v63, %v4735_v26  ;;  %v10990_v43 = vadd.f32 %v7936_v21, %v14011_v47  ;;  %v4742_v29 = vmul.f32 %v7936_v21, %v14005_v15  ;;  %v4625_v10 = vadd.f32 %v4605_v31, %v10973_v54  ;;  %v10995_v36 = vpop.f32.mrb[31].mxu1  ;;  %v14016_v63 = vld [vmem:[#allocation52_spill] sm:$0xff] }
 0x177   : > { %14010 = vst [vmem:[#allocation10_spill] sm:$0xff] %v10976_v35  ;;  %14013 = vst [vmem:[#allocation55_spill] sm:$0xff] %v10995_v36  ;;  %v10998_v26 = vsel %vm4641_vm9, 0.0, %v4621_v13  ;;  %v11001_v45 = vsel %vm4640_vm10, 0.0, %v4620_v59  ;;  %v4604_v44 = vmul.f32 0.97, %v10673_v49 }
 0x178   : > { %14012 = vst [vmem:[#allocation54_spill] sm:$0xff] %v10990_v43  ;;  %14014 = vst [vmem:[#allocation68_spill] sm:$0xff] %v10998_v26  ;;  %v4566_v58 = vmul.f32 0.75, %v14016_v63  ;;  %v4747_v47 = vadd.f32 %v4742_v29, %v4737_v37  ;;  %vm4643_vm12 = vcmp.ge.f32.partialorder %v4623_v48, 1.25  ;;  %vm4645_vm13 = vcmp.ge.f32.partialorder %v4625_v10, 1.25  ;;  %v14017_v43 = vld [vmem:[#allocation56_spill] sm:$0xff] }
 0x179   : > { %14015 = vst [vmem:[#allocation69_spill] sm:$0xff] %v11001_v45  ;;  %v4606_v21 = vmul.f32 0.97, %v10690_v20  ;;  %v7937_v38 = vsel %vm4643_vm12, 1.0, %v13899_v39  ;;  %v7939_v31 = vsel %vm4645_vm13, 1.0, %v13899_v39  ;;  %v4567_v13 = vmul.f32 0.75, %v10628_v8 }
 0x17a   : > { %v4607_v59 = vmul.f32 0.97, %v10709_v40  ;;  %v11013_v54 = vadd.f32 %v7937_v38, %v14017_v43  ;;  %v4743_v49 = vmul.f32 %v7937_v38, %v14005_v15  ;;  %v14019_v37 = vld [vmem:[#allocation13_spill] sm:$0xff]  ;;  %v14021_v63 = vld [vmem:[#allocation11_spill] sm:$0xff]  ;;  %v4624_v24 = vadd.f32 %v4604_v44, %v10976_v35  ;;  %v11028_v36 = vpop.f32.mrb[32].mxu0 }
 0x17b   : > { %v11017_v29 = vadd.f32 %v7939_v31, %v14019_v37  ;;  %v4750_v20 = vmul.f32 %v7939_v31, %v14021_v63  ;;  %v11022_v45 = vadd.f32 %v4566_v58, %v10829_v25  ;;  %v11025_v26 = vadd.f32 %v4567_v13, %v10873_v5  ;;  %v14024_v8 = vld [vmem:[#allocation25_spill] sm:$0xff]  ;;  %v11038_v44 = vpop.f32.mrb[33].mxu0 }
 0x17c   : > { %14018 = vst [vmem:[#allocation52_spill] sm:$0xff] %v11013_v54  ;;  %v4569_v40 = vmul.f32 0.75, %v14024_v8  ;;  %v11031_v43 = vsel %vm4642_vm11, 0.0, %v4622_v12  ;;  %v4748_v38 = vadd.f32 %v4743_v49, %v4738_v32  ;;  %v11036_v54 = vpop.f32.mrb[32].mxu1  ;;  %vm4644_vm14 = vcmp.ge.f32.partialorder %v4624_v24, 1.25  ;;  %v14035_v35 = vld [vmem:[#allocation21_spill] sm:$0xff] }
 0x17d   : > { %14020 = vst [vmem:[#allocation56_spill] sm:$0xff] %v11017_v29  ;;  %14022 = vst [vmem:[#allocation13_spill] sm:$0xff] %v11022_v45  ;;  %v11033_v37 = vadd.f32 %v4750_v20, %v4745_v60  ;;  %v14025_v29 = vld [vmem:[#allocation20_spill] sm:$0xff]  ;;  %v4626_v25 = vadd.f32 %v4606_v21, %v11022_v45  ;;  %v4627_v5 = vadd.f32 %v4607_v59, %v11025_v26  ;;  %v11045_v13 = vpop.f32.mrb[33].mxu1  ;;  %v11048_v32 = vsel %vm4643_vm12, 0.0, %v4623_v48  ;;  %v14029_v21 = vld [vmem:[#allocation14_spill] sm:$0xff] }
 0x17e   : > { %14023 = vst [vmem:[#allocation11_spill] sm:$0xff] %v11025_v26  ;;  %v4568_v31 = vmul.f32 0.75, %v14025_v29  ;;  %v11043_v58 = vadd.f32 %v4569_v40, %v10881_v22  ;;  %v11051_v12 = vsel %vm4645_vm13, 0.0, %v4625_v10  ;;  %v7938_v60 = vsel %vm4644_vm14, 1.0, %v13899_v39 }
 0x17f   : > { %14027 = vst [vmem:[#allocation20_spill] sm:$0xff] %v11051_v12  ;;  %v11059_v29 = vadd.f32 %v7938_v60, %v14029_v21  ;;  %v4744_v22 = vmul.f32 %v7938_v60, %v14005_v15  ;;  %vm4646_vm15 = vcmp.ge.f32.partialorder %v4626_v25, 1.25  ;;  %vm4647_vm0 = vcmp.ge.f32.partialorder %v4627_v5, 1.25  ;;  %v14033_v21 = vld [vmem:[#allocation30_spill] sm:$0xff] }
 0x180   : > { %14026 = vst [vmem:[#allocation25_spill] sm:$0xff] %v11043_v58  ;;  %v11056_v49 = vadd.f32 %v4568_v31, %v10883_v17  ;;  %v7940_v48 = vsel %vm4646_vm15, 1.0, %v13899_v39  ;;  %v7941_v10 = vsel %vm4647_vm0, 1.0, %v13899_v39  ;;  %v4609_v59 = vmul.f32 0.97, %v10722_v61  ;;  %v14031_v17 = vld [vmem:[#allocation15_spill] sm:$0xff] }
 0x181   : > { %14030 = vst [vmem:[#allocation14_spill] sm:$0xff] %v11059_v29  ;;  %v4608_v20 = vmul.f32 0.97, %v10729_v57  ;;  %v4749_v8 = vadd.f32 %v4744_v22, %v4739_v3  ;;  %v11069_v40 = vadd.f32 %v7940_v48, %v14031_v17  ;;  %v4751_v31 = vmul.f32 %v7940_v48, %v14021_v63  ;;  %v11079_v61 = vpop.f32.mrb[34].mxu0 }
 0x182   : > { %14028 = vst [vmem:[#allocation70_spill] sm:$0xff] %v11056_v49  ;;  %v11073_v60 = vadd.f32 %v7941_v10, %v14033_v21  ;;  %v4752_v29 = vmul.f32 %v7941_v10, %v14021_v63  ;;  %v4629_v26 = vadd.f32 %v4609_v59, %v11043_v58  ;;  %v4570_v12 = vmul.f32 0.75, %v14035_v35  ;;  %v11093_v10 = vpop.f32.mrb[34].mxu1  ;;  %v14040_v58 = vld [vmem:[#allocation28_spill] sm:$0xff] }
 0x183   : > { %14032 = vst [vmem:[#allocation15_spill] sm:$0xff] %v11069_v40  ;;  %v4628_v45 = vadd.f32 %v4608_v20, %v11056_v49  ;;  %v11082_v57 = vsel %vm4644_vm14, 0.0, %v4624_v24  ;;  %v11085_v3 = vsel %vm4646_vm15, 0.0, %v4626_v25  ;;  %v11088_v22 = vadd.f32 %v4751_v31, %v10981_v11  ;;  %v11100_v24 = vpop.f32.mrb[35].mxu0  ;;  %v11102_v20 = vpop.f32.mrb[35].mxu1 }
 0x184   : > { %14034 = vst [vmem:[#allocation30_spill] sm:$0xff] %v11073_v60  ;;  %v11091_v48 = vsel %vm4647_vm0, 0.0, %v4627_v5  ;;  %v11095_v59 = vadd.f32 %v4752_v29, %v4747_v47  ;;  %vm4649_vm3 = vcmp.ge.f32.partialorder %v4629_v26, 1.25  ;;  %v11098_v35 = vadd.f32 %v4570_v12, %v10895_v16  ;;  %v14037_v47 = vld [vmem:[#allocation22_spill] sm:$0xff]  ;;  %v14039_v16 = vld [vmem:[#allocation16_spill] sm:$0xff] }
 0x185   : > { %14036 = vst [vmem:[#allocation21_spill] sm:$0xff] %v11091_v48  ;;  %vm4648_vm4 = vcmp.ge.f32.partialorder %v4628_v45, 1.25  ;;  %v7943_v25 = vsel %vm4649_vm3, 1.0, %v13899_v39  ;;  %v4610_v5 = vmul.f32 0.97, %v10745_v34  ;;  %v4770_v17 = vmul.f32 0.75, %v10748_v42 }
 0x186   : > { %v7942_v11 = vsel %vm4648_vm4, 1.0, %v13899_v39  ;;  %v11110_v29 = vadd.f32 %v7943_v25, %v14037_v47  ;;  %v4754_v31 = vmul.f32 %v7943_v25, %v14021_v63  ;;  %v11117_v60 = vsel %vm4649_vm3, 0.0, %v4629_v26  ;;  %v14042_v25 = vld [vmem:[#allocation29_spill] sm:$0xff] }
 0x187   : > { %v11114_v12 = vadd.f32 %v7942_v11, %v14039_v16  ;;  %v4753_v21 = vmul.f32 %v7942_v11, %v14021_v63  ;;  %v4630_v40 = vadd.f32 %v4610_v5, %v11098_v35  ;;  %v4780_v49 = vmul.f32 0.97, %v10820_v51 }
 0x188   : > { %14038 = vst [vmem:[#allocation22_spill] sm:$0xff] %v11110_v29  ;;  %v4571_v34 = vmul.f32 0.75, %v14040_v58  ;;  %v11122_v48 = vadd.f32 %v4754_v31, %v4749_v8  ;;  %v11125_v42 = vsel %vm4648_vm4, 0.0, %v4628_v45  ;;  %v4573_v29 = vmul.f32 0.75, %v14042_v25  ;;  %v11133_v5 = vpop.f32.mrb[36].mxu0  ;;  %v14043_v31 = vld [vmem:[#allocation17_spill] sm:$0xff] }
 0x189   : > { %v4758_v47 = vadd.f32 %v4753_v21, %v4748_v38  ;;  %vm4650_vm5 = vcmp.ge.f32.partialorder %v4630_v40, 1.25  ;;  %v4611_v26 = vmul.f32 0.97, %v10751_v14  ;;  %v4781_v11 = vmul.f32 0.97, %v10832_v52  ;;  %v11142_v8 = vpop.f32.mrb[36].mxu1 }
 0x18a   : > { %14041 = vst [vmem:[#allocation16_spill] sm:$0xff] %v11122_v48  ;;  %v11129_v16 = vadd.f32 %v4571_v34, %v10924_v27  ;;  %v7944_v51 = vsel %vm4650_vm5, 1.0, %v13899_v39  ;;  %v4771_v58 = vmul.f32 0.75, %v10758_v56  ;;  %v11139_v45 = vadd.f32 %v4573_v29, %v10935_v50  ;;  %v11144_v27 = vpop.f32.mrb[37].mxu0  ;;  %v11152_v25 = vpop.f32.mrb[37].mxu1 }
 0x18b   : > { %v4613_v38 = vmul.f32 0.97, %v10776_v18  ;;  %v11147_v14 = vadd.f32 %v7944_v51, %v14043_v31  ;;  %v4760_v52 = vmul.f32 %v7944_v51, %v10230_v30  ;;  %v4572_v34 = vmul.f32 0.75, %v10659_v62 }
 0x18c   : > { %v4631_v21 = vadd.f32 %v4611_v26, %v11129_v16  ;;  %v11155_v56 = vsel %vm4650_vm5, 0.0, %v4630_v40  ;;  %v4773_v50 = vmul.f32 0.75, %v10779_v9  ;;  %v4783_v29 = vmul.f32 0.97, %v10837_v7  ;;  %v14045_v9 = vld [vmem:[#allocation24_spill] sm:$0xff] }
 0x18d   : > { %v4633_v18 = vadd.f32 %v4613_v38, %v11139_v45  ;;  %v4765_v31 = vadd.f32 %v4760_v52, %v11033_v37  ;;  %v11162_v51 = vadd.f32 %v4572_v34, %v10937_v41  ;;  %v4612_v26 = vmul.f32 0.97, %v10789_v55 }
 0x18e   : > { %vm4651_vm6 = vcmp.ge.f32.partialorder %v4631_v21, 1.25  ;;  %v4772_v40 = vmul.f32 0.75, %v10801_v1  ;;  %v4574_v38 = vmul.f32 0.75, %v10740_v53  ;;  %v4614_v53 = vmul.f32 0.97, %v10840_v19 }
 0x18f   : > { %14044 = vst [vmem:[#allocation28_spill] sm:$0xff] %v11162_v51  ;;  %v7945_v62 = vsel %vm4651_vm6, 1.0, %v13899_v39  ;;  %vm4653_vm8 = vcmp.ge.f32.partialorder %v4633_v18, 1.25  ;;  %v11169_v48 = vadd.f32 %v4770_v17, %v4765_v31  ;;  %v11182_v52 = vadd.f32 %v4612_v26, %v11162_v51  ;;  %v11188_v17 = vpop.f32.mrb[38].mxu0 }
 0x190   : > { %v11172_v7 = vadd.f32 %v7945_v62, %v14045_v9  ;;  %v4761_v37 = vmul.f32 %v7945_v62, %v10230_v30  ;;  %v11177_v41 = vsel %vm4653_vm8, 1.0, %v13899_v39  ;;  %v11185_v1 = vadd.f32 %v4574_v38, %v10945_v0  ;;  %v14049_v9 = vld [vmem:[#allocation34_spill] sm:$0xff]  ;;  %v11198_v26 = vpop.f32.mrb[39].mxu0 }
 0x191   : > { %14047 = vst [vmem:[#allocation17_spill] sm:$0xff] %v11177_v41  ;;  %v4763_v55 = vmul.f32 %v11177_v41, %v10230_v30  ;;  %v11191_v34 = vadd.f32 %v4780_v49, %v11169_v48  ;;  %v4782_v62 = vmul.f32 0.97, %v10869_v2  ;;  %v11196_v41 = vpop.f32.mrb[38].mxu1  ;;  %14050 = vst [vmem:[#allocation34_spill] sm:$0xff] %v11198_v26  ;;  %vm4652_vm9 = vcmp.ge.f32.partialorder %v11182_v52, 1.25 }
 0x192   : > { %14046 = vst [vmem:[#allocation29_spill] sm:$0xff] %v11172_v7  ;;  %14048 = vst [vmem:[#allocation24_spill] sm:$0xff] %v11185_v1  ;;  %v4766_v31 = vadd.f32 %v4761_v37, %v11088_v22  ;;  %v4981_v7 = vmul.f32 0.75, %v14049_v9  ;;  %v11202_v19 = vadd.f32 %v4614_v53, %v11185_v1  ;;  %v5021_v0 = vmul.f32 0.97, %v10875_v6  ;;  %v11205_v49 = vpop.f32.mrb[39].mxu1 }
 0x193   : > { %v4768_v51 = vadd.f32 %v4763_v55, %v4758_v47  ;;  %14051 = vst [vmem:[#allocation71_spill] sm:$0xff] %v11205_v49  ;;  %v7946_v2 = vsel %vm4652_vm9, 1.0, %v13899_v39  ;;  %v4983_v37 = vmul.f32 0.75, %v10843_v46  ;;  %v11215_v47 = vsel %vm4651_vm6, 0.0, %v4631_v21  ;;  %v14052_v53 = vld [vmem:[#allocation18_spill] sm:$0xff]  ;;  %v14060_v26 = vld [vmem:[#allocation64_spill] sm:$0xff] }
 0x194   : > { %v11207_v38 = vadd.f32 %v4771_v58, %v4766_v31  ;;  %v5001_v22 = vadd.f32 %v4981_v7, %v10978_v28  ;;  %v11220_v9 = vadd.f32 %v7946_v2, %v14052_v53  ;;  %v4762_v6 = vmul.f32 %v7946_v2, %v10230_v30  ;;  %v14057_v7 = vld [vmem:[#allocation60_spill] sm:$0xff]  ;;  %v14058_v2 = vld [vmem:[#allocation63_spill] sm:$0xff] }
 0x195   : > { %v11217_v55 = vadd.f32 %v4773_v50, %v4768_v51  ;;  %v11227_v31 = vsel %vm4653_vm8, 0.0, %v4633_v18  ;;  %v5003_v28 = vadd.f32 %v4983_v37, %v10985_v33  ;;  %v14056_v50 = vld [vmem:[#allocation46_spill] sm:$0xff]  ;;  %v4982_v53 = vmul.f32 0.75, %v14057_v7 }
 0x196   : > { %14053 = vst [vmem:[#allocation18_spill] sm:$0xff] %v11220_v9  ;;  %v11224_v58 = vadd.f32 %v4781_v11, %v11207_v38  ;;  %14054 = vst [vmem:[#allocation72_spill] sm:$0xff] %v11227_v31  ;;  %v5041_v49 = vadd.f32 %v5021_v0, %v5001_v22  ;;  %v4767_v21 = vadd.f32 %v4762_v6, %v11095_v59  ;;  %v5023_v51 = vmul.f32 0.97, %v14056_v50  ;;  %v14059_v11 = vld [vmem:[#allocation43_spill] sm:$0xff] }
 0x197   : > { %v11231_v46 = vadd.f32 %v4783_v29, %v11217_v55  ;;  %v5022_v9 = vmul.f32 0.97, %v14058_v2  ;;  %v4984_v1 = vmul.f32 0.75, %v14059_v11  ;;  %v5024_v18 = vmul.f32 0.97, %v14060_v26  ;;  %v14061_v22 = vld [vmem:[#allocation59_spill] sm:$0xff] }
 0x198   : > { %vm5061_vm10 = vcmp.ge.f32.partialorder %v5041_v49, 1.25  ;;  %v11239_v31 = vadd.f32 %v4772_v40, %v4767_v21  ;;  %v5043_v0 = vadd.f32 %v5023_v51, %v5003_v28  ;;  %v5002_v29 = vadd.f32 %v4982_v53, %v10987_v4  ;;  %v14062_v6 = vld [vmem:[#allocation55_spill] sm:$0xff]  ;;  %v14063_v49 = vld [vmem:[#allocation44_spill] sm:$0xff]  ;;  %v14065_v51 = vld [vmem:[#allocation61_spill] sm:$0xff] }
 0x199   : > { %14055 = vst [vmem:[#allocation73_spill] sm:$0xff] %v11231_v46  ;;  %v7954_v33 = vsel %vm5061_vm10, 1.0, %v13899_v39  ;;  %v5004_v50 = vadd.f32 %v4984_v1, %v14062_v6  ;;  %v4985_v7 = vmul.f32 0.75, %v14063_v49  ;;  %v14064_v40 = vld [vmem:[#allocation67_spill] sm:$0xff]  ;;  %v4987_v53 = vmul.f32 0.75, %v14065_v51  ;;  %v14067_v6 = vld [vmem:[#allocation68_spill] sm:$0xff] }
 0x19a   : > { %v5121_v59 = vadd.f32 %v7954_v33, %v14061_v22  ;;  %v5141_v37 = vmul.f32 %v7954_v33, %v10218_v23  ;;  %v11248_v2 = vadd.f32 %v4782_v62, %v11239_v31  ;;  %vm5063_vm11 = vcmp.ge.f32.partialorder %v5043_v0, 1.25  ;;  %v14066_v22 = vld [vmem:[#allocation48_spill] sm:$0xff]  ;;  %v14070_v51 = vld [vmem:[#allocation65_spill] sm:$0xff] }
 0x19b   : > { %v5042_v26 = vadd.f32 %v5022_v9, %v5002_v29  ;;  %v5025_v21 = vmul.f32 0.97, %v14064_v40  ;;  %v7956_v11 = vsel %vm5063_vm11, 1.0, %v13899_v39  ;;  %v5044_v28 = vadd.f32 %v5024_v18, %v5004_v50  ;;  %v14068_v29 = vld [vmem:[#allocation47_spill] sm:$0xff]  ;;  %v14069_v50 = vld [vmem:[#allocation62_spill] sm:$0xff] }
 0x19c   : > { %v5005_v4 = vadd.f32 %v4985_v7, %v11028_v36  ;;  %v5123_v33 = vadd.f32 %v7956_v11, %v14066_v22  ;;  %v5143_v1 = vmul.f32 %v7956_v11, %v10218_v23  ;;  %v5027_v49 = vmul.f32 0.97, %v14067_v6 }
 0x19d   : > { %vm5062_vm12 = vcmp.ge.f32.partialorder %v5042_v26, 1.25  ;;  %vm5064_vm13 = vcmp.ge.f32.partialorder %v5044_v28, 1.25  ;;  %v5007_v0 = vadd.f32 %v4987_v53, %v11036_v54  ;;  %v4986_v7 = vmul.f32 0.75, %v14069_v50  ;;  %v14071_v54 = vld [vmem:[#allocation69_spill] sm:$0xff]  ;;  %v14073_v50 = vld [vmem:[#allocation66_spill] sm:$0xff] }
 0x19e   : > { %v7955_v62 = vsel %vm5062_vm12, 1.0, %v13899_v39  ;;  %v5045_v9 = vadd.f32 %v5025_v21, %v5005_v4  ;;  %v7957_v36 = vsel %vm5064_vm13, 1.0, %v13899_v39  ;;  %v5026_v4 = vmul.f32 0.97, %v14071_v54  ;;  %v14072_v53 = vld [vmem:[#allocation49_spill] sm:$0xff] }
 0x19f   : > { %v5122_v40 = vadd.f32 %v7955_v62, %v14068_v29  ;;  %v5142_v18 = vmul.f32 %v7955_v62, %v10218_v23  ;;  %v5124_v22 = vadd.f32 %v7957_v36, %v14070_v51  ;;  %v5144_v26 = vmul.f32 %v7957_v36, %v10218_v23 }
 0x1a0   : > { %vm5065_vm14 = vcmp.ge.f32.partialorder %v5045_v9, 1.25  ;;  %v5047_v11 = vadd.f32 %v5027_v49, %v5007_v0  ;;  %v5006_v21 = vadd.f32 %v4986_v7, %v11038_v44  ;;  %v4988_v46 = vmul.f32 0.75, %v14073_v50  ;;  %v14074_v49 = vld [vmem:[#allocation23_spill] sm:$0xff]  ;;  %v14077_v50 = vld [vmem:[#allocation50_spill] sm:$0xff] }
 0x1a1   : > { %v7526_v6 = vadd.f32 %v5122_v40, %v5121_v59  ;;  %v7958_v28 = vsel %vm5065_vm14, 1.0, %v13899_v39  ;;  %v5028_v59 = vmul.f32 0.97, %v11031_v43  ;;  %v14075_v7 = vld [vmem:[#allocation51_spill] sm:$0xff]  ;;  %vm4654_vm8 = vcmp.ge.f32.partialorder %v11202_v19, 1.25 }
 0x1a2   : > { %v5125_v29 = vadd.f32 %v7958_v28, %v14072_v53  ;;  %v11270_v62 = vmul.f32 %v7958_v28, %v10218_v23  ;;  %vm5067_vm15 = vcmp.ge.f32.partialorder %v5047_v11, 1.25  ;;  %v5046_v9 = vadd.f32 %v5026_v4, %v5006_v21  ;;  %v14076_v11 = vld [vmem:[#allocation53_spill] sm:$0xff] }
 0x1a3   : > { %v7527_v51 = vadd.f32 %v7526_v6, %v5123_v33  ;;  %v7960_v36 = vsel %vm5067_vm15, 1.0, %v13899_v39  ;;  %v5008_v40 = vadd.f32 %v4988_v46, %v11045_v13  ;;  %v4989_v54 = vmul.f32 0.75, %v14075_v7 }
 0x1a4   : > { %v5127_v0 = vadd.f32 %v7960_v36, %v14074_v49  ;;  %v5147_v44 = vmul.f32 %v7960_v36, %v14005_v15  ;;  %vm5066_vm0 = vcmp.ge.f32.partialorder %v5046_v9, 1.25  ;;  %v5029_v23 = vmul.f32 0.97, %v11048_v32  ;;  %v14079_v9 = vld [vmem:[#allocation10_spill] sm:$0xff] }
 0x1a5   : > { %v7528_v53 = vadd.f32 %v7527_v51, %v5124_v22  ;;  %v4991_v28 = vmul.f32 0.75, %v14076_v11  ;;  %v7959_v6 = vsel %vm5066_vm0, 1.0, %v13899_v39  ;;  %v5048_v21 = vadd.f32 %v5028_v59, %v5008_v40  ;;  %v14078_v51 = vld [vmem:[#allocation20_spill] sm:$0xff]  ;;  %v14081_v11 = vld [vmem:[#allocation13_spill] sm:$0xff] }
 0x1a6   : > { %v11281_v33 = vadd.f32 %v5147_v44, %v5142_v18  ;;  %v5009_v43 = vadd.f32 %v4989_v54, %v11079_v61  ;;  %v5126_v36 = vadd.f32 %v7959_v6, %v14077_v50  ;;  %v5146_v13 = vmul.f32 %v7959_v6, %v14005_v15  ;;  %v14080_v61 = vld [vmem:[#allocation54_spill] sm:$0xff] }
 0x1a7   : > { %v7529_v4 = vadd.f32 %v7528_v53, %v5125_v29  ;;  %v5011_v46 = vadd.f32 %v4991_v28, %v11093_v10  ;;  %vm5068_vm3 = vcmp.ge.f32.partialorder %v5048_v21, 1.25  ;;  %v5031_v32 = vmul.f32 0.97, %v14078_v51 }
 0x1a8   : > { %v5049_v22 = vadd.f32 %v5029_v23, %v5009_v43  ;;  %v4990_v49 = vmul.f32 0.75, %v14079_v9  ;;  %v5151_v18 = vadd.f32 %v5146_v13, %v5141_v37  ;;  %v7961_v7 = vsel %vm5068_vm3, 1.0, %v13899_v39  ;;  %v14082_v37 = vld [vmem:[#allocation52_spill] sm:$0xff]  ;;  %v14085_v9 = vld [vmem:[#allocation21_spill] sm:$0xff] }
 0x1a9   : > { %v7530_v44 = vadd.f32 %v7529_v4, %v5126_v36  ;;  %v5030_v59 = vmul.f32 0.97, %v11082_v57  ;;  %v5128_v29 = vadd.f32 %v7961_v7, %v14080_v61  ;;  %v5148_v40 = vmul.f32 %v7961_v7, %v14005_v15  ;;  %v14087_v61 = vld [vmem:[#allocation14_spill] sm:$0xff] }
 0x1aa   : > { %vm5069_vm4 = vcmp.ge.f32.partialorder %v5049_v22, 1.25  ;;  %v5051_v54 = vadd.f32 %v5031_v32, %v5011_v46  ;;  %v5010_v23 = vadd.f32 %v4990_v49, %v11100_v24  ;;  %v4992_v28 = vmul.f32 0.75, %v14081_v11 }
 0x1ab   : > { %v7531_v53 = vadd.f32 %v7530_v44, %v5127_v0  ;;  %v7962_v10 = vsel %vm5069_vm4, 1.0, %v13899_v39  ;;  %v5153_v6 = vadd.f32 %v5148_v40, %v5143_v1  ;;  %v14083_v0 = vld [vmem:[#allocation56_spill] sm:$0xff]  ;;  %v5032_v24 = vmul.f32 0.97, %v11085_v3  ;;  %v14084_v1 = vld [vmem:[#allocation11_spill] sm:$0xff] }
 0x1ac   : > { %v5129_v21 = vadd.f32 %v7962_v10, %v14082_v37  ;;  %v5149_v43 = vmul.f32 %v7962_v10, %v14005_v15  ;;  %vm5071_vm5 = vcmp.ge.f32.partialorder %v5051_v54, 1.25  ;;  %v5050_v50 = vadd.f32 %v5030_v59, %v5010_v23  ;;  %v14088_v10 = vld [vmem:[#allocation70_spill] sm:$0xff] }
 0x1ad   : > { %v7532_v57 = vadd.f32 %v7531_v53, %v5128_v29  ;;  %v7964_v4 = vsel %vm5071_vm5, 1.0, %v13899_v39  ;;  %v5012_v36 = vadd.f32 %v4992_v28, %v11102_v20  ;;  %v4993_v32 = vmul.f32 0.75, %v14084_v1 }
 0x1ae   : > { %v5154_v13 = vadd.f32 %v5149_v43, %v5144_v26  ;;  %v5131_v46 = vadd.f32 %v7964_v4, %v14083_v0  ;;  %v5156_v22 = vmul.f32 %v7964_v4, %v14021_v63  ;;  %vm5070_vm6 = vcmp.ge.f32.partialorder %v5050_v50, 1.25  ;;  %v14086_v26 = vld [vmem:[#allocation25_spill] sm:$0xff]  ;;  %v14089_v43 = vld [vmem:[#allocation15_spill] sm:$0xff]  ;;  %v14090_v0 = vld [vmem:[#allocation30_spill] sm:$0xff] }
 0x1af   : > { %v7533_v51 = vadd.f32 %v7532_v57, %v5129_v21  ;;  %v5033_v49 = vmul.f32 0.97, %v14085_v9  ;;  %v7963_v7 = vsel %vm5070_vm6, 1.0, %v13899_v39  ;;  %v5052_v20 = vadd.f32 %v5032_v24, %v5012_v36 }
 0x1b0   : > { %v11307_v44 = vadd.f32 %v5156_v22, %v5151_v18  ;;  %v4995_v59 = vmul.f32 0.75, %v14086_v26  ;;  %v5130_v29 = vadd.f32 %v7963_v7, %v14087_v61  ;;  %v5150_v40 = vmul.f32 %v7963_v7, %v14005_v15 }
 0x1b1   : > { %v5013_v3 = vadd.f32 %v4993_v32, %v11133_v5  ;;  %v5035_v54 = vmul.f32 0.97, %v11117_v60  ;;  %vm5072_vm10 = vcmp.ge.f32.partialorder %v5052_v20, 1.25  ;;  %v4994_v23 = vmul.f32 0.75, %v14088_v10 }
 0x1b2   : > { %v5015_v53 = vadd.f32 %v4995_v59, %v11142_v8  ;;  %v5034_v18 = vmul.f32 0.97, %v11125_v42  ;;  %v5155_v11 = vadd.f32 %v5150_v40, %v11270_v62  ;;  %v7534_v28 = vadd.f32 %v7533_v51, %v5130_v29 }
 0x1b3   : > { %v7965_v37 = vsel %vm5072_vm10, 1.0, %v13899_v39  ;;  %v5053_v21 = vadd.f32 %v5033_v49, %v5013_v3  ;;  %v5014_v60 = vadd.f32 %v4994_v23, %v11144_v27  ;;  %vm4790_vm12 = vcmp.ge.f32.partialorder %v11191_v34, 1.25 }
 0x1b4   : > { %v5132_v57 = vadd.f32 %v7965_v37, %v14089_v43  ;;  %v5157_v15 = vmul.f32 %v7965_v37, %v14021_v63  ;;  %v5055_v5 = vadd.f32 %v5035_v54, %v5015_v53  ;;  %v7535_v4 = vadd.f32 %v7534_v28, %v5131_v46  ;;  %v14091_v46 = vld [vmem:[#allocation22_spill] sm:$0xff]  ;;  %v14093_v37 = vld [vmem:[#allocation28_spill] sm:$0xff] }
 0x1b5   : > { %vm5073_vm11 = vcmp.ge.f32.partialorder %v5053_v21, 1.25  ;;  %v4996_v8 = vmul.f32 0.75, %v11098_v35  ;;  %v5054_v50 = vadd.f32 %v5034_v18, %v5014_v60  ;;  %v4805_v35 = vsel %vm4790_vm12, 0.0, %v11191_v34  ;;  %v14094_v60 = vld [vmem:[#allocation29_spill] sm:$0xff] }
 0x1b6   : > { %v11326_v42 = vadd.f32 %v5157_v15, %v11281_v33  ;;  %v7966_v62 = vsel %vm5073_vm11, 1.0, %v13899_v39  ;;  %vm5075_vm13 = vcmp.ge.f32.partialorder %v5055_v5, 1.25  ;;  %v7536_v36 = vadd.f32 %v7535_v4, %v5132_v57  ;;  %v5430_v5 = vld [vmem:[%s13811_s3 + $0x180] sm:$0xff] }
 0x1b7   : > { %v5133_v22 = vadd.f32 %v7966_v62, %v14090_v0  ;;  %v5158_v24 = vmul.f32 %v7966_v62, %v14021_v63  ;;  %v7968_v27 = vsel %vm5075_vm13, 1.0, %v13899_v39  ;;  %vm5074_vm14 = vcmp.ge.f32.partialorder %v5054_v50, 1.25  ;;  %v5382_v0 = vld [vmem:[%s13811_s3] sm:$0xff] }
 0x1b8   : > { %v5135_v51 = vadd.f32 %v7968_v27, %v14091_v46  ;;  %v5160_v1 = vmul.f32 %v7968_v27, %v14021_v63  ;;  %v7967_v9 = vsel %vm5074_vm14, 1.0, %v13899_v39  ;;  %v5016_v49 = vadd.f32 %v4996_v8, %v11152_v25  ;;  %v14095_v8 = vld [vmem:[#allocation34_spill] sm:$0xff]  ;;  %v14096_v27 = vld [vmem:[#allocation24_spill] sm:$0xff] }
 0x1b9   : > { %v11337_v33 = vadd.f32 %v5158_v24, %v5153_v6  ;;  %v7537_v32 = vadd.f32 %v7536_v36, %v5133_v22  ;;  %v5134_v20 = vadd.f32 %v7967_v9, %v11114_v12  ;;  %v5159_v26 = vmul.f32 %v7967_v9, %v14021_v63  ;;  %v5431_v36 = vld [vmem:[%s13811_s3 + $0x188] sm:$0xff] }
 0x1ba   : > { %v11341_v7 = vadd.f32 %v5160_v1, %v5155_v11  ;;  %v5036_v59 = vmul.f32 0.97, %v11155_v56  ;;  %v4712_v61 = vsel %vm4652_vm9, 0.0, %v11182_v52  ;;  %v4714_v6 = vsel %vm4654_vm8, 0.0, %v11202_v19  ;;  %v5383_v22 = vld [vmem:[%s13811_s3 + $0x8] sm:$0xff]  ;;  %v5414_v1 = vld [vmem:[%s13811_s3 + $0x100] sm:$0xff] }
 0x1bb   : > { %vm4791_vm15 = vcmp.ge.f32.partialorder %v11224_v58, 1.25  ;;  %v4997_v25 = vmul.f32 0.75, %v11129_v16  ;;  %v11354_v29 = vadd.f32 %v5159_v26, %v5154_v13  ;;  %v7538_v40 = vadd.f32 %v7537_v32, %v5134_v20  ;;  %v5400_v26 = vld [vmem:[%s13811_s3 + $0x90] sm:$0xff]  ;;  %v11561_v19 = vld [vmem:[%s13811_s3 + $0x48] sm:$0xff] }
 0x1bc   : > { %v5056_v12 = vadd.f32 %v5036_v59, %v5016_v49  ;;  %v4806_v63 = vsel %vm4791_vm15, 0.0, %v11224_v58  ;;  %v5176_v56 = vmul.f32 0.75, %v11169_v48  ;;  %v5186_v3 = vmul.f32 0.97, %v4805_v35  ;;  %v5415_v35 = vld [vmem:[%s13811_s3 + $0x108] sm:$0xff]  ;;  %v5401_v59 = vld [vmem:[%s13811_s3 + $0x98] sm:$0xff] }
 0x1bd   : > { %v5017_v52 = vadd.f32 %v4997_v25, %v11188_v17  ;;  %v5037_v54 = vmul.f32 0.97, %v11215_v47  ;;  %v7539_v53 = vadd.f32 %v7538_v40, %v5135_v51  ;;  %v5177_v10 = vmul.f32 0.75, %v11207_v38  ;;  %v14092_v47 = vld [vmem:[#allocation72_spill] sm:$0xff]  ;;  %v14097_v40 = vld [vmem:[#allocation71_spill] sm:$0xff]  ;;  %v14122_v58 = vld [vmem:[#allocation57_spill] sm:$0xff] }
 0x1be   : > { %vm5076_vm9 = vcmp.ge.f32.partialorder %v5056_v12, 1.25  ;;  %v4999_v16 = vmul.f32 0.75, %v11139_v45  ;;  %v11365_v18 = vmul.f32 0.97, %v4806_v63  ;;  %vm4792_vm0 = vcmp.ge.f32.partialorder %v11248_v2, 1.25 }
 0x1bf   : > { %v7969_v13 = vsel %vm5076_vm9, 1.0, %v13899_v39  ;;  %v5057_v23 = vadd.f32 %v5037_v54, %v5017_v52  ;;  %v5039_v28 = vmul.f32 0.97, %v14092_v47  ;;  %v11373_v38 = vmul.f32 0.75, %v11217_v55  ;;  %v5399_v55 = vld [vmem:[%s13811_s3 + $0x88] sm:$0xff]  ;;  %v5385_v52 = vld [vmem:[%s13811_s3 + $0x18] sm:$0xff] }
 0x1c0   : > { %v5136_v48 = vadd.f32 %v7969_v13, %v11147_v14  ;;  %v5166_v11 = vmul.f32 %v7969_v13, %v10230_v30  ;;  %v5019_v17 = vadd.f32 %v4999_v16, %v11196_v41  ;;  %v4807_v45 = vsel %vm4792_vm0, 0.0, %v11248_v2  ;;  %v5398_v41 = vld [vmem:[%s13811_s3 + $0x80] sm:$0xff]  ;;  %v5416_v54 = vld [vmem:[%s13811_s3 + $0x110] sm:$0xff]  ;;  %v11466_v47 = vld [vmem:[%s13811_s3 + $0x28] sm:$0xff] }
 0x1c1   : > { %vm5077_vm3 = vcmp.ge.f32.partialorder %v5057_v23, 1.25  ;;  %v4998_v21 = vmul.f32 0.75, %v14093_v37  ;;  %v5038_v50 = vmul.f32 0.97, %v4712_v61  ;;  %v5000_v46 = vmul.f32 0.75, %v14096_v27  ;;  %v5432_v61 = vld [vmem:[%s13811_s3 + $0x190] sm:$0xff] }
 0x1c2   : > { %v5171_v43 = vadd.f32 %v5166_v11, %v11307_v44  ;;  %v11380_v57 = vadd.f32 %v7539_v53, %v5136_v48  ;;  %v7970_v14 = vsel %vm5077_vm3, 1.0, %v13899_v39  ;;  %v5059_v15 = vadd.f32 %v5039_v28, %v5019_v17  ;;  %v5402_v23 = vld [vmem:[%s13811_s3 + $0xa0] sm:$0xff]  ;;  %v5403_v48 = vld [vmem:[%s13811_s3 + $0xa8] sm:$0xff] }
 0x1c3   : > { %v11393_v4 = vadd.f32 %v7970_v14, %v14094_v60  ;;  %v5167_v44 = vmul.f32 %v7970_v14, %v10230_v30  ;;  %v5018_v62 = vadd.f32 %v4998_v21, %v14095_v8  ;;  %v5040_v51 = vmul.f32 0.97, %v4714_v6  ;;  %v5434_v11 = vld [vmem:[%s13811_s3 + $0x1a0] sm:$0xff]  ;;  %v11501_v8 = vld [vmem:[%s13811_s3 + $0x1b0] sm:$0xff] }
 0x1c4   : > { %v5181_v24 = vadd.f32 %v5176_v56, %v5171_v43  ;;  %vm5079_vm4 = vcmp.ge.f32.partialorder %v5059_v15, 1.25  ;;  %v8847_v20 = vpack.c.bf16 %v5399_v55, %v5398_v41  ;;  %v5020_v12 = vadd.f32 %v5000_v46, %v14097_v40  ;;  %v5384_v56 = vld [vmem:[%s13811_s3 + $0x10] sm:$0xff]  ;;  %v11461_v17 = vld [vmem:[%s13811_s3 + $0x20] sm:$0xff]  ;;  %v11479_v15 = vld [vmem:[%s13811_s3 + $0x128] sm:$0xff] }
 0x1c5   : > { %v5172_v32 = vadd.f32 %v5167_v44, %v11326_v42  ;;  %v11415_v9 = vsel %vm5079_vm4, 1.0, %v13899_v39  ;;  %v5058_v49 = vadd.f32 %v5038_v50, %v5018_v62  ;;  %v5433_v42 = vld [vmem:[%s13811_s3 + $0x198] sm:$0xff]  ;;  %v8879_v63 = vpack.c.bf16 %v5431_v36, %v5430_v5  ;;  %v11474_v14 = vld [vmem:[%s13811_s3 + $0x120] sm:$0xff]  ;;  %v14098_v55 = vld [vmem:[#allocation18_spill] sm:$0xff] }
 0x1c6   : > { %v11429_v6 = vadd.f32 %v5186_v3, %v5181_v24  ;;  %v5169_v25 = vmul.f32 %v11415_v9, %v10230_v30  ;;  %v5417_v3 = vld [vmem:[%s13811_s3 + $0x118] sm:$0xff]  ;;  %8848 = vmatprep.subr.bf16.mxu0 %v8847_v20  ;;  %v8849_v16 = vpack.c.bf16 %v5383_v22, %v5382_v0  ;;  %v8881_v13 = vpack.c.bf16 %v5415_v35, %v5414_v1  ;;  %v11522_v22 = vld [vmem:[%s13811_s3 + $0x130] sm:$0xff]  ;;  %v11538_v1 = vld [vmem:[%s13811_s3 + $0xc8] sm:$0xff] }
 0x1c7   : > { %v5182_v53 = vadd.f32 %v5177_v10, %v5172_v32  ;;  %vm5078_vm5 = vcmp.ge.f32.partialorder %v5058_v49, 1.25  ;;  %v5435_v10 = vld [vmem:[%s13811_s3 + $0x1a8] sm:$0xff]  ;;  %v5178_v21 = vmul.f32 0.75, %v11239_v31  ;;  %v5060_v43 = vadd.f32 %v5040_v51, %v5020_v12  ;;  %8880 = vmatprep.subr.bf16.mxu1 %v8879_v63  ;;  %v11489_v31 = vld [vmem:[%s13811_s3 + $0xb8] sm:$0xff]  ;;  %v11533_v51 = vld [vmem:[%s13811_s3 + $0xc0] sm:$0xff] }
 0x1c8   : > { %v5174_v28 = vadd.f32 %v5169_v25, %v11354_v29  ;;  %v7971_v37 = vsel %vm5078_vm5, 1.0, %v13899_v39  ;;  %v11484_v29 = vld [vmem:[%s13811_s3 + $0xb0] sm:$0xff]  ;;  %v5188_v44 = vmul.f32 0.97, %v4807_v45  ;;  %8850 = vmatpush3.bf16.msra.mxu0 %v8849_v16  ;;  %8882 = vmatpush3.bf16.msra.mxu1 %v8881_v13  ;;  %v5437_v62 = vld [vmem:[%s13811_s3 + $0x1b8] sm:$0xff]  ;;  %v8851_v45 = vpack.c.bf16 %v5401_v59, %v5400_v26  ;;  %v11543_v35 = vld [vmem:[%s13811_s3 + $0x1c0] sm:$0xff] }
 0x1c9   : > { %v11492_v41 = vadd.f32 %v11365_v18, %v5182_v53  ;;  %v11495_v5 = vadd.f32 %v7971_v37, %v14098_v55  ;;  %v5168_v60 = vmul.f32 %v7971_v37, %v10230_v30  ;;  %v11509_v18 = vld [vmem:[%s13811_s3 + $0x30] sm:$0xff]  ;;  %vm5080_vm6 = vcmp.ge.f32.partialorder %v5060_v43, 1.25  ;;  %v11517_v0 = vld [vmem:[%s13811_s3 + $0x38] sm:$0xff]  ;;  %v5439_v26 = vld [vmem:[%s13811_s3 + $0x1c8] sm:$0xff] }
 0x1ca   : > { %v11512_v50 = vadd.f32 %v11373_v38, %v5174_v28  ;;  %v8883_v36 = vpack.c.bf16 %v5433_v42, %v5432_v61  ;;  %v11527_v24 = vld [vmem:[%s13811_s3 + $0x138] sm:$0xff]  ;;  %v8853_v27 = vpack.c.bf16 %v5385_v52, %v5384_v56  ;;  %v8885_v46 = vpack.c.bf16 %v5417_v3, %v5416_v54  ;;  %8852 = vmatprep.subr.bf16.mxu0 %v8851_v45  ;;  %v11556_v59 = vld [vmem:[%s13811_s3 + $0x40] sm:$0xff]  ;;  %v14099_v61 = vld [vmem:[#allocation58_spill] sm:$0xff] }
 0x1cb   : > { %v5173_v38 = vadd.f32 %v5168_v60, %v11337_v33  ;;  %v7948_v33 = vsel %vm4654_vm8, 1.0, %v13899_v39  ;;  %v8855_v32 = vpack.c.bf16 %v5403_v48, %v5402_v23  ;;  %v8887_v49 = vpack.c.bf16 %v5435_v10, %v5434_v11  ;;  %v11571_v63 = vld [vmem:[%s13811_s3 + $0x140] sm:$0xff]  ;;  %v11576_v56 = vld [vmem:[%s13811_s3 + $0x148] sm:$0xff]  ;;  %v11588_v16 = vld [vmem:[%s13811_s3 + $0xd0] sm:$0xff] }
 0x1cc   : > { %8884 = vmatprep.subr.bf16.mxu1 %v8883_v36  ;;  %v8857_v20 = vpack.c.bf16 %v11466_v47, %v11461_v17  ;;  %v4774_v42 = vmul.f32 0.75, %v14099_v61  ;;  %8854 = vmatpush3.bf16.msra.mxu0 %v8853_v27  ;;  %v8889_v40 = vpack.c.bf16 %v11479_v15, %v11474_v14  ;;  %v8859_v12 = vpack.c.bf16 %v11489_v31, %v11484_v29  ;;  %v11593_v13 = vld [vmem:[%s13811_s3 + $0xd8] sm:$0xff]  ;;  %v14100_v23 = vld [vmem:[#allocation42_spill] sm:$0xff]  ;;  %v5440_v47 = vld [vmem:[%s13811_s3 + $0x1d0] sm:$0xff] }
 0x1cd   : > { %v5183_v25 = vadd.f32 %v5178_v21, %v5173_v38  ;;  %8886 = vmatpush3.bf16.msra.mxu1 %v8885_v46  ;;  %v7973_v52 = vsel %vm5080_vm6, 1.0, %v13899_v39  ;;  %8856 = vmatprep.subr.bf16.mxu0 %v8855_v32  ;;  %v8891_v54 = vpack.c.bf16 %v5437_v62, %v11501_v8  ;;  %v8861_v3 = vpack.c.bf16 %v11517_v0, %v11509_v18  ;;  %v14101_v37 = vld [vmem:[#allocation39_spill] sm:$0xff]  ;;  %v14102_v21 = vld [vmem:[#allocation32_spill] sm:$0xff]  ;;  %v14104_v15 = vld [vmem:[#allocation17_spill] sm:$0xff] }
 0x1ce   : > { %8888 = vmatprep.subr.bf16.mxu1 %v8887_v49  ;;  %v8893_v53 = vpack.c.bf16 %v11527_v24, %v11522_v22  ;;  %vm3939_vm8 = vcmp.ge.f32.partialorder %v14100_v23, 1.25  ;;  %v8863_v11 = vpack.c.bf16 %v11538_v1, %v11533_v51  ;;  %v8895_v10 = vpack.c.bf16 %v5439_v26, %v11543_v35  ;;  %v14103_v14 = vld [vmem:[#allocation31_spill] sm:$0xff]  ;;  %v5441_v55 = vld [vmem:[%s13811_s3 + $0x1d8] sm:$0xff] }
 0x1cf   : > { %v11596_v48 = vadd.f32 %v5188_v44, %v5183_v25  ;;  %v8865_v17 = vpack.c.bf16 %v11561_v19, %v11556_v59  ;;  %v8897_v28 = vpack.c.bf16 %v11576_v56, %v11571_v63  ;;  %v4308_v43 = vadd.f32 %v14102_v21, %v14101_v37  ;;  %v11619_v60 = vld [vmem:[%s13811_s3 + $0x50] sm:$0xff]  ;;  %v11624_v44 = vld [vmem:[%s13811_s3 + $0x58] sm:$0xff]  ;;  %v5478_v19 = vld [vmem:[%s13811_s3 + $0x300] sm:$0xff] }
 0x1d0   : > { %v4733_v29 = vadd.f32 %v14104_v15, %v14103_v14  ;;  %v4764_v31 = vmul.f32 %v7948_v33, %v10230_v30  ;;  %8858 = vmatpush3.bf16.msra.mxu0 %v8857_v20  ;;  %v5170_v8 = vmul.f32 %v7973_v52, %v10230_v30  ;;  %v7541_v62 = vadd.f32 %v11380_v57, %v11393_v4  ;;  %v5424_v45 = vld [vmem:[%s13811_s3 + $0x150] sm:$0xff]  ;;  %v5425_v36 = vld [vmem:[%s13811_s3 + $0x158] sm:$0xff]  ;;  %v14107_v20 = vld [vmem:[#allocation45_spill] sm:$0xff] }
 0x1d1   : > { %8890 = vmatpush3.bf16.msra.mxu1 %v8889_v40  ;;  %v8867_v18 = vpack.c.bf16 %v11593_v13, %v11588_v16  ;;  %v11640_v22 = vsel %vm3938_vm7, 1.0, %v13899_v39  ;;  %8860 = vmatprep.subr.bf16.mxu0 %v8859_v12  ;;  %v4734_v30 = vadd.f32 %v7948_v33, %v4308_v43  ;;  %v14106_v57 = vld [vmem:[#allocation16_spill] sm:$0xff]  ;;  %v11647_v38 = vsel %vm3939_vm8, 1.0, %v13899_v39  ;;  %v14114_v43 = vld [vmem:[#allocation41_spill] sm:$0xff] }
 0x1d2   : > { %8892 = vmatprep.subr.bf16.mxu1 %v8891_v54  ;;  %v4769_v4 = vadd.f32 %v4764_v31, %v14106_v57  ;;  %v5139_v24 = vadd.f32 %v11415_v9, %v4733_v29  ;;  %v5175_v27 = vadd.f32 %v5170_v8, %v11341_v7  ;;  %v7542_v46 = vadd.f32 %v7541_v62, %v11495_v5  ;;  %v14108_v26 = vld [vmem:[#allocation12_spill] sm:$0xff] }
 0x1d3   : > { %v8899_v51 = vpack.c.bf16 %v5441_v55, %v5440_v47  ;;  %v8869_v1 = vpack.c.bf16 %v11624_v44, %v11619_v60  ;;  %v5140_v33 = vadd.f32 %v7973_v52, %v4734_v30  ;;  %v8901_v32 = vpack.c.bf16 %v5425_v36, %v5424_v45 }
 0x1d4   : > { %v11653_v35 = vadd.f32 %v4774_v42, %v4769_v4  ;;  %v3954_v9 = vsel %vm3939_vm8, 0.0, %v14100_v23  ;;  %8862 = vmatpush3.bf16.msra.mxu0 %v8861_v3  ;;  %v7543_v49 = vadd.f32 %v7542_v46, %v5139_v24  ;;  %v3966_v7 = vcombine.low %v14107_v20, %v11640_v22  ;;  %v14112_v23 = vld [vmem:[#allocation40_spill] sm:$0xff]  ;;  %v14117_v46 = vld [vmem:[#allocation26_spill] sm:$0xff] }
 0x1d5   : > { %8894 = vmatpush3.bf16.msra.mxu1 %v8893_v53  ;;  %v3987_v5 = vrot.slane %v11647_v38, %v14108_v26  ;;  %v14109_v59 = vlaneseq  ;;  %8864 = vmatprep.subr.bf16.mxu0 %v8863_v11  ;;  %v4039_v25 = vcombine.high %v14107_v20, %v11640_v22  ;;  %v4040_v40 = vcombine.high %v11647_v38, %v11647_v38 }
 0x1d6   : > { %8896 = vmatprep.subr.bf16.mxu1 %v8895_v10  ;;  %v5180_v42 = vmul.f32 0.75, %v11653_v35  ;;  %v4358_v12 = vmul.f32 0.97, %v3954_v9  ;;  %v7544_v63 = vadd.f32 %v7543_v49, %v5140_v33  ;;  %v3980_v56 = vrot.slane %v3966_v7, %v14108_v26  ;;  %v14119_v33 = vld [vmem:[#allocation27_spill] sm:$0xff] }
 0x1d7   : > { %vm11663_vm7 = vcmp.lt.s32.totalorder %v14109_v59, 640  ;;  %v4002_v52 = vrot.slane %v3987_v5, %v14108_v26  ;;  %v4011_v54 = vcombine.high %v3987_v5, %v3987_v5  ;;  %v4054_v53 = vrot.slane %v4039_v25, %v14108_v26 }
 0x1d8   : > { %v11674_v3 = vadd.f32 %v5180_v42, %v5175_v27  ;;  %v4061_v16 = vrot.slane %v4040_v40, %v14108_v26  ;;  %v4363_v13 = vadd.f32 %v4358_v12, %v14099_v61  ;;  %8866 = vmatpush3.bf16.msra.mxu0 %v8865_v17  ;;  %v3988_v11 = vcombine.low %v14112_v23, %v3980_v56  ;;  %v14116_v27 = vld [vmem:[#allocation37_spill] sm:$0xff] }
 0x1d9   : > { %8898 = vmatpush3.bf16.msra.mxu1 %v8897_v28  ;;  %v4010_v10 = vcombine.high %v14112_v23, %v3980_v56  ;;  %v4025_v47 = vrot.slane %v4011_v54, %v14108_v26  ;;  %v7926_v21 = vsel %vm4366_vm2, 1.0, %v13899_v39  ;;  %7545 = vadd.xlane.f32.xlu0 %v7544_v63  ;;  %v4062_v14 = vcombine.low %v14114_v43, %v4054_v53  ;;  %v14120_v63 = vld [vmem:[#allocation73_spill] sm:$0xff] }
 0x1da   : > { %8868 = vmatprep.subr.bf16.mxu0 %v8867_v18  ;;  %v4076_v15 = vrot.slane %v4061_v16, %v14108_v26  ;;  %v4081_v61 = vcombine.high %v14114_v43, %v4054_v53  ;;  %vm4368_vm10 = vcmp.ge.f32.partialorder %v4363_v13, 1.25  ;;  %8900 = vmatprep.subr.bf16.mxu1 %v8899_v51  ;;  %v3995_v17 = vrot.slane %v3988_v11, %v14108_v26 }
 0x1db   : > { %v4018_v28 = vrot.slane %v4010_v10, %v14108_v26  ;;  %v4082_v29 = vcombine.high %v4061_v16, %v4061_v16  ;;  %v7927_v55 = vsel %vm4367_vm1, 1.0, %v13899_v39  ;;  %v4069_v60 = vrot.slane %v4062_v14, %v14108_v26  ;;  %v14121_v16 = vld [vmem:[#allocation35_spill] sm:$0xff] }
 0x1dc   : > { %v4089_v44 = vrot.slane %v4081_v61, %v14108_v26  ;;  %v7928_v8 = vsel %vm4368_vm10, 1.0, %v13899_v39  ;;  %v4383_v62 = vsel %vm4368_vm10, 0.0, %v4363_v13  ;;  %8870 = vmatpush3.bf16.msra.mxu0 %v8869_v1  ;;  %v4003_v18 = vcombine.low %v3995_v17, %v4002_v52  ;;  %v14118_v1 = vld [vmem:[#allocation38_spill] sm:$0xff] }
 0x1dd   : > { %8902 = vmatpush3.bf16.msra.mxu1 %v8901_v32  ;;  %v4026_v45 = vcombine.low %v4018_v28, %v4025_v47  ;;  %v4030_v36 = vcombine.high %v3995_v17, %v4002_v52  ;;  %v4784_v0 = vmul.f32 0.97, %v4383_v62  ;;  %v4034_v30 = vcombine.high %v4018_v28, %v4025_v47 }
 0x1de   : > { %v4077_v57 = vcombine.low %v4069_v60, %v4076_v15  ;;  %v4096_v4 = vrot.slane %v4082_v29, %v14108_v26  ;;  %v4101_v24 = vcombine.high %v4069_v60, %v4076_v15  ;;  %4009 = vst.msk [vmem:[#allocation3] ss:$4 sm:$0x1f] %vm11663_vm7, %v4003_v18  ;;  %v4384_v51 = vadd.f32 %v14117_v46, %v14116_v27 }
 0x1df   : > { %4029 = vst.msk [vmem:[#allocation3 + $0x14] ss:$4 sm:$0x1f] %vm11663_vm7, %v4026_v45  ;;  %4033 = vst.msk [vmem:[#allocation3 + $0x28] ss:$4 sm:$0x1f] %vm11663_vm7, %v4030_v36  ;;  %v4385_v32 = vadd.f32 %v14119_v33, %v14118_v1  ;;  %v4386_v9 = vadd.f32 %v7926_v21, %v14107_v20  ;;  %v4387_v49 = vadd.f32 %v7927_v55, %v11640_v22 }
 0x1e0   : > { %4037 = vst.msk [vmem:[#allocation3 + $0x3c] ss:$4 sm:$0x1f] %vm11663_vm7, %v4034_v30  ;;  %4080 = vst.msk [vmem:[#allocation3 + $0x50] ss:$4 sm:$0x1f] %vm11663_vm7, %v4077_v57  ;;  %v4097_v7 = vcombine.low %v4089_v44, %v4096_v4  ;;  %v4105_v5 = vcombine.high %v4089_v44, %v4096_v4  ;;  %v4388_v59 = vadd.f32 %v7928_v8, %v11647_v38 }
 0x1e1   : > { %4104 = vst.msk [vmem:[#allocation3 + $0x78] ss:$4 sm:$0x1f] %vm11663_vm7, %v4101_v24  ;;  %v4395_v42 = vcombine.low %v7926_v21, %v7927_v55  ;;  %v4416_v25 = vrot.slane %v7928_v8, %v14108_v26  ;;  %v4465_v40 = vcombine.high %v7926_v21, %v7927_v55  ;;  %v4466_v20 = vcombine.high %v7928_v8, %v7928_v8 }
 0x1e2   : > { %v4789_v22 = vadd.f32 %v4784_v0, %v11653_v35  ;;  %4100 = vst.msk [vmem:[#allocation3 + $0x64] ss:$4 sm:$0x1f] %vm11663_vm7, %v4097_v7  ;;  %4108 = vst.msk [vmem:[#allocation3 + $0x8c] ss:$4 sm:$0x1f] %vm11663_vm7, %v4105_v5 }
 0x1e3   : > { %v4409_v12 = vrot.slane %v4395_v42, %v14108_v26  ;;  %vm4793_vm1 = vcmp.ge.f32.partialorder %v14120_v63, 1.25  ;;  %v7949_v38 = vsel %vm4790_vm12, 1.0, %v13899_v39  ;;  %v7950_v56 = vsel %vm4791_vm15, 1.0, %v13899_v39 }
 0x1e4   : > { %v4431_v35 = vrot.slane %v4416_v25, %v14108_v26  ;;  %v4437_v52 = vcombine.high %v4416_v25, %v4416_v25  ;;  %v4480_v54 = vrot.slane %v4465_v40, %v14108_v26  ;;  %v4487_v53 = vrot.slane %v4466_v20, %v14108_v26 }
 0x1e5   : > { %v4417_v13 = vcombine.low %v14121_v16, %v4409_v12  ;;  %v4436_v23 = vcombine.high %v14121_v16, %v4409_v12  ;;  %vm4794_vm2 = vcmp.ge.f32.partialorder %v4789_v22, 1.25  ;;  %v7951_v34 = vsel %vm4792_vm0, 1.0, %v13899_v39 }
 0x1e6   : > { %v4451_v11 = vrot.slane %v4437_v52, %v14108_v26  ;;  %v4488_v10 = vcombine.low %v14122_v58, %v4480_v54  ;;  %v4502_v47 = vrot.slane %v4487_v53, %v14108_v26  ;;  %v4507_v37 = vcombine.high %v14122_v58, %v4480_v54 }
 0x1e7   : > { %v4424_v21 = vrot.slane %v4417_v13, %v14108_v26  ;;  %v4444_v43 = vrot.slane %v4436_v23, %v14108_v26  ;;  %v4508_v14 = vcombine.high %v4487_v53, %v4487_v53  ;;  %v7952_v15 = vsel %vm4793_vm1, 1.0, %v13899_v39 }
 0x1e8   : > { %v4495_v2 = vrot.slane %v4488_v10, %v14108_v26  ;;  %v4515_v61 = vrot.slane %v4507_v37, %v14108_v26  ;;  %v7953_v17 = vsel %vm4794_vm2, 1.0, %v13899_v39  ;;  %v4808_v28 = vsel %vm4793_vm1, 0.0, %v14120_v63 }
 0x1e9   : > { %vm5196_vm11 = vcmp.ge.f32.partialorder %v11429_v6, 1.25  ;;  %v4432_v29 = vcombine.low %v4424_v21, %v4431_v35  ;;  %v4452_v31 = vcombine.low %v4444_v43, %v4451_v11  ;;  %v4456_v55 = vcombine.high %v4424_v21, %v4431_v35 }
 0x1ea   : > { %v4460_v60 = vcombine.high %v4444_v43, %v4451_v11  ;;  %v4503_v44 = vcombine.low %v4495_v2, %v4502_v47  ;;  %v4522_v8 = vrot.slane %v4508_v14, %v14108_v26  ;;  %v4527_v62 = vcombine.high %v4495_v2, %v4502_v47 }
 0x1eb   : > { %v4809_v18 = vsel %vm4794_vm2, 0.0, %v4789_v22  ;;  %4435 = vst.msk [vmem:[#allocation3 + $0x1] ss:$4 sm:$0x1f] %vm11663_vm7, %v4432_v29  ;;  %v11765_v45 = vadd.f32 %v7949_v38, %v4384_v51  ;;  %v11767_v36 = vadd.f32 %v7950_v56, %v4385_v32  ;;  %v11769_v0 = vadd.f32 %v7951_v34, %v4386_v9 }
 0x1ec   : > { %4455 = vst.msk [vmem:[#allocation3 + $0x15] ss:$4 sm:$0x1f] %vm11663_vm7, %v4452_v31  ;;  %4459 = vst.msk [vmem:[#allocation3 + $0x29] ss:$4 sm:$0x1f] %vm11663_vm7, %v4456_v55  ;;  %v11771_v30 = vadd.f32 %v7952_v15, %v4387_v49  ;;  %v4523_v57 = vcombine.low %v4515_v61, %v4522_v8  ;;  %v4531_v4 = vcombine.high %v4515_v61, %v4522_v8 }
 0x1ed   : > { %4463 = vst.msk [vmem:[#allocation3 + $0x3d] ss:$4 sm:$0x1f] %vm11663_vm7, %v4460_v60  ;;  %vm5197_vm12 = vcmp.ge.f32.partialorder %v11492_v41, 1.25  ;;  %v4814_v24 = vadd.f32 %v7953_v17, %v4388_v59  ;;  %v4820_v27 = vcombine.low %v7949_v38, %v7950_v56  ;;  %v4821_v46 = vcombine.low %v7951_v34, %v7952_v15 }
 0x1ee   : > { %4506 = vst.msk [vmem:[#allocation3 + $0x51] ss:$4 sm:$0x1f] %vm11663_vm7, %v4503_v44  ;;  %4530 = vst.msk [vmem:[#allocation3 + $0x79] ss:$4 sm:$0x1f] %vm11663_vm7, %v4527_v62  ;;  %v4842_v51 = vrot.slane %v7953_v17, %v14108_v26  ;;  %v4890_v1 = vcombine.high %v7949_v38, %v7950_v56  ;;  %v4891_v33 = vcombine.high %v7951_v34, %v7952_v15 }
 0x1ef   : > { %4526 = vst.msk [vmem:[#allocation3 + $0x65] ss:$4 sm:$0x1f] %vm11663_vm7, %v4523_v57  ;;  %4534 = vst.msk [vmem:[#allocation3 + $0x8d] ss:$4 sm:$0x1f] %vm11663_vm7, %v4531_v4  ;;  %v4828_v32 = vrot.slane %v4820_v27, %v14108_v26  ;;  %v4892_v9 = vcombine.high %v7953_v17, %v7953_v17  ;;  %v4835_v5 = vrot.slane %v4821_v46, %v14108_v26 }
 0x1f0   : > { %v5189_v49 = vmul.f32 0.97, %v4808_v28  ;;  %v5190_v7 = vmul.f32 0.97, %v4809_v18  ;;  %v4857_v59 = vrot.slane %v4842_v51, %v14108_v26  ;;  %v4863_v42 = vcombine.high %v4842_v51, %v4842_v51 }
 0x1f1   : > { %v4899_v25 = vrot.slane %v4890_v1, %v14108_v26  ;;  %v4906_v40 = vrot.slane %v4891_v33, %v14108_v26  ;;  %v4913_v20 = vrot.slane %v4892_v9, %v14108_v26  ;;  %v4843_v63 = vcombine.low %v4828_v32, %v4835_v5  ;;  %v5442_v1 = vld [vmem:[%s13811_s3 + $0x1e0] sm:$0xff]  ;;  %v5443_v33 = vld [vmem:[%s13811_s3 + $0x1e8] sm:$0xff] }
 0x1f2   : > { %v5194_v22 = vadd.f32 %v5189_v49, %v11512_v50  ;;  %v5195_v12 = vadd.f32 %v5190_v7, %v11674_v3  ;;  %v4862_v38 = vcombine.high %v4828_v32, %v4835_v5  ;;  %v4877_v56 = vrot.slane %v4863_v42, %v14108_v26  ;;  %v5394_v5 = vld [vmem:[%s13811_s3 + $0x60] sm:$0xff] }
 0x1f3   : > { %vm5198_vm13 = vcmp.ge.f32.partialorder %v11596_v48, 1.25  ;;  %v4914_v35 = vcombine.low %v4899_v25, %v4906_v40  ;;  %v4928_v52 = vrot.slane %v4913_v20, %v14108_v26  ;;  %v4933_v54 = vcombine.high %v4899_v25, %v4906_v40 }
 0x1f4   : > { %v4934_v53 = vcombine.high %v4913_v20, %v4913_v20  ;;  %v4850_v16 = vrot.slane %v4843_v63, %v14108_v26  ;;  %v4870_v13 = vrot.slane %v4862_v38, %v14108_v26  ;;  %vm5199_vm14 = vcmp.ge.f32.partialorder %v5194_v22, 1.25  ;;  %v5426_v22 = vld [vmem:[%s13811_s3 + $0x160] sm:$0xff] }
 0x1f5   : > { %vm5200_vm15 = vcmp.ge.f32.partialorder %v5195_v12, 1.25  ;;  %v4921_v50 = vrot.slane %v4914_v35, %v14108_v26  ;;  %v4941_v3 = vrot.slane %v4933_v54, %v14108_v26  ;;  %v7974_v34 = vsel %vm5196_vm11, 1.0, %v13899_v39  ;;  %v5427_v35 = vld [vmem:[%s13811_s3 + $0x168] sm:$0xff]  ;;  %v5413_v54 = vld [vmem:[%s13811_s3 + $0xf8] sm:$0xff] }
 0x1f6   : > { %v4948_v23 = vrot.slane %v4934_v53, %v14108_v26  ;;  %v4858_v11 = vcombine.low %v4850_v16, %v4857_v59  ;;  %v4878_v58 = vcombine.low %v4870_v13, %v4877_v56  ;;  %v4882_v10 = vcombine.high %v4850_v16, %v4857_v59  ;;  %v5395_v59 = vld [vmem:[%s13811_s3 + $0x68] sm:$0xff] }
 0x1f7   : > { %v4886_v47 = vcombine.high %v4870_v13, %v4877_v56  ;;  %v4929_v37 = vcombine.low %v4921_v50, %v4928_v52  ;;  %v4953_v43 = vcombine.high %v4921_v50, %v4928_v52  ;;  %v7975_v6 = vsel %vm5197_vm12, 1.0, %v13899_v39  ;;  %v5412_v52 = vld [vmem:[%s13811_s3 + $0xf0] sm:$0xff] }
 0x1f8   : > { %v4949_v21 = vcombine.low %v4941_v3, %v4948_v23  ;;  %v4957_v14 = vcombine.high %v4941_v3, %v4948_v23  ;;  %4861 = vst.msk [vmem:[#allocation3 + $0x2] ss:$4 sm:$0x1f] %vm11663_vm7, %v4858_v11  ;;  %4881 = vst.msk [vmem:[#allocation3 + $0x16] ss:$4 sm:$0x1f] %vm11663_vm7, %v4878_v58  ;;  %v5211_v41 = vadd.f32 %v7974_v34, %v11765_v45 }
 0x1f9   : > { %4885 = vst.msk [vmem:[#allocation3 + $0x2a] ss:$4 sm:$0x1f] %vm11663_vm7, %v4882_v10  ;;  %4889 = vst.msk [vmem:[#allocation3 + $0x3e] ss:$4 sm:$0x1f] %vm11663_vm7, %v4886_v47  ;;  %v5212_v48 = vadd.f32 %v7975_v6, %v11767_v36  ;;  %v5221_v31 = vcombine.low %v7974_v34, %v7975_v6  ;;  %v5291_v44 = vcombine.high %v7974_v34, %v7975_v6 }
 0x1fa   : > { %v7976_v15 = vsel %vm5198_vm13, 1.0, %v13899_v39  ;;  %v7977_v2 = vsel %vm5199_vm14, 1.0, %v13899_v39  ;;  %v7978_v61 = vsel %vm5200_vm15, 1.0, %v13899_v39  ;;  %4932 = vst.msk [vmem:[#allocation3 + $0x52] ss:$4 sm:$0x1f] %vm11663_vm7, %v4929_v37  ;;  %v8903_v56 = vpack.c.bf16 %v5443_v33, %v5442_v1 }
 0x1fb   : > { %4952 = vst.msk [vmem:[#allocation3 + $0x66] ss:$4 sm:$0x1f] %vm11663_vm7, %v4949_v21  ;;  %4956 = vst.msk [vmem:[#allocation3 + $0x7a] ss:$4 sm:$0x1f] %vm11663_vm7, %v4953_v43  ;;  %v5213_v17 = vadd.f32 %v7976_v15, %v11769_v0  ;;  %v5214_v28 = vadd.f32 %v7977_v2, %v11771_v30  ;;  %v11832_v29 = vadd.f32 %v7978_v61, %v4814_v24 }
 0x1fc   : > { %4960 = vst.msk [vmem:[#allocation3 + $0x8e] ss:$4 sm:$0x1f] %vm11663_vm7, %v4957_v14  ;;  %v5222_v55 = vcombine.low %v7976_v15, %v7977_v2  ;;  %v5243_v60 = vrot.slane %v7978_v61, %v14108_v26  ;;  %v5292_v8 = vcombine.high %v7976_v15, %v7977_v2  ;;  %v5293_v62 = vcombine.high %v7978_v61, %v7978_v61  ;;  %v5410_v45 = vld [vmem:[%s13811_s3 + $0xe0] sm:$0xff]  ;;  %v5411_v36 = vld [vmem:[%s13811_s3 + $0xe8] sm:$0xff]  ;;  %v5444_v3 = vld [vmem:[%s13811_s3 + $0x1f0] sm:$0xff] }
 0x1fd   : > { %v7558_v18 = vadd.f32 %v5212_v48, %v5211_v41  ;;  %v5229_v0 = vrot.slane %v5221_v31, %v14108_v26  ;;  %v5300_v24 = vrot.slane %v5291_v44, %v14108_v26  ;;  %v8871_v7 = vpack.c.bf16 %v5411_v36, %v5410_v45  ;;  %v5445_v23 = vld [vmem:[%s13811_s3 + $0x1f8] sm:$0xff]  ;;  %v5396_v34 = vld [vmem:[%s13811_s3 + $0x70] sm:$0xff]  ;;  %8904 = vmatprep.subr.bf16.mxu1 %v8903_v56  ;;  %v5462_v37 = vld [vmem:[%s13811_s3 + $0x280] sm:$0xff] }
 0x1fe   : > { %v5236_v30 = vrot.slane %v5222_v55, %v14108_v26  ;;  %v5258_v57 = vrot.slane %v5243_v60, %v14108_v26  ;;  %v5264_v4 = vcombine.high %v5243_v60, %v5243_v60  ;;  %v5307_v27 = vrot.slane %v5292_v8, %v14108_v26  ;;  %v5463_v21 = vld [vmem:[%s13811_s3 + $0x288] sm:$0xff]  ;;  %v5428_v2 = vld [vmem:[%s13811_s3 + $0x170] sm:$0xff]  ;;  %v5429_v61 = vld [vmem:[%s13811_s3 + $0x178] sm:$0xff] }
 0x1ff   : > { %v5314_v46 = vrot.slane %v5293_v62, %v14108_v26  ;;  %v7559_v51 = vadd.f32 %v7558_v18, %v5213_v17  ;;  %8872 = vmatprep.subr.bf16.mxu0 %v8871_v7  ;;  %v8873_v50 = vpack.c.bf16 %v5395_v59, %v5394_v5  ;;  %v8905_v48 = vpack.c.bf16 %v5427_v35, %v5426_v22  ;;  %v5494_v31 = vld [vmem:[%s13811_s3 + $0x380] sm:$0xff]  ;;  %v5495_v55 = vld [vmem:[%s13811_s3 + $0x388] sm:$0xff]  ;;  %v5464_v36 = vld [vmem:[%s13811_s3 + $0x290] sm:$0xff] }
 0x200   : > { %v5244_v32 = vcombine.low %v5229_v0, %v5236_v30  ;;  %v5263_v9 = vcombine.high %v5229_v0, %v5236_v30  ;;  %v5278_v49 = vrot.slane %v5264_v4, %v14108_v26  ;;  %v5315_v42 = vcombine.low %v5300_v24, %v5307_v27  ;;  %v5446_v62 = vld [vmem:[%s13811_s3 + $0x200] sm:$0xff]  ;;  %v5447_v18 = vld [vmem:[%s13811_s3 + $0x208] sm:$0xff]  ;;  %v5465_v0 = vld [vmem:[%s13811_s3 + $0x298] sm:$0xff] }
 0x201   : > { %v5329_v25 = vrot.slane %v5314_v46, %v14108_v26  ;;  %v5334_v40 = vcombine.high %v5300_v24, %v5307_v27  ;;  %v5335_v20 = vcombine.high %v5314_v46, %v5314_v46  ;;  %v7560_v38 = vadd.f32 %v7559_v51, %v5214_v28  ;;  %8874 = vmatpush3.bf16.msra.mxu0 %v8873_v50  ;;  %v5479_v45 = vld [vmem:[%s13811_s3 + $0x308] sm:$0xff]  ;;  %v5496_v30 = vld [vmem:[%s13811_s3 + $0x390] sm:$0xff]  ;;  %v5481_v5 = vld [vmem:[%s13811_s3 + $0x318] sm:$0xff] }
 0x202   : > { %v5251_v12 = vrot.slane %v5244_v32, %v14108_v26  ;;  %v5271_v63 = vrot.slane %v5263_v9, %v14108_v26  ;;  %v5322_v53 = vrot.slane %v5315_v42, %v14108_v26  ;;  %v8875_v17 = vpack.c.bf16 %v5413_v54, %v5412_v52  ;;  %8906 = vmatpush3.bf16.msra.mxu1 %v8905_v48  ;;  %v5448_v27 = vld [vmem:[%s13811_s3 + $0x210] sm:$0xff]  ;;  %v5466_v59 = vld [vmem:[%s13811_s3 + $0x2a0] sm:$0xff]  ;;  %v5499_v22 = vld [vmem:[%s13811_s3 + $0x3a8] sm:$0xff] }
 0x203   : > { %v5342_v16 = vrot.slane %v5334_v40, %v14108_v26  ;;  %v5349_v13 = vrot.slane %v5335_v20, %v14108_v26  ;;  %v5397_v26 = vld [vmem:[%s13811_s3 + $0x78] sm:$0xff]  ;;  %v7561_v41 = vadd.f32 %v7560_v38, %v11832_v29  ;;  %v8907_v28 = vpack.c.bf16 %v5445_v23, %v5444_v3  ;;  %v5480_v7 = vld [vmem:[%s13811_s3 + $0x310] sm:$0xff]  ;;  %v5467_v40 = vld [vmem:[%s13811_s3 + $0x2a8] sm:$0xff] }
 0x204   : > { %v5259_v11 = vcombine.low %v5251_v12, %v5258_v57  ;;  %v5279_v58 = vcombine.low %v5271_v63, %v5278_v49  ;;  %v5283_v10 = vcombine.high %v5251_v12, %v5258_v57  ;;  %v5287_v47 = vcombine.high %v5271_v63, %v5278_v49  ;;  %8876 = vmatprep.subr.bf16.mxu0 %v8875_v17  ;;  %v5497_v57 = vld [vmem:[%s13811_s3 + $0x398] sm:$0xff]  ;;  %v5498_v20 = vld [vmem:[%s13811_s3 + $0x3a0] sm:$0xff]  ;;  %v5451_v52 = vld [vmem:[%s13811_s3 + $0x228] sm:$0xff] }
 0x205   : > { %v5330_v43 = vcombine.low %v5322_v53, %v5329_v25  ;;  %v5350_v14 = vcombine.low %v5342_v16, %v5349_v13  ;;  %v5354_v6 = vcombine.high %v5322_v53, %v5329_v25  ;;  %v5358_v15 = vcombine.high %v5342_v16, %v5349_v13  ;;  %7562 = vadd.xlane.f32.xlu0 %v7561_v41  ;;  %v5449_v49 = vld [vmem:[%s13811_s3 + $0x218] sm:$0xff]  ;;  %v5450_v35 = vld [vmem:[%s13811_s3 + $0x220] sm:$0xff]  ;;  %v5483_v13 = vld [vmem:[%s13811_s3 + $0x328] sm:$0xff] }
 0x206   : > { %5262 = vst.msk [vmem:[#allocation3 + $0x3] ss:$4 sm:$0x1f] %vm11663_vm7, %v5259_v11  ;;  %5282 = vst.msk [vmem:[#allocation3 + $0x17] ss:$4 sm:$0x1f] %vm11663_vm7, %v5279_v58  ;;  %v8877_v29 = vpack.c.bf16 %v5397_v26, %v5396_v34  ;;  %v8911_v60 = vpack.c.bf16 %v5463_v21, %v5462_v37  ;;  %v8909_v44 = vpack.c.bf16 %v5429_v61, %v5428_v2  ;;  %8908 = vmatprep.subr.bf16.mxu1 %v8907_v28 }
 0x207   : > { %5286 = vst.msk [vmem:[#allocation3 + $0x2b] ss:$4 sm:$0x1f] %vm11663_vm7, %v5283_v10  ;;  %5290 = vst.msk [vmem:[#allocation3 + $0x3f] ss:$4 sm:$0x1f] %vm11663_vm7, %v5287_v47  ;;  %v8943_v8 = vpack.c.bf16 %v5495_v55, %v5494_v31  ;;  %v8913_v1 = vpack.c.bf16 %v5447_v18, %v5446_v62  ;;  %v8945_v33 = vpack.c.bf16 %v5479_v45, %v5478_v19 }
 0x208   : > { %5333 = vst.msk [vmem:[#allocation3 + $0x53] ss:$4 sm:$0x1f] %vm11663_vm7, %v5330_v43  ;;  %5353 = vst.msk [vmem:[#allocation3 + $0x67] ss:$4 sm:$0x1f] %vm11663_vm7, %v5350_v14  ;;  %8878 = vmatpush3.bf16.msra.mxu0 %v8877_v29  ;;  %8910 = vmatpush3.bf16.msra.mxu1 %v8909_v44  ;;  %v8915_v42 = vpack.c.bf16 %v5465_v0, %v5464_v36  ;;  %v8947_v25 = vpack.c.bf16 %v5497_v57, %v5496_v30 }
 0x209   : > { %5357 = vst.msk [vmem:[#allocation3 + $0x7b] ss:$4 sm:$0x1f] %vm11663_vm7, %v5354_v6  ;;  %5361 = vst.msk [vmem:[#allocation3 + $0x8f] ss:$4 sm:$0x1f] %vm11663_vm7, %v5358_v15  ;;  %8912 = vmatprep.subr.bf16.mxu0 %v8911_v60  ;;  %8944 = vmatprep.subr.bf16.mxu1 %v8943_v8  ;;  %v8917_v38 = vpack.c.bf16 %v5449_v49, %v5448_v27  ;;  %v8949_v56 = vpack.c.bf16 %v5481_v5, %v5480_v7 }
 0x20a   : > { %v8919_v54 = vpack.c.bf16 %v5467_v40, %v5466_v59  ;;  %v8951_v53 = vpack.c.bf16 %v5499_v22, %v5498_v20  ;;  %v5482_v16 = vld [vmem:[%s13811_s3 + $0x320] sm:$0xff]  ;;  %v5468_v50 = vld [vmem:[%s13811_s3 + $0x2b0] sm:$0xff]  ;;  %v5469_v3 = vld [vmem:[%s13811_s3 + $0x2b8] sm:$0xff]  ;;  %v8921_v11 = vpack.c.bf16 %v5451_v52, %v5450_v35  ;;  %vm7556_vm9 = vcmask 0  }
 0x20b   : > { %v5500_v23 = vld [vmem:[%s13811_s3 + $0x3b0] sm:$0xff]  ;;  %v5501_v34 = vld [vmem:[%s13811_s3 + $0x3b8] sm:$0xff]  ;;  %v8953_v58 = vpack.c.bf16 %v5483_v13, %v5482_v16  ;;  %v8923_v26 = vpack.c.bf16 %v5469_v3, %v5468_v50  ;;  %v5470_v14 = vld [vmem:[%s13811_s3 + $0x2c0] sm:$0xff]  ;;  %vm7574_vm6 = vcmask 1040384  }
 0x20c   : > { %v5452_v10 = vld [vmem:[%s13811_s3 + $0x230] sm:$0xff]  ;;  %v5453_v47 = vld [vmem:[%s13811_s3 + $0x238] sm:$0xff]  ;;  %v8955_v37 = vpack.c.bf16 %v5501_v34, %v5500_v23  ;;  %v5471_v6 = vld [vmem:[%s13811_s3 + $0x2c8] sm:$0xff] }
 0x20d   : > { %v5362_v4 = vld [vmem:[#allocation3] sm:$0xff]  ;;  %v5363_v24 = vld [vmem:[#allocation3 + $0x8] sm:$0xff]  ;;  %v11952_v32 = vld [vmem:[#allocation3 + $0x10] sm:$0xff]  ;;  %v8925_v61 = vpack.c.bf16 %v5453_v47, %v5452_v10  ;;  %v8927_v28 = vpack.c.bf16 %v5471_v6, %v5470_v14 }
 0x20e   : > { %v6042_v46 = vcombine.high %v5362_v4, %v5362_v4  ;;  %v6043_v51 = vcombine.high %v5363_v24, %v5363_v24  ;;  %v11954_v9 = vld [vmem:[#allocation3 + $0x18] sm:$0xff]  ;;  %v6044_v12 = vcombine.high %v11952_v32, %v11952_v32  ;;  %v5484_v21 = vld [vmem:[%s13811_s3 + $0x330] sm:$0xff]  ;;  %v5502_v15 = vld [vmem:[%s13811_s3 + $0x3c0] sm:$0xff] }
 0x20f   : > { %v6045_v63 = vcombine.high %v11954_v9, %v11954_v9  ;;  %v5485_v43 = vld [vmem:[%s13811_s3 + $0x338] sm:$0xff]  ;;  %v5503_v2 = vld [vmem:[%s13811_s3 + $0x3c8] sm:$0xff]  ;;  %v5454_v48 = vld [vmem:[%s13811_s3 + $0x240] sm:$0xff] }
 0x210   : > { %6146 = vmatprep.mubr.f32.mxu0 %v6042_v46  ;;  %6216 = vmatprep.mubr.f32.mxu1 %v6043_v51  ;;  %v8957_v41 = vpack.c.bf16 %v5485_v43, %v5484_v21  ;;  %v5455_v17 = vld [vmem:[%s13811_s3 + $0x248] sm:$0xff]  ;;  %v8959_v31 = vpack.c.bf16 %v5503_v2, %v5502_v15  ;;  %v5486_v55 = vld [vmem:[%s13811_s3 + $0x340] sm:$0xff]  ;;  %v5472_v60 = vld [vmem:[%s13811_s3 + $0x2d0] sm:$0xff] }
 0x211   : > { %6147 = vmatmul.mubr.f32.vlgmr.msra.gmra.mrb[40].mxu0 %v5362_v4  ;;  %6217 = vmatmul.mubr.f32.vlgmr.msra.gmra.mrb[40].mxu1 %v5363_v24  ;;  %v5487_v29 = vld [vmem:[%s13811_s3 + $0x348] sm:$0xff]  ;;  %v5473_v44 = vld [vmem:[%s13811_s3 + $0x2d8] sm:$0xff]  ;;  %v5504_v8 = vld [vmem:[%s13811_s3 + $0x3d0] sm:$0xff]  ;;  %v8929_v18 = vpack.c.bf16 %v5455_v17, %v5454_v48 }
 0x212   : > { %8914 = vmatpush3.bf16.msra.mxu0 %v8913_v1  ;;  %8946 = vmatpush3.bf16.msra.mxu1 %v8945_v33  ;;  %v5505_v62 = vld [vmem:[%s13811_s3 + $0x3d8] sm:$0xff]  ;;  %v8961_v19 = vpack.c.bf16 %v5487_v29, %v5486_v55  ;;  %v5456_v45 = vld [vmem:[%s13811_s3 + $0x250] sm:$0xff]  ;;  %v8931_v0 = vpack.c.bf16 %v5473_v44, %v5472_v60  ;;  %v5474_v24 = vld [vmem:[%s13811_s3 + $0x2e0] sm:$0xff] }
 0x213   : > { %6286 = vmatprep.mubr.f32.mxu0 %v6044_v12  ;;  %6356 = vmatprep.mubr.f32.mxu1 %v6045_v63  ;;  %v5457_v36 = vld [vmem:[%s13811_s3 + $0x258] sm:$0xff]  ;;  %v8963_v30 = vpack.c.bf16 %v5505_v62, %v5504_v8  ;;  %v5488_v57 = vld [vmem:[%s13811_s3 + $0x350] sm:$0xff]  ;;  %v5475_v27 = vld [vmem:[%s13811_s3 + $0x2e8] sm:$0xff] }
 0x214   : > { %8916 = vmatprep.subr.bf16.mxu0 %v8915_v42  ;;  %8948 = vmatprep.subr.bf16.mxu1 %v8947_v25  ;;  %v5489_v4 = vld [vmem:[%s13811_s3 + $0x358] sm:$0xff]  ;;  %v5506_v46 = vld [vmem:[%s13811_s3 + $0x3e0] sm:$0xff]  ;;  %v5507_v51 = vld [vmem:[%s13811_s3 + $0x3e8] sm:$0xff]  ;;  %v8933_v1 = vpack.c.bf16 %v5457_v36, %v5456_v45  ;;  %v8935_v5 = vpack.c.bf16 %v5475_v27, %v5474_v24 }
 0x215   : > { %v8965_v33 = vpack.c.bf16 %v5489_v4, %v5488_v57  ;;  %v5458_v49 = vld [vmem:[%s13811_s3 + $0x260] sm:$0xff]  ;;  %v5459_v7 = vld [vmem:[%s13811_s3 + $0x268] sm:$0xff]  ;;  %v8967_v59 = vpack.c.bf16 %v5507_v51, %v5506_v46  ;;  %v5476_v40 = vld [vmem:[%s13811_s3 + $0x2f0] sm:$0xff] }
 0x216   : > { %8918 = vmatpush3.bf16.msra.mxu0 %v8917_v38  ;;  %8950 = vmatpush3.bf16.msra.mxu1 %v8949_v56  ;;  %v5490_v42 = vld [vmem:[%s13811_s3 + $0x360] sm:$0xff]  ;;  %v5491_v25 = vld [vmem:[%s13811_s3 + $0x368] sm:$0xff]  ;;  %v5477_v20 = vld [vmem:[%s13811_s3 + $0x2f8] sm:$0xff]  ;;  %v8937_v63 = vpack.c.bf16 %v5459_v7, %v5458_v49 }
 0x217   : > { %8920 = vmatprep.subr.bf16.mxu0 %v8919_v54  ;;  %8952 = vmatprep.subr.bf16.mxu1 %v8951_v53  ;;  %v5508_v22 = vld [vmem:[%s13811_s3 + $0x3f0] sm:$0xff]  ;;  %v5509_v12 = vld [vmem:[%s13811_s3 + $0x3f8] sm:$0xff]  ;;  %v8969_v38 = vpack.c.bf16 %v5491_v25, %v5490_v42  ;;  %v8939_v52 = vpack.c.bf16 %v5477_v20, %v5476_v40  ;;  %v5526_v13 = vld [vmem:[%s13811_s3 + $0x480] sm:$0xff] }
 0x218   : > { %v5460_v56 = vld [vmem:[%s13811_s3 + $0x270] sm:$0xff]  ;;  %v5461_v35 = vld [vmem:[%s13811_s3 + $0x278] sm:$0xff]  ;;  %v8971_v54 = vpack.c.bf16 %v5509_v12, %v5508_v22  ;;  %v5527_v50 = vld [vmem:[%s13811_s3 + $0x488] sm:$0xff] }
 0x219   : > { %v5492_v53 = vld [vmem:[%s13811_s3 + $0x370] sm:$0xff]  ;;  %v5493_v16 = vld [vmem:[%s13811_s3 + $0x378] sm:$0xff]  ;;  %v5558_v3 = vld [vmem:[%s13811_s3 + $0x580] sm:$0xff]  ;;  %v8941_v34 = vpack.c.bf16 %v5461_v35, %v5460_v56 }
 0x21a   : > { %8922 = vmatpush3.bf16.msra.mxu0 %v8921_v11  ;;  %8954 = vmatpush3.bf16.msra.mxu1 %v8953_v58  ;;  %v5559_v23 = vld [vmem:[%s13811_s3 + $0x588] sm:$0xff]  ;;  %v8973_v11 = vpack.c.bf16 %v5493_v16, %v5492_v53  ;;  %v8975_v58 = vpack.c.bf16 %v5527_v50, %v5526_v13  ;;  %v5510_v47 = vld [vmem:[%s13811_s3 + $0x400] sm:$0xff]  ;;  %v5528_v43 = vld [vmem:[%s13811_s3 + $0x490] sm:$0xff] }
 0x21b   : > { %8924 = vmatprep.subr.bf16.mxu0 %v8923_v26  ;;  %8956 = vmatprep.subr.bf16.mxu1 %v8955_v37  ;;  %v9007_v10 = vpack.c.bf16 %v5559_v23, %v5558_v3  ;;  %v5511_v26 = vld [vmem:[%s13811_s3 + $0x408] sm:$0xff]  ;;  %v5542_v37 = vld [vmem:[%s13811_s3 + $0x500] sm:$0xff]  ;;  %v5529_v14 = vld [vmem:[%s13811_s3 + $0x498] sm:$0xff] }
 0x21c   : > { %v5543_v21 = vld [vmem:[%s13811_s3 + $0x508] sm:$0xff]  ;;  %v12143_v6 = vld [vmem:[#allocation3 + $0x20] sm:$0xff]  ;;  %v5560_v15 = vld [vmem:[%s13811_s3 + $0x590] sm:$0xff]  ;;  %v8979_v29 = vpack.c.bf16 %v5529_v14, %v5528_v43 }
 0x21d   : > { %v5561_v2 = vld [vmem:[%s13811_s3 + $0x598] sm:$0xff]  ;;  %v9009_v48 = vpack.c.bf16 %v5543_v21, %v5542_v37  ;;  %v5512_v17 = vld [vmem:[%s13811_s3 + $0x410] sm:$0xff]  ;;  %v6046_v55 = vcombine.high %v12143_v6, %v12143_v6  ;;  %v5530_v8 = vld [vmem:[%s13811_s3 + $0x4a0] sm:$0xff] }
 0x21e   : > { %8926 = vmatpush3.bf16.msra.mxu0 %v8925_v61  ;;  %8958 = vmatpush3.bf16.msra.mxu1 %v8957_v41  ;;  %v8977_v61 = vpack.c.bf16 %v5511_v26, %v5510_v47  ;;  %v12151_v41 = vld [vmem:[#allocation3 + $0x28] sm:$0xff]  ;;  %v9011_v60 = vpack.c.bf16 %v5561_v2, %v5560_v15  ;;  %v5545_v44 = vld [vmem:[%s13811_s3 + $0x518] sm:$0xff]  ;;  %v5546_v57 = vld [vmem:[%s13811_s3 + $0x520] sm:$0xff] }
 0x21f   : > { %8928 = vmatprep.subr.bf16.mxu0 %v8927_v28  ;;  %8960 = vmatprep.subr.bf16.mxu1 %v8959_v31  ;;  %v5513_v28 = vld [vmem:[%s13811_s3 + $0x418] sm:$0xff]  ;;  %v5544_v31 = vld [vmem:[%s13811_s3 + $0x510] sm:$0xff]  ;;  %v5531_v62 = vld [vmem:[%s13811_s3 + $0x4a8] sm:$0xff] }
 0x220   : > { %v5563_v45 = vld [vmem:[%s13811_s3 + $0x5a8] sm:$0xff]  ;;  %v8981_v36 = vpack.c.bf16 %v5513_v28, %v5512_v17  ;;  %v5532_v27 = vld [vmem:[%s13811_s3 + $0x4b0] sm:$0xff]  ;;  %v5533_v46 = vld [vmem:[%s13811_s3 + $0x4b8] sm:$0xff] }
 0x221   : > { %v5547_v24 = vld [vmem:[%s13811_s3 + $0x528] sm:$0xff]  ;;  %v5564_v51 = vld [vmem:[%s13811_s3 + $0x5b0] sm:$0xff]  ;;  %v8987_v7 = vpack.c.bf16 %v5533_v46, %v5532_v27  ;;  %v5549_v40 = vld [vmem:[%s13811_s3 + $0x538] sm:$0xff] }
 0x222   : > { %8930 = vmatpush3.bf16.msra.mxu0 %v8929_v18  ;;  %8962 = vmatpush3.bf16.msra.mxu1 %v8961_v19  ;;  %v6047_v18 = vcombine.high %v12151_v41, %v12151_v41  ;;  %v5562_v19 = vld [vmem:[%s13811_s3 + $0x5a0] sm:$0xff]  ;;  %v9017_v49 = vpack.c.bf16 %v5547_v24, %v5546_v57  ;;  %v5548_v42 = vld [vmem:[%s13811_s3 + $0x530] sm:$0xff]  ;;  %v5535_v22 = vld [vmem:[%s13811_s3 + $0x4c8] sm:$0xff] }
 0x223   : > { %8932 = vmatprep.subr.bf16.mxu0 %v8931_v0  ;;  %8964 = vmatprep.subr.bf16.mxu1 %v8963_v30  ;;  %v9013_v0 = vpack.c.bf16 %v5545_v44, %v5544_v31  ;;  %v5515_v30 = vld [vmem:[%s13811_s3 + $0x428] sm:$0xff]  ;;  %v9015_v4 = vpack.c.bf16 %v5563_v45, %v5562_v19  ;;  %v5534_v20 = vld [vmem:[%s13811_s3 + $0x4c0] sm:$0xff]  ;;  %v9021_v56 = vpack.c.bf16 %v5549_v40, %v5548_v42  ;;  %v5536_v50 = vld [vmem:[%s13811_s3 + $0x4d0] sm:$0xff] }
 0x224   : > { %v5566_v12 = vld [vmem:[%s13811_s3 + $0x5c0] sm:$0xff]  ;;  %v8991_v35 = vpack.c.bf16 %v5535_v22, %v5534_v20  ;;  %v5551_v13 = vld [vmem:[%s13811_s3 + $0x548] sm:$0xff]  ;;  %v5537_v3 = vld [vmem:[%s13811_s3 + $0x4d8] sm:$0xff] }
 0x225   : > { %v5550_v53 = vld [vmem:[%s13811_s3 + $0x540] sm:$0xff]  ;;  %v5568_v23 = vld [vmem:[%s13811_s3 + $0x5d0] sm:$0xff]  ;;  %v5521_v26 = vld [vmem:[%s13811_s3 + $0x458] sm:$0xff] }
 0x226   : > { %8934 = vmatpush3.bf16.msra.mxu0 %v8933_v1  ;;  %8966 = vmatpush3.bf16.msra.mxu1 %v8965_v33  ;;  %v5565_v1 = vld [vmem:[%s13811_s3 + $0x5b8] sm:$0xff]  ;;  %v5520_v47 = vld [vmem:[%s13811_s3 + $0x450] sm:$0xff]  ;;  %v5538_v14 = vld [vmem:[%s13811_s3 + $0x4e0] sm:$0xff] }
 0x227   : > { %8936 = vmatprep.subr.bf16.mxu0 %v8935_v5  ;;  %8968 = vmatprep.subr.bf16.mxu1 %v8967_v59  ;;  %v5516_v5 = vld [vmem:[%s13811_s3 + $0x430] sm:$0xff]  ;;  %v5517_v59 = vld [vmem:[%s13811_s3 + $0x438] sm:$0xff]  ;;  %v9019_v25 = vpack.c.bf16 %v5565_v1, %v5564_v51  ;;  %v5539_v15 = vld [vmem:[%s13811_s3 + $0x4e8] sm:$0xff] }
 0x228   : > { %v5552_v37 = vld [vmem:[%s13811_s3 + $0x550] sm:$0xff]  ;;  %v5553_v43 = vld [vmem:[%s13811_s3 + $0x558] sm:$0xff]  ;;  %v5570_v2 = vld [vmem:[%s13811_s3 + $0x5e0] sm:$0xff]  ;;  %v8999_v28 = vpack.c.bf16 %v5539_v15, %v5538_v14 }
 0x229   : > { %v9029_v17 = vpack.c.bf16 %v5553_v43, %v5552_v37  ;;  %v5522_v31 = vld [vmem:[%s13811_s3 + $0x460] sm:$0xff]  ;;  %v5555_v44 = vld [vmem:[%s13811_s3 + $0x568] sm:$0xff]  ;;  %v5573_v19 = vld [vmem:[%s13811_s3 + $0x5f8] sm:$0xff] }
 0x22a   : > { %8938 = vmatpush3.bf16.msra.mxu0 %v8937_v63  ;;  %8970 = vmatpush3.bf16.msra.mxu1 %v8969_v38  ;;  %v5567_v63 = vld [vmem:[%s13811_s3 + $0x5c8] sm:$0xff]  ;;  %v8989_v38 = vpack.c.bf16 %v5517_v59, %v5516_v5  ;;  %v5590_v24 = vld [vmem:[%s13811_s3 + $0x680] sm:$0xff]  ;;  %v5592_v40 = vld [vmem:[%s13811_s3 + $0x690] sm:$0xff] }
 0x22b   : > { %8940 = vmatprep.subr.bf16.mxu0 %v8939_v52  ;;  %8972 = vmatprep.subr.bf16.mxu1 %v8971_v54  ;;  %v5518_v52 = vld [vmem:[%s13811_s3 + $0x440] sm:$0xff]  ;;  %v5519_v54 = vld [vmem:[%s13811_s3 + $0x448] sm:$0xff]  ;;  %v9023_v16 = vpack.c.bf16 %v5567_v63, %v5566_v12  ;;  %v5593_v20 = vld [vmem:[%s13811_s3 + $0x698] sm:$0xff] }
 0x22c   : > { %v5591_v27 = vld [vmem:[%s13811_s3 + $0x688] sm:$0xff]  ;;  %v5622_v46 = vld [vmem:[%s13811_s3 + $0x780] sm:$0xff]  ;;  %v5624_v22 = vld [vmem:[%s13811_s3 + $0x790] sm:$0xff] }
 0x22d   : > { %v5623_v51 = vld [vmem:[%s13811_s3 + $0x788] sm:$0xff]  ;;  %v5606_v42 = vld [vmem:[%s13811_s3 + $0x700] sm:$0xff]  ;;  %v12348_v63 = vld [vmem:[#allocation3 + $0x30] sm:$0xff] }
 0x22e   : > { %8942 = vmatpush3.bf16.msra.mxu0 %v8941_v34  ;;  %8974 = vmatpush3.bf16.msra.mxu1 %v8973_v11  ;;  %v5569_v34 = vld [vmem:[%s13811_s3 + $0x5d8] sm:$0xff]  ;;  %v8993_v11 = vpack.c.bf16 %v5519_v54, %v5518_v52  ;;  %v5575_v5 = vld [vmem:[%s13811_s3 + $0x608] sm:$0xff]  ;;  %v9071_v59 = vpack.c.bf16 %v5623_v51, %v5622_v46  ;;  %v5578_v37 = vld [vmem:[%s13811_s3 + $0x620] sm:$0xff] }
 0x22f   : > { %8976 = vmatprep.subr.bf16.mxu0 %v8975_v58  ;;  %9008 = vmatprep.subr.bf16.mxu1 %v9007_v10  ;;  %v9025_v58 = vpack.c.bf16 %v5551_v13, %v5550_v53  ;;  %v8995_v10 = vpack.c.bf16 %v5537_v3, %v5536_v50  ;;  %v9027_v21 = vpack.c.bf16 %v5569_v34, %v5568_v23  ;;  %v12356_v52 = vld [vmem:[#allocation3 + $0x38] sm:$0xff]  ;;  %v5608_v53 = vld [vmem:[%s13811_s3 + $0x710] sm:$0xff]  ;;  %v5594_v50 = vld [vmem:[%s13811_s3 + $0x6a0] sm:$0xff] }
 0x230   : > { %v5577_v54 = vld [vmem:[%s13811_s3 + $0x618] sm:$0xff]  ;;  %v5595_v3 = vld [vmem:[%s13811_s3 + $0x6a8] sm:$0xff]  ;;  %v6048_v23 = vcombine.high %v12348_v63, %v12348_v63  ;;  %v5596_v15 = vld [vmem:[%s13811_s3 + $0x6b0] sm:$0xff] }
 0x231   : > { %6287 = vmatmul.mubr.f32.vlgmr.msra.gmra.mrb[42].mxu0 %v11952_v32  ;;  %6357 = vmatmul.mubr.f32.vlgmr.msra.gmra.mrb[42].mxu1 %v11954_v9  ;;  %v8983_v32 = vpack.c.bf16 %v5531_v62, %v5530_v8  ;;  %v5514_v9 = vld [vmem:[%s13811_s3 + $0x420] sm:$0xff]  ;;  %v5540_v8 = vld [vmem:[%s13811_s3 + $0x4f0] sm:$0xff]  ;;  %v5541_v62 = vld [vmem:[%s13811_s3 + $0x4f8] sm:$0xff] }
 0x232   : > { %8978 = vmatpush3.bf16.msra.mxu0 %v8977_v61  ;;  %6426 = vmatprep.mubr.f32.mxu0 %v6046_v55  ;;  %v8985_v33 = vpack.c.bf16 %v5515_v30, %v5514_v9  ;;  %v5571_v61 = vld [vmem:[%s13811_s3 + $0x5e8] sm:$0xff]  ;;  %v5525_v9 = vld [vmem:[%s13811_s3 + $0x478] sm:$0xff]  ;;  %v5556_v30 = vld [vmem:[%s13811_s3 + $0x570] sm:$0xff] }
 0x233   : > { %9010 = vmatpush3.bf16.msra.mxu1 %v9009_v48  ;;  %6496 = vmatprep.mubr.f32.mxu1 %v6047_v18  ;;  %v8997_v48 = vpack.c.bf16 %v5521_v26, %v5520_v47  ;;  %v5523_v55 = vld [vmem:[%s13811_s3 + $0x468] sm:$0xff]  ;;  %v5572_v18 = vld [vmem:[%s13811_s3 + $0x5f0] sm:$0xff]  ;;  %v5609_v13 = vld [vmem:[%s13811_s3 + $0x718] sm:$0xff]  ;;  %v9047_v26 = vpack.c.bf16 %v5595_v3, %v5594_v50 }
 0x234   : > { %8980 = vmatprep.subr.bf16.mxu0 %v8979_v29  ;;  %9012 = vmatprep.subr.bf16.mxu1 %v9011_v60  ;;  %v5554_v29 = vld [vmem:[%s13811_s3 + $0x560] sm:$0xff]  ;;  %v9031_v60 = vpack.c.bf16 %v5571_v61, %v5570_v2  ;;  %v9001_v45 = vpack.c.bf16 %v5523_v55, %v5522_v31  ;;  %v9035_v57 = vpack.c.bf16 %v5573_v19, %v5572_v18  ;;  %v5611_v14 = vld [vmem:[%s13811_s3 + $0x728] sm:$0xff]  ;;  %v5597_v2 = vld [vmem:[%s13811_s3 + $0x6b8] sm:$0xff] }
 0x235   : > { %v5628_v61 = vld [vmem:[%s13811_s3 + $0x7b0] sm:$0xff]  ;;  %v9051_v31 = vpack.c.bf16 %v5597_v2, %v5596_v15  ;;  %v5599_v18 = vld [vmem:[%s13811_s3 + $0x6c8] sm:$0xff]  ;;  %v5630_v19 = vld [vmem:[%s13811_s3 + $0x7c0] sm:$0xff] }
 0x236   : > { %8982 = vmatpush3.bf16.msra.mxu0 %v8981_v36  ;;  %v9033_v36 = vpack.c.bf16 %v5555_v44, %v5554_v29  ;;  %v5580_v55 = vld [vmem:[%s13811_s3 + $0x630] sm:$0xff]  ;;  %v5581_v29 = vld [vmem:[%s13811_s3 + $0x638] sm:$0xff]  ;;  %v5619_v3 = vld [vmem:[%s13811_s3 + $0x768] sm:$0xff] }
 0x237   : > { %9014 = vmatpush3.bf16.msra.mxu1 %v9013_v0  ;;  %8984 = vmatprep.subr.bf16.mxu0 %v8983_v32  ;;  %v9003_v0 = vpack.c.bf16 %v5541_v62, %v5540_v8  ;;  %v5524_v32 = vld [vmem:[%s13811_s3 + $0x470] sm:$0xff]  ;;  %v5613_v8 = vld [vmem:[%s13811_s3 + $0x738] sm:$0xff]  ;;  %v5598_v62 = vld [vmem:[%s13811_s3 + $0x6c0] sm:$0xff] }
 0x238   : > { %9016 = vmatprep.subr.bf16.mxu1 %v9015_v4  ;;  %v5557_v4 = vld [vmem:[%s13811_s3 + $0x578] sm:$0xff]  ;;  %v9005_v1 = vpack.c.bf16 %v5525_v9, %v5524_v32  ;;  %v9055_v32 = vpack.c.bf16 %v5599_v18, %v5598_v62  ;;  %v5582_v9 = vld [vmem:[%s13811_s3 + $0x640] sm:$0xff]  ;;  %v5632_v51 = vld [vmem:[%s13811_s3 + $0x7d0] sm:$0xff] }
 0x239   : > { %v5601_v46 = vld [vmem:[%s13811_s3 + $0x6d8] sm:$0xff]  ;;  %v5655_v15 = vld [vmem:[%s13811_s3 + $0x888] sm:$0xff]  ;;  %v5686_v2 = vld [vmem:[%s13811_s3 + $0x980] sm:$0xff] }
 0x23a   : > { %8986 = vmatpush3.bf16.msra.mxu0 %v8985_v33  ;;  %v9037_v33 = vpack.c.bf16 %v5557_v4, %v5556_v30  ;;  %v5583_v30 = vld [vmem:[%s13811_s3 + $0x648] sm:$0xff]  ;;  %v5656_v18 = vld [vmem:[%s13811_s3 + $0x890] sm:$0xff] }
 0x23b   : > { %9018 = vmatpush3.bf16.msra.mxu1 %v9017_v49  ;;  %8988 = vmatprep.subr.bf16.mxu0 %v8987_v7  ;;  %v9039_v49 = vpack.c.bf16 %v5591_v27, %v5590_v24  ;;  %v5574_v7 = vld [vmem:[%s13811_s3 + $0x600] sm:$0xff]  ;;  %v5615_v24 = vld [vmem:[%s13811_s3 + $0x748] sm:$0xff]  ;;  %v5600_v27 = vld [vmem:[%s13811_s3 + $0x6d0] sm:$0xff] }
 0x23c   : > { %9020 = vmatprep.subr.bf16.mxu1 %v9019_v25  ;;  %v5607_v25 = vld [vmem:[%s13811_s3 + $0x708] sm:$0xff]  ;;  %v9041_v12 = vpack.c.bf16 %v5575_v5, %v5574_v7  ;;  %v9059_v7 = vpack.c.bf16 %v5601_v46, %v5600_v27  ;;  %v5584_v5 = vld [vmem:[%s13811_s3 + $0x650] sm:$0xff] }
 0x23d   : > { %v5672_v27 = vld [vmem:[%s13811_s3 + $0x910] sm:$0xff] }
 0x23e   : > { %8990 = vmatpush3.bf16.msra.mxu0 %v8989_v38  ;;  %v5625_v38 = vld [vmem:[%s13811_s3 + $0x798] sm:$0xff] }
 0x23f   : > { %9022 = vmatpush3.bf16.msra.mxu1 %v9021_v56  ;;  %8992 = vmatprep.subr.bf16.mxu0 %v8991_v35  ;;  %v5576_v56 = vld [vmem:[%s13811_s3 + $0x610] sm:$0xff]  ;;  %v9073_v35 = vpack.c.bf16 %v5607_v25, %v5606_v42  ;;  %v9075_v34 = vpack.c.bf16 %v5625_v38, %v5624_v22  ;;  %v5603_v22 = vld [vmem:[%s13811_s3 + $0x6e8] sm:$0xff] }
 0x240   : > { %9024 = vmatprep.subr.bf16.mxu1 %v9023_v16  ;;  %v9043_v16 = vpack.c.bf16 %v5593_v20, %v5592_v40  ;;  %v9045_v47 = vpack.c.bf16 %v5577_v54, %v5576_v56  ;;  %v5616_v42 = vld [vmem:[%s13811_s3 + $0x750] sm:$0xff]  ;;  %v5617_v40 = vld [vmem:[%s13811_s3 + $0x758] sm:$0xff]  ;;  %v5602_v20 = vld [vmem:[%s13811_s3 + $0x6e0] sm:$0xff] }
 0x241   : > { %v5635_v38 = vld [vmem:[%s13811_s3 + $0x7e8] sm:$0xff]  ;;  %v9063_v54 = vpack.c.bf16 %v5603_v22, %v5602_v20 }
 0x242   : > { %8994 = vmatpush3.bf16.msra.mxu0 %v8993_v11  ;;  %v5626_v11 = vld [vmem:[%s13811_s3 + $0x7a0] sm:$0xff] }
 0x243   : > { %9026 = vmatpush3.bf16.msra.mxu1 %v9025_v58  ;;  %8996 = vmatprep.subr.bf16.mxu0 %v8995_v10  ;;  %v5627_v58 = vld [vmem:[%s13811_s3 + $0x7a8] sm:$0xff]  ;;  %v6049_v10 = vcombine.high %v12356_v52, %v12356_v52 }
 0x244   : > { %9028 = vmatprep.subr.bf16.mxu1 %v9027_v21  ;;  %v5579_v21 = vld [vmem:[%s13811_s3 + $0x628] sm:$0xff]  ;;  %v9079_v43 = vpack.c.bf16 %v5627_v58, %v5626_v11  ;;  %v5636_v11 = vld [vmem:[%s13811_s3 + $0x7f0] sm:$0xff]  ;;  %v5637_v58 = vld [vmem:[%s13811_s3 + $0x7f8] sm:$0xff] }
 0x246   : > { %8998 = vmatpush3.bf16.msra.mxu0 %v8997_v48  ;;  %v5629_v48 = vld [vmem:[%s13811_s3 + $0x7b8] sm:$0xff] }
 0x247   : > { %9030 = vmatpush3.bf16.msra.mxu1 %v9029_v17  ;;  %9000 = vmatprep.subr.bf16.mxu0 %v8999_v28  ;;  %v9049_v17 = vpack.c.bf16 %v5579_v21, %v5578_v37  ;;  %v9083_v44 = vpack.c.bf16 %v5629_v48, %v5628_v61  ;;  %v5589_v37 = vld [vmem:[%s13811_s3 + $0x678] sm:$0xff]  ;;  %v5620_v21 = vld [vmem:[%s13811_s3 + $0x770] sm:$0xff]  ;;  %v5687_v61 = vld [vmem:[%s13811_s3 + $0x988] sm:$0xff] }
 0x248   : > { %9032 = vmatprep.subr.bf16.mxu1 %v9031_v60  ;;  %v5612_v60 = vld [vmem:[%s13811_s3 + $0x730] sm:$0xff] }
 0x24a   : > { %9002 = vmatpush3.bf16.msra.mxu0 %v9001_v45  ;;  %v5631_v45 = vld [vmem:[%s13811_s3 + $0x7c8] sm:$0xff] }
 0x24b   : > { %9034 = vmatpush3.bf16.msra.mxu1 %v9033_v36  ;;  %9004 = vmatprep.subr.bf16.mxu0 %v9003_v0  ;;  %v9053_v36 = vpack.c.bf16 %v5581_v29, %v5580_v55  ;;  %v9085_v0 = vpack.c.bf16 %v5613_v8, %v5612_v60  ;;  %v9087_v4 = vpack.c.bf16 %v5631_v45, %v5630_v19  ;;  %v5639_v55 = vld [vmem:[%s13811_s3 + $0x808] sm:$0xff]  ;;  %v5657_v19 = vld [vmem:[%s13811_s3 + $0x898] sm:$0xff]  ;;  %v5688_v45 = vld [vmem:[%s13811_s3 + $0x990] sm:$0xff] }
 0x24c   : > { %9036 = vmatprep.subr.bf16.mxu1 %v9035_v57  ;;  %v5614_v57 = vld [vmem:[%s13811_s3 + $0x740] sm:$0xff]  ;;  %v9135_v60 = vpack.c.bf16 %v5687_v61, %v5686_v2  ;;  %v5671_v8 = vld [vmem:[%s13811_s3 + $0x908] sm:$0xff]  ;;  %v9107_v46 = vpack.c.bf16 %v5657_v19, %v5656_v18  ;;  %v5648_v19 = vld [vmem:[%s13811_s3 + $0x850] sm:$0xff] }
 0x24d   : > { %v5646_v61 = vld [vmem:[%s13811_s3 + $0x840] sm:$0xff] }
 0x24e   : > { %9006 = vmatpush3.bf16.msra.mxu0 %v9005_v1  ;;  %v5633_v1 = vld [vmem:[%s13811_s3 + $0x7d8] sm:$0xff] }
 0x24f   : > { %9038 = vmatpush3.bf16.msra.mxu1 %v9037_v33  ;;  %9040 = vmatprep.subr.bf16.mxu0 %v9039_v49  ;;  %v9057_v33 = vpack.c.bf16 %v5583_v30, %v5582_v9  ;;  %v9089_v49 = vpack.c.bf16 %v5615_v24, %v5614_v57  ;;  %v9091_v25 = vpack.c.bf16 %v5633_v1, %v5632_v51  ;;  %v5640_v9 = vld [vmem:[%s13811_s3 + $0x810] sm:$0xff]  ;;  %v5641_v24 = vld [vmem:[%s13811_s3 + $0x818] sm:$0xff]  ;;  %v5658_v1 = vld [vmem:[%s13811_s3 + $0x8a0] sm:$0xff] }
 0x250   : > { %9072 = vmatprep.subr.bf16.mxu1 %v9071_v59  ;;  %v5585_v59 = vld [vmem:[%s13811_s3 + $0x658] sm:$0xff] }
 0x251   : > { %6427 = vmatmul.mubr.f32.vlgmr.msra.gmra.mrb[44].mxu0 %v12143_v6  ;;  %v9077_v6 = vpack.c.bf16 %v5609_v13, %v5608_v53  ;;  %v9061_v56 = vpack.c.bf16 %v5585_v59, %v5584_v5  ;;  %v5586_v53 = vld [vmem:[%s13811_s3 + $0x660] sm:$0xff]  ;;  %v5673_v51 = vld [vmem:[%s13811_s3 + $0x918] sm:$0xff] }
 0x252   : > { %6497 = vmatmul.mubr.f32.vlgmr.msra.gmra.mrb[44].mxu1 %v12151_v41  ;;  %9042 = vmatpush3.bf16.msra.mxu0 %v9041_v12  ;;  %v5610_v41 = vld [vmem:[%s13811_s3 + $0x720] sm:$0xff]  ;;  %v9141_v20 = vpack.c.bf16 %v5673_v51, %v5672_v27  ;;  %v5699_v27 = vld [vmem:[%s13811_s3 + $0x9e8] sm:$0xff] }
 0x253   : > { %6566 = vmatprep.mubr.f32.mxu0 %v6048_v23  ;;  %9074 = vmatpush3.bf16.msra.mxu1 %v9073_v35  ;;  %v9081_v28 = vpack.c.bf16 %v5611_v14, %v5610_v41  ;;  %v5634_v12 = vld [vmem:[%s13811_s3 + $0x7e0] sm:$0xff]  ;;  %v9093_v35 = vpack.c.bf16 %v5617_v40, %v5616_v42  ;;  %v5604_v23 = vld [vmem:[%s13811_s3 + $0x6f0] sm:$0xff]  ;;  %v9099_v41 = vpack.c.bf16 %v5637_v58, %v5636_v11  ;;  %v5691_v42 = vld [vmem:[%s13811_s3 + $0x9a8] sm:$0xff] }
 0x254   : > { %6636 = vmatprep.mubr.f32.mxu1 %v6049_v10  ;;  %9044 = vmatprep.subr.bf16.mxu0 %v9043_v16  ;;  %v5587_v16 = vld [vmem:[%s13811_s3 + $0x668] sm:$0xff]  ;;  %v5618_v13 = vld [vmem:[%s13811_s3 + $0x760] sm:$0xff]  ;;  %v9095_v50 = vpack.c.bf16 %v5635_v38, %v5634_v12  ;;  %v9109_v40 = vpack.c.bf16 %v5641_v24, %v5640_v9  ;;  %v5644_v58 = vld [vmem:[%s13811_s3 + $0x830] sm:$0xff] }
 0x255   : > { %9076 = vmatprep.subr.bf16.mxu1 %v9075_v34  ;;  %v5605_v34 = vld [vmem:[%s13811_s3 + $0x6f8] sm:$0xff]  ;;  %v9065_v10 = vpack.c.bf16 %v5587_v16, %v5586_v53  ;;  %v5654_v14 = vld [vmem:[%s13811_s3 + $0x880] sm:$0xff]  ;;  %v5643_v38 = vld [vmem:[%s13811_s3 + $0x828] sm:$0xff] }
 0x256   : > { %9046 = vmatpush3.bf16.msra.mxu0 %v9045_v47  ;;  %v9097_v47 = vpack.c.bf16 %v5619_v3, %v5618_v13  ;;  %v5690_v59 = vld [vmem:[%s13811_s3 + $0x9a0] sm:$0xff]  ;;  %v5661_v53 = vld [vmem:[%s13811_s3 + $0x8b8] sm:$0xff]  ;;  %v5692_v13 = vld [vmem:[%s13811_s3 + $0x9b0] sm:$0xff] }
 0x257   : > { %9078 = vmatpush3.bf16.msra.mxu1 %v9077_v6  ;;  %9048 = vmatprep.subr.bf16.mxu0 %v9047_v26  ;;  %v9067_v6 = vpack.c.bf16 %v5605_v34, %v5604_v23  ;;  %v5588_v26 = vld [vmem:[%s13811_s3 + $0x670] sm:$0xff]  ;;  %v5642_v12 = vld [vmem:[%s13811_s3 + $0x820] sm:$0xff]  ;;  %v5681_v9 = vld [vmem:[%s13811_s3 + $0x958] sm:$0xff] }
 0x258   : > { %9080 = vmatprep.subr.bf16.mxu1 %v9079_v43  ;;  %v5621_v43 = vld [vmem:[%s13811_s3 + $0x778] sm:$0xff]  ;;  %v9069_v48 = vpack.c.bf16 %v5589_v37, %v5588_v26  ;;  %v9113_v3 = vpack.c.bf16 %v5643_v38, %v5642_v12  ;;  %v5662_v37 = vld [vmem:[%s13811_s3 + $0x8c0] sm:$0xff]  ;;  %v5652_v38 = vld [vmem:[%s13811_s3 + $0x870] sm:$0xff] }
 0x259   : > { %v5677_v26 = vld [vmem:[%s13811_s3 + $0x938] sm:$0xff]  ;;  %v5698_v24 = vld [vmem:[%s13811_s3 + $0x9e0] sm:$0xff] }
 0x25a   : > { %9050 = vmatpush3.bf16.msra.mxu0 %v9049_v17  ;;  %v9101_v17 = vpack.c.bf16 %v5621_v43, %v5620_v21  ;;  %v5663_v21 = vld [vmem:[%s13811_s3 + $0x8c8] sm:$0xff] }
 0x25b   : > { %9082 = vmatpush3.bf16.msra.mxu1 %v9081_v28  ;;  %9052 = vmatprep.subr.bf16.mxu0 %v9051_v31  ;;  %v9103_v28 = vpack.c.bf16 %v5655_v15, %v5654_v14  ;;  %v5638_v31 = vld [vmem:[%s13811_s3 + $0x800] sm:$0xff]  ;;  %v5695_v43 = vld [vmem:[%s13811_s3 + $0x9c8] sm:$0xff]  ;;  %v9119_v2 = vpack.c.bf16 %v5663_v21, %v5662_v37  ;;  %v5720_v37 = vld [vmem:[%s13811_s3 + $0xa90] sm:$0xff] }
 0x25c   : > { %9084 = vmatprep.subr.bf16.mxu1 %v9083_v44  ;;  %v5670_v44 = vld [vmem:[%s13811_s3 + $0x900] sm:$0xff]  ;;  %v5721_v21 = vld [vmem:[%s13811_s3 + $0xa98] sm:$0xff] }
 0x25d   : > { %v9137_v57 = vpack.c.bf16 %v5671_v8, %v5670_v44  ;;  %v5697_v44 = vld [vmem:[%s13811_s3 + $0x9d8] sm:$0xff] }
 0x25e   : > { %9054 = vmatpush3.bf16.msra.mxu0 %v9053_v36  ;;  %v9105_v36 = vpack.c.bf16 %v5639_v55, %v5638_v31  ;;  %v5679_v31 = vld [vmem:[%s13811_s3 + $0x948] sm:$0xff]  ;;  %v5664_v55 = vld [vmem:[%s13811_s3 + $0x8d0] sm:$0xff] }
 0x25f   : > { %9086 = vmatpush3.bf16.msra.mxu1 %v9085_v0  ;;  %9056 = vmatprep.subr.bf16.mxu0 %v9055_v32  ;;  %v12550_v0 = vld [vmem:[#allocation3 + $0x40] sm:$0xff]  ;;  %v5689_v32 = vld [vmem:[%s13811_s3 + $0x998] sm:$0xff] }
 0x260   : > { %9088 = vmatprep.subr.bf16.mxu1 %v9087_v4  ;;  %v12558_v4 = vld [vmem:[#allocation3 + $0x48] sm:$0xff]  ;;  %v9139_v5 = vpack.c.bf16 %v5689_v32, %v5688_v45  ;;  %v5649_v45 = vld [vmem:[%s13811_s3 + $0x858] sm:$0xff] }
 0x262   : > { %9058 = vmatpush3.bf16.msra.mxu0 %v9057_v33  ;;  %v5659_v33 = vld [vmem:[%s13811_s3 + $0x8a8] sm:$0xff] }
 0x263   : > { %9090 = vmatpush3.bf16.msra.mxu1 %v9089_v49  ;;  %9060 = vmatprep.subr.bf16.mxu0 %v9059_v7  ;;  %v6050_v7 = vcombine.high %v12550_v0, %v12550_v0  ;;  %v9111_v22 = vpack.c.bf16 %v5659_v33, %v5658_v1  ;;  %v5650_v33 = vld [vmem:[%s13811_s3 + $0x860] sm:$0xff] }
 0x264   : > { %9092 = vmatprep.subr.bf16.mxu1 %v9091_v25  ;;  %v6051_v25 = vcombine.high %v12558_v4, %v12558_v4 }
 0x266   : > { %9062 = vmatpush3.bf16.msra.mxu0 %v9061_v56  ;;  %v7546_v29 = vpop.xlane.xlu0 %7545  ;;  %v9143_v56 = vpack.c.bf16 %v5691_v42, %v5690_v59  ;;  %v5683_v59 = vld [vmem:[%s13811_s3 + $0x968] sm:$0xff]  ;;  %v5668_v42 = vld [vmem:[%s13811_s3 + $0x8f0] sm:$0xff] }
 0x267   : > { %9094 = vmatpush3.bf16.msra.mxu1 %v9093_v35  ;;  %9064 = vmatprep.subr.bf16.mxu0 %v9063_v54  ;;  %v7547_v62 = vrot.slane %v7546_v29, 4  ;;  %v5675_v35 = vld [vmem:[%s13811_s3 + $0x928] sm:$0xff]  ;;  %v5660_v54 = vld [vmem:[%s13811_s3 + $0x8b0] sm:$0xff] }
 0x268   : > { %9096 = vmatprep.subr.bf16.mxu1 %v9095_v50  ;;  %v5693_v50 = vld [vmem:[%s13811_s3 + $0x9b8] sm:$0xff]  ;;  %v9115_v11 = vpack.c.bf16 %v5661_v53, %v5660_v54  ;;  %v5718_v53 = vld [vmem:[%s13811_s3 + $0xa80] sm:$0xff] }
 0x269   : > { %v7548_v30 = vadd.f32 %v7547_v62, %v7546_v29  ;;  %v5665_v29 = vld [vmem:[%s13811_s3 + $0x8d8] sm:$0xff] }
 0x26a   : > { %9066 = vmatpush3.bf16.msra.mxu0 %v9065_v10  ;;  %v5645_v10 = vld [vmem:[%s13811_s3 + $0x838] sm:$0xff]  ;;  %v9123_v18 = vpack.c.bf16 %v5665_v29, %v5664_v55  ;;  %v5722_v55 = vld [vmem:[%s13811_s3 + $0xaa0] sm:$0xff]  ;;  %v5723_v29 = vld [vmem:[%s13811_s3 + $0xaa8] sm:$0xff] }
 0x26b   : > { %9098 = vmatpush3.bf16.msra.mxu1 %v9097_v47  ;;  %9068 = vmatprep.subr.bf16.mxu0 %v9067_v6  ;;  %v7549_v49 = vrot.slane %v7548_v30, 2  ;;  %v5676_v47 = vld [vmem:[%s13811_s3 + $0x930] sm:$0xff]  ;;  %v9147_v6 = vpack.c.bf16 %v5693_v50, %v5692_v13  ;;  %v9117_v14 = vpack.c.bf16 %v5645_v10, %v5644_v58  ;;  %v5685_v54 = vld [vmem:[%s13811_s3 + $0x978] sm:$0xff]  ;;  %v5750_v13 = vld [vmem:[%s13811_s3 + $0xb80] sm:$0xff] }
 0x26c   : > { %9100 = vmatprep.subr.bf16.mxu1 %v9099_v41  ;;  %v5694_v41 = vld [vmem:[%s13811_s3 + $0x9c0] sm:$0xff]  ;;  %v9149_v15 = vpack.c.bf16 %v5677_v26, %v5676_v47  ;;  %v5751_v50 = vld [vmem:[%s13811_s3 + $0xb88] sm:$0xff]  ;;  %v12743_v26 = vld [vmem:[#allocation3 + $0x50] sm:$0xff] }
 0x26d   : > { %v5703_v58 = vld [vmem:[%s13811_s3 + $0xa08] sm:$0xff]  ;;  %v9199_v10 = vpack.c.bf16 %v5751_v50, %v5750_v13  ;;  %v5734_v47 = vld [vmem:[%s13811_s3 + $0xb00] sm:$0xff] }
 0x26e   : > { %9070 = vmatpush3.bf16.msra.mxu0 %v9069_v48  ;;  %v5647_v48 = vld [vmem:[%s13811_s3 + $0x848] sm:$0xff]  ;;  %v5742_v13 = vld [vmem:[%s13811_s3 + $0xb40] sm:$0xff] }
 0x26f   : > { %9102 = vmatpush3.bf16.msra.mxu1 %v9101_v17  ;;  %9104 = vmatprep.subr.bf16.mxu0 %v9103_v28  ;;  %v5678_v17 = vld [vmem:[%s13811_s3 + $0x940] sm:$0xff]  ;;  %v9151_v28 = vpack.c.bf16 %v5695_v43, %v5694_v41  ;;  %v9121_v8 = vpack.c.bf16 %v5647_v48, %v5646_v61  ;;  %v12751_v43 = vld [vmem:[#allocation3 + $0x58] sm:$0xff]  ;;  %v5704_v61 = vld [vmem:[%s13811_s3 + $0xa10] sm:$0xff] }
 0x270   : > { %9136 = vmatprep.subr.bf16.mxu1 %v9135_v60  ;;  %v5696_v60 = vld [vmem:[%s13811_s3 + $0x9d0] sm:$0xff]  ;;  %v9153_v62 = vpack.c.bf16 %v5679_v31, %v5678_v17  ;;  %v5705_v48 = vld [vmem:[%s13811_s3 + $0xa18] sm:$0xff] }
 0x271   : > { %6567 = vmatmul.mubr.f32.vlgmr.msra.gmra.mrb[46].mxu0 %v12348_v63  ;;  %v7550_v63 = vadd.f32 %v7549_v49, %v7548_v30  ;;  %v9155_v32 = vpack.c.bf16 %v5697_v44, %v5696_v60  ;;  %v5666_v30 = vld [vmem:[%s13811_s3 + $0x8e0] sm:$0xff]  ;;  %v5651_v49 = vld [vmem:[%s13811_s3 + $0x868] sm:$0xff]  ;;  %v5736_v17 = vld [vmem:[%s13811_s3 + $0xb10] sm:$0xff]  ;;  %v6052_v60 = vcombine.high %v12743_v26, %v12743_v26 }
 0x272   : > { %6637 = vmatmul.mubr.f32.vlgmr.msra.gmra.mrb[46].mxu1 %v12356_v52  ;;  %9106 = vmatpush3.bf16.msra.mxu0 %v9105_v36  ;;  %v5674_v52 = vld [vmem:[%s13811_s3 + $0x920] sm:$0xff]  ;;  %v5680_v36 = vld [vmem:[%s13811_s3 + $0x950] sm:$0xff]  ;;  %v5737_v31 = vld [vmem:[%s13811_s3 + $0xb18] sm:$0xff] }
 0x273   : > { %6706 = vmatprep.mubr.f32.mxu0 %v6050_v7  ;;  %9138 = vmatpush3.bf16.msra.mxu1 %v9137_v57  ;;  %v7551_v16 = vrot.slane %v7550_v63, 1  ;;  %v9145_v34 = vpack.c.bf16 %v5675_v35, %v5674_v52  ;;  %v5667_v57 = vld [vmem:[%s13811_s3 + $0x8e8] sm:$0xff]  ;;  %v9157_v51 = vpack.c.bf16 %v5681_v9, %v5680_v36  ;;  %v5682_v7 = vld [vmem:[%s13811_s3 + $0x960] sm:$0xff]  ;;  %v5653_v52 = vld [vmem:[%s13811_s3 + $0x878] sm:$0xff] }
 0x274   : > { %6776 = vmatprep.mubr.f32.mxu1 %v6051_v25  ;;  %9108 = vmatprep.subr.bf16.mxu0 %v9107_v46  ;;  %v9125_v46 = vpack.c.bf16 %v5649_v45, %v5648_v19  ;;  %v9127_v1 = vpack.c.bf16 %v5667_v57, %v5666_v30  ;;  %v5669_v25 = vld [vmem:[%s13811_s3 + $0x8f8] sm:$0xff]  ;;  %v9173_v19 = vpack.c.bf16 %v5705_v48, %v5704_v61  ;;  %v5706_v36 = vld [vmem:[%s13811_s3 + $0xa20] sm:$0xff]  ;;  %v5739_v30 = vld [vmem:[%s13811_s3 + $0xb28] sm:$0xff] }
 0x275   : > { %9140 = vmatprep.subr.bf16.mxu1 %v9139_v5  ;;  %v7552_v23 = vadd.f32 %v7551_v16, %v7550_v63  ;;  %v9159_v5 = vpack.c.bf16 %v5699_v27, %v5698_v24  ;;  %v5701_v63 = vld [vmem:[%s13811_s3 + $0x9f8] sm:$0xff]  ;;  %v9131_v12 = vpack.c.bf16 %v5669_v25, %v5668_v42  ;;  %v5719_v16 = vld [vmem:[%s13811_s3 + $0xa88] sm:$0xff]  ;;  %v9175_v45 = vpack.c.bf16 %v5723_v29, %v5722_v55  ;;  %v5724_v57 = vld [vmem:[%s13811_s3 + $0xab0] sm:$0xff] }
 0x276   : > { %9110 = vmatpush3.bf16.msra.mxu0 %v9109_v40  ;;  %v5700_v40 = vld [vmem:[%s13811_s3 + $0x9f0] sm:$0xff]  ;;  %v5725_v24 = vld [vmem:[%s13811_s3 + $0xab8] sm:$0xff]  ;;  %v5763_v55 = vld [vmem:[%s13811_s3 + $0xbe8] sm:$0xff] }
 0x277   : > { %9142 = vmatpush3.bf16.msra.mxu1 %v9141_v20  ;;  %9112 = vmatprep.subr.bf16.mxu0 %v9111_v22  ;;  %9488 = vpush %v7552_v23  ;;  %v9129_v20 = vpack.c.bf16 %v5651_v49, %v5650_v33  ;;  %v9161_v22 = vpack.c.bf16 %v5683_v59, %v5682_v7  ;;  %v5709_v59 = vld [vmem:[%s13811_s3 + $0xa38] sm:$0xff]  ;;  %v5740_v42 = vld [vmem:[%s13811_s3 + $0xb30] sm:$0xff] }
 0x278   : > { %9144 = vmatprep.subr.bf16.mxu1 %v9143_v56  ;;  %v5684_v56 = vld [vmem:[%s13811_s3 + $0x970] sm:$0xff]  ;;  %v9163_v35 = vpack.c.bf16 %v5701_v63, %v5700_v40  ;;  %v9179_v7 = vpack.c.bf16 %v5725_v24, %v5724_v57  ;;  %v5741_v63 = vld [vmem:[%s13811_s3 + $0xb38] sm:$0xff] }
 0x279   : > { %v9165_v23 = vpack.c.bf16 %v5685_v54, %v5684_v56  ;;  %v5745_v48 = vld [vmem:[%s13811_s3 + $0xb58] sm:$0xff]  ;;  %v5716_v24 = vld [vmem:[%s13811_s3 + $0xa70] sm:$0xff] }
 0x27a   : > { %9114 = vmatpush3.bf16.msra.mxu0 %v9113_v3  ;;  %v9133_v3 = vpack.c.bf16 %v5653_v52, %v5652_v38  ;;  %v5759_v38 = vld [vmem:[%s13811_s3 + $0xbc8] sm:$0xff] }
 0x27b   : > { %9146 = vmatpush3.bf16.msra.mxu1 %v9145_v34  ;;  %9116 = vmatprep.subr.bf16.mxu0 %v9115_v11  ;;  %v9167_v34 = vpack.c.bf16 %v5719_v16, %v5718_v53  ;;  %v5702_v11 = vld [vmem:[%s13811_s3 + $0xa00] sm:$0xff]  ;;  %v5711_v16 = vld [vmem:[%s13811_s3 + $0xa48] sm:$0xff] }
 0x27c   : > { %9148 = vmatprep.subr.bf16.mxu1 %v9147_v6  ;;  %v5735_v6 = vld [vmem:[%s13811_s3 + $0xb08] sm:$0xff]  ;;  %v9169_v41 = vpack.c.bf16 %v5703_v58, %v5702_v11  ;;  %v5710_v53 = vld [vmem:[%s13811_s3 + $0xa40] sm:$0xff]  ;;  %v5729_v11 = vld [vmem:[%s13811_s3 + $0xad8] sm:$0xff] }
 0x27d   : > { %v5760_v58 = vld [vmem:[%s13811_s3 + $0xbd0] sm:$0xff] }
 0x27e   : > { %9118 = vmatpush3.bf16.msra.mxu0 %v9117_v14  ;;  %v5752_v14 = vld [vmem:[%s13811_s3 + $0xb90] sm:$0xff] }
 0x27f   : > { %9150 = vmatpush3.bf16.msra.mxu1 %v9149_v15  ;;  %9120 = vmatprep.subr.bf16.mxu0 %v9119_v2  ;;  %v5753_v15 = vld [vmem:[%s13811_s3 + $0xb98] sm:$0xff]  ;;  %v9201_v2 = vpack.c.bf16 %v5735_v6, %v5734_v47  ;;  %v9185_v6 = vpack.c.bf16 %v5711_v16, %v5710_v53  ;;  %v12958_v53 = vld [vmem:[#allocation3 + $0x68] sm:$0xff]  ;;  %v5816_v16 = vld [vmem:[%s13811_s3 + $0xd90] sm:$0xff] }
 0x280   : > { %9152 = vmatprep.subr.bf16.mxu1 %v9151_v28  ;;  %v9171_v28 = vpack.c.bf16 %v5721_v21, %v5720_v37  ;;  %v9203_v44 = vpack.c.bf16 %v5753_v15, %v5752_v14  ;;  %v5713_v14 = vld [vmem:[%s13811_s3 + $0xa58] sm:$0xff]  ;;  %v5744_v15 = vld [vmem:[%s13811_s3 + $0xb50] sm:$0xff] }
 0x282   : > { %9122 = vmatpush3.bf16.msra.mxu0 %v9121_v8  ;;  %v5754_v8 = vld [vmem:[%s13811_s3 + $0xba0] sm:$0xff] }
 0x283   : > { %9154 = vmatpush3.bf16.msra.mxu1 %v9153_v62  ;;  %9124 = vmatprep.subr.bf16.mxu0 %v9123_v18  ;;  %v5755_v62 = vld [vmem:[%s13811_s3 + $0xba8] sm:$0xff]  ;;  %v6053_v18 = vcombine.high %v12751_v43, %v12751_v43 }
 0x284   : > { %9156 = vmatprep.subr.bf16.mxu1 %v9155_v32  ;;  %v5707_v32 = vld [vmem:[%s13811_s3 + $0xa28] sm:$0xff]  ;;  %v9207_v9 = vpack.c.bf16 %v5755_v62, %v5754_v8  ;;  %v5714_v8 = vld [vmem:[%s13811_s3 + $0xa60] sm:$0xff] }
 0x285   : > { %v9177_v33 = vpack.c.bf16 %v5707_v32, %v5706_v36  ;;  %v5715_v62 = vld [vmem:[%s13811_s3 + $0xa68] sm:$0xff]  ;;  %v5733_v36 = vld [vmem:[%s13811_s3 + $0xaf8] sm:$0xff]  ;;  %v5764_v32 = vld [vmem:[%s13811_s3 + $0xbf0] sm:$0xff] }
 0x286   : > { %9126 = vmatpush3.bf16.msra.mxu0 %v9125_v46  ;;  %v5756_v46 = vld [vmem:[%s13811_s3 + $0xbb0] sm:$0xff] }
 0x287   : > { %9158 = vmatpush3.bf16.msra.mxu1 %v9157_v51  ;;  %9128 = vmatprep.subr.bf16.mxu0 %v9127_v1  ;;  %v5757_v51 = vld [vmem:[%s13811_s3 + $0xbb8] sm:$0xff] }
 0x288   : > { %9160 = vmatprep.subr.bf16.mxu1 %v9159_v5  ;;  %v5708_v5 = vld [vmem:[%s13811_s3 + $0xa30] sm:$0xff]  ;;  %v9211_v40 = vpack.c.bf16 %v5757_v51, %v5756_v46 }
 0x289   : > { %v9181_v56 = vpack.c.bf16 %v5709_v59, %v5708_v5  ;;  %v5748_v46 = vld [vmem:[%s13811_s3 + $0xb70] sm:$0xff]  ;;  %v5815_v5 = vld [vmem:[%s13811_s3 + $0xd88] sm:$0xff] }
 0x28a   : > { %9130 = vmatpush3.bf16.msra.mxu0 %v9129_v20  ;;  %v5726_v20 = vld [vmem:[%s13811_s3 + $0xac0] sm:$0xff] }
 0x28b   : > { %9162 = vmatpush3.bf16.msra.mxu1 %v9161_v22  ;;  %9132 = vmatprep.subr.bf16.mxu0 %v9131_v12  ;;  %v5727_v22 = vld [vmem:[%s13811_s3 + $0xac8] sm:$0xff]  ;;  %v5758_v12 = vld [vmem:[%s13811_s3 + $0xbc0] sm:$0xff] }
 0x28c   : > { %9164 = vmatprep.subr.bf16.mxu1 %v9163_v35  ;;  %v9213_v35 = vpack.c.bf16 %v5741_v63, %v5740_v42  ;;  %v9183_v54 = vpack.c.bf16 %v5727_v22, %v5726_v20  ;;  %v5766_v63 = vld [vmem:[%s13811_s3 + $0xc00] sm:$0xff]  ;;  %v5767_v20 = vld [vmem:[%s13811_s3 + $0xc08] sm:$0xff] }
 0x28e   : > { %9134 = vmatpush3.bf16.msra.mxu0 %v9133_v3  ;;  %v9215_v3 = vpack.c.bf16 %v5759_v38, %v5758_v12  ;;  %v5798_v12 = vld [vmem:[%s13811_s3 + $0xd00] sm:$0xff]  ;;  %v5799_v38 = vld [vmem:[%s13811_s3 + $0xd08] sm:$0xff] }
 0x28f   : > { %9166 = vmatpush3.bf16.msra.mxu1 %v9165_v23  ;;  %9168 = vmatprep.subr.bf16.mxu0 %v9167_v34  ;;  %v5743_v23 = vld [vmem:[%s13811_s3 + $0xb48] sm:$0xff]  ;;  %v5728_v34 = vld [vmem:[%s13811_s3 + $0xad0] sm:$0xff] }
 0x290   : > { %9200 = vmatprep.subr.bf16.mxu1 %v9199_v10  ;;  %v5761_v10 = vld [vmem:[%s13811_s3 + $0xbd8] sm:$0xff]  ;;  %v9217_v37 = vpack.c.bf16 %v5743_v23, %v5742_v13  ;;  %v9187_v21 = vpack.c.bf16 %v5729_v11, %v5728_v34  ;;  %v5800_v34 = vld [vmem:[%s13811_s3 + $0xd10] sm:$0xff] }
 0x291   : > { %6707 = vmatmul.mubr.f32.vlgmr.msra.gmra.mrb[48].mxu0 %v12550_v0  ;;  %v9205_v0 = vpack.c.bf16 %v5737_v31, %v5736_v17  ;;  %v9219_v61 = vpack.c.bf16 %v5761_v10, %v5760_v58  ;;  %v5730_v17 = vld [vmem:[%s13811_s3 + $0xae0] sm:$0xff]  ;;  %v5817_v13 = vld [vmem:[%s13811_s3 + $0xd98] sm:$0xff] }
 0x292   : > { %6777 = vmatmul.mubr.f32.vlgmr.msra.gmra.mrb[48].mxu1 %v12558_v4  ;;  %9170 = vmatpush3.bf16.msra.mxu0 %v9169_v41  ;;  %v5738_v4 = vld [vmem:[%s13811_s3 + $0xb20] sm:$0xff]  ;;  %v7563_v27 = vpop.xlane.xlu0 %7562  ;;  %v5712_v41 = vld [vmem:[%s13811_s3 + $0xa50] sm:$0xff]  ;;  %v5769_v23 = vld [vmem:[%s13811_s3 + $0xc18] sm:$0xff] }
 0x293   : > { %6846 = vmatprep.mubr.f32.mxu0 %v6052_v60  ;;  %9202 = vmatpush3.bf16.msra.mxu1 %v9201_v2  ;;  %v7564_v1 = vrot.slane %v7563_v27, 4  ;;  %v9209_v49 = vpack.c.bf16 %v5739_v30, %v5738_v4  ;;  %v5762_v31 = vld [vmem:[%s13811_s3 + $0xbe0] sm:$0xff]  ;;  %v9189_v29 = vpack.c.bf16 %v5713_v14, %v5712_v41  ;;  %v9221_v60 = vpack.c.bf16 %v5745_v48, %v5744_v15  ;;  %v5765_v4 = vld [vmem:[%s13811_s3 + $0xbf8] sm:$0xff]  ;;  %v5819_v41 = vld [vmem:[%s13811_s3 + $0xda8] sm:$0xff] }
 0x294   : > { %6916 = vmatprep.mubr.f32.mxu1 %v6053_v18  ;;  %9172 = vmatprep.subr.bf16.mxu0 %v9171_v28  ;;  %v5731_v28 = vld [vmem:[%s13811_s3 + $0xae8] sm:$0xff]  ;;  %v5746_v18 = vld [vmem:[%s13811_s3 + $0xb60] sm:$0xff]  ;;  %v9227_v51 = vpack.c.bf16 %v5765_v4, %v5764_v32  ;;  %v5801_v58 = vld [vmem:[%s13811_s3 + $0xd18] sm:$0xff]  ;;  %v6055_v14 = vcombine.high %v12958_v53, %v12958_v53 }
 0x295   : > { %9204 = vmatprep.subr.bf16.mxu1 %v9203_v44  ;;  %v7565_v25 = vadd.f32 %v7564_v1, %v7563_v27  ;;  %v9191_v44 = vpack.c.bf16 %v5731_v28, %v5730_v17  ;;  %v5717_v27 = vld [vmem:[%s13811_s3 + $0xa78] sm:$0xff]  ;;  %v5786_v10 = vld [vmem:[%s13811_s3 + $0xca0] sm:$0xff]  ;;  %v5771_v48 = vld [vmem:[%s13811_s3 + $0xc28] sm:$0xff] }
 0x296   : > { %9174 = vmatpush3.bf16.msra.mxu0 %v9173_v19  ;;  %v9223_v19 = vpack.c.bf16 %v5763_v55, %v5762_v31  ;;  %v5749_v1 = vld [vmem:[%s13811_s3 + $0xb78] sm:$0xff]  ;;  %v9197_v59 = vpack.c.bf16 %v5717_v27, %v5716_v24  ;;  %v5803_v28 = vld [vmem:[%s13811_s3 + $0xd28] sm:$0xff]  ;;  %v5788_v31 = vld [vmem:[%s13811_s3 + $0xcb0] sm:$0xff] }
 0x297   : > { %9206 = vmatpush3.bf16.msra.mxu1 %v9205_v0  ;;  %9176 = vmatprep.subr.bf16.mxu0 %v9175_v45  ;;  %v7566_v52 = vrot.slane %v7565_v25, 2  ;;  %v5747_v0 = vld [vmem:[%s13811_s3 + $0xb68] sm:$0xff]  ;;  %v5732_v45 = vld [vmem:[%s13811_s3 + $0xaf0] sm:$0xff]  ;;  %v5789_v55 = vld [vmem:[%s13811_s3 + $0xcb8] sm:$0xff] }
 0x298   : > { %9208 = vmatprep.subr.bf16.mxu1 %v9207_v9  ;;  %v9193_v9 = vpack.c.bf16 %v5715_v62, %v5714_v8  ;;  %v9225_v30 = vpack.c.bf16 %v5747_v0, %v5746_v18  ;;  %v9195_v57 = vpack.c.bf16 %v5733_v36, %v5732_v45  ;;  %v9243_v62 = vpack.c.bf16 %v5789_v55, %v5788_v31  ;;  %v5772_v18 = vld [vmem:[%s13811_s3 + $0xc30] sm:$0xff]  ;;  %v5805_v36 = vld [vmem:[%s13811_s3 + $0xd38] sm:$0xff]  ;;  %v5790_v32 = vld [vmem:[%s13811_s3 + $0xcc0] sm:$0xff] }
 0x299   : > { %v7567_v50 = vadd.f32 %v7566_v52, %v7565_v25  ;;  %v9229_v25 = vpack.c.bf16 %v5749_v1, %v5748_v46  ;;  %v12950_v52 = vld [vmem:[#allocation3 + $0x60] sm:$0xff]  ;;  %v5804_v0 = vld [vmem:[%s13811_s3 + $0xd30] sm:$0xff]  ;;  %v5791_v4 = vld [vmem:[%s13811_s3 + $0xcc8] sm:$0xff] }
 0x29a   : > { %9178 = vmatpush3.bf16.msra.mxu0 %v9177_v33  ;;  %v5782_v33 = vld [vmem:[%s13811_s3 + $0xc80] sm:$0xff]  ;;  %v9277_v24 = vpack.c.bf16 %v5805_v36, %v5804_v0  ;;  %v9247_v27 = vpack.c.bf16 %v5791_v4, %v5790_v32  ;;  %v5847_v31 = vld [vmem:[%s13811_s3 + $0xe88] sm:$0xff]  ;;  %v13152_v36 = vld [vmem:[#allocation3 + $0x70] sm:$0xff] }
 0x29b   : > { %9210 = vmatpush3.bf16.msra.mxu1 %v9209_v49  ;;  %9180 = vmatprep.subr.bf16.mxu0 %v9179_v7  ;;  %v7568_v47 = vrot.slane %v7567_v50, 1  ;;  %v5783_v49 = vld [vmem:[%s13811_s3 + $0xc88] sm:$0xff]  ;;  %v5814_v7 = vld [vmem:[%s13811_s3 + $0xd80] sm:$0xff]  ;;  %v5848_v32 = vld [vmem:[%s13811_s3 + $0xe90] sm:$0xff] }
 0x29c   : > { %9212 = vmatprep.subr.bf16.mxu1 %v9211_v40  ;;  %v9231_v40 = vpack.c.bf16 %v5783_v49, %v5782_v33  ;;  %v9263_v22 = vpack.c.bf16 %v5815_v5, %v5814_v7  ;;  %v5774_v46 = vld [vmem:[%s13811_s3 + $0xc40] sm:$0xff]  ;;  %v5807_v49 = vld [vmem:[%s13811_s3 + $0xd48] sm:$0xff]  ;;  %v5792_v7 = vld [vmem:[%s13811_s3 + $0xcd0] sm:$0xff] }
 0x29d   : > { %v7569_v2 = vadd.f32 %v7568_v47, %v7567_v50  ;;  %v9265_v50 = vpack.c.bf16 %v5799_v38, %v5798_v12  ;;  %v5787_v47 = vld [vmem:[%s13811_s3 + $0xca8] sm:$0xff]  ;;  %v5806_v1 = vld [vmem:[%s13811_s3 + $0xd40] sm:$0xff]  ;;  %v5793_v5 = vld [vmem:[%s13811_s3 + $0xcd8] sm:$0xff] }
 0x29e   : > { %9182 = vmatpush3.bf16.msra.mxu0 %v9181_v56  ;;  %v5784_v56 = vld [vmem:[%s13811_s3 + $0xc90] sm:$0xff]  ;;  %v5878_v55 = vld [vmem:[%s13811_s3 + $0xf80] sm:$0xff]  ;;  %v5849_v4 = vld [vmem:[%s13811_s3 + $0xe98] sm:$0xff] }
 0x29f   : > { %9214 = vmatpush3.bf16.msra.mxu1 %v9213_v35  ;;  %9184 = vmatprep.subr.bf16.mxu0 %v9183_v54  ;;  %9490 = vpush %v7569_v2  ;;  %v5785_v35 = vld [vmem:[%s13811_s3 + $0xc98] sm:$0xff]  ;;  %v9233_v54 = vpack.c.bf16 %v5767_v20, %v5766_v63  ;;  %v9239_v2 = vpack.c.bf16 %v5787_v47, %v5786_v10  ;;  %v5776_v20 = vld [vmem:[%s13811_s3 + $0xc50] sm:$0xff]  ;;  %v5811_v47 = vld [vmem:[%s13811_s3 + $0xd68] sm:$0xff] }
 0x2a0   : > { %9216 = vmatprep.subr.bf16.mxu1 %v9215_v3  ;;  %v5768_v3 = vld [vmem:[%s13811_s3 + $0xc10] sm:$0xff]  ;;  %v9235_v11 = vpack.c.bf16 %v5785_v35, %v5784_v56  ;;  %v9251_v63 = vpack.c.bf16 %v5793_v5, %v5792_v7  ;;  %v5809_v56 = vld [vmem:[%s13811_s3 + $0xd58] sm:$0xff]  ;;  %v5794_v35 = vld [vmem:[%s13811_s3 + $0xce0] sm:$0xff] }
 0x2a1   : > { %v9237_v15 = vpack.c.bf16 %v5769_v23, %v5768_v3  ;;  %v5808_v12 = vld [vmem:[%s13811_s3 + $0xd50] sm:$0xff]  ;;  %v5862_v0 = vld [vmem:[%s13811_s3 + $0xf00] sm:$0xff]  ;;  %v5851_v5 = vld [vmem:[%s13811_s3 + $0xea8] sm:$0xff] }
 0x2a2   : > { %9186 = vmatpush3.bf16.msra.mxu0 %v9185_v6  ;;  %v6054_v6 = vcombine.high %v12950_v52, %v12950_v52  ;;  %v9285_v3 = vpack.c.bf16 %v5809_v56, %v5808_v12  ;;  %v5850_v7 = vld [vmem:[%s13811_s3 + $0xea0] sm:$0xff] }
 0x2a3   : > { %9218 = vmatpush3.bf16.msra.mxu1 %v9217_v37  ;;  %9188 = vmatprep.subr.bf16.mxu0 %v9187_v21  ;;  %v9267_v37 = vpack.c.bf16 %v5817_v13, %v5816_v16  ;;  %v5818_v21 = vld [vmem:[%s13811_s3 + $0xda0] sm:$0xff]  ;;  %v5827_v13 = vld [vmem:[%s13811_s3 + $0xde8] sm:$0xff] }
 0x2a4   : > { %9220 = vmatprep.subr.bf16.mxu1 %v9219_v61  ;;  %v5770_v61 = vld [vmem:[%s13811_s3 + $0xc20] sm:$0xff]  ;;  %v9271_v17 = vpack.c.bf16 %v5819_v41, %v5818_v21  ;;  %v5828_v21 = vld [vmem:[%s13811_s3 + $0xdf0] sm:$0xff]  ;;  %v5829_v41 = vld [vmem:[%s13811_s3 + $0xdf8] sm:$0xff] }
 0x2a5   : > { %v5826_v16 = vld [vmem:[%s13811_s3 + $0xde0] sm:$0xff] }
 0x2a6   : > { %9190 = vmatpush3.bf16.msra.mxu0 %v9189_v29  ;;  %v5820_v29 = vld [vmem:[%s13811_s3 + $0xdb0] sm:$0xff]  ;;  %v9287_v10 = vpack.c.bf16 %v5827_v13, %v5826_v16  ;;  %v5834_v12 = vld [vmem:[%s13811_s3 + $0xe20] sm:$0xff]  ;;  %v5853_v13 = vld [vmem:[%s13811_s3 + $0xeb8] sm:$0xff] }
 0x2a7   : > { %9222 = vmatpush3.bf16.msra.mxu1 %v9221_v60  ;;  %9192 = vmatprep.subr.bf16.mxu0 %v9191_v44  ;;  %v5821_v60 = vld [vmem:[%s13811_s3 + $0xdb8] sm:$0xff]  ;;  %v9241_v44 = vpack.c.bf16 %v5771_v48, %v5770_v61  ;;  %v5812_v48 = vld [vmem:[%s13811_s3 + $0xd70] sm:$0xff] }
 0x2a8   : > { %9224 = vmatprep.subr.bf16.mxu1 %v9223_v19  ;;  %s9489_s17 = spop %9488  ;;  %v5773_v19 = vld [vmem:[%s13811_s3 + $0xc38] sm:$0xff]  ;;  %v9275_v45 = vpack.c.bf16 %v5821_v60, %v5820_v29  ;;  %v5879_v29 = vld [vmem:[%s13811_s3 + $0xf88] sm:$0xff]  ;;  %v5852_v16 = vld [vmem:[%s13811_s3 + $0xeb0] sm:$0xff] }
 0x2a9   : > { %v7554_v42 = vstv %s9489_s17  ;;  %v5781_v61 = vld [vmem:[%s13811_s3 + $0xc78] sm:$0xff]  ;;  %s9582_s17 = scalar_lea.vmem %s7612_s16, 64 }
 0x2aa   : > { %9194 = vmatpush3.bf16.msra.mxu0 %v9193_v9  ;;  %7557 = vst.msk [vmem:[%s309_s9] sm:$0x1] %vm7556_vm9, %v7554_v42  ;;  %v5822_v9 = vld [vmem:[%s13811_s3 + $0xdc0] sm:$0xff]  ;;  %v5825_v42 = vld [vmem:[%s13811_s3 + $0xdd8] sm:$0xff]  ;;  %p9583_p9 = scmp.ne.s32.totalorder %s7612_s16, %s9582_s17  ;;  %s9653_s9 = smov [#allocation7]  }
 0x2ab   : > { %9226 = vmatpush3.bf16.msra.mxu1 %v9225_v30  ;;  %9196 = vmatprep.subr.bf16.mxu0 %v9195_v57  ;;  %v5823_v30 = vld [vmem:[%s13811_s3 + $0xdc8] sm:$0xff]  ;;  %v9245_v57 = vpack.c.bf16 %v5773_v19, %v5772_v18  ;;  %v9327_v19 = vpack.c.bf16 %v5879_v29, %v5878_v55  ;;  %v5856_v55 = vld [vmem:[%s13811_s3 + $0xed0] sm:$0xff]  ;;  %v5857_v29 = vld [vmem:[%s13811_s3 + $0xed8] sm:$0xff]  ;;  %s9586_s18 = sshll.u32 %s9653_s9, 4  ;;  %s9587_s18 = int_to_ptr.vmem [resolvable:$false] %s9586_s18 }
 0x2ac   : > { %9228 = vmatprep.subr.bf16.mxu1 %v9227_v51  ;;  %v5775_v51 = vld [vmem:[%s13811_s3 + $0xc48] sm:$0xff]  ;;  %v9279_v33 = vpack.c.bf16 %v5823_v30, %v5822_v9  ;;  %v13160_v30 = vld [vmem:[#allocation3 + $0x78] sm:$0xff]  ;;  %p9584_p10 = pnand %p9583_p9, %p9732_p5  ;;  %p9589_p13 = scmp.lt.s32.totalorder %s7612_s16, %s9587_s18 }
 0x2ad   : > { %v5831_v18 = vld [vmem:[%s13811_s3 + $0xe08] sm:$0xff] }
 0x2ae   : > { %9198 = vmatpush3.bf16.msra.mxu0 %v9197_v59  ;;  %v5824_v59 = vld [vmem:[%s13811_s3 + $0xdd0] sm:$0xff]  ;;  %p9585_p12 = pneg %p9584_p10 }
 0x2af   : > { %9230 = vmatpush3.bf16.msra.mxu1 %v9229_v25  ;;  %9232 = vmatprep.subr.bf16.mxu0 %v9231_v40  ;;  %v9249_v25 = vpack.c.bf16 %v5775_v51, %v5774_v46  ;;  %v9281_v40 = vpack.c.bf16 %v5807_v49, %v5806_v1  ;;  %v9283_v38 = vpack.c.bf16 %v5825_v42, %v5824_v59  ;;  %v5832_v46 = vld [vmem:[%s13811_s3 + $0xe10] sm:$0xff]  ;;  %v5833_v51 = vld [vmem:[%s13811_s3 + $0xe18] sm:$0xff] }
 0x2b0   : > { %9264 = vmatprep.subr.bf16.mxu1 %v9263_v22  ;;  %v5777_v22 = vld [vmem:[%s13811_s3 + $0xc58] sm:$0xff]  ;;  %v5864_v1 = vld [vmem:[%s13811_s3 + $0xf10] sm:$0xff]  ;;  %v6056_v59 = vcombine.high %v13152_v36, %v13152_v36 }
 0x2b1   : > { %6847 = vmatmul.mubr.f32.vlgmr.msra.gmra.mrb[50].mxu0 %v12743_v26  ;;  %v9269_v26 = vpack.c.bf16 %v5801_v58, %v5800_v34  ;;  %v5778_v34 = vld [vmem:[%s13811_s3 + $0xc60] sm:$0xff]  ;;  %v5865_v49 = vld [vmem:[%s13811_s3 + $0xf18] sm:$0xff] }
 0x2b2   : > { %6917 = vmatmul.mubr.f32.vlgmr.msra.gmra.mrb[50].mxu1 %v12751_v43  ;;  %9234 = vmatpush3.bf16.msra.mxu0 %v9233_v54  ;;  %v5802_v43 = vld [vmem:[%s13811_s3 + $0xd20] sm:$0xff]  ;;  %v5795_v54 = vld [vmem:[%s13811_s3 + $0xce8] sm:$0xff] }
 0x2b3   : > { %6986 = vmatprep.mubr.f32.mxu0 %v6054_v6  ;;  %9266 = vmatpush3.bf16.msra.mxu1 %v9265_v50  ;;  %v9273_v8 = vpack.c.bf16 %v5803_v28, %v5802_v43  ;;  %v9253_v50 = vpack.c.bf16 %v5777_v22, %v5776_v20  ;;  %v9255_v23 = vpack.c.bf16 %v5795_v54, %v5794_v35  ;;  %v5810_v58 = vld [vmem:[%s13811_s3 + $0xd60] sm:$0xff]  ;;  %v5796_v6 = vld [vmem:[%s13811_s3 + $0xcf0] sm:$0xff]  ;;  %v5867_v54 = vld [vmem:[%s13811_s3 + $0xf28] sm:$0xff] }
 0x2b4   : > { %7056 = vmatprep.mubr.f32.mxu1 %v6055_v14  ;;  %9236 = vmatprep.subr.bf16.mxu0 %v9235_v11  ;;  %v5779_v11 = vld [vmem:[%s13811_s3 + $0xc68] sm:$0xff]  ;;  %v9291_v43 = vpack.c.bf16 %v5829_v41, %v5828_v21  ;;  %v5846_v28 = vld [vmem:[%s13811_s3 + $0xe80] sm:$0xff]  ;;  %v9333_v20 = vpack.c.bf16 %v5865_v49, %v5864_v1  ;;  %v9303_v22 = vpack.c.bf16 %v5851_v5, %v5850_v7 }
 0x2b5   : > { %9268 = vmatprep.subr.bf16.mxu1 %v9267_v37  ;;  %v5797_v37 = vld [vmem:[%s13811_s3 + $0xcf8] sm:$0xff]  ;;  %v9257_v14 = vpack.c.bf16 %v5779_v11, %v5778_v34  ;;  %v9307_v11 = vpack.c.bf16 %v5853_v13, %v5852_v16  ;;  %v5854_v21 = vld [vmem:[%s13811_s3 + $0xec0] sm:$0xff]  ;;  %v5855_v41 = vld [vmem:[%s13811_s3 + $0xec8] sm:$0xff] }
 0x2b6   : > { %9238 = vmatpush3.bf16.msra.mxu0 %v9237_v15  ;;  %v9289_v15 = vpack.c.bf16 %v5811_v47, %v5810_v58  ;;  %v5836_v58 = vld [vmem:[%s13811_s3 + $0xe30] sm:$0xff]  ;;  %v5843_v49 = vld [vmem:[%s13811_s3 + $0xe68] sm:$0xff]  ;;  %v5874_v7 = vld [vmem:[%s13811_s3 + $0xf60] sm:$0xff] }
 0x2b7   : > { %9270 = vmatpush3.bf16.msra.mxu1 %v9269_v26  ;;  %9240 = vmatprep.subr.bf16.mxu0 %v9239_v2  ;;  %v9259_v26 = vpack.c.bf16 %v5797_v37, %v5796_v6  ;;  %v5780_v2 = vld [vmem:[%s13811_s3 + $0xc70] sm:$0xff]  ;;  %v5869_v37 = vld [vmem:[%s13811_s3 + $0xf38] sm:$0xff] }
 0x2b8   : > { %9272 = vmatprep.subr.bf16.mxu1 %v9271_v17  ;;  %v5813_v17 = vld [vmem:[%s13811_s3 + $0xd78] sm:$0xff]  ;;  %v9261_v60 = vpack.c.bf16 %v5781_v61, %v5780_v2  ;;  %v5868_v47 = vld [vmem:[%s13811_s3 + $0xf30] sm:$0xff]  ;;  %v9311_v61 = vpack.c.bf16 %v5855_v41, %v5854_v21  ;;  %v5894_v41 = vld [vmem:[%s13811_s3 + $0x1000] sm:$0xff] }
 0x2b9   : > { %v9341_v2 = vpack.c.bf16 %v5869_v37, %v5868_v47  ;;  %v5844_v16 = vld [vmem:[%s13811_s3 + $0xe70] sm:$0xff]  ;;  %v5845_v13 = vld [vmem:[%s13811_s3 + $0xe78] sm:$0xff]  ;;  %v5943_v47 = vld [vmem:[%s13811_s3 + $0x1188] sm:$0xff] }
 0x2ba   : > { %9242 = vmatpush3.bf16.msra.mxu0 %v9241_v44  ;;  %v9293_v44 = vpack.c.bf16 %v5813_v17, %v5812_v48  ;;  %v5838_v48 = vld [vmem:[%s13811_s3 + $0xe40] sm:$0xff] }
 0x2bb   : > { %9274 = vmatpush3.bf16.msra.mxu1 %v9273_v8  ;;  %9244 = vmatprep.subr.bf16.mxu0 %v9243_v62  ;;  %v9295_v8 = vpack.c.bf16 %v5847_v31, %v5846_v28  ;;  %v5830_v62 = vld [vmem:[%s13811_s3 + $0xe00] sm:$0xff]  ;;  %v5871_v31 = vld [vmem:[%s13811_s3 + $0xf48] sm:$0xff] }
 0x2bc   : > { %9276 = vmatprep.subr.bf16.mxu1 %v9275_v45  ;;  %v5863_v45 = vld [vmem:[%s13811_s3 + $0xf08] sm:$0xff]  ;;  %v9297_v9 = vpack.c.bf16 %v5831_v18, %v5830_v62  ;;  %v5870_v17 = vld [vmem:[%s13811_s3 + $0xf40] sm:$0xff]  ;;  %v9315_v18 = vpack.c.bf16 %v5857_v29, %v5856_v55  ;;  %v5945_v55 = vld [vmem:[%s13811_s3 + $0x1198] sm:$0xff] }
 0x2bd   : > { %v9345_v62 = vpack.c.bf16 %v5871_v31, %v5870_v17  ;;  %v5944_v31 = vld [vmem:[%s13811_s3 + $0x1190] sm:$0xff] }
 0x2be   : > { %9246 = vmatpush3.bf16.msra.mxu0 %v9245_v57  ;;  %v5880_v57 = vld [vmem:[%s13811_s3 + $0xf90] sm:$0xff] }
 0x2bf   : > { %9278 = vmatpush3.bf16.msra.mxu1 %v9277_v24  ;;  %9248 = vmatprep.subr.bf16.mxu0 %v9247_v27  ;;  %v5881_v24 = vld [vmem:[%s13811_s3 + $0xf98] sm:$0xff]  ;;  %v9329_v27 = vpack.c.bf16 %v5863_v45, %v5862_v0  ;;  %v5872_v45 = vld [vmem:[%s13811_s3 + $0xf50] sm:$0xff] }
 0x2c0   : > { %9280 = vmatprep.subr.bf16.mxu1 %v9279_v33  ;;  %v9299_v33 = vpack.c.bf16 %v5849_v4, %v5848_v32  ;;  %v9331_v42 = vpack.c.bf16 %v5881_v24, %v5880_v57  ;;  %v5841_v0 = vld [vmem:[%s13811_s3 + $0xe58] sm:$0xff]  ;;  %v5859_v57 = vld [vmem:[%s13811_s3 + $0xee8] sm:$0xff]  ;;  %v5890_v24 = vld [vmem:[%s13811_s3 + $0xfe0] sm:$0xff] }
 0x2c1   : > { %v5873_v4 = vld [vmem:[%s13811_s3 + $0xf58] sm:$0xff] }
 0x2c2   : > { %9250 = vmatpush3.bf16.msra.mxu0 %v9249_v25  ;;  %v5882_v25 = vld [vmem:[%s13811_s3 + $0xfa0] sm:$0xff] }
 0x2c3   : > { %9282 = vmatpush3.bf16.msra.mxu1 %v9281_v40  ;;  %9252 = vmatprep.subr.bf16.mxu0 %v9251_v63  ;;  %v5883_v40 = vld [vmem:[%s13811_s3 + $0xfa8] sm:$0xff]  ;;  %v6057_v63 = vcombine.high %v13160_v30, %v13160_v30 }
 0x2c4   : > { %9284 = vmatprep.subr.bf16.mxu1 %v9283_v38  ;;  %v5866_v38 = vld [vmem:[%s13811_s3 + $0xf20] sm:$0xff]  ;;  %v9335_v35 = vpack.c.bf16 %v5883_v40, %v5882_v25  ;;  %v5875_v25 = vld [vmem:[%s13811_s3 + $0xf68] sm:$0xff]  ;;  %v5860_v40 = vld [vmem:[%s13811_s3 + $0xef0] sm:$0xff] }
 0x2c5   : > { %v9337_v34 = vpack.c.bf16 %v5867_v54, %v5866_v38 }
 0x2c6   : > { %9254 = vmatpush3.bf16.msra.mxu0 %v9253_v50  ;;  %v5884_v50 = vld [vmem:[%s13811_s3 + $0xfb0] sm:$0xff] }
 0x2c7   : > { %9286 = vmatpush3.bf16.msra.mxu1 %v9285_v3  ;;  %9256 = vmatprep.subr.bf16.mxu0 %v9255_v23  ;;  %v5885_v3 = vld [vmem:[%s13811_s3 + $0xfb8] sm:$0xff] }
 0x2c8   : > { %9288 = vmatprep.subr.bf16.mxu1 %v9287_v10  ;;  %v5837_v10 = vld [vmem:[%s13811_s3 + $0xe38] sm:$0xff]  ;;  %v9339_v6 = vpack.c.bf16 %v5885_v3, %v5884_v50  ;;  %v5876_v50 = vld [vmem:[%s13811_s3 + $0xf70] sm:$0xff] }
 0x2ca   : > { %9258 = vmatpush3.bf16.msra.mxu0 %v9257_v14  ;;  %v5886_v14 = vld [vmem:[%s13811_s3 + $0xfc0] sm:$0xff] }
 0x2cb   : > { %9290 = vmatpush3.bf16.msra.mxu1 %v9289_v15  ;;  %9260 = vmatprep.subr.bf16.mxu0 %v9259_v26  ;;  %v5887_v15 = vld [vmem:[%s13811_s3 + $0xfc8] sm:$0xff]  ;;  %v9309_v26 = vpack.c.bf16 %v5837_v10, %v5836_v58  ;;  %v5942_v10 = vld [vmem:[%s13811_s3 + $0x1180] sm:$0xff] }
 0x2cc   : > { %9292 = vmatprep.subr.bf16.mxu1 %v9291_v43  ;;  %v5839_v43 = vld [vmem:[%s13811_s3 + $0xe48] sm:$0xff]  ;;  %v9343_v28 = vpack.c.bf16 %v5887_v15, %v5886_v14  ;;  %v9391_v15 = vpack.c.bf16 %v5943_v47, %v5942_v10  ;;  %v5920_v10 = vld [vmem:[%s13811_s3 + $0x10d0] sm:$0xff]  ;;  %v5921_v47 = vld [vmem:[%s13811_s3 + $0x10d8] sm:$0xff] }
 0x2cd   : > { %v5911_v58 = vld [vmem:[%s13811_s3 + $0x1088] sm:$0xff] }
 0x2ce   : > { %9262 = vmatpush3.bf16.msra.mxu0 %v9261_v60  ;;  %v5888_v60 = vld [vmem:[%s13811_s3 + $0xfd0] sm:$0xff]  ;;  %v5895_v14 = vld [vmem:[%s13811_s3 + $0x1008] sm:$0xff] }
 0x2cf   : > { %9294 = vmatpush3.bf16.msra.mxu1 %v9293_v44  ;;  %9296 = vmatprep.subr.bf16.mxu0 %v9295_v8  ;;  %v5889_v44 = vld [vmem:[%s13811_s3 + $0xfd8] sm:$0xff]  ;;  %v9313_v8 = vpack.c.bf16 %v5839_v43, %v5838_v48  ;;  %v5912_v48 = vld [vmem:[%s13811_s3 + $0x1090] sm:$0xff]  ;;  %v9361_v17 = vpack.c.bf16 %v5895_v14, %v5894_v41  ;;  %v9379_v14 = vpack.c.bf16 %v5921_v47, %v5920_v10 }
 0x2d0   : > { %9328 = vmatprep.subr.bf16.mxu1 %v9327_v19  ;;  %s9491_s13 = spop %9490  ;;  %v5840_v19 = vld [vmem:[%s13811_s3 + $0xe50] sm:$0xff]  ;;  %v9347_v32 = vpack.c.bf16 %v5889_v44, %v5888_v60  ;;  %v5913_v43 = vld [vmem:[%s13811_s3 + $0x1098] sm:$0xff] }
 0x2d1   : > { %6987 = vmatmul.mubr.f32.vlgmr.msra.gmra.mrb[52].mxu0 %v12950_v52  ;;  %v9301_v52 = vpack.c.bf16 %v5833_v51, %v5832_v46  ;;  %v7571_v56 = vstv %s9491_s13  ;;  %v9317_v46 = vpack.c.bf16 %v5841_v0, %v5840_v19  ;;  %v9349_v51 = vpack.c.bf16 %v5873_v4, %v5872_v45  ;;  %v5896_v60 = vld [vmem:[%s13811_s3 + $0x1010] sm:$0xff]  ;;  %v5897_v44 = vld [vmem:[%s13811_s3 + $0x1018] sm:$0xff]  ;;  %v5914_v19 = vld [vmem:[%s13811_s3 + $0x10a0] sm:$0xff]  ;;  %s7589_s13 = scalar_lea.sflag [#allocation5], %s284_s20 }
 0x2d2   : > { %7057 = vmatmul.mubr.f32.vlgmr.msra.gmra.mrb[52].mxu1 %v12958_v53  ;;  %9298 = vmatpush3.bf16.msra.mxu0 %v9297_v9  ;;  %v5835_v53 = vld [vmem:[%s13811_s3 + $0xe28] sm:$0xff]  ;;  %7573 = vst.msk [vmem:[%s312_s8] sm:$0x1] %vm7556_vm9, %v7571_v56  ;;  %v5858_v9 = vld [vmem:[%s13811_s3 + $0xee0] sm:$0xff]  ;;  %v6008_v10 = vld [vmem:[%s13811_s3 + $0x1390] sm:$0xff]  ;;  %s9588_s8 = scalar_lea.vmem %s9587_s18, 128 }
 0x2d3   : > { %7126 = vmatprep.mubr.f32.mxu0 %v6056_v59  ;;  %9330 = vmatpush3.bf16.msra.mxu1 %v9329_v27  ;;  %v9305_v23 = vpack.c.bf16 %v5835_v53, %v5834_v12  ;;  %v5891_v27 = vld [vmem:[%s13811_s3 + $0xfe8] sm:$0xff]  ;;  %v9319_v1 = vpack.c.bf16 %v5859_v57, %v5858_v9  ;;  %v5893_v12 = vld [vmem:[%s13811_s3 + $0xff8] sm:$0xff]  ;;  %v5946_v4 = vld [vmem:[%s13811_s3 + $0x11a0] sm:$0xff]  ;;  %p9590_p0 = scmp.lt.s32.totalorder %s9588_s8, %s9582_s17 }
 0x2d4   : > { %7196 = vmatprep.mubr.f32.mxu1 %v6057_v63  ;;  %9300 = vmatprep.subr.bf16.mxu0 %v9299_v33  ;;  %v5842_v33 = vld [vmem:[%s13811_s3 + $0xe60] sm:$0xff]  ;;  %v5861_v63 = vld [vmem:[%s13811_s3 + $0xef8] sm:$0xff]  ;;  %v5915_v0 = vld [vmem:[%s13811_s3 + $0x10a8] sm:$0xff] }
 0x2d5   : > { %9332 = vmatprep.subr.bf16.mxu1 %v9331_v42  ;;  %v9351_v42 = vpack.c.bf16 %v5891_v27, %v5890_v24  ;;  %v9321_v56 = vpack.c.bf16 %v5843_v49, %v5842_v33  ;;  %v9323_v54 = vpack.c.bf16 %v5861_v63, %v5860_v40  ;;  %v5947_v9 = vld [vmem:[%s13811_s3 + $0x11a8] sm:$0xff]  ;;  %v9365_v24 = vpack.c.bf16 %v5897_v44, %v5896_v60  ;;  %v5916_v49 = vld [vmem:[%s13811_s3 + $0x10b0] sm:$0xff]  ;;  %v6009_v47 = vld [vmem:[%s13811_s3 + $0x1398] sm:$0xff]  ;;  %p9591_p1 = por %p9590_p0, %p9589_p13 }
 0x2d6   : > { %9302 = vmatpush3.bf16.msra.mxu0 %v9301_v52  ;;  %v9367_v27 = vpack.c.bf16 %v5915_v0, %v5914_v19  ;;  %v5931_v33 = vld [vmem:[%s13811_s3 + $0x1128] sm:$0xff]  ;;  %v5900_v63 = vld [vmem:[%s13811_s3 + $0x1030] sm:$0xff]  ;;  %v5938_v19 = vld [vmem:[%s13811_s3 + $0x1160] sm:$0xff] }
 0x2d7   : > { %9334 = vmatpush3.bf16.msra.mxu1 %v9333_v20  ;;  %9304 = vmatprep.subr.bf16.mxu0 %v9303_v22  ;;  %v5892_v22 = vld [vmem:[%s13811_s3 + $0xff0] sm:$0xff]  ;;  %p9592_p2 = pnand %p9591_p1, %p9585_p12 }
 0x2d8   : > { %9336 = vmatprep.subr.bf16.mxu1 %v9335_v35  ;;  %v9353_v35 = vpack.c.bf16 %v5875_v25, %v5874_v7  ;;  %v5917_v7 = vld [vmem:[%s13811_s3 + $0x10b8] sm:$0xff] }
 0x2d9   : > { %v9371_v40 = vpack.c.bf16 %v5917_v7, %v5916_v49  ;;  %v5908_v7 = vld [vmem:[%s13811_s3 + $0x1070] sm:$0xff] }
 0x2da   : > { %9306 = vmatpush3.bf16.msra.mxu0 %v9305_v23  ;;  %v9355_v23 = vpack.c.bf16 %v5893_v12, %v5892_v22  ;;  %v5933_v12 = vld [vmem:[%s13811_s3 + $0x1138] sm:$0xff] }
 0x2db   : > { %9338 = vmatpush3.bf16.msra.mxu1 %v9337_v34  ;;  %9308 = vmatprep.subr.bf16.mxu0 %v9307_v11  ;;  %v5877_v34 = vld [vmem:[%s13811_s3 + $0xf78] sm:$0xff]  ;;  %v5910_v11 = vld [vmem:[%s13811_s3 + $0x1080] sm:$0xff] }
 0x2dc   : > { %9340 = vmatprep.subr.bf16.mxu1 %v9339_v6  ;;  %v9325_v6 = vpack.c.bf16 %v5845_v13, %v5844_v16  ;;  %v9357_v37 = vpack.c.bf16 %v5877_v34, %v5876_v50  ;;  %v9359_v21 = vpack.c.bf16 %v5911_v58, %v5910_v11  ;;  %v5902_v50 = vld [vmem:[%s13811_s3 + $0x1040] sm:$0xff]  ;;  %v5935_v58 = vld [vmem:[%s13811_s3 + $0x1148] sm:$0xff] }
 0x2dd   : > { %v5934_v34 = vld [vmem:[%s13811_s3 + $0x1140] sm:$0xff] }
 0x2de   : > { %9310 = vmatpush3.bf16.msra.mxu0 %v9309_v26  ;;  %v5926_v26 = vld [vmem:[%s13811_s3 + $0x1100] sm:$0xff]  ;;  %v9409_v41 = vpack.c.bf16 %v5935_v58, %v5934_v34  ;;  %v5977_v34 = vld [vmem:[%s13811_s3 + $0x1298] sm:$0xff] }
 0x2df   : > { %9342 = vmatpush3.bf16.msra.mxu1 %v9341_v2  ;;  %9312 = vmatprep.subr.bf16.mxu0 %v9311_v61  ;;  %v5927_v2 = vld [vmem:[%s13811_s3 + $0x1108] sm:$0xff]  ;;  %v13361_v61 = vld [vmem:[#allocation3 + $0x80] sm:$0xff]  ;;  %v13574_v58 = vld [vmem:[#allocation3 + $0x98] sm:$0xff] }
 0x2e0   : > { %9344 = vmatprep.subr.bf16.mxu1 %v9343_v28  ;;  %v13369_v28 = vld [vmem:[#allocation3 + $0x88] sm:$0xff]  ;;  %v9393_v29 = vpack.c.bf16 %v5927_v2, %v5926_v26  ;;  %v6058_v45 = vcombine.high %v13361_v61, %v13361_v61  ;;  %v5905_v26 = vld [vmem:[%s13811_s3 + $0x1058] sm:$0xff]  ;;  %v5936_v2 = vld [vmem:[%s13811_s3 + $0x1150] sm:$0xff] }
 0x2e1   : > { %v6059_v57 = vcombine.high %v13369_v28, %v13369_v28 }
 0x2e2   : > { %9314 = vmatpush3.bf16.msra.mxu0 %v9313_v8  ;;  %v5928_v8 = vld [vmem:[%s13811_s3 + $0x1110] sm:$0xff] }
 0x2e3   : > { %9346 = vmatpush3.bf16.msra.mxu1 %v9345_v62  ;;  %9316 = vmatprep.subr.bf16.mxu0 %v9315_v18  ;;  %v9363_v62 = vpack.c.bf16 %v5913_v43, %v5912_v48  ;;  %v5929_v18 = vld [vmem:[%s13811_s3 + $0x1118] sm:$0xff] }
 0x2e4   : > { %v8019_v5 = vpop.f32.mrb[40].mxu0  ;;  %v8054_v59 = vpop.f32.mrb[40].mxu1  ;;  %9348 = vmatprep.subr.bf16.mxu1 %v9347_v32  ;;  %v9395_v32 = vpack.c.bf16 %v5945_v55, %v5944_v31  ;;  %v5937_v43 = vld [vmem:[%s13811_s3 + $0x1158] sm:$0xff]  ;;  %v5923_v31 = vld [vmem:[%s13811_s3 + $0x10e8] sm:$0xff]  ;;  %v5954_v55 = vld [vmem:[%s13811_s3 + $0x11e0] sm:$0xff] }
 0x2e5   : > { %v8020_v52 = vpop.f32.mrb[41].mxu0  ;;  %v8055_v20 = vpop.f32.mrb[41].mxu1  ;;  %v9413_v44 = vpack.c.bf16 %v5937_v43, %v5936_v2  ;;  %v5979_v2 = vld [vmem:[%s13811_s3 + $0x12a8] sm:$0xff]  ;;  %v9459_v43 = vpack.c.bf16 %v6009_v47, %v6008_v10  ;;  %v6018_v47 = vld [vmem:[%s13811_s3 + $0x13e0] sm:$0xff] }
 0x2e6   : > { %v8021_v53 = vadd.f32 %v8020_v52, %v8019_v5  ;;  %v8056_v38 = vadd.f32 %v8055_v20, %v8054_v59  ;;  %9318 = vmatpush3.bf16.msra.mxu0 %v9317_v46  ;;  %v5898_v46 = vld [vmem:[%s13811_s3 + $0x1020] sm:$0xff]  ;;  %v5948_v5 = vld [vmem:[%s13811_s3 + $0x11b0] sm:$0xff]  ;;  %v5949_v59 = vld [vmem:[%s13811_s3 + $0x11b8] sm:$0xff] }
 0x2e7   : > { %9350 = vmatpush3.bf16.msra.mxu1 %v9349_v51  ;;  %9320 = vmatprep.subr.bf16.mxu0 %v9319_v1  ;;  %v5899_v51 = vld [vmem:[%s13811_s3 + $0x1028] sm:$0xff]  ;;  %v9399_v1 = vpack.c.bf16 %v5947_v9, %v5946_v4  ;;  %v5901_v52 = vld [vmem:[%s13811_s3 + $0x1038] sm:$0xff]  ;;  %v5932_v20 = vld [vmem:[%s13811_s3 + $0x1130] sm:$0xff]  ;;  %v9403_v22 = vpack.c.bf16 %v5949_v59, %v5948_v5 }
 0x2e8   : > { %v13332_v3 = vadd.f32 %v8056_v38, %v8021_v53  ;;  %9352 = vmatprep.subr.bf16.mxu1 %v9351_v42  ;;  %v9369_v42 = vpack.c.bf16 %v5899_v51, %v5898_v46  ;;  %v5918_v53 = vld [vmem:[%s13811_s3 + $0x10c0] sm:$0xff]  ;;  %v5919_v38 = vld [vmem:[%s13811_s3 + $0x10c8] sm:$0xff]  ;;  %v9405_v16 = vpack.c.bf16 %v5933_v12, %v5932_v20  ;;  %v5924_v9 = vld [vmem:[%s13811_s3 + $0x10f0] sm:$0xff] }
 0x2e9   : > { %v9375_v13 = vpack.c.bf16 %v5919_v38, %v5918_v53  ;;  %v5939_v4 = vld [vmem:[%s13811_s3 + $0x1168] sm:$0xff]  ;;  %v5957_v46 = vld [vmem:[%s13811_s3 + $0x11f8] sm:$0xff]  ;;  %v5940_v59 = vld [vmem:[%s13811_s3 + $0x1170] sm:$0xff] }
 0x2ea   : > { %9322 = vmatpush3.bf16.msra.mxu0 %v9321_v56  ;;  %v5950_v56 = vld [vmem:[%s13811_s3 + $0x11c0] sm:$0xff]  ;;  %v5909_v5 = vld [vmem:[%s13811_s3 + $0x1078] sm:$0xff]  ;;  %v5987_v10 = vld [vmem:[%s13811_s3 + $0x12e8] sm:$0xff] }
 0x2eb   : > { %9354 = vmatpush3.bf16.msra.mxu1 %v9353_v35  ;;  %9324 = vmatprep.subr.bf16.mxu0 %v9323_v54  ;;  %v5951_v35 = vld [vmem:[%s13811_s3 + $0x11c8] sm:$0xff]  ;;  %v9373_v54 = vpack.c.bf16 %v5901_v52, %v5900_v63  ;;  %v5974_v63 = vld [vmem:[%s13811_s3 + $0x1280] sm:$0xff]  ;;  %v9389_v12 = vpack.c.bf16 %v5909_v5, %v5908_v7 }
 0x2ec   : > { %9356 = vmatprep.subr.bf16.mxu1 %v9355_v23  ;;  %v5903_v23 = vld [vmem:[%s13811_s3 + $0x1048] sm:$0xff]  ;;  %v9407_v11 = vpack.c.bf16 %v5951_v35, %v5950_v56  ;;  %v6006_v20 = vld [vmem:[%s13811_s3 + $0x1380] sm:$0xff] }
 0x2ed   : > { %v5975_v52 = vld [vmem:[%s13811_s3 + $0x1288] sm:$0xff]  ;;  %v5958_v56 = vld [vmem:[%s13811_s3 + $0x1200] sm:$0xff] }
 0x2ee   : > { %9326 = vmatpush3.bf16.msra.mxu0 %v9325_v6  ;;  %v5952_v6 = vld [vmem:[%s13811_s3 + $0x11d0] sm:$0xff]  ;;  %v9423_v38 = vpack.c.bf16 %v5975_v52, %v5974_v63  ;;  %v5959_v35 = vld [vmem:[%s13811_s3 + $0x1208] sm:$0xff] }
 0x2ef   : > { %9358 = vmatpush3.bf16.msra.mxu1 %v9357_v37  ;;  %9360 = vmatprep.subr.bf16.mxu0 %v9359_v21  ;;  %v5953_v37 = vld [vmem:[%s13811_s3 + $0x11d8] sm:$0xff]  ;;  %v9377_v21 = vpack.c.bf16 %v5903_v23, %v5902_v50  ;;  %v13566_v50 = vld [vmem:[#allocation3 + $0x90] sm:$0xff]  ;;  %v5999_v52 = vld [vmem:[%s13811_s3 + $0x1348] sm:$0xff] }
 0x2f0   : > { %9392 = vmatprep.subr.bf16.mxu1 %v9391_v15  ;;  %v5904_v15 = vld [vmem:[%s13811_s3 + $0x1050] sm:$0xff]  ;;  %v9411_v48 = vpack.c.bf16 %v5953_v37, %v5952_v6 }
 0x2f1   : > { %7127 = vmatmul.mubr.f32.vlgmr.msra.gmra.mrb[54].mxu0 %v13152_v36  ;;  %v9397_v36 = vpack.c.bf16 %v5929_v18, %v5928_v8  ;;  %v9381_v60 = vpack.c.bf16 %v5905_v26, %v5904_v15  ;;  %v5907_v18 = vld [vmem:[%s13811_s3 + $0x1068] sm:$0xff]  ;;  %v5976_v23 = vld [vmem:[%s13811_s3 + $0x1290] sm:$0xff]  ;;  %v5993_v15 = vld [vmem:[%s13811_s3 + $0x1318] sm:$0xff] }
 0x2f2   : > { %7197 = vmatmul.mubr.f32.vlgmr.msra.gmra.mrb[54].mxu1 %v13160_v30  ;;  %9362 = vmatpush3.bf16.msra.mxu0 %v9361_v17  ;;  %v5930_v30 = vld [vmem:[%s13811_s3 + $0x1120] sm:$0xff]  ;;  %v5960_v37 = vld [vmem:[%s13811_s3 + $0x1210] sm:$0xff] }
 0x2f3   : > { %7266 = vmatprep.mubr.f32.mxu0 %v6058_v45  ;;  %9394 = vmatpush3.bf16.msra.mxu1 %v9393_v29  ;;  %v9401_v25 = vpack.c.bf16 %v5931_v33, %v5930_v30  ;;  %v5922_v17 = vld [vmem:[%s13811_s3 + $0x10e0] sm:$0xff]  ;;  %v5955_v29 = vld [vmem:[%s13811_s3 + $0x11e8] sm:$0xff]  ;;  %v9417_v33 = vpack.c.bf16 %v5939_v4, %v5938_v19  ;;  %v5980_v19 = vld [vmem:[%s13811_s3 + $0x12b0] sm:$0xff] }
 0x2f4   : > { %7336 = vmatprep.mubr.f32.mxu1 %v6059_v57  ;;  %9364 = vmatprep.subr.bf16.mxu0 %v9363_v62  ;;  %v9383_v8 = vpack.c.bf16 %v5923_v31, %v5922_v17  ;;  %v5906_v62 = vld [vmem:[%s13811_s3 + $0x1060] sm:$0xff]  ;;  %v5925_v57 = vld [vmem:[%s13811_s3 + $0x10f8] sm:$0xff]  ;;  %v6011_v31 = vld [vmem:[%s13811_s3 + $0x13a8] sm:$0xff] }
 0x2f5   : > { %9396 = vmatprep.subr.bf16.mxu1 %v9395_v32  ;;  %v9415_v32 = vpack.c.bf16 %v5955_v29, %v5954_v55  ;;  %v9387_v49 = vpack.c.bf16 %v5925_v57, %v5924_v9  ;;  %v5978_v26 = vld [vmem:[%s13811_s3 + $0x12a0] sm:$0xff]  ;;  %v6061_v55 = vcombine.high %v13574_v58, %v13574_v58 }
 0x2f6   : > { %9366 = vmatpush3.bf16.msra.mxu0 %v9365_v24  ;;  %v6010_v17 = vld [vmem:[%s13811_s3 + $0x13a0] sm:$0xff] }
 0x2f7   : > { %9398 = vmatpush3.bf16.msra.mxu1 %v9397_v36  ;;  %9368 = vmatprep.subr.bf16.mxu0 %v9367_v27  ;;  %v5956_v27 = vld [vmem:[%s13811_s3 + $0x11f0] sm:$0xff] }
 0x2f8   : > { %9400 = vmatprep.subr.bf16.mxu1 %v9399_v1  ;;  %v9385_v1 = vpack.c.bf16 %v5907_v18, %v5906_v62  ;;  %v9463_v62 = vpack.c.bf16 %v6011_v31, %v6010_v17  ;;  %v5995_v18 = vld [vmem:[%s13811_s3 + $0x1328] sm:$0xff]  ;;  %v5988_v17 = vld [vmem:[%s13811_s3 + $0x12f0] sm:$0xff]  ;;  %v5989_v31 = vld [vmem:[%s13811_s3 + $0x12f8] sm:$0xff] }
 0x2fa   : > { %9370 = vmatpush3.bf16.msra.mxu0 %v9369_v42 }
 0x2fb   : > { %9402 = vmatpush3.bf16.msra.mxu1 %v9401_v25  ;;  %9372 = vmatprep.subr.bf16.mxu0 %v9371_v40  ;;  %v9419_v25 = vpack.c.bf16 %v5957_v46, %v5956_v27  ;;  %v5941_v40 = vld [vmem:[%s13811_s3 + $0x1178] sm:$0xff]  ;;  %v5996_v27 = vld [vmem:[%s13811_s3 + $0x1330] sm:$0xff] }
 0x2fc   : > { %9404 = vmatprep.subr.bf16.mxu1 %v9403_v22  ;;  %v9421_v53 = vpack.c.bf16 %v5941_v40, %v5940_v59  ;;  %v5998_v40 = vld [vmem:[%s13811_s3 + $0x1340] sm:$0xff] }
 0x2fe   : > { %9374 = vmatpush3.bf16.msra.mxu0 %v9373_v54 }
 0x2ff   : > { %9406 = vmatpush3.bf16.msra.mxu1 %v9405_v16  ;;  %9376 = vmatprep.subr.bf16.mxu0 %v9375_v13  ;;  %v5990_v16 = vld [vmem:[%s13811_s3 + $0x1300] sm:$0xff]  ;;  %v5991_v13 = vld [vmem:[%s13811_s3 + $0x1308] sm:$0xff] }
 0x300   : > { %9408 = vmatprep.subr.bf16.mxu1 %v9407_v11  ;;  %v9425_v11 = vpack.c.bf16 %v5959_v35, %v5958_v56  ;;  %v9457_v6 = vpack.c.bf16 %v5991_v13, %v5990_v16  ;;  %v9473_v56 = vpack.c.bf16 %v5999_v52, %v5998_v40  ;;  %v5969_v16 = vld [vmem:[%s13811_s3 + $0x1258] sm:$0xff]  ;;  %v6000_v13 = vld [vmem:[%s13811_s3 + $0x1350] sm:$0xff] }
 0x302   : > { %9378 = vmatpush3.bf16.msra.mxu0 %v9377_v21  ;;  %v5961_v21 = vld [vmem:[%s13811_s3 + $0x1218] sm:$0xff] }
 0x303   : > { %9410 = vmatpush3.bf16.msra.mxu1 %v9409_v41  ;;  %9380 = vmatprep.subr.bf16.mxu0 %v9379_v14  ;;  %v5992_v41 = vld [vmem:[%s13811_s3 + $0x1310] sm:$0xff]  ;;  %v9427_v14 = vpack.c.bf16 %v5977_v34, %v5976_v23  ;;  %v9429_v29 = vpack.c.bf16 %v5961_v21, %v5960_v37  ;;  %v6001_v34 = vld [vmem:[%s13811_s3 + $0x1358] sm:$0xff] }
 0x304   : > { %v8089_v0 = vpop.f32.mrb[42].mxu0  ;;  %v8124_v45 = vpop.f32.mrb[42].mxu1  ;;  %9412 = vmatprep.subr.bf16.mxu1 %v9411_v48  ;;  %v6060_v48 = vcombine.high %v13566_v50, %v13566_v50  ;;  %v9477_v21 = vpack.c.bf16 %v6001_v34, %v6000_v13 }
 0x305   : > { %v8090_v24 = vpop.f32.mrb[43].mxu0  ;;  %v8125_v36 = vpop.f32.mrb[43].mxu1 }
 0x306   : > { %v8091_v51 = vadd.f32 %v8090_v24, %v8089_v0  ;;  %v8126_v30 = vadd.f32 %v8125_v36, %v8124_v45  ;;  %9382 = vmatpush3.bf16.msra.mxu0 %v9381_v60  ;;  %v9431_v60 = vpack.c.bf16 %v5979_v2, %v5978_v26  ;;  %v5981_v0 = vld [vmem:[%s13811_s3 + $0x12b8] sm:$0xff]  ;;  %v6012_v45 = vld [vmem:[%s13811_s3 + $0x13b0] sm:$0xff]  ;;  %v6002_v26 = vld [vmem:[%s13811_s3 + $0x1360] sm:$0xff] }
 0x307   : > { %9414 = vmatpush3.bf16.msra.mxu1 %v9413_v44  ;;  %9384 = vmatprep.subr.bf16.mxu0 %v9383_v8  ;;  %v5962_v44 = vld [vmem:[%s13811_s3 + $0x1220] sm:$0xff]  ;;  %v5963_v8 = vld [vmem:[%s13811_s3 + $0x1228] sm:$0xff]  ;;  %v9435_v57 = vpack.c.bf16 %v5981_v0, %v5980_v19  ;;  %v5964_v24 = vld [vmem:[%s13811_s3 + $0x1230] sm:$0xff]  ;;  %v9451_v19 = vpack.c.bf16 %v5989_v31, %v5988_v17 }
 0x308   : > { %v6289_v42 = vadd.f32 %v8091_v51, %v13332_v3  ;;  %9416 = vmatprep.subr.bf16.mxu1 %v9415_v32  ;;  %v6007_v3 = vld [vmem:[%s13811_s3 + $0x1388] sm:$0xff]  ;;  %v6013_v32 = vld [vmem:[%s13811_s3 + $0x13b8] sm:$0xff]  ;;  %v9433_v4 = vpack.c.bf16 %v5963_v8, %v5962_v44  ;;  %v5972_v0 = vld [vmem:[%s13811_s3 + $0x1270] sm:$0xff] }
 0x309   : > { %v9455_v54 = vpack.c.bf16 %v6007_v3, %v6006_v20  ;;  %v5965_v36 = vld [vmem:[%s13811_s3 + $0x1238] sm:$0xff]  ;;  %v9467_v46 = vpack.c.bf16 %v6013_v32, %v6012_v45  ;;  %v5984_v20 = vld [vmem:[%s13811_s3 + $0x12d0] sm:$0xff] }
 0x30a   : > { %v13552_v22 = vadd.f32 %v8126_v30, %v6289_v42  ;;  %9386 = vmatpush3.bf16.msra.mxu0 %v9385_v1  ;;  %v5997_v51 = vld [vmem:[%s13811_s3 + $0x1338] sm:$0xff]  ;;  %v5982_v30 = vld [vmem:[%s13811_s3 + $0x12c0] sm:$0xff]  ;;  %v5983_v1 = vld [vmem:[%s13811_s3 + $0x12c8] sm:$0xff]  ;;  %v9437_v7 = vpack.c.bf16 %v5965_v36, %v5964_v24 }
 0x30b   : > { %9418 = vmatpush3.bf16.msra.mxu1 %v9417_v33  ;;  %9388 = vmatprep.subr.bf16.mxu0 %v9387_v49  ;;  %v6014_v33 = vld [vmem:[%s13811_s3 + $0x13c0] sm:$0xff]  ;;  %v6015_v49 = vld [vmem:[%s13811_s3 + $0x13c8] sm:$0xff]  ;;  %v9469_v5 = vpack.c.bf16 %v5997_v51, %v5996_v27  ;;  %v9439_v59 = vpack.c.bf16 %v5983_v1, %v5982_v30  ;;  %v5985_v3 = vld [vmem:[%s13811_s3 + $0x12d8] sm:$0xff] }
 0x30c   : > { %9420 = vmatprep.subr.bf16.mxu1 %v9419_v25  ;;  %v5966_v42 = vld [vmem:[%s13811_s3 + $0x1240] sm:$0xff]  ;;  %v5967_v25 = vld [vmem:[%s13811_s3 + $0x1248] sm:$0xff]  ;;  %v9471_v63 = vpack.c.bf16 %v6015_v49, %v6014_v33  ;;  %v9443_v35 = vpack.c.bf16 %v5985_v3, %v5984_v20  ;;  %v5973_v45 = vld [vmem:[%s13811_s3 + $0x1278] sm:$0xff] }
 0x30d   : > { %v9453_v36 = vpack.c.bf16 %v5973_v45, %v5972_v0 }
 0x30e   : > { %9390 = vmatpush3.bf16.msra.mxu0 %v9389_v12  ;;  %v6016_v12 = vld [vmem:[%s13811_s3 + $0x13d0] sm:$0xff] }
 0x30f   : > { %9422 = vmatpush3.bf16.msra.mxu1 %v9421_v53  ;;  %9424 = vmatprep.subr.bf16.mxu0 %v9423_v38  ;;  %v6017_v53 = vld [vmem:[%s13811_s3 + $0x13d8] sm:$0xff]  ;;  %v9441_v38 = vpack.c.bf16 %v5967_v25, %v5966_v42 }
 0x310   : > { %9456 = vmatprep.subr.bf16.mxu1 %v9455_v54  ;;  %v5968_v54 = vld [vmem:[%s13811_s3 + $0x1250] sm:$0xff]  ;;  %v9475_v23 = vpack.c.bf16 %v6017_v53, %v6016_v12 }
 0x311   : > { %7267 = vmatmul.mubr.f32.vlgmr.msra.gmra.mrb[56].mxu0 %v13361_v61  ;;  %v9461_v61 = vpack.c.bf16 %v5993_v15, %v5992_v41  ;;  %v9445_v37 = vpack.c.bf16 %v5969_v16, %v5968_v54  ;;  %v5971_v15 = vld [vmem:[%s13811_s3 + $0x1268] sm:$0xff] }
 0x312   : > { %7337 = vmatmul.mubr.f32.vlgmr.msra.gmra.mrb[56].mxu1 %v13369_v28  ;;  %9426 = vmatpush3.bf16.msra.mxu0 %v9425_v11  ;;  %v5994_v28 = vld [vmem:[%s13811_s3 + $0x1320] sm:$0xff] }
 0x313   : > { %7406 = vmatprep.mubr.f32.mxu0 %v6060_v48  ;;  %9458 = vmatpush3.bf16.msra.mxu1 %v9457_v6  ;;  %v9465_v9 = vpack.c.bf16 %v5995_v18, %v5994_v28  ;;  %v5986_v11 = vld [vmem:[%s13811_s3 + $0x12e0] sm:$0xff]  ;;  %v6019_v6 = vld [vmem:[%s13811_s3 + $0x13e8] sm:$0xff] }
 0x314   : > { %7476 = vmatprep.mubr.f32.mxu1 %v6061_v55  ;;  %9428 = vmatprep.subr.bf16.mxu0 %v9427_v14  ;;  %v9447_v41 = vpack.c.bf16 %v5987_v10, %v5986_v11  ;;  %v5970_v14 = vld [vmem:[%s13811_s3 + $0x1260] sm:$0xff]  ;;  %v9479_v48 = vpack.c.bf16 %v6019_v6, %v6018_v47 }
 0x315   : > { %9460 = vmatprep.subr.bf16.mxu1 %v9459_v43  ;;  %v6003_v43 = vld [vmem:[%s13811_s3 + $0x1368] sm:$0xff]  ;;  %v9449_v28 = vpack.c.bf16 %v5971_v15, %v5970_v14 }
 0x316   : > { %9430 = vmatpush3.bf16.msra.mxu0 %v9429_v29  ;;  %v9481_v18 = vpack.c.bf16 %v6003_v43, %v6002_v26 }
 0x317   : > { %9462 = vmatpush3.bf16.msra.mxu1 %v9461_v61  ;;  %9432 = vmatprep.subr.bf16.mxu0 %v9431_v60  ;;  %v6020_v61 = vld [vmem:[%s13811_s3 + $0x13f0] sm:$0xff]  ;;  %v6021_v60 = vld [vmem:[%s13811_s3 + $0x13f8] sm:$0xff] }
 0x318   : > { %9464 = vmatprep.subr.bf16.mxu1 %v9463_v62 }
 0x31a   : > { %9434 = vmatpush3.bf16.msra.mxu0 %v9433_v4  ;;  %v9483_v4 = vpack.c.bf16 %v6021_v60, %v6020_v61 }
 0x31b   : > { %9466 = vmatpush3.bf16.msra.mxu1 %v9465_v9  ;;  %9436 = vmatprep.subr.bf16.mxu0 %v9435_v57  ;;  %v6004_v9 = vld [vmem:[%s13811_s3 + $0x1370] sm:$0xff]  ;;  %v6005_v57 = vld [vmem:[%s13811_s3 + $0x1378] sm:$0xff] }
 0x31c   : > { %9468 = vmatprep.subr.bf16.mxu1 %v9467_v46  ;;  %v9485_v27 = vpack.c.bf16 %v6005_v57, %v6004_v9 }
 0x31e   : > { %9438 = vmatpush3.bf16.msra.mxu0 %v9437_v7 }
 0x31f   : > { %9470 = vmatpush3.bf16.msra.mxu1 %v9469_v5  ;;  %9440 = vmatprep.subr.bf16.mxu0 %v9439_v59 }
 0x320   : > { %9472 = vmatprep.subr.bf16.mxu1 %v9471_v63 }
 0x322   : > { %9442 = vmatpush3.bf16.msra.mxu0 %v9441_v38 }
 0x323   : > { %9474 = vmatpush3.bf16.msra.mxu1 %v9473_v56  ;;  %9444 = vmatprep.subr.bf16.mxu0 %v9443_v35 }
 0x324   : > { %v8159_v2 = vpop.f32.mrb[44].mxu0  ;;  %9476 = vmatprep.subr.bf16.mxu1 %v9475_v23 }
 0x325   : > { %v8194_v55 = vpop.f32.mrb[44].mxu1  ;;  %v8160_v29 = vpop.f32.mrb[45].mxu0 }
 0x326   : > { %v8161_v44 = vadd.f32 %v8160_v29, %v8159_v2  ;;  %v8195_v8 = vpop.f32.mrb[45].mxu1  ;;  %9446 = vmatpush3.bf16.msra.mxu0 %v9445_v37 }
 0x327   : > { %v8196_v62 = vadd.f32 %v8195_v8, %v8194_v55  ;;  %9478 = vmatpush3.bf16.msra.mxu1 %v9477_v21  ;;  %9448 = vmatprep.subr.bf16.mxu0 %v9447_v41 }
 0x328   : > { %v6429_v32 = vadd.f32 %v8161_v44, %v13552_v22  ;;  %9480 = vmatprep.subr.bf16.mxu1 %v9479_v48 }
 0x32a   : > { %v6499_v24 = vadd.f32 %v8196_v62, %v6429_v32  ;;  %9450 = vmatpush3.bf16.msra.mxu0 %v9449_v28 }
 0x32b   : > { %9482 = vmatpush3.bf16.msra.mxu1 %v9481_v18  ;;  %9452 = vmatprep.subr.bf16.mxu0 %v9451_v19 }
 0x32c   : > { %9484 = vmatprep.subr.bf16.mxu1 %v9483_v4 }
 0x32e   : > { %9454 = vmatpush3.bf16.msra.mxu0 %v9453_v36 }
 0x32f   : > { %9486 = vmatpush3.bf16.msra.mxu1 %v9485_v27 }
 0x331   : > { %7407 = vmatmul.mubr.f32.vlgmr.msra.gmra.mrb[58].mxu0 %v13566_v50 }
 0x332   : > { %7477 = vmatmul.mubr.f32.vlgmr.msra.gmra.mrb[58].mxu1 %v13574_v58 }
 0x344   : > { %v8229_v22 = vpop.f32.mrb[46].mxu0 }
 0x345   : > { %v8264_v46 = vpop.f32.mrb[46].mxu1  ;;  %v8230_v51 = vpop.f32.mrb[47].mxu0 }
 0x346   : > { %v8231_v30 = vadd.f32 %v8230_v51, %v8229_v22  ;;  %v8265_v1 = vpop.f32.mrb[47].mxu1 }
 0x347   : > { %v8266_v33 = vadd.f32 %v8265_v1, %v8264_v46 }
 0x348   : > { %v6569_v49 = vadd.f32 %v8231_v30, %v6499_v24 }
 0x34a   : > { %v6639_v7 = vadd.f32 %v8266_v33, %v6569_v49 }
 0x364   : > { %v8299_v5 = vpop.f32.mrb[48].mxu0 }
 0x365   : > { %v8334_v59 = vpop.f32.mrb[48].mxu1  ;;  %v8300_v42 = vpop.f32.mrb[49].mxu0 }
 0x366   : > { %v8301_v25 = vadd.f32 %v8300_v42, %v8299_v5  ;;  %v8335_v40 = vpop.f32.mrb[49].mxu1 }
 0x367   : > { %v8336_v63 = vadd.f32 %v8335_v40, %v8334_v59 }
 0x368   : > { %v6709_v52 = vadd.f32 %v8301_v25, %v6639_v7 }
 0x36a   : > { %v6779_v20 = vadd.f32 %v8336_v63, %v6709_v52 }
 0x384   : > { %v8369_v3 = vpop.f32.mrb[50].mxu0 }
 0x385   : > { %v8404_v50 = vpop.f32.mrb[50].mxu1  ;;  %v8370_v12 = vpop.f32.mrb[51].mxu0 }
 0x386   : > { %v8371_v58 = vadd.f32 %v8370_v12, %v8369_v3  ;;  %v8405_v53 = vpop.f32.mrb[51].mxu1 }
 0x387   : > { %v8406_v38 = vadd.f32 %v8405_v53, %v8404_v50 }
 0x388   : > { %v6849_v56 = vadd.f32 %v8371_v58, %v6779_v20 }
 0x38a   : > { %v6919_v35 = vadd.f32 %v8406_v38, %v6849_v56 }
 0x3a4   : > { %v8439_v54 = vpop.f32.mrb[52].mxu0 }
 0x3a5   : > { %v8474_v16 = vpop.f32.mrb[52].mxu1  ;;  %v8440_v13 = vpop.f32.mrb[53].mxu0 }
 0x3a6   : > { %v8441_v23 = vadd.f32 %v8440_v13, %v8439_v54  ;;  %v8475_v34 = vpop.f32.mrb[53].mxu1 }
 0x3a7   : > { %v8476_v11 = vadd.f32 %v8475_v34, %v8474_v16 }
 0x3a8   : > { %v6989_v10 = vadd.f32 %v8441_v23, %v6919_v35 }
 0x3aa   : > { %v7059_v47 = vadd.f32 %v8476_v11, %v6989_v10 }
 0x3c4   : > { %v8509_v6 = vpop.f32.mrb[54].mxu0 }
 0x3c5   : > { %v8544_v37 = vpop.f32.mrb[54].mxu1  ;;  %v8510_v21 = vpop.f32.mrb[55].mxu0 }
 0x3c6   : > { %v8511_v41 = vadd.f32 %v8510_v21, %v8509_v6  ;;  %v8545_v14 = vpop.f32.mrb[55].mxu1 }
 0x3c7   : > { %v8546_v15 = vadd.f32 %v8545_v14, %v8544_v37 }
 0x3c8   : > { %v7129_v26 = vadd.f32 %v8511_v41, %v7059_v47 }
 0x3ca   : > { %v7199_v2 = vadd.f32 %v8546_v15, %v7129_v26 }
 0x3e4   : > { %v8579_v48 = vpop.f32.mrb[56].mxu0 }
 0x3e5   : > { %v8614_v43 = vpop.f32.mrb[56].mxu1  ;;  %v8580_v17 = vpop.f32.mrb[57].mxu0 }
 0x3e6   : > { %v8581_v31 = vadd.f32 %v8580_v17, %v8579_v48  ;;  %v8615_v55 = vpop.f32.mrb[57].mxu1 }
 0x3e7   : > { %v8616_v29 = vadd.f32 %v8615_v55, %v8614_v43 }
 0x3e8   : > { %v7269_v61 = vadd.f32 %v8581_v31, %v7199_v2 }
 0x3ea   : > { %v7339_v60 = vadd.f32 %v8616_v29, %v7269_v61 }
 0x404   : > { %v8649_v44 = vpop.f32.mrb[58].mxu0 }
 0x405   : > { %v8684_v8 = vpop.f32.mrb[58].mxu1  ;;  %v8650_v28 = vpop.f32.mrb[59].mxu0 }
 0x406   : > { %v8651_v62 = vadd.f32 %v8650_v28, %v8649_v44  ;;  %v8685_v18 = vpop.f32.mrb[59].mxu1 }
 0x407   : > { %v8686_v19 = vadd.f32 %v8685_v18, %v8684_v8 }
 0x408   : > { %v7409_v0 = vadd.f32 %v8651_v62, %v7339_v60 }
 0x40a   : > { %v7479_v45 = vadd.f32 %v8686_v19, %v7409_v0 }
 0x40c   : > { %vm7484_vm0 = vcmp.ge.f32.partialorder %v7479_v45, 1.25  ;;  %v7490_v32 = vmul.f32 0.75, %v7479_v45  ;;  %v7492_v4 = vrot.slane %v7479_v45, 1  ;;  %v7504_v46 = vrot.slane %v7479_v45, 2 }
 0x40d   : > { %v7979_v9 = vsel %vm7484_vm0, 1.0, %v13899_v39  ;;  %v7487_v57 = vsel %vm7484_vm0, 0.0, %v7479_v45  ;;  %v7516_v5 = vrot.slane %v7479_v45, 3 }
 0x40e   : > { %v7494_v24 = vadd.f32 %v7492_v4, %v7490_v32  ;;  %v7495_v36 = vmul.f32 0.97, %v7487_v57  ;;  %7488 = vst [vmem:[%s13751_s22] sm:$0x1] %v7979_v9 }
 0x410   : > { %v7496_v27 = vadd.f32 %v7495_v36, %v7494_v24  ;;  %v7503_v22 = vmul.f32 0.75, %v7494_v24 }
 0x412   : > { %vm7497_vm3 = vcmp.ge.f32.partialorder %v7496_v27, 1.25  ;;  %v7506_v51 = vadd.f32 %v7504_v46, %v7503_v22 }
 0x413   : > { %v7980_v30 = vsel %vm7497_vm3, 1.0, %v13899_v39  ;;  %v7500_v1 = vsel %vm7497_vm3, 0.0, %v7496_v27 }
 0x414   : > { %v7507_v33 = vmul.f32 0.97, %v7500_v1  ;;  %7501 = vst [vmem:[%s13751_s22 + $0x1] sm:$0x1] %v7980_v30  ;;  %v7515_v7 = vmul.f32 0.75, %v7506_v51  ;;  %v7502_v63 = vadd.f32 %v7980_v30, %v7979_v9 }
 0x416   : > { %v7508_v49 = vadd.f32 %v7507_v33, %v7506_v51  ;;  %v7518_v25 = vadd.f32 %v7516_v5, %v7515_v7 }
 0x418   : > { %vm7509_vm4 = vcmp.ge.f32.partialorder %v7508_v49, 1.25 }
 0x419   : > { %v7981_v59 = vsel %vm7509_vm4, 1.0, %v13899_v39  ;;  %v7512_v42 = vsel %vm7509_vm4, 0.0, %v7508_v49 }
 0x41a   : > { %v7519_v40 = vmul.f32 0.97, %v7512_v42  ;;  %7513 = vst [vmem:[%s13751_s22 + $0x2] sm:$0x1] %v7981_v59  ;;  %v7514_v20 = vadd.f32 %v7981_v59, %v7502_v63 }
 0x41c   : > { %v7520_v52 = vadd.f32 %v7519_v40, %v7518_v25 }
 0x41e   : > { %vm7521_vm5 = vcmp.ge.f32.partialorder %v7520_v52, 1.25 }
 0x41f   : > { %v7982_v3 = vsel %vm7521_vm5, 1.0, %v13899_v39 }
 0x420   : > { %v7525_v50 = vadd.f32 %v7982_v3, %v7514_v20  ;;  %7524 = vst [vmem:[%s13751_s22 + $0x3] sm:$0x1] %v7982_v3 }
 0x422   : > { %v7575_v12 = vsel %vm7574_vm6, %v7525_v50, 0.0 }
 0x423   : > { %7576 = vadd.xlane.f32.xlu1 %v7575_v12 }
 0x424   : > { %9595 = shalt.err (!%p9592_p2)
}
 0x425   : > { %s9596_s28 = scalar_lea.hbm %s13764_s15, 64  ;;  %s9600_s22 = scalar_lea.hbm %s13812_s4, 128 }
 0x426   : > { %p9597_p3 = scmp.ne.s32.totalorder %s13764_s15, %s9596_s28  ;;  %p9601_p8 = scmp.lt.u32.totalorder %s13764_s15, %s13812_s4 }
 0x427   : > { %p9602_p11 = scmp.lt.u32.totalorder %s9600_s22, %s9596_s28  ;;  %p9604_p10 = scmp.lt.u32.totalorder %s9596_s28, %s13764_s15 }
 0x428   : > { %p9598_p4 = pnand %p9597_p3, %p9732_p5 }
 0x429   : > { %p9603_p9 = por %p9602_p11, %p9601_p8 }
 0x42a   : > { %p9599_p7 = pneg %p9598_p4 }
 0x42b   : > { %p9605_p12 = por %p9604_p10, %p9603_p9 }
 0x42d   : > { %p9606_p13 = pnand %p9605_p12, %p9599_p7 }
 0x42f   : > { %9609 = shalt.err (!%p9606_p13)
}
 0x430   : > { %9498 = dma.vmem_to_hbm [thread:$0]  (%p9732_p5), %s7612_s16, 64, %s13764_s15, %s7589_s13  }
 0x431   : > { %s315_s9 = scalar_lea.vmem %s13815_s7, %s9764_s19 }
 0x4b0   : > { %v7577_v39 = vpop.xlane.xlu1 %7576 }
 0x4b1   : > { %v7578_v58 = vrot.slane %v7577_v39, 4 }
 0x4b3   : > { %v7579_v53 = vadd.f32 %v7578_v58, %v7577_v39 }
 0x4b5   : > { %v7580_v38 = vrot.slane %v7579_v53, 2 }
 0x4b7   : > { %v7581_v56 = vadd.f32 %v7580_v38, %v7579_v53 }
 0x4b9   : > { %v7582_v35 = vrot.slane %v7581_v56, 1 }
 0x4bb   : > { %v7583_v54 = vadd.f32 %v7582_v35, %v7581_v56 }
 0x4bd   : > { %9492 = vpush %v7583_v54 }
 0x4ee   : > { %s9493_s18 = spop %9492 }
 0x4ef   : > { %v7585_v16 = vstv %s9493_s18 }
 0x4f0   : > { %7587 = vst.msk [vmem:[%s315_s9] sm:$0x1] %vm7556_vm9, %v7585_v16 }
 0x4f1 PF: > { %p9510_p5 = scmp.ge.s32.totalorder %s9648_s27, 2  ;;  %s7632_s11 = sand.u32 1, %s9636_s24  }
 0x4f2   : > { %s7633_s15 = scalar_lea.sflag [#allocation5], %s7632_s11 }
 0x4f3   : > { %p9505_p0 = pnand %p9510_p5, %p9736_p6 }
 0x4f5   : > { %9631 = dma.done.wait (!%p9505_p0), %s7633_s15, 64  }
 0x4f6   : > { %9633 = vsyncadd (!%p9505_p0), %s7633_s15, 4294967232  ;;  %p19_p1 = scmp.ge.s32.totalorder %s9719_s30, 4   ;;  %s14123_s24 = smov %s9640_s25 }
 0x4f7   : > { %s14124_s25 = smov %s9644_s26  ;;  %s14125_s26 = smov %s9730_s10 }
 0x4f8   : > { %s14126_s27 = smov %s9719_s30  ;;  %21 = sbr.rel (!%p19_p1) target bundleno = 4 (0x4), region = 143 }
 0x4ff   :  { %7656 = vsyncpa [#allocation5], 1 }
 0x500   :  { %7658 = vsyncpa [#allocation5 + $0x1], 1 }
 0x501   :  { %7659 = vsyncpa [#allocation6], 1 }
 0x502   :  { %7661 = vsyncpa [#allocation6 + $0x1], 1 }

</bundles_post_ra>
